<compile_context>
chip_gen: v5e
topology: v5e:2x2
jax: 0.10.0
libtpu: 0.0.40
codegen_flags: <defaults>
</compile_context>

<pallas_src>
import functools

import jax
import jax.numpy as jnp
from jax import lax
from jax.experimental import pallas as pl
from jax.experimental.pallas import tpu as pltpu

# sigmoid(_Z_FORCE + h_z) == 1.0 exactly in f32 for any realistic h_z, so a
# forced z-gate makes the GRU update an exact identity (h_new == h).
_Z_FORCE = 1e9


def _gru_chunk_kernel(gi_ref, whh_ref, bhh_ref, h_ref, *, chunk, hidden_p):
    """One grid step == `chunk` RNN time steps for one batch tile.

    gi_ref  : (Tc, TB, 3*Hp) precomputed input projections, gate-padded,
              with t_exist / T-padding folded into the z-gate slot
    whh_ref : (Hp, 3*Hp)     W_hh^T, gate-padded (gate order r, z, n)
    bhh_ref : (1, 3*Hp)      b_hh, gate-padded
    h_ref   : (TB, Hp)       hidden state; resident across the chunk axis
    """
    c = pl.program_id(1)
    Hp = hidden_p

    @pl.when(c == 0)
    def _():
        h_ref[...] = jnp.zeros_like(h_ref)

    def step(i, h):
        gi = gi_ref[i]                                            # (TB, 3Hp)
        # TODO(synk): on v6e/v7x this per-step RHS staging could use
        # pltpu.matmul_push_rhs once per chunk; kept as jnp.dot for clarity.
        gh = jnp.dot(h, whh_ref[...],
                     preferred_element_type=jnp.float32,
                     precision=lax.Precision.HIGHEST) + bhh_ref[...]
        i_r, i_z, i_n = gi[:, 0:Hp], gi[:, Hp:2 * Hp], gi[:, 2 * Hp:3 * Hp]
        h_r, h_z, h_n = gh[:, 0:Hp], gh[:, Hp:2 * Hp], gh[:, 2 * Hp:3 * Hp]
        r = jax.nn.sigmoid(i_r + h_r)
        z = jax.nn.sigmoid(i_z + h_z)      # == 1.0 exactly where t_exist == 0
        n = jnp.tanh(i_n + r * h_n)        # PyTorch GRUCell gate math
        return (1.0 - z) * n + z * h

    # Cap unroll at 8: full unroll of a long chunk plus W_hh tiles exceeds the
    # 64-vreg file at larger TB and spills onto the serial critical path.
    h = lax.fori_loop(0, chunk, step, h_ref[...], unroll=min(chunk, 8))
    h_ref[...] = h                                                # one store/chunk


def classic_rnn_forward(times, values, masks, params, *, chunk=None,
                        batch_tile=None):
    """Pallas implementation of ClassicRNN.forward.

    times  : [B, T]     float32
    values : [B, T, V]  float32
    masks  : [B, T, V]  float32
    params : dict with 'w_ih_t' [I, 3H], 'w_hh_t' [H, 3H],
                       'b_ih' [1, 3H], 'b_hh' [1, 3H]   (gate order r, z, n)
    returns {'hidden_state': [B, H]}
    """
    f32 = jnp.float32
    B, T, V = values.shape
    H = params['w_hh_t'].shape[0]

    # Lane-dense hidden dim: each gate gets a 128-aligned slot.
    Hp = ((H + 127) // 128) * 128
    # Time chunking (amortize per-grid-step overhead); pad T with no-op steps.
    Tc = chunk if chunk is not None else min(T, 32)
    Tp = pl.cdiv(T, Tc) * Tc
    # Batch tiling: v5e/v6e -> TB=B; v7x -> batch_tile=B//2 (>=128 ideally).
    TB = batch_tile if batch_tile is not None else B
    assert B % TB == 0 and (TB % 8 == 0 or TB == B)

    # delta_ts = diff(times) ++ zero column, then x_t = [values, masks, dt].
    delta_ts = jnp.concatenate(
        [times[:, 1:] - times[:, :-1], jnp.zeros((B, 1), times.dtype)], axis=1)
    x_seq = jnp.concatenate(
        [values, masks, delta_ts[..., None]], axis=-1).astype(f32)    # [B,T,I]

    # Gate-pad the (tiny) weights BEFORE the projection so gi comes out of the
    # einsum already 128-lane-aligned per gate -- no second HBM copy of gi.
    def gate_pad(w):
        out = jnp.zeros((w.shape[0], 3 * Hp), f32)
        for g in range(3):
            out = out.at[:, g * Hp:g * Hp + H].set(
                w[:, g * H:(g + 1) * H].astype(f32))
        return out

    wih_p = gate_pad(params['w_ih_t'])                              # (I, 3Hp)
    bih_p = gate_pad(params['b_ih'])                                # (1, 3Hp)
    whh_p = jnp.zeros((Hp, 3 * Hp), f32).at[:H, :].set(
        gate_pad(params['w_hh_t']))                                 # (Hp, 3Hp)
    bhh_p = gate_pad(params['b_hh'])                                # (1, 3Hp)

    # Hoisted input projection, emitted directly in [T, B, 3*Hp] order
    # (no separate transpose pass over the largest tensor).
    gi = jnp.einsum('bti,ih->tbh', x_seq, wih_p,
                    precision=lax.Precision.HIGHEST) + bih_p        # [T,B,3Hp]

    # Fold t_exist gating into gi: where t_exist == 0, force the z-gate
    # pre-activation to +_Z_FORCE so z == 1.0 exactly and h_new == h exactly.
    lane = jnp.arange(3 * Hp)
    z_slot = (lane >= Hp) & (lane < 2 * Hp)                         # (3Hp,)
    te = jnp.transpose(times > 0.0, (1, 0))[:, :, None]             # (T,B,1)
    gi = jnp.where(jnp.logical_and(~te, z_slot[None, None, :]),
                   jnp.float32(_Z_FORCE), gi)

    # Pad T up to a multiple of Tc with gated-off (identity) steps.
    if Tp > T:
        pad_blk = jnp.where(z_slot, jnp.float32(_Z_FORCE), 0.0).astype(f32)
        pad_blk = jnp.broadcast_to(pad_blk[None, None, :], (Tp - T, B, 3 * Hp))
        gi = jnp.concatenate([gi, pad_blk], axis=0)

    nb, nc = B // TB, Tp // Tc
    kernel = functools.partial(_gru_chunk_kernel, chunk=Tc, hidden_p=Hp)

    # Explicit VMEM budget: gi double buffer + weights + resident h block.
    vmem_need = (2 * Tc * TB * 3 * Hp * 4
                 + 2 * (Hp + 1) * 3 * Hp * 4
                 + TB * Hp * 4)
    assert vmem_need < (48 << 20), \
        "VMEM footprint too large: shrink chunk / batch_tile"
    vmem_limit = int(min(max(vmem_need + (8 << 20), 32 << 20), 56 << 20))

    hidden_p = pl.pallas_call(
        kernel,
        out_shape=jax.ShapeDtypeStruct((B, Hp), f32),
        grid_spec=pltpu.PrefetchScalarGridSpec(
            num_scalar_prefetch=0,
            grid=(nb, nc),
            in_specs=[
                pl.BlockSpec((Tc, TB, 3 * Hp), lambda b, c: (c, b, 0)),  # gi chunk
                pl.BlockSpec((Hp, 3 * Hp), lambda b, c: (0, 0)),         # W_hh^T
                pl.BlockSpec((1, 3 * Hp), lambda b, c: (0, 0)),          # b_hh
            ],
            out_specs=pl.BlockSpec((TB, Hp), lambda b, c: (b, 0)),       # resident h
        ),
        compiler_params=pltpu.CompilerParams(
            dimension_semantics=("parallel", "arbitrary"),
            vmem_limit_bytes=vmem_limit),
    )(gi, whh_p, bhh_p)

    return {'hidden_state': hidden_p[:, :H]}


def classic_rnn_reference(times, values, masks, params):
    """Pure-JAX reference (same math as the PyTorch module)."""
    B, T, V = values.shape
    H = params['w_hh_t'].shape[0]
    hi = lax.Precision.HIGHEST
    delta_ts = jnp.concatenate(
        [times[:, 1:] - times[:, :-1], jnp.zeros((B, 1), times.dtype)], axis=1)
    input_series = jnp.concatenate([values, masks], axis=-1)
    h = jnp.zeros((B, H), jnp.float32)
    for i in range(T):
        x = jnp.concatenate([input_series[:, i, :], delta_ts[:, i:i + 1]], -1)
        gi = jnp.dot(x, params['w_ih_t'], precision=hi) + params['b_ih']
        gh = jnp.dot(h, params['w_hh_t'], precision=hi) + params['b_hh']
        i_r, i_z, i_n = gi[:, :H], gi[:, H:2 * H], gi[:, 2 * H:]
        h_r, h_z, h_n = gh[:, :H], gh[:, H:2 * H], gh[:, 2 * H:]
        r = jax.nn.sigmoid(i_r + h_r)
        z = jax.nn.sigmoid(i_z + h_z)
        n = jnp.tanh(i_n + r * h_n)
        h_new = (1.0 - z) * n + z * h
        t_e = (times[:, i:i + 1] > 0.0)
        h = jnp.where(t_e, h_new, h)
    return h


if __name__ == "__main__":
    # Small shapes implied by the module: batch B, seq T, variable_num V,
    # rnn_hidden_dim H; GRU input dim I = 2*V + 1 (values ++ masks ++ delta_t).
    B, T, V, H = 8, 8, 4, 32
    I = 2 * V + 1

    key = jax.random.PRNGKey(0)
    k_t, k_v, k_m, k1, k2, k3, k4 = jax.random.split(key, 7)

    # Times: increasing positives with trailing zero padding so that the
    # t_exist gating path is exercised.
    raw_t = jnp.cumsum(jax.random.uniform(k_t, (B, T), minval=0.1, maxval=1.0),
                       axis=1)
    pad = (jnp.arange(T)[None, :] < (T - 2)).astype(jnp.float32)  # last 2 padded
    times = raw_t * pad
    values = jax.random.normal(k_v, (B, T, V), dtype=jnp.float32)
    masks = (jax.random.uniform(k_m, (B, T, V)) > 0.5).astype(jnp.float32)

    # Deterministic GRUCell parameters (PyTorch default U(-1/sqrt(H), 1/sqrt(H))),
    # gate order (r, z, n), stored pre-transposed for x @ W^T.
    bound = 1.0 / jnp.sqrt(jnp.float32(H))
    params = {
        'w_ih_t': jax.random.uniform(k1, (I, 3 * H), minval=-bound, maxval=bound,
                                     dtype=jnp.float32),
        'w_hh_t': jax.random.uniform(k2, (H, 3 * H), minval=-bound, maxval=bound,
                                     dtype=jnp.float32),
        'b_ih': jax.random.uniform(k3, (1, 3 * H), minval=-bound, maxval=bound,
                                   dtype=jnp.float32),
        'b_hh': jax.random.uniform(k4, (1, 3 * H), minval=-bound, maxval=bound,
                                   dtype=jnp.float32),
    }
    # TODO(synk): self.rec_lyr (Linear->Tanh->Linear) is unused in forward(),
    # so it is not part of the kernel; only hidden_state is produced.

    out = classic_rnn_forward(times, values, masks, params)
    hidden = jax.block_until_ready(out['hidden_state'])

    ref = classic_rnn_reference(times, values, masks, params)
    assert hidden.shape == (B, H)
    assert jnp.allclose(hidden, ref, atol=1e-5, rtol=1e-5), "mismatch vs reference"

    print("KERNEL_OK")
</pallas_src>

<mosaic_0001>
module attributes {stable_mosaic.version = 11 : i64} {
  func.func @_gru_chunk_kernel(%arg0: i32, %arg1: i32, %arg2: memref<8x8x384xf32, #tpu.memory_space<vmem>>, %arg3: memref<128x384xf32, #tpu.memory_space<vmem>>, %arg4: memref<1x384xf32, #tpu.memory_space<vmem>>, %arg5: memref<8x128xf32, #tpu.memory_space<vmem>>) attributes {dimension_semantics = [#tpu.dimension_semantics<parallel>, #tpu.dimension_semantics<arbitrary>], iteration_bounds = array<i64: 1, 1>, scalar_prefetch = 0 : i64, scratch_operands = 0 : i64, tpu.core_type = #tpu.core_type<tc>, window_params = [{transform_indices = @transform_0, window_bounds = array<i64: 8, 8, 384>}, {pipeline_mode = #tpu.pipeline_mode<synchronous>, transform_indices = @transform_1, window_bounds = array<i64: 128, 384>}, {pipeline_mode = #tpu.pipeline_mode<synchronous>, transform_indices = @transform_2, window_bounds = array<i64: 1, 384>}, {transform_indices = @transform_3, window_bounds = array<i64: 8, 128>}]} {
    %c0_i32 = arith.constant 0 : i32
    %0 = arith.cmpi eq, %arg1, %c0_i32 : i32
    %1 = arith.extui %0 : i1 to i32
    %c0_i32_0 = arith.constant 0 : i32
    %2 = arith.cmpi ne, %1, %c0_i32_0 : i32
    scf.if %2 {
      %cst_84 = arith.constant 0.000000e+00 : f32
      %277 = vector.broadcast %cst_84 : f32 to vector<8x128xf32>
      %c0_85 = arith.constant 0 : index
      %c0_86 = arith.constant 0 : index
      %278 = vector.load %arg5[%c0_85, %c0_86] : memref<8x128xf32, #tpu.memory_space<vmem>>, vector<8x128xf32>
      tpu.vector_store %arg5[%c0_85, %c0_86], %277 {strides = array<i32>} : memref<8x128xf32, #tpu.memory_space<vmem>>, vector<8x128xf32>,
    } else {
    }
    %c0 = arith.constant 0 : index
    %c0_1 = arith.constant 0 : index
    %3 = vector.load %arg5[%c0, %c0_1] : memref<8x128xf32, #tpu.memory_space<vmem>>, vector<8x128xf32>
    %c0_i32_2 = arith.constant 0 : i32
    %4 = arith.index_cast %c0_i32_2 : i32 to index
    %c0_3 = arith.constant 0 : index
    %c0_4 = arith.constant 0 : index
    %5 = vector.load %arg2[%4, %c0_3, %c0_4] : memref<8x8x384xf32, #tpu.memory_space<vmem>>, vector<1x8x384xf32>
    %6 = vector.shape_cast %5 : vector<1x8x384xf32> to vector<8x384xf32>
    %c0_5 = arith.constant 0 : index
    %c0_6 = arith.constant 0 : index
    %7 = vector.load %arg3[%c0_5, %c0_6] : memref<128x384xf32, #tpu.memory_space<vmem>>, vector<128x384xf32>
    %cst = arith.constant dense<0.000000e+00> : vector<8x384xf32>
    %8 = tpu.matmul %3, %7, %cst {dimension_numbers = #tpu.dot_dimension_numbers<[1], [0], [0], [1], [0, 0, 1, 1], [], []>, precision = #tpu.contract_precision<fp32>} : vector<8x128xf32>, vector<128x384xf32>, vector<8x384xf32> -> vector<8x384xf32>
    %c0_7 = arith.constant 0 : index
    %c0_8 = arith.constant 0 : index
    %9 = vector.load %arg4[%c0_7, %c0_8] : memref<1x384xf32, #tpu.memory_space<vmem>>, vector<1x384xf32>
    %10 = vector.broadcast %9 : vector<1x384xf32> to vector<8x384xf32>
    %11 = arith.addf %8, %10 : vector<8x384xf32>
    %12 = vector.extract_strided_slice %6 {offsets = [0, 0], sizes = [8, 128], strides = [1, 1]} : vector<8x384xf32> to vector<8x128xf32>
    %13 = vector.extract_strided_slice %6 {offsets = [0, 128], sizes = [8, 128], strides = [1, 1]} : vector<8x384xf32> to vector<8x128xf32>
    %14 = vector.extract_strided_slice %6 {offsets = [0, 256], sizes = [8, 128], strides = [1, 1]} : vector<8x384xf32> to vector<8x128xf32>
    %15 = vector.extract_strided_slice %11 {offsets = [0, 0], sizes = [8, 128], strides = [1, 1]} : vector<8x384xf32> to vector<8x128xf32>
    %16 = vector.extract_strided_slice %11 {offsets = [0, 128], sizes = [8, 128], strides = [1, 1]} : vector<8x384xf32> to vector<8x128xf32>
    %17 = vector.extract_strided_slice %11 {offsets = [0, 256], sizes = [8, 128], strides = [1, 1]} : vector<8x384xf32> to vector<8x128xf32>
    %18 = arith.addf %12, %15 : vector<8x128xf32>
    %19 = arith.negf %18 : vector<8x128xf32>
    %20 = math.exp %19 : vector<8x128xf32>
    %cst_9 = arith.constant 1.000000e+00 : f32
    %21 = vector.broadcast %cst_9 : f32 to vector<8x128xf32>
    %22 = arith.addf %21, %20 : vector<8x128xf32>
    %23 = arith.divf %21, %22 : vector<8x128xf32>
    %24 = arith.addf %13, %16 : vector<8x128xf32>
    %25 = arith.negf %24 : vector<8x128xf32>
    %26 = math.exp %25 : vector<8x128xf32>
    %cst_10 = arith.constant 1.000000e+00 : f32
    %27 = vector.broadcast %cst_10 : f32 to vector<8x128xf32>
    %28 = arith.addf %27, %26 : vector<8x128xf32>
    %29 = arith.divf %27, %28 : vector<8x128xf32>
    %30 = arith.mulf %23, %17 : vector<8x128xf32>
    %31 = arith.addf %14, %30 : vector<8x128xf32>
    %32 = math.tanh %31 : vector<8x128xf32>
    %cst_11 = arith.constant 1.000000e+00 : f32
    %33 = vector.broadcast %cst_11 : f32 to vector<8x128xf32>
    %34 = arith.subf %33, %29 : vector<8x128xf32>
    %35 = arith.mulf %34, %32 : vector<8x128xf32>
    %36 = arith.mulf %29, %3 : vector<8x128xf32>
    %37 = arith.addf %35, %36 : vector<8x128xf32>
    %c1_i32 = arith.constant 1 : i32
    %38 = arith.index_cast %c1_i32 : i32 to index
    %c0_12 = arith.constant 0 : index
    %c0_13 = arith.constant 0 : index
    %39 = vector.load %arg2[%38, %c0_12, %c0_13] : memref<8x8x384xf32, #tpu.memory_space<vmem>>, vector<1x8x384xf32>
    %40 = vector.shape_cast %39 : vector<1x8x384xf32> to vector<8x384xf32>
    %c0_14 = arith.constant 0 : index
    %c0_15 = arith.constant 0 : index
    %41 = vector.load %arg3[%c0_14, %c0_15] : memref<128x384xf32, #tpu.memory_space<vmem>>, vector<128x384xf32>
    %cst_16 = arith.constant dense<0.000000e+00> : vector<8x384xf32>
    %42 = tpu.matmul %37, %41, %cst_16 {dimension_numbers = #tpu.dot_dimension_numbers<[1], [0], [0], [1], [0, 0, 1, 1], [], []>, precision = #tpu.contract_precision<fp32>} : vector<8x128xf32>, vector<128x384xf32>, vector<8x384xf32> -> vector<8x384xf32>
    %c0_17 = arith.constant 0 : index
    %c0_18 = arith.constant 0 : index
    %43 = vector.load %arg4[%c0_17, %c0_18] : memref<1x384xf32, #tpu.memory_space<vmem>>, vector<1x384xf32>
    %44 = vector.broadcast %43 : vector<1x384xf32> to vector<8x384xf32>
    %45 = arith.addf %42, %44 : vector<8x384xf32>
    %46 = vector.extract_strided_slice %40 {offsets = [0, 0], sizes = [8, 128], strides = [1, 1]} : vector<8x384xf32> to vector<8x128xf32>
    %47 = vector.extract_strided_slice %40 {offsets = [0, 128], sizes = [8, 128], strides = [1, 1]} : vector<8x384xf32> to vector<8x128xf32>
    %48 = vector.extract_strided_slice %40 {offsets = [0, 256], sizes = [8, 128], strides = [1, 1]} : vector<8x384xf32> to vector<8x128xf32>
    %49 = vector.extract_strided_slice %45 {offsets = [0, 0], sizes = [8, 128], strides = [1, 1]} : vector<8x384xf32> to vector<8x128xf32>
    %50 = vector.extract_strided_slice %45 {offsets = [0, 128], sizes = [8, 128], strides = [1, 1]} : vector<8x384xf32> to vector<8x128xf32>
    %51 = vector.extract_strided_slice %45 {offsets = [0, 256], sizes = [8, 128], strides = [1, 1]} : vector<8x384xf32> to vector<8x128xf32>
    %52 = arith.addf %46, %49 : vector<8x128xf32>
    %53 = arith.negf %52 : vector<8x128xf32>
    %54 = math.exp %53 : vector<8x128xf32>
    %cst_19 = arith.constant 1.000000e+00 : f32
    %55 = vector.broadcast %cst_19 : f32 to vector<8x128xf32>
    %56 = arith.addf %55, %54 : vector<8x128xf32>
    %57 = arith.divf %55, %56 : vector<8x128xf32>
    %58 = arith.addf %47, %50 : vector<8x128xf32>
    %59 = arith.negf %58 : vector<8x128xf32>
    %60 = math.exp %59 : vector<8x128xf32>
    %cst_20 = arith.constant 1.000000e+00 : f32
    %61 = vector.broadcast %cst_20 : f32 to vector<8x128xf32>
    %62 = arith.addf %61, %60 : vector<8x128xf32>
    %63 = arith.divf %61, %62 : vector<8x128xf32>
    %64 = arith.mulf %57, %51 : vector<8x128xf32>
    %65 = arith.addf %48, %64 : vector<8x128xf32>
    %66 = math.tanh %65 : vector<8x128xf32>
    %cst_21 = arith.constant 1.000000e+00 : f32
    %67 = vector.broadcast %cst_21 : f32 to vector<8x128xf32>
    %68 = arith.subf %67, %63 : vector<8x128xf32>
    %69 = arith.mulf %68, %66 : vector<8x128xf32>
    %70 = arith.mulf %63, %37 : vector<8x128xf32>
    %71 = arith.addf %69, %70 : vector<8x128xf32>
    %c2_i32 = arith.constant 2 : i32
    %72 = arith.index_cast %c2_i32 : i32 to index
    %c0_22 = arith.constant 0 : index
    %c0_23 = arith.constant 0 : index
    %73 = vector.load %arg2[%72, %c0_22, %c0_23] : memref<8x8x384xf32, #tpu.memory_space<vmem>>, vector<1x8x384xf32>
    %74 = vector.shape_cast %73 : vector<1x8x384xf32> to vector<8x384xf32>
    %c0_24 = arith.constant 0 : index
    %c0_25 = arith.constant 0 : index
    %75 = vector.load %arg3[%c0_24, %c0_25] : memref<128x384xf32, #tpu.memory_space<vmem>>, vector<128x384xf32>
    %cst_26 = arith.constant dense<0.000000e+00> : vector<8x384xf32>
    %76 = tpu.matmul %71, %75, %cst_26 {dimension_numbers = #tpu.dot_dimension_numbers<[1], [0], [0], [1], [0, 0, 1, 1], [], []>, precision = #tpu.contract_precision<fp32>} : vector<8x128xf32>, vector<128x384xf32>, vector<8x384xf32> -> vector<8x384xf32>
    %c0_27 = arith.constant 0 : index
    %c0_28 = arith.constant 0 : index
    %77 = vector.load %arg4[%c0_27, %c0_28] : memref<1x384xf32, #tpu.memory_space<vmem>>, vector<1x384xf32>
    %78 = vector.broadcast %77 : vector<1x384xf32> to vector<8x384xf32>
    %79 = arith.addf %76, %78 : vector<8x384xf32>
    %80 = vector.extract_strided_slice %74 {offsets = [0, 0], sizes = [8, 128], strides = [1, 1]} : vector<8x384xf32> to vector<8x128xf32>
    %81 = vector.extract_strided_slice %74 {offsets = [0, 128], sizes = [8, 128], strides = [1, 1]} : vector<8x384xf32> to vector<8x128xf32>
    %82 = vector.extract_strided_slice %74 {offsets = [0, 256], sizes = [8, 128], strides = [1, 1]} : vector<8x384xf32> to vector<8x128xf32>
    %83 = vector.extract_strided_slice %79 {offsets = [0, 0], sizes = [8, 128], strides = [1, 1]} : vector<8x384xf32> to vector<8x128xf32>
    %84 = vector.extract_strided_slice %79 {offsets = [0, 128], sizes = [8, 128], strides = [1, 1]} : vector<8x384xf32> to vector<8x128xf32>
    %85 = vector.extract_strided_slice %79 {offsets = [0, 256], sizes = [8, 128], strides = [1, 1]} : vector<8x384xf32> to vector<8x128xf32>
    %86 = arith.addf %80, %83 : vector<8x128xf32>
    %87 = arith.negf %86 : vector<8x128xf32>
    %88 = math.exp %87 : vector<8x128xf32>
    %cst_29 = arith.constant 1.000000e+00 : f32
    %89 = vector.broadcast %cst_29 : f32 to vector<8x128xf32>
    %90 = arith.addf %89, %88 : vector<8x128xf32>
    %91 = arith.divf %89, %90 : vector<8x128xf32>
    %92 = arith.addf %81, %84 : vector<8x128xf32>
    %93 = arith.negf %92 : vector<8x128xf32>
    %94 = math.exp %93 : vector<8x128xf32>
    %cst_30 = arith.constant 1.000000e+00 : f32
    %95 = vector.broadcast %cst_30 : f32 to vector<8x128xf32>
    %96 = arith.addf %95, %94 : vector<8x128xf32>
    %97 = arith.divf %95, %96 : vector<8x128xf32>
    %98 = arith.mulf %91, %85 : vector<8x128xf32>
    %99 = arith.addf %82, %98 : vector<8x128xf32>
    %100 = math.tanh %99 : vector<8x128xf32>
    %cst_31 = arith.constant 1.000000e+00 : f32
    %101 = vector.broadcast %cst_31 : f32 to vector<8x128xf32>
    %102 = arith.subf %101, %97 : vector<8x128xf32>
    %103 = arith.mulf %102, %100 : vector<8x128xf32>
    %104 = arith.mulf %97, %71 : vector<8x128xf32>
    %105 = arith.addf %103, %104 : vector<8x128xf32>
    %c3_i32 = arith.constant 3 : i32
    %106 = arith.index_cast %c3_i32 : i32 to index
    %c0_32 = arith.constant 0 : index
    %c0_33 = arith.constant 0 : index
    %107 = vector.load %arg2[%106, %c0_32, %c0_33] : memref<8x8x384xf32, #tpu.memory_space<vmem>>, vector<1x8x384xf32>
    %108 = vector.shape_cast %107 : vector<1x8x384xf32> to vector<8x384xf32>
    %c0_34 = arith.constant 0 : index
    %c0_35 = arith.constant 0 : index
    %109 = vector.load %arg3[%c0_34, %c0_35] : memref<128x384xf32, #tpu.memory_space<vmem>>, vector<128x384xf32>
    %cst_36 = arith.constant dense<0.000000e+00> : vector<8x384xf32>
    %110 = tpu.matmul %105, %109, %cst_36 {dimension_numbers = #tpu.dot_dimension_numbers<[1], [0], [0], [1], [0, 0, 1, 1], [], []>, precision = #tpu.contract_precision<fp32>} : vector<8x128xf32>, vector<128x384xf32>, vector<8x384xf32> -> vector<8x384xf32>
    %c0_37 = arith.constant 0 : index
    %c0_38 = arith.constant 0 : index
    %111 = vector.load %arg4[%c0_37, %c0_38] : memref<1x384xf32, #tpu.memory_space<vmem>>, vector<1x384xf32>
    %112 = vector.broadcast %111 : vector<1x384xf32> to vector<8x384xf32>
    %113 = arith.addf %110, %112 : vector<8x384xf32>
    %114 = vector.extract_strided_slice %108 {offsets = [0, 0], sizes = [8, 128], strides = [1, 1]} : vector<8x384xf32> to vector<8x128xf32>
    %115 = vector.extract_strided_slice %108 {offsets = [0, 128], sizes = [8, 128], strides = [1, 1]} : vector<8x384xf32> to vector<8x128xf32>
    %116 = vector.extract_strided_slice %108 {offsets = [0, 256], sizes = [8, 128], strides = [1, 1]} : vector<8x384xf32> to vector<8x128xf32>
    %117 = vector.extract_strided_slice %113 {offsets = [0, 0], sizes = [8, 128], strides = [1, 1]} : vector<8x384xf32> to vector<8x128xf32>
    %118 = vector.extract_strided_slice %113 {offsets = [0, 128], sizes = [8, 128], strides = [1, 1]} : vector<8x384xf32> to vector<8x128xf32>
    %119 = vector.extract_strided_slice %113 {offsets = [0, 256], sizes = [8, 128], strides = [1, 1]} : vector<8x384xf32> to vector<8x128xf32>
    %120 = arith.addf %114, %117 : vector<8x128xf32>
    %121 = arith.negf %120 : vector<8x128xf32>
    %122 = math.exp %121 : vector<8x128xf32>
    %cst_39 = arith.constant 1.000000e+00 : f32
    %123 = vector.broadcast %cst_39 : f32 to vector<8x128xf32>
    %124 = arith.addf %123, %122 : vector<8x128xf32>
    %125 = arith.divf %123, %124 : vector<8x128xf32>
    %126 = arith.addf %115, %118 : vector<8x128xf32>
    %127 = arith.negf %126 : vector<8x128xf32>
    %128 = math.exp %127 : vector<8x128xf32>
    %cst_40 = arith.constant 1.000000e+00 : f32
    %129 = vector.broadcast %cst_40 : f32 to vector<8x128xf32>
    %130 = arith.addf %129, %128 : vector<8x128xf32>
    %131 = arith.divf %129, %130 : vector<8x128xf32>
    %132 = arith.mulf %125, %119 : vector<8x128xf32>
    %133 = arith.addf %116, %132 : vector<8x128xf32>
    %134 = math.tanh %133 : vector<8x128xf32>
    %cst_41 = arith.constant 1.000000e+00 : f32
    %135 = vector.broadcast %cst_41 : f32 to vector<8x128xf32>
    %136 = arith.subf %135, %131 : vector<8x128xf32>
    %137 = arith.mulf %136, %134 : vector<8x128xf32>
    %138 = arith.mulf %131, %105 : vector<8x128xf32>
    %139 = arith.addf %137, %138 : vector<8x128xf32>
    %c4_i32 = arith.constant 4 : i32
    %140 = arith.index_cast %c4_i32 : i32 to index
    %c0_42 = arith.constant 0 : index
    %c0_43 = arith.constant 0 : index
    %141 = vector.load %arg2[%140, %c0_42, %c0_43] : memref<8x8x384xf32, #tpu.memory_space<vmem>>, vector<1x8x384xf32>
    %142 = vector.shape_cast %141 : vector<1x8x384xf32> to vector<8x384xf32>
    %c0_44 = arith.constant 0 : index
    %c0_45 = arith.constant 0 : index
    %143 = vector.load %arg3[%c0_44, %c0_45] : memref<128x384xf32, #tpu.memory_space<vmem>>, vector<128x384xf32>
    %cst_46 = arith.constant dense<0.000000e+00> : vector<8x384xf32>
    %144 = tpu.matmul %139, %143, %cst_46 {dimension_numbers = #tpu.dot_dimension_numbers<[1], [0], [0], [1], [0, 0, 1, 1], [], []>, precision = #tpu.contract_precision<fp32>} : vector<8x128xf32>, vector<128x384xf32>, vector<8x384xf32> -> vector<8x384xf32>
    %c0_47 = arith.constant 0 : index
    %c0_48 = arith.constant 0 : index
    %145 = vector.load %arg4[%c0_47, %c0_48] : memref<1x384xf32, #tpu.memory_space<vmem>>, vector<1x384xf32>
    %146 = vector.broadcast %145 : vector<1x384xf32> to vector<8x384xf32>
    %147 = arith.addf %144, %146 : vector<8x384xf32>
    %148 = vector.extract_strided_slice %142 {offsets = [0, 0], sizes = [8, 128], strides = [1, 1]} : vector<8x384xf32> to vector<8x128xf32>
    %149 = vector.extract_strided_slice %142 {offsets = [0, 128], sizes = [8, 128], strides = [1, 1]} : vector<8x384xf32> to vector<8x128xf32>
    %150 = vector.extract_strided_slice %142 {offsets = [0, 256], sizes = [8, 128], strides = [1, 1]} : vector<8x384xf32> to vector<8x128xf32>
    %151 = vector.extract_strided_slice %147 {offsets = [0, 0], sizes = [8, 128], strides = [1, 1]} : vector<8x384xf32> to vector<8x128xf32>
    %152 = vector.extract_strided_slice %147 {offsets = [0, 128], sizes = [8, 128], strides = [1, 1]} : vector<8x384xf32> to vector<8x128xf32>
    %153 = vector.extract_strided_slice %147 {offsets = [0, 256], sizes = [8, 128], strides = [1, 1]} : vector<8x384xf32> to vector<8x128xf32>
    %154 = arith.addf %148, %151 : vector<8x128xf32>
    %155 = arith.negf %154 : vector<8x128xf32>
    %156 = math.exp %155 : vector<8x128xf32>
    %cst_49 = arith.constant 1.000000e+00 : f32
    %157 = vector.broadcast %cst_49 : f32 to vector<8x128xf32>
    %158 = arith.addf %157, %156 : vector<8x128xf32>
    %159 = arith.divf %157, %158 : vector<8x128xf32>
    %160 = arith.addf %149, %152 : vector<8x128xf32>
    %161 = arith.negf %160 : vector<8x128xf32>
    %162 = math.exp %161 : vector<8x128xf32>
    %cst_50 = arith.constant 1.000000e+00 : f32
    %163 = vector.broadcast %cst_50 : f32 to vector<8x128xf32>
    %164 = arith.addf %163, %162 : vector<8x128xf32>
    %165 = arith.divf %163, %164 : vector<8x128xf32>
    %166 = arith.mulf %159, %153 : vector<8x128xf32>
    %167 = arith.addf %150, %166 : vector<8x128xf32>
    %168 = math.tanh %167 : vector<8x128xf32>
    %cst_51 = arith.constant 1.000000e+00 : f32
    %169 = vector.broadcast %cst_51 : f32 to vector<8x128xf32>
    %170 = arith.subf %169, %165 : vector<8x128xf32>
    %171 = arith.mulf %170, %168 : vector<8x128xf32>
    %172 = arith.mulf %165, %139 : vector<8x128xf32>
    %173 = arith.addf %171, %172 : vector<8x128xf32>
    %c5_i32 = arith.constant 5 : i32
    %174 = arith.index_cast %c5_i32 : i32 to index
    %c0_52 = arith.constant 0 : index
    %c0_53 = arith.constant 0 : index
    %175 = vector.load %arg2[%174, %c0_52, %c0_53] : memref<8x8x384xf32, #tpu.memory_space<vmem>>, vector<1x8x384xf32>
    %176 = vector.shape_cast %175 : vector<1x8x384xf32> to vector<8x384xf32>
    %c0_54 = arith.constant 0 : index
    %c0_55 = arith.constant 0 : index
    %177 = vector.load %arg3[%c0_54, %c0_55] : memref<128x384xf32, #tpu.memory_space<vmem>>, vector<128x384xf32>
    %cst_56 = arith.constant dense<0.000000e+00> : vector<8x384xf32>
    %178 = tpu.matmul %173, %177, %cst_56 {dimension_numbers = #tpu.dot_dimension_numbers<[1], [0], [0], [1], [0, 0, 1, 1], [], []>, precision = #tpu.contract_precision<fp32>} : vector<8x128xf32>, vector<128x384xf32>, vector<8x384xf32> -> vector<8x384xf32>
    %c0_57 = arith.constant 0 : index
    %c0_58 = arith.constant 0 : index
    %179 = vector.load %arg4[%c0_57, %c0_58] : memref<1x384xf32, #tpu.memory_space<vmem>>, vector<1x384xf32>
    %180 = vector.broadcast %179 : vector<1x384xf32> to vector<8x384xf32>
    %181 = arith.addf %178, %180 : vector<8x384xf32>
    %182 = vector.extract_strided_slice %176 {offsets = [0, 0], sizes = [8, 128], strides = [1, 1]} : vector<8x384xf32> to vector<8x128xf32>
    %183 = vector.extract_strided_slice %176 {offsets = [0, 128], sizes = [8, 128], strides = [1, 1]} : vector<8x384xf32> to vector<8x128xf32>
    %184 = vector.extract_strided_slice %176 {offsets = [0, 256], sizes = [8, 128], strides = [1, 1]} : vector<8x384xf32> to vector<8x128xf32>
    %185 = vector.extract_strided_slice %181 {offsets = [0, 0], sizes = [8, 128], strides = [1, 1]} : vector<8x384xf32> to vector<8x128xf32>
    %186 = vector.extract_strided_slice %181 {offsets = [0, 128], sizes = [8, 128], strides = [1, 1]} : vector<8x384xf32> to vector<8x128xf32>
    %187 = vector.extract_strided_slice %181 {offsets = [0, 256], sizes = [8, 128], strides = [1, 1]} : vector<8x384xf32> to vector<8x128xf32>
    %188 = arith.addf %182, %185 : vector<8x128xf32>
    %189 = arith.negf %188 : vector<8x128xf32>
    %190 = math.exp %189 : vector<8x128xf32>
    %cst_59 = arith.constant 1.000000e+00 : f32
    %191 = vector.broadcast %cst_59 : f32 to vector<8x128xf32>
    %192 = arith.addf %191, %190 : vector<8x128xf32>
    %193 = arith.divf %191, %192 : vector<8x128xf32>
    %194 = arith.addf %183, %186 : vector<8x128xf32>
    %195 = arith.negf %194 : vector<8x128xf32>
    %196 = math.exp %195 : vector<8x128xf32>
    %cst_60 = arith.constant 1.000000e+00 : f32
    %197 = vector.broadcast %cst_60 : f32 to vector<8x128xf32>
    %198 = arith.addf %197, %196 : vector<8x128xf32>
    %199 = arith.divf %197, %198 : vector<8x128xf32>
    %200 = arith.mulf %193, %187 : vector<8x128xf32>
    %201 = arith.addf %184, %200 : vector<8x128xf32>
    %202 = math.tanh %201 : vector<8x128xf32>
    %cst_61 = arith.constant 1.000000e+00 : f32
    %203 = vector.broadcast %cst_61 : f32 to vector<8x128xf32>
    %204 = arith.subf %203, %199 : vector<8x128xf32>
    %205 = arith.mulf %204, %202 : vector<8x128xf32>
    %206 = arith.mulf %199, %173 : vector<8x128xf32>
    %207 = arith.addf %205, %206 : vector<8x128xf32>
    %c6_i32 = arith.constant 6 : i32
    %208 = arith.index_cast %c6_i32 : i32 to index
    %c0_62 = arith.constant 0 : index
    %c0_63 = arith.constant 0 : index
    %209 = vector.load %arg2[%208, %c0_62, %c0_63] : memref<8x8x384xf32, #tpu.memory_space<vmem>>, vector<1x8x384xf32>
    %210 = vector.shape_cast %209 : vector<1x8x384xf32> to vector<8x384xf32>
    %c0_64 = arith.constant 0 : index
    %c0_65 = arith.constant 0 : index
    %211 = vector.load %arg3[%c0_64, %c0_65] : memref<128x384xf32, #tpu.memory_space<vmem>>, vector<128x384xf32>
    %cst_66 = arith.constant dense<0.000000e+00> : vector<8x384xf32>
    %212 = tpu.matmul %207, %211, %cst_66 {dimension_numbers = #tpu.dot_dimension_numbers<[1], [0], [0], [1], [0, 0, 1, 1], [], []>, precision = #tpu.contract_precision<fp32>} : vector<8x128xf32>, vector<128x384xf32>, vector<8x384xf32> -> vector<8x384xf32>
    %c0_67 = arith.constant 0 : index
    %c0_68 = arith.constant 0 : index
    %213 = vector.load %arg4[%c0_67, %c0_68] : memref<1x384xf32, #tpu.memory_space<vmem>>, vector<1x384xf32>
    %214 = vector.broadcast %213 : vector<1x384xf32> to vector<8x384xf32>
    %215 = arith.addf %212, %214 : vector<8x384xf32>
    %216 = vector.extract_strided_slice %210 {offsets = [0, 0], sizes = [8, 128], strides = [1, 1]} : vector<8x384xf32> to vector<8x128xf32>
    %217 = vector.extract_strided_slice %210 {offsets = [0, 128], sizes = [8, 128], strides = [1, 1]} : vector<8x384xf32> to vector<8x128xf32>
    %218 = vector.extract_strided_slice %210 {offsets = [0, 256], sizes = [8, 128], strides = [1, 1]} : vector<8x384xf32> to vector<8x128xf32>
    %219 = vector.extract_strided_slice %215 {offsets = [0, 0], sizes = [8, 128], strides = [1, 1]} : vector<8x384xf32> to vector<8x128xf32>
    %220 = vector.extract_strided_slice %215 {offsets = [0, 128], sizes = [8, 128], strides = [1, 1]} : vector<8x384xf32> to vector<8x128xf32>
    %221 = vector.extract_strided_slice %215 {offsets = [0, 256], sizes = [8, 128], strides = [1, 1]} : vector<8x384xf32> to vector<8x128xf32>
    %222 = arith.addf %216, %219 : vector<8x128xf32>
    %223 = arith.negf %222 : vector<8x128xf32>
    %224 = math.exp %223 : vector<8x128xf32>
    %cst_69 = arith.constant 1.000000e+00 : f32
    %225 = vector.broadcast %cst_69 : f32 to vector<8x128xf32>
    %226 = arith.addf %225, %224 : vector<8x128xf32>
    %227 = arith.divf %225, %226 : vector<8x128xf32>
    %228 = arith.addf %217, %220 : vector<8x128xf32>
    %229 = arith.negf %228 : vector<8x128xf32>
    %230 = math.exp %229 : vector<8x128xf32>
    %cst_70 = arith.constant 1.000000e+00 : f32
    %231 = vector.broadcast %cst_70 : f32 to vector<8x128xf32>
    %232 = arith.addf %231, %230 : vector<8x128xf32>
    %233 = arith.divf %231, %232 : vector<8x128xf32>
    %234 = arith.mulf %227, %221 : vector<8x128xf32>
    %235 = arith.addf %218, %234 : vector<8x128xf32>
    %236 = math.tanh %235 : vector<8x128xf32>
    %cst_71 = arith.constant 1.000000e+00 : f32
    %237 = vector.broadcast %cst_71 : f32 to vector<8x128xf32>
    %238 = arith.subf %237, %233 : vector<8x128xf32>
    %239 = arith.mulf %238, %236 : vector<8x128xf32>
    %240 = arith.mulf %233, %207 : vector<8x128xf32>
    %241 = arith.addf %239, %240 : vector<8x128xf32>
    %c7_i32 = arith.constant 7 : i32
    %242 = arith.index_cast %c7_i32 : i32 to index
    %c0_72 = arith.constant 0 : index
    %c0_73 = arith.constant 0 : index
    %243 = vector.load %arg2[%242, %c0_72, %c0_73] : memref<8x8x384xf32, #tpu.memory_space<vmem>>, vector<1x8x384xf32>
    %244 = vector.shape_cast %243 : vector<1x8x384xf32> to vector<8x384xf32>
    %c0_74 = arith.constant 0 : index
    %c0_75 = arith.constant 0 : index
    %245 = vector.load %arg3[%c0_74, %c0_75] : memref<128x384xf32, #tpu.memory_space<vmem>>, vector<128x384xf32>
    %cst_76 = arith.constant dense<0.000000e+00> : vector<8x384xf32>
    %246 = tpu.matmul %241, %245, %cst_76 {dimension_numbers = #tpu.dot_dimension_numbers<[1], [0], [0], [1], [0, 0, 1, 1], [], []>, precision = #tpu.contract_precision<fp32>} : vector<8x128xf32>, vector<128x384xf32>, vector<8x384xf32> -> vector<8x384xf32>
    %c0_77 = arith.constant 0 : index
    %c0_78 = arith.constant 0 : index
    %247 = vector.load %arg4[%c0_77, %c0_78] : memref<1x384xf32, #tpu.memory_space<vmem>>, vector<1x384xf32>
    %248 = vector.broadcast %247 : vector<1x384xf32> to vector<8x384xf32>
    %249 = arith.addf %246, %248 : vector<8x384xf32>
    %250 = vector.extract_strided_slice %244 {offsets = [0, 0], sizes = [8, 128], strides = [1, 1]} : vector<8x384xf32> to vector<8x128xf32>
    %251 = vector.extract_strided_slice %244 {offsets = [0, 128], sizes = [8, 128], strides = [1, 1]} : vector<8x384xf32> to vector<8x128xf32>
    %252 = vector.extract_strided_slice %244 {offsets = [0, 256], sizes = [8, 128], strides = [1, 1]} : vector<8x384xf32> to vector<8x128xf32>
    %253 = vector.extract_strided_slice %249 {offsets = [0, 0], sizes = [8, 128], strides = [1, 1]} : vector<8x384xf32> to vector<8x128xf32>
    %254 = vector.extract_strided_slice %249 {offsets = [0, 128], sizes = [8, 128], strides = [1, 1]} : vector<8x384xf32> to vector<8x128xf32>
    %255 = vector.extract_strided_slice %249 {offsets = [0, 256], sizes = [8, 128], strides = [1, 1]} : vector<8x384xf32> to vector<8x128xf32>
    %256 = arith.addf %250, %253 : vector<8x128xf32>
    %257 = arith.negf %256 : vector<8x128xf32>
    %258 = math.exp %257 : vector<8x128xf32>
    %cst_79 = arith.constant 1.000000e+00 : f32
    %259 = vector.broadcast %cst_79 : f32 to vector<8x128xf32>
    %260 = arith.addf %259, %258 : vector<8x128xf32>
    %261 = arith.divf %259, %260 : vector<8x128xf32>
    %262 = arith.addf %251, %254 : vector<8x128xf32>
    %263 = arith.negf %262 : vector<8x128xf32>
    %264 = math.exp %263 : vector<8x128xf32>
    %cst_80 = arith.constant 1.000000e+00 : f32
    %265 = vector.broadcast %cst_80 : f32 to vector<8x128xf32>
    %266 = arith.addf %265, %264 : vector<8x128xf32>
    %267 = arith.divf %265, %266 : vector<8x128xf32>
    %268 = arith.mulf %261, %255 : vector<8x128xf32>
    %269 = arith.addf %252, %268 : vector<8x128xf32>
    %270 = math.tanh %269 : vector<8x128xf32>
    %cst_81 = arith.constant 1.000000e+00 : f32
    %271 = vector.broadcast %cst_81 : f32 to vector<8x128xf32>
    %272 = arith.subf %271, %267 : vector<8x128xf32>
    %273 = arith.mulf %272, %270 : vector<8x128xf32>
    %274 = arith.mulf %267, %241 : vector<8x128xf32>
    %275 = arith.addf %273, %274 : vector<8x128xf32>
    %c8_i32 = arith.constant 8 : i32
    %c0_82 = arith.constant 0 : index
    %c0_83 = arith.constant 0 : index
    %276 = vector.load %arg5[%c0_82, %c0_83] : memref<8x128xf32, #tpu.memory_space<vmem>>, vector<8x128xf32>
    tpu.vector_store %arg5[%c0_82, %c0_83], %275 {strides = array<i32>} : memref<8x128xf32, #tpu.memory_space<vmem>>, vector<8x128xf32>,
    return
  }
  func.func @transform_0(%arg0: i32, %arg1: i32) -> (i32, i32, i32) {
    %c0_i32 = arith.constant 0 : i32
    %c0_i32_0 = arith.constant 0 : i32
    return %arg1, %arg0, %c0_i32 : i32, i32, i32
  }
  func.func @transform_1(%arg0: i32, %arg1: i32) -> (i32, i32) {
    %c0_i32 = arith.constant 0 : i32
    %c0_i32_0 = arith.constant 0 : i32
    %c0_i32_1 = arith.constant 0 : i32
    return %c0_i32, %c0_i32_0 : i32, i32
  }
  func.func @transform_2(%arg0: i32, %arg1: i32) -> (i32, i32) {
    %c0_i32 = arith.constant 0 : i32
    %c0_i32_0 = arith.constant 0 : i32
    %c0_i32_1 = arith.constant 0 : i32
    return %c0_i32, %c0_i32_0 : i32, i32
  }
  func.func @transform_3(%arg0: i32, %arg1: i32) -> (i32, i32) {
    %c0_i32 = arith.constant 0 : i32
    %c0_i32_0 = arith.constant 0 : i32
    return %arg0, %c0_i32 : i32, i32
  }
}

</mosaic_0001>

<bundles_post_ra>
// kernel: tpu_custom_call.1
= control target key start
LH: loop header
LB: loop body
LE: loop exit
PB: predicated region body
PF: predicated region fallthrough
CT: control target
= control target key end

     0   :  { %8 = vsyncpa [#allocation3], 0  ;;  %s12149_s0 = inlined_call_operand.hbm [shape: f32[8,8,384], index: 0, kind: input, shape index: {}]   ;;  %s12150_s1 = inlined_call_operand.hbm [shape: f32[128,384], index: 1, kind: input, shape index: {}]   ;;  %s12151_s2 = inlined_call_operand.hbm [shape: f32[1,384], index: 2, kind: input, shape index: {}]   ;;  %s12152_s3 = inlined_call_operand.hbm [shape: f32[8,128], index: 3, kind: output, shape index: {}]  }
   0x1   :  { %9 = vsyncpa [#allocation6], 0 }
   0x2   :  { %10 = vsyncpa [#allocation4], 0  ;;  %s28_s14 = sshll.u32 %s12150_s1, 4  ;;  %s8937_s15 = smov [#allocation5]   ;;  %s29_s14 = int_to_ptr.hbm [resolvable:$true] %s28_s14 }
   0x3   :  { %s30_s16 = sshll.u32 %s8937_s15, 4  ;;  %s15_s19 = sshll.u32 %s12149_s0, 4  ;;  %s31_s16 = int_to_ptr.vmem [resolvable:$true] %s30_s16  ;;  %s16_s19 = int_to_ptr.hbm [resolvable:$true] %s15_s19 }
   0x4   :  { %s8938_s20 = smov 384   ;;  %s8939_s21 = smov 24  }
   0x5   :  { %36 = dma.hbm_to_vmem [thread:$0]  %s29_s14, 6144, %s31_s16, [#allocation6], %s8938_s20, %s8938_s20, %s8939_s21  }
   0x6   :  { %s8940_s22 = smov [#allocation2]   ;;  %s42_s26 = sshll.u32 %s12151_s2, 4  ;;  %s43_s26 = int_to_ptr.hbm [resolvable:$true] %s42_s26 }
   0x7   :  { %s17_s23 = sshll.u32 %s8940_s22, 4  ;;  %s8941_s1 = smov [#allocation7]   ;;  %s18_s23 = int_to_ptr.vmem [resolvable:$true] %s17_s23 }
   0x8   :  { %23 = dma.hbm_to_vmem [thread:$0]  %s16_s19, 3072, %s18_s23, [#allocation3], %s8938_s20, %s8938_s20, %s8939_s21  }
   0x9   :  { %s44_s27 = sshll.u32 %s8941_s1, 4  ;;  %s45_s27 = int_to_ptr.vmem [resolvable:$true] %s44_s27 }
   0xa   :  { %47 = dma.hbm_to_vmem [thread:$0]  %s43_s26, 48, %s45_s27, [#allocation6]  }
   0xb   :  { %8931 = dma.done.wait [#allocation3], 3072  }
   0xc   :  { %8932 = vsyncadd [#allocation3], 4294964224 }
   0xd   :  { %8933 = dma.done.wait [#allocation6], 6192  }
   0xe   :  { %8934 = vsyncadd [#allocation6], 4294961104  ;;  %v114_v0 = vld [vmem:[#allocation5 + $0x168] sm:$0xff]  ;;  %v111_v1 = vld [vmem:[#allocation5 + $0x150] sm:$0xff]  ;;  %s8943_s0 = smov [#allocation8]   ;;  %s8721_s30 = sshll.u32 %s12152_s3, 4  ;;  %s8722_s30 = int_to_ptr.hbm [resolvable:$true] %s8721_s30 }
   0xf   :  { %v108_v2 = vld [vmem:[#allocation5 + $0x138] sm:$0xff]  ;;  %v8973_v3 = vand.u32 4294901760, %v114_v0  ;;  %v8975_v4 = vand.u32 4294901760, %v111_v1  ;;  %v105_v6 = vld [vmem:[#allocation5 + $0x120] sm:$0xff]  ;;  %v102_v7 = vld [vmem:[#allocation5 + $0x108] sm:$0xff]  ;;  %s8719_s2 = sshll.u32 %s8943_s0, 4  ;;  %s8720_s2 = int_to_ptr.vmem [resolvable:$true] %s8719_s2 }
  0x10   :  { %v8977_v5 = vand.u32 4294901760, %v108_v2  ;;  %v99_v8 = vld [vmem:[#allocation5 + $0xf0] sm:$0xff]  ;;  %v8979_v9 = vand.u32 4294901760, %v105_v6  ;;  %v8981_v10 = vand.u32 4294901760, %v102_v7  ;;  %v96_v12 = vld [vmem:[#allocation5 + $0xd8] sm:$0xff]  ;;  %v93_v13 = vld [vmem:[#allocation5 + $0xc0] sm:$0xff] }
  0x11   :  { %12725 = vst [vmem:[#allocation12_spill] sm:$0xff] %v8973_v3  ;;  %v8983_v11 = vand.u32 4294901760, %v99_v8  ;;  %126 = vmatpush.msra.mxu0 %v8973_v3  ;;  %v8987_v14 = vsub.f32 %v114_v0, %v8973_v3  ;;  %v8990_v15 = vsub.f32 %v111_v1, %v8975_v4  ;;  %v8995_v17 = vand.u32 4294901760, %v96_v12  ;;  %322 = vmatpush.msra.mxu3 %v8973_v3  ;;  %v90_v21 = vld [vmem:[#allocation5 + $0xa8] sm:$0xff]  ;;  %v87_v34 = vld [vmem:[#allocation5 + $0x90] sm:$0xff]  ;;  %v84_v35 = vld [vmem:[#allocation5 + $0x78] sm:$0xff] }
  0x12   :  { %12726 = vst [vmem:[#allocation13_spill] sm:$0xff] %v8975_v4  ;;  %v8993_v16 = vsub.f32 %v108_v2, %v8977_v5  ;;  %v8999_v18 = vsub.f32 %v105_v6, %v8979_v9  ;;  %v9002_v19 = vsub.f32 %v102_v7, %v8981_v10  ;;  %v9004_v20 = vand.u32 4294901760, %v93_v13  ;;  %v81_v42 = vld [vmem:[#allocation5 + $0x60] sm:$0xff]  ;;  %v78_v47 = vld [vmem:[#allocation5 + $0x48] sm:$0xff]  ;;  %v75_v53 = vld [vmem:[#allocation5 + $0x30] sm:$0xff] }
  0x13   :  { %12727 = vst [vmem:[#allocation14_spill] sm:$0xff] %v8977_v5  ;;  %128 = vmatpush.msra.mxu0 %v8975_v4  ;;  %v9008_v22 = vand.u32 4294901760, %v8987_v14  ;;  %v9011_v23 = vand.u32 4294901760, %v8990_v15  ;;  %v9017_v25 = vsub.f32 %v99_v8, %v8983_v11  ;;  %269 = vmatpush.msra.mxu2 %v8987_v14  ;;  %v9027_v28 = vsub.f32 %v96_v12, %v8995_v17  ;;  %v72_v61 = vld [vmem:[#allocation5 + $0x18] sm:$0xff]  ;;  %v115_v62 = vld [vmem:[#allocation5 + $0x170] sm:$0xff]  ;;  %v69_v7 = vld [vmem:[#allocation5] sm:$0xff] }
  0x14   :  { %12728 = vst [vmem:[#allocation15_spill] sm:$0xff] %v8979_v9  ;;  %v9014_v24 = vand.u32 4294901760, %v8993_v16  ;;  %v9021_v26 = vand.u32 4294901760, %v8999_v18  ;;  %v9024_v27 = vand.u32 4294901760, %v9002_v19  ;;  %324 = vmatpush.msra.mxu3 %v8975_v4  ;;  %v9037_v32 = vand.u32 4294901760, %v90_v21  ;;  %v112_v8 = vld [vmem:[#allocation5 + $0x158] sm:$0xff] }
  0x15   :  { %12729 = vst [vmem:[#allocation16_spill] sm:$0xff] %v8981_v10  ;;  %v169_v29 = vsub.f32 %v8987_v14, %v9008_v22  ;;  %130 = vmatpush.msra.mxu0 %v8977_v5  ;;  %v175_v30 = vsub.f32 %v8990_v15, %v9011_v23  ;;  %272 = vmatpush.msra.mxu2 %v8990_v15  ;;  %v9052_v39 = vand.u32 4294901760, %v9017_v25  ;;  %v9058_v41 = vand.u32 4294901760, %v9027_v28 }
  0x16   :  { %12730 = vst [vmem:[#allocation17_spill] sm:$0xff] %v8983_v11  ;;  %v181_v31 = vsub.f32 %v8993_v16, %v9014_v24  ;;  %v9041_v33 = vsub.f32 %v93_v13, %v9004_v20  ;;  %326 = vmatpush.msra.mxu3 %v8977_v5  ;;  %v187_v38 = vsub.f32 %v8999_v18, %v9021_v26  ;;  %v9065_v44 = vand.u32 4294901760, %v87_v34 }
  0x17   :  { %12731 = vst [vmem:[#allocation18_spill] sm:$0xff] %v8987_v14  ;;  %v9044_v36 = vand.u32 4294901760, %v169_v29  ;;  %v9046_v37 = vand.u32 4294901760, %v175_v30  ;;  %132 = vmatpush.msra.mxu0 %v8979_v9  ;;  %275 = vmatpush.msra.mxu2 %v8993_v16  ;;  %v193_v40 = vsub.f32 %v9002_v19, %v9024_v27  ;;  %v9068_v45 = vsub.f32 %v90_v21, %v9037_v32 }
  0x18   :  { %12732 = vst [vmem:[#allocation19_spill] sm:$0xff] %v8990_v15  ;;  %328 = vmatpush.msra.mxu3 %v8979_v9  ;;  %v9062_v43 = vand.u32 4294901760, %v181_v31  ;;  %v9070_v46 = vand.u32 4294901760, %v84_v35  ;;  %v9073_v48 = vand.u32 4294901760, %v9041_v33  ;;  %v9078_v49 = vand.u32 4294901760, %v187_v38 }
  0x19   :  { %12733 = vst [vmem:[#allocation20_spill] sm:$0xff] %v8993_v16  ;;  %171 = vmatpush.msra.mxu1 %v9044_v36  ;;  %134 = vmatpush.msra.mxu0 %v8981_v10  ;;  %v199_v50 = vsub.f32 %v9017_v25, %v9052_v39  ;;  %v9084_v51 = vsub.f32 %v87_v34, %v9065_v44  ;;  %v9086_v52 = vand.u32 4294901760, %v81_v42  ;;  %v9090_v55 = vand.u32 4294901760, %v78_v47  ;;  %v109_v34 = vld [vmem:[#allocation5 + $0x140] sm:$0xff]  ;;  %v100_v16 = vld [vmem:[#allocation5 + $0xf8] sm:$0xff] }
  0x1a   :  { %12734 = vst [vmem:[#allocation21_spill] sm:$0xff] %v8995_v17  ;;  %278 = vmatpush.msra.mxu2 %v8999_v18  ;;  %330 = vmatpush.msra.mxu3 %v8981_v10  ;;  %v205_v54 = vsub.f32 %v9027_v28, %v9058_v41  ;;  %v9095_v56 = vand.u32 4294901760, %v193_v40  ;;  %v9099_v57 = vand.u32 4294901760, %v9068_v45  ;;  %v9102_v58 = vsub.f32 %v84_v35, %v9070_v46 }
  0x1b   :  { %12735 = vst [vmem:[#allocation22_spill] sm:$0xff] %v8999_v18  ;;  %177 = vmatpush.msra.mxu1 %v9046_v37  ;;  %136 = vmatpush.msra.mxu0 %v8983_v11  ;;  %v211_v59 = vsub.f32 %v9041_v33, %v9073_v48  ;;  %v9106_v60 = vand.u32 4294901760, %v75_v53  ;;  %v9111_v63 = vand.u32 4294901760, %v199_v50  ;;  %v9115_v0 = vand.u32 4294901760, %v9084_v51 }
  0x1c   :  { %12736 = vst [vmem:[#allocation23_spill] sm:$0xff] %v9002_v19  ;;  %281 = vmatpush.msra.mxu2 %v9002_v19  ;;  %332 = vmatpush.msra.mxu3 %v8983_v11  ;;  %v9118_v1 = vsub.f32 %v81_v42, %v9086_v52  ;;  %v9120_v2 = vand.u32 4294901760, %v205_v54  ;;  %v9123_v6 = vsub.f32 %v78_v47, %v9090_v55  ;;  %v9132_v13 = vand.u32 4294901760, %v9102_v58 }
  0x1d   :  { %12737 = vst [vmem:[#allocation24_spill] sm:$0xff] %v9004_v20  ;;  %183 = vmatpush.msra.mxu1 %v9062_v43  ;;  %138 = vmatpush.msra.mxu0 %v8995_v17  ;;  %v217_v12 = vsub.f32 %v9068_v45, %v9099_v57  ;;  %v9134_v21 = vand.u32 4294901760, %v72_v61  ;;  %v9136_v29 = vand.u32 4294901760, %v115_v62  ;;  %v9138_v30 = vand.u32 4294901760, %v211_v59 }
  0x1e   :  { %12738 = vst [vmem:[#allocation25_spill] sm:$0xff] %v9008_v22  ;;  %284 = vmatpush.msra.mxu2 %v9017_v25  ;;  %334 = vmatpush.msra.mxu3 %v8995_v17  ;;  %v9141_v31 = vsub.f32 %v75_v53, %v9106_v60  ;;  %v223_v35 = vsub.f32 %v9084_v51, %v9115_v0  ;;  %v9150_v38 = vand.u32 4294901760, %v9118_v1  ;;  %v9152_v40 = vand.u32 4294901760, %v69_v7 }
  0x1f   :  { %12739 = vst [vmem:[#allocation26_spill] sm:$0xff] %v9011_v23  ;;  %189 = vmatpush.msra.mxu1 %v9078_v49  ;;  %140 = vmatpush.msra.mxu0 %v9004_v20  ;;  %v9154_v42 = vand.u32 4294901760, %v112_v8  ;;  %v9157_v47 = vand.u32 4294901760, %v9123_v6  ;;  %v9162_v50 = vsub.f32 %v115_v62, %v9136_v29  ;;  %v9165_v53 = vand.u32 4294901760, %v217_v12 }
  0x20   :  { %12740 = vst [vmem:[#allocation27_spill] sm:$0xff] %v9014_v24  ;;  %287 = vmatpush.msra.mxu2 %v9027_v28  ;;  %336 = vmatpush.msra.mxu3 %v9004_v20  ;;  %v229_v54 = vsub.f32 %v9102_v58, %v9132_v13  ;;  %v9171_v59 = vsub.f32 %v72_v61, %v9134_v21  ;;  %v9184_v12 = vand.u32 4294901760, %v223_v35 }
  0x21   :  { %12741 = vst [vmem:[#allocation28_spill] sm:$0xff] %v9017_v25  ;;  %195 = vmatpush.msra.mxu1 %v9095_v56  ;;  %142 = vmatpush.msra.mxu0 %v9037_v32  ;;  %v9181_v62 = vsub.f32 %v112_v8, %v9154_v42  ;;  %v235_v61 = vsub.f32 %v9118_v1, %v9150_v38  ;;  %v106_v25 = vld [vmem:[#allocation5 + $0x128] sm:$0xff]  ;;  %v9195_v8 = vand.u32 4294901760, %v9162_v50 }
  0x22   :  { %12742 = vst [vmem:[#allocation29_spill] sm:$0xff] %v9021_v26  ;;  %290 = vmatpush.msra.mxu2 %v9041_v33  ;;  %338 = vmatpush.msra.mxu3 %v9037_v32  ;;  %v9198_v35 = vand.u32 4294901760, %v229_v54  ;;  %v9214_v54 = vand.u32 4294901760, %v106_v25 }
  0x23   :  { %12743 = vst [vmem:[#allocation30_spill] sm:$0xff] %v9024_v27  ;;  %201 = vmatpush.msra.mxu1 %v9111_v63  ;;  %144 = vmatpush.msra.mxu0 %v9065_v44  ;;  %v9217_v18 = vand.u32 4294901760, %v235_v61 }
  0x24   :  { %12744 = vst [vmem:[#allocation31_spill] sm:$0xff] %v9027_v28  ;;  %293 = vmatpush.msra.mxu2 %v9068_v45  ;;  %340 = vmatpush.msra.mxu3 %v9065_v44  ;;  %v9190_v28 = vsub.f32 %v69_v7, %v9152_v40  ;;  %v9204_v7 = vand.u32 4294901760, %v9171_v59 }
  0x25   :  { %12745 = vst [vmem:[#allocation32_spill] sm:$0xff] %v9037_v32  ;;  %207 = vmatpush.msra.mxu1 %v9120_v2  ;;  %146 = vmatpush.msra.mxu0 %v9070_v46 }
  0x26   :  { %12746 = vst [vmem:[#allocation33_spill] sm:$0xff] %v9041_v33  ;;  %v9173_v33 = vand.u32 4294901760, %v109_v34  ;;  %296 = vmatpush.msra.mxu2 %v9084_v51  ;;  %342 = vmatpush.msra.mxu3 %v9070_v46 }
  0x27   :  { %12747 = vst [vmem:[#allocation34_spill] sm:$0xff] %v9044_v36  ;;  %213 = vmatpush.msra.mxu1 %v9138_v30  ;;  %148 = vmatpush.msra.mxu0 %v9086_v52 }
  0x28   :  { %12748 = vst [vmem:[#allocation35_spill] sm:$0xff] %v9046_v37  ;;  %299 = vmatpush.msra.mxu2 %v9102_v58  ;;  %344 = vmatpush.msra.mxu3 %v9086_v52  ;;  %v9207_v19 = vsub.f32 %v109_v34, %v9173_v33 }
  0x29   :  { %12749 = vst [vmem:[#allocation36_spill] sm:$0xff] %v9052_v39  ;;  %219 = vmatpush.msra.mxu1 %v9165_v53  ;;  %150 = vmatpush.msra.mxu0 %v9090_v55 }
  0x2a   :  { %12750 = vst [vmem:[#allocation37_spill] sm:$0xff] %v9058_v41  ;;  %302 = vmatpush.msra.mxu2 %v9118_v1  ;;  %346 = vmatpush.msra.mxu3 %v9090_v55 }
  0x2b   :  { %12751 = vst [vmem:[#allocation38_spill] sm:$0xff] %v9062_v43  ;;  %225 = vmatpush.msra.mxu1 %v9184_v12  ;;  %152 = vmatpush.msra.mxu0 %v9106_v60 }
  0x2c   :  { %12752 = vst [vmem:[#allocation39_spill] sm:$0xff] %v9065_v44  ;;  %305 = vmatpush.msra.mxu2 %v9123_v6  ;;  %348 = vmatpush.msra.mxu3 %v9106_v60 }
  0x2d   :  { %12753 = vst [vmem:[#allocation40_spill] sm:$0xff] %v9068_v45  ;;  %v9176_v45 = vand.u32 4294901760, %v9141_v31  ;;  %231 = vmatpush.msra.mxu1 %v9198_v35  ;;  %154 = vmatpush.msra.mxu0 %v9134_v21 }
  0x2e   :  { %12754 = vst [vmem:[#allocation41_spill] sm:$0xff] %v9070_v46  ;;  %308 = vmatpush.msra.mxu2 %v9141_v31  ;;  %350 = vmatpush.msra.mxu3 %v9134_v21 }
  0x2f   :  { %12755 = vst [vmem:[#allocation42_spill] sm:$0xff] %v9073_v48  ;;  %v247_v34 = vsub.f32 %v9141_v31, %v9176_v45  ;;  %237 = vmatpush.msra.mxu1 %v9217_v18  ;;  %156 = vmatpush.msra.mxu0 %v9152_v40 }
  0x30   :  { %12756 = vst [vmem:[#allocation43_spill] sm:$0xff] %v9078_v49  ;;  %311 = vmatpush.msra.mxu2 %v9171_v59  ;;  %352 = vmatpush.msra.mxu3 %v9152_v40 }
  0x31   :  { %12757 = vst [vmem:[#allocation44_spill] sm:$0xff] %v9084_v51  ;;  %v241_v51 = vsub.f32 %v9123_v6, %v9157_v47  ;;  %363 = vmatpush.msrb.mxu0 %v9008_v22  ;;  %v91_v22 = vld [vmem:[#allocation5 + $0xb0] sm:$0xff] }
  0x32   :  { %12758 = vst [vmem:[#allocation45_spill] sm:$0xff] %v9086_v52  ;;  %314 = vmatpush.msra.mxu2 %v9190_v28 }
  0x33   :  { %12759 = vst [vmem:[#allocation46_spill] sm:$0xff] %v9090_v55  ;;  %v9230_v61 = vand.u32 4294901760, %v241_v51  ;;  %v9245_v51 = vsub.f32 %v106_v25, %v9214_v54  ;;  %v94_v25 = vld [vmem:[#allocation5 + $0xc8] sm:$0xff]  ;;  %367 = vmatpush.msrb.mxu0 %v9011_v23  ;;  %v88_v23 = vld [vmem:[#allocation5 + $0x98] sm:$0xff] }
  0x34   :  { %12760 = vst [vmem:[#allocation47_spill] sm:$0xff] %v9095_v56  ;;  %v9253_v56 = vand.u32 4294901760, %v100_v16  ;;  %467 = vmatpush.msrb.mxu2 %v9136_v29 }
  0x35   :  { %12761 = vst [vmem:[#allocation48_spill] sm:$0xff] %v9099_v57  ;;  %243 = vmatpush.msra.mxu1 %v9230_v61  ;;  %371 = vmatpush.msrb.mxu0 %v9014_v24  ;;  %v85_v24 = vld [vmem:[#allocation5 + $0x80] sm:$0xff] }
  0x36   :  { %12762 = vst [vmem:[#allocation49_spill] sm:$0xff] %v9102_v58  ;;  %v9212_v58 = vand.u32 4294901760, %v9181_v62  ;;  %469 = vmatpush.msrb.mxu2 %v9154_v42 }
  0x37   :  { %12763 = vst [vmem:[#allocation50_spill] sm:$0xff] %v9106_v60  ;;  %375 = vmatpush.msrb.mxu0 %v9021_v26  ;;  %v12251_v26 = vmov 0.0  }
  0x38   :  { %12764 = vst [vmem:[#allocation51_spill] sm:$0xff] %v9111_v63  ;;  %v9248_v63 = vand.u32 4294901760, %v247_v34  ;;  %471 = vmatpush.msrb.mxu2 %v9173_v33  ;;  %162 = vmatmul.f32.vlgmr.msra.gmra.mxu0 %v12251_v26 }
  0x39   :  { %12765 = vst [vmem:[#allocation52_spill] sm:$0xff] %v9115_v0  ;;  %379 = vmatpush.msrb.mxu0 %v9024_v27  ;;  %317 = vmatmul.f32.vlgmr.msra.gmra.mxu2 %v12251_v26  ;;  %v82_v27 = vld [vmem:[#allocation5 + $0x68] sm:$0xff] }
  0x3a   :  { %12766 = vst [vmem:[#allocation53_spill] sm:$0xff] %v9118_v1  ;;  %v510_v1 = vsub.f32 %v9162_v50, %v9195_v8  ;;  %249 = vmatpush.msra.mxu1 %v9248_v63  ;;  %473 = vmatpush.msrb.mxu2 %v9214_v54 }
  0x3b   :  { %12767 = vst [vmem:[#allocation54_spill] sm:$0xff] %v9120_v2  ;;  %v9236_v2 = vand.u32 4294901760, %v9207_v19  ;;  %383 = vmatpush.msrb.mxu0 %v9052_v39  ;;  %356 = vmatmul.f32.vlgmr.msra.gmra.mxu3 %v12251_v26 }
  0x3c   :  { %12768 = vst [vmem:[#allocation55_spill] sm:$0xff] %v9123_v6  ;;  %v516_v6 = vsub.f32 %v9181_v62, %v9212_v58 }
  0x3d   :  { %12769 = vst [vmem:[#allocation56_spill] sm:$0xff] %v9132_v13  ;;  %v522_v34 = vsub.f32 %v9207_v19, %v9236_v2  ;;  %387 = vmatpush.msrb.mxu0 %v9058_v41  ;;  %v76_v41 = vld [vmem:[#allocation5 + $0x38] sm:$0xff] }
  0x3e   :  { %12770 = vst [vmem:[#allocation57_spill] sm:$0xff] %v9134_v21 }
  0x3f   :  { %12771 = vst [vmem:[#allocation58_spill] sm:$0xff] %v9138_v30  ;;  %v9223_v30 = vand.u32 4294901760, %v9190_v28  ;;  %391 = vmatpush.msrb.mxu0 %v9073_v48 }
  0x40   :  { %12772 = vst [vmem:[#allocation59_spill] sm:$0xff] %v9141_v31  ;;  %v9257_v31 = vand.u32 4294901760, %v510_v1  ;;  %v9272_v1 = vand.u32 4294901760, %v516_v6  ;;  %v9288_v6 = vand.u32 4294901760, %v91_v22 }
  0x41   :  { %12773 = vst [vmem:[#allocation60_spill] sm:$0xff] %v9150_v38  ;;  %v259_v14 = vsub.f32 %v9190_v28, %v9223_v30  ;;  %395 = vmatpush.msrb.mxu0 %v9099_v57  ;;  %v70_v57 = vld [vmem:[#allocation5 + $0x8] sm:$0xff] }
  0x42   :  { %12774 = vst [vmem:[#allocation61_spill] sm:$0xff] %v9152_v40  ;;  %512 = vmatpush.msrb.mxu3 %v9257_v31 }
  0x43   :  { %12775 = vst [vmem:[#allocation62_spill] sm:$0xff] %v9154_v42  ;;  %399 = vmatpush.msrb.mxu0 %v9115_v0 }
  0x44   :  { %12776 = vst [vmem:[#allocation63_spill] sm:$0xff] %v9157_v47  ;;  %518 = vmatpush.msrb.mxu3 %v9272_v1 }
  0x45   :  { %12777 = vst [vmem:[#allocation64_spill] sm:$0xff] %v9162_v50  ;;  %403 = vmatpush.msrb.mxu0 %v9132_v13 }
  0x46   :  { %12778 = vst [vmem:[#allocation65_spill] sm:$0xff] %v9165_v53  ;;  %v103_v53 = vld [vmem:[#allocation5 + $0x110] sm:$0xff] }
  0x47   :  { %12779 = vst [vmem:[#allocation66_spill] sm:$0xff] %v9171_v59  ;;  %v9238_v15 = vand.u32 4294901760, %v103_v53  ;;  %407 = vmatpush.msrb.mxu0 %v9150_v38 }
  0x48   :  { %12780 = vst [vmem:[#allocation67_spill] sm:$0xff] %v9173_v33 }
  0x49   :  { %12781 = vst [vmem:[#allocation68_spill] sm:$0xff] %v9176_v45  ;;  %475 = vmatpush.msrb.mxu2 %v9238_v15  ;;  %411 = vmatpush.msrb.mxu0 %v9157_v47 }
  0x4a   :  { %12782 = vst [vmem:[#allocation69_spill] sm:$0xff] %v9181_v62 }
  0x4b   :  { %12783 = vst [vmem:[#allocation70_spill] sm:$0xff] %v9184_v12  ;;  %v253_v12 = vsub.f32 %v9171_v59, %v9204_v7  ;;  %v9278_v59 = vand.u32 4294901760, %v259_v14  ;;  %v9292_v14 = vand.u32 4294901760, %v522_v34  ;;  %477 = vmatpush.msrb.mxu2 %v9253_v56  ;;  %415 = vmatpush.msrb.mxu0 %v9176_v45 }
  0x4c   :  { %12784 = vst [vmem:[#allocation71_spill] sm:$0xff] %v9190_v28 }
  0x4d   :  { %12785 = vst [vmem:[#allocation72_spill] sm:$0xff] %v9195_v8  ;;  %v9260_v49 = vand.u32 4294901760, %v253_v12  ;;  %v9275_v12 = vand.u32 4294901760, %v9245_v51  ;;  %524 = vmatpush.msrb.mxu3 %v9292_v14  ;;  %419 = vmatpush.msrb.mxu0 %v9204_v7 }
  0x4e   :  { %12786 = vst [vmem:[#allocation73_spill] sm:$0xff] %v9198_v35  ;;  %v97_v35 = vld [vmem:[#allocation5 + $0xe0] sm:$0xff] }
  0x4f   :  { %12787 = vst [vmem:[#allocation74_spill] sm:$0xff] %v9204_v7  ;;  %v9268_v43 = vand.u32 4294901760, %v97_v35  ;;  %255 = vmatpush.msra.mxu1 %v9260_v49  ;;  %423 = vmatpush.msrb.mxu0 %v9223_v30 }
  0x50   :  { %12788 = vst [vmem:[#allocation75_spill] sm:$0xff] %v9207_v19 }
  0x51   :  { %12789 = vst [vmem:[#allocation76_spill] sm:$0xff] %v9212_v58  ;;  %261 = vmatpush.msra.mxu1 %v9278_v59  ;;  %479 = vmatpush.msrb.mxu2 %v9268_v43 }
  0x52   :  { %12790 = vst [vmem:[#allocation77_spill] sm:$0xff] %v9214_v54  ;;  %263 = vmatmul.f32.vlgmr.msra.gmra.mxu1 %v12251_v26  ;;  %610 = vmatpush.msra.mxu0 %v9162_v50 }
  0x53   :  { %12791 = vst [vmem:[#allocation78_spill] sm:$0xff] %v9217_v18  ;;  %v9266_v18 = vsub.f32 %v103_v53, %v9238_v15  ;;  %v9282_v53 = vsub.f32 %v100_v16, %v9253_v56  ;;  %v9298_v16 = vsub.f32 %v97_v35, %v9268_v43  ;;  %v9312_v35 = vand.u32 4294901760, %v88_v23  ;;  %430 = vmatpush.msrb.mxu1 %v8973_v3 }
  0x54   :  { %12792 = vst [vmem:[#allocation79_spill] sm:$0xff] %v9223_v30  ;;  %613 = vmatpush.msra.mxu0 %v9181_v62 }
  0x55   :  { %12793 = vst [vmem:[#allocation80_spill] sm:$0xff] %v9230_v61  ;;  %v9284_v61 = vand.u32 4294901760, %v94_v25  ;;  %v9295_v28 = vand.u32 4294901760, %v9266_v18  ;;  %v9307_v34 = vand.u32 4294901760, %v9282_v53  ;;  %432 = vmatpush.msrb.mxu1 %v8975_v4  ;;  %v9340_v37 = vsub.f32 %v88_v23, %v9312_v35  ;;  %v79_v4 = vld [vmem:[#allocation5 + $0x50] sm:$0xff] }
  0x56   :  { %12794 = vst [vmem:[#allocation81_spill] sm:$0xff] %v9236_v2  ;;  %616 = vmatpush.msra.mxu0 %v9207_v19 }
  0x57   :  { %12795 = vst [vmem:[#allocation82_spill] sm:$0xff] %v9238_v15  ;;  %434 = vmatpush.msrb.mxu1 %v8977_v5  ;;  %481 = vmatpush.msrb.mxu2 %v9284_v61 }
  0x58   :  { %12796 = vst [vmem:[#allocation83_spill] sm:$0xff] %v9245_v51  ;;  %619 = vmatpush.msra.mxu0 %v9245_v51 }
  0x59   :  { %12797 = vst [vmem:[#allocation84_spill] sm:$0xff] %v9248_v63  ;;  %v9326_v63 = vand.u32 4294901760, %v85_v24  ;;  %436 = vmatpush.msrb.mxu1 %v8979_v9  ;;  %v9385_v9 = vand.u32 4294901760, %v76_v41  ;;  %483 = vmatpush.msrb.mxu2 %v9288_v6 }
  0x5a   :  { %12798 = vst [vmem:[#allocation85_spill] sm:$0xff] %v9253_v56  ;;  %622 = vmatpush.msra.mxu0 %v9266_v18 }
  0x5b   :  { %12799 = vst [vmem:[#allocation86_spill] sm:$0xff] %v9257_v31  ;;  %v528_v31 = vsub.f32 %v9245_v51, %v9275_v12  ;;  %v9356_v23 = vsub.f32 %v85_v24, %v9326_v63  ;;  %438 = vmatpush.msrb.mxu1 %v8981_v10  ;;  %485 = vmatpush.msrb.mxu2 %v9312_v35 }
  0x5c   :  { %12800 = vst [vmem:[#allocation87_spill] sm:$0xff] %v9260_v49  ;;  %v9310_v49 = vsub.f32 %v94_v25, %v9284_v61  ;;  %v9324_v25 = vand.u32 4294901760, %v9298_v16  ;;  %625 = vmatpush.msra.mxu0 %v9282_v53 }
  0x5d   :  { %12801 = vst [vmem:[#allocation88_spill] sm:$0xff] %v9266_v18  ;;  %v9380_v26 = vand.u32 4294901760, %v9356_v23  ;;  %440 = vmatpush.msrb.mxu1 %v8983_v11  ;;  %v9414_v11 = vand.u32 4294901760, %v70_v57  ;;  %487 = vmatpush.msrb.mxu2 %v9326_v63 }
  0x5e   :  { %12802 = vst [vmem:[#allocation89_spill] sm:$0xff] %v9268_v43  ;;  %v9337_v3 = vand.u32 4294901760, %v9310_v49  ;;  %v546_v36 = vsub.f32 %v9298_v16, %v9324_v25  ;;  %628 = vmatpush.msra.mxu0 %v9298_v16 }
  0x5f   :  { %12803 = vst [vmem:[#allocation90_spill] sm:$0xff] %v9272_v1  ;;  %v9317_v1 = vsub.f32 %v91_v22, %v9288_v6  ;;  %v9332_v22 = vand.u32 4294901760, %v528_v31  ;;  %442 = vmatpush.msrb.mxu1 %v8995_v17  ;;  %v9440_v38 = vsub.f32 %v70_v57, %v9414_v11 }
  0x60   :  { %12804 = vst [vmem:[#allocation91_spill] sm:$0xff] %v9275_v12  ;;  %631 = vmatpush.msra.mxu0 %v9310_v49 }
  0x61   :  { %12805 = vst [vmem:[#allocation92_spill] sm:$0xff] %v9278_v59  ;;  %v534_v59 = vsub.f32 %v9266_v18, %v9295_v28  ;;  %v9345_v39 = vand.u32 4294901760, %v9317_v1  ;;  %530 = vmatpush.msrb.mxu3 %v9332_v22  ;;  %444 = vmatpush.msrb.mxu1 %v9004_v20 }
  0x62   :  { %12806 = vst [vmem:[#allocation93_spill] sm:$0xff] %v9282_v53  ;;  %634 = vmatpush.msra.mxu0 %v9317_v1 }
  0x63   :  { %12807 = vst [vmem:[#allocation94_spill] sm:$0xff] %v9284_v61  ;;  %v9349_v31 = vand.u32 4294901760, %v534_v59  ;;  %v552_v59 = vsub.f32 %v9310_v49, %v9337_v3  ;;  %v558_v24 = vsub.f32 %v9317_v1, %v9345_v39  ;;  %446 = vmatpush.msrb.mxu1 %v9037_v32 }
  0x64   :  { %12808 = vst [vmem:[#allocation95_spill] sm:$0xff] %v9288_v6  ;;  %637 = vmatpush.msra.mxu0 %v9340_v37 }
  0x65   :  { %12809 = vst [vmem:[#allocation96_spill] sm:$0xff] %v9292_v14  ;;  %v540_v14 = vsub.f32 %v9282_v53, %v9307_v34  ;;  %536 = vmatpush.msrb.mxu3 %v9349_v31  ;;  %v9402_v0 = vand.u32 4294901760, %v558_v24  ;;  %448 = vmatpush.msrb.mxu1 %v9065_v44 }
  0x66   :  { %12810 = vst [vmem:[#allocation97_spill] sm:$0xff] %v9295_v28  ;;  %v9369_v28 = vand.u32 4294901760, %v79_v4  ;;  %640 = vmatpush.msra.mxu0 %v9356_v23 }
  0x67   :  { %12811 = vst [vmem:[#allocation98_spill] sm:$0xff] %v9298_v16  ;;  %v9362_v5 = vand.u32 4294901760, %v540_v14  ;;  %v9377_v14 = vand.u32 4294901760, %v546_v36  ;;  %450 = vmatpush.msrb.mxu1 %v9070_v46  ;;  %v113_v16 = vld [vmem:[#allocation5 + $0x160] sm:$0xff] }
  0x68   :  { %12812 = vst [vmem:[#allocation99_spill] sm:$0xff] %v9307_v34  ;;  %v9353_v34 = vand.u32 4294901760, %v82_v27  ;;  %v9396_v10 = vsub.f32 %v79_v4, %v9369_v28  ;;  %v9412_v4 = vsub.f32 %v76_v41, %v9385_v9  ;;  %v9524_v51 = vand.u32 4294901760, %v113_v16 }
  0x69   :  { %12813 = vst [vmem:[#allocation100_spill] sm:$0xff] %v9310_v49  ;;  %542 = vmatpush.msrb.mxu3 %v9362_v5  ;;  %452 = vmatpush.msrb.mxu1 %v9086_v52 }
  0x6a   :  { %12814 = vst [vmem:[#allocation101_spill] sm:$0xff] %v9312_v35  ;;  %v9383_v48 = vsub.f32 %v82_v27, %v9353_v34  ;;  %489 = vmatpush.msrb.mxu2 %v9353_v34 }
  0x6b   :  { %12815 = vst [vmem:[#allocation102_spill] sm:$0xff] %v9317_v1  ;;  %548 = vmatpush.msrb.mxu3 %v9377_v14  ;;  %454 = vmatpush.msrb.mxu1 %v9090_v55  ;;  %v110_v1 = vld [vmem:[#allocation5 + $0x148] sm:$0xff] }
  0x6c   :  { %12816 = vst [vmem:[#allocation103_spill] sm:$0xff] %v9324_v25  ;;  %v9367_v25 = vand.u32 4294901760, %v9340_v37  ;;  %491 = vmatpush.msrb.mxu2 %v9369_v28  ;;  %643 = vmatpush.msra.mxu0 %v9383_v48 }
  0x6d   :  { %12817 = vst [vmem:[#allocation104_spill] sm:$0xff] %v9326_v63  ;;  %456 = vmatpush.msrb.mxu1 %v9106_v60 }
  0x6e   :  { %12818 = vst [vmem:[#allocation105_spill] sm:$0xff] %v9332_v22  ;;  %v73_v22 = vld [vmem:[#allocation5 + $0x20] sm:$0xff]  ;;  %v564_v36 = vsub.f32 %v9340_v37, %v9367_v25  ;;  %493 = vmatpush.msrb.mxu2 %v9385_v9  ;;  %646 = vmatpush.msra.mxu0 %v9396_v10 }
  0x6f   :  { %12819 = vst [vmem:[#allocation106_spill] sm:$0xff] %v9337_v3  ;;  %v9398_v27 = vand.u32 4294901760, %v73_v22  ;;  %458 = vmatpush.msrb.mxu1 %v9134_v21  ;;  %v12854_v53 = vld [vmem:[#allocation99_spill] sm:$0xff] }
  0x70   :  { %12820 = vst [vmem:[#allocation107_spill] sm:$0xff] %v9340_v37  ;;  %v9420_v24 = vand.u32 4294901760, %v564_v36  ;;  %v107_v37 = vld [vmem:[#allocation5 + $0x130] sm:$0xff]  ;;  %649 = vmatpush.msra.mxu0 %v9412_v4 }
  0x71   :  { %12821 = vst [vmem:[#allocation108_spill] sm:$0xff] %v9345_v39  ;;  %v9426_v13 = vsub.f32 %v73_v22, %v9398_v27  ;;  %495 = vmatpush.msrb.mxu2 %v9398_v27  ;;  %460 = vmatpush.msrb.mxu1 %v9152_v40 }
  0x72   :  { %12822 = vst [vmem:[#allocation109_spill] sm:$0xff] %v9349_v31  ;;  %v9391_v31 = vand.u32 4294901760, %v552_v59  ;;  %v570_v59 = vsub.f32 %v9356_v23, %v9380_v26 }
  0x73   :  { %12823 = vst [vmem:[#allocation110_spill] sm:$0xff] %v9353_v34  ;;  %497 = vmatpush.msrb.mxu2 %v9414_v11  ;;  %663 = vmatpush.msra.mxu1 %v9136_v29  ;;  %v12856_v18 = vld [vmem:[#allocation103_spill] sm:$0xff] }
  0x74   :  { %12824 = vst [vmem:[#allocation111_spill] sm:$0xff] %v9356_v23  ;;  %554 = vmatpush.msrb.mxu3 %v9391_v31  ;;  %v9432_v41 = vand.u32 4294901760, %v570_v59  ;;  %v9449_v59 = vand.u32 4294901760, %v9426_v13  ;;  %v9533_v23 = vand.u32 4294901760, %v110_v1  ;;  %652 = vmatpush.msra.mxu0 %v9426_v13 }
  0x75   :  { %12825 = vst [vmem:[#allocation112_spill] sm:$0xff] %v9362_v5  ;;  %v9409_v5 = vand.u32 4294901760, %v9383_v48  ;;  %704 = vmatpush.msra.mxu2 %v9195_v8  ;;  %665 = vmatpush.msra.mxu1 %v9154_v42 }
  0x76   :  { %12826 = vst [vmem:[#allocation113_spill] sm:$0xff] %v9367_v25  ;;  %560 = vmatpush.msrb.mxu3 %v9402_v0  ;;  %655 = vmatpush.msra.mxu0 %v9440_v38 }
  0x77   :  { %12827 = vst [vmem:[#allocation114_spill] sm:$0xff] %v9369_v28  ;;  %v576_v36 = vsub.f32 %v9383_v48, %v9409_v5  ;;  %708 = vmatpush.msra.mxu2 %v9212_v58  ;;  %667 = vmatpush.msra.mxu1 %v9173_v33  ;;  %v89_v58 = vld [vmem:[#allocation5 + $0xa0] sm:$0xff] }
  0x78   :  { %12828 = vst [vmem:[#allocation115_spill] sm:$0xff] %v9377_v14  ;;  %v9423_v14 = vand.u32 4294901760, %v9396_v10  ;;  %566 = vmatpush.msrb.mxu3 %v9420_v24 }
  0x79   :  { %12829 = vst [vmem:[#allocation116_spill] sm:$0xff] %v9380_v26  ;;  %v9455_v57 = vand.u32 4294901760, %v576_v36  ;;  %v594_v36 = vsub.f32 %v9426_v13, %v9449_v59  ;;  %712 = vmatpush.msra.mxu2 %v9236_v2  ;;  %669 = vmatpush.msra.mxu1 %v9214_v54 }
  0x7a   :  { %12830 = vst [vmem:[#allocation117_spill] sm:$0xff] %v9383_v48  ;;  %v582_v22 = vsub.f32 %v9396_v10, %v9423_v14  ;;  %572 = vmatpush.msrb.mxu3 %v9432_v41  ;;  %v9540_v48 = vsub.f32 %v113_v16, %v9524_v51  ;;  %v98_v16 = vld [vmem:[#allocation5 + $0xe8] sm:$0xff] }
  0x7b   :  { %12831 = vst [vmem:[#allocation118_spill] sm:$0xff] %v9385_v9  ;;  %716 = vmatpush.msra.mxu2 %v9275_v12  ;;  %671 = vmatpush.msra.mxu1 %v9238_v15  ;;  %v9570_v62 = vand.u32 4294901760, %v98_v16  ;;  %v92_v12 = vld [vmem:[#allocation5 + $0xb8] sm:$0xff] }
  0x7c   :  { %12832 = vst [vmem:[#allocation119_spill] sm:$0xff] %v9391_v31  ;;  %v9437_v31 = vand.u32 4294901760, %v9412_v4  ;;  %v9466_v7 = vand.u32 4294901760, %v582_v22  ;;  %578 = vmatpush.msrb.mxu3 %v9455_v57  ;;  %v9482_v22 = vand.u32 4294901760, %v594_v36  ;;  %v12853_v36 = vld [vmem:[#allocation97_spill] sm:$0xff] }
  0x7d   :  { %12833 = vst [vmem:[#allocation120_spill] sm:$0xff] %v9396_v10  ;;  %720 = vmatpush.msra.mxu2 %v12853_v36  ;;  %673 = vmatpush.msra.mxu1 %v9253_v56  ;;  %v9552_v10 = vsub.f32 %v110_v1, %v9533_v23  ;;  %v95_v1 = vld [vmem:[#allocation5 + $0xd0] sm:$0xff] }
  0x7e   :  { %12834 = vst [vmem:[#allocation121_spill] sm:$0xff] %v9398_v27  ;;  %v588_v45 = vsub.f32 %v9412_v4, %v9437_v31  ;;  %584 = vmatpush.msrb.mxu3 %v9466_v7 }
  0x7f   :  { %12835 = vst [vmem:[#allocation122_spill] sm:$0xff] %v9402_v0  ;;  %v12848_v0 = vmov 0.0   ;;  %724 = vmatpush.msra.mxu2 %v12854_v53  ;;  %675 = vmatpush.msra.mxu1 %v9268_v43 }
  0x80   :  { %12836 = vst [vmem:[#allocation123_spill] sm:$0xff] %v9409_v5  ;;  %425 = vmatmul.f32.vlgmr.msrb.gmra.mxu0 %v12848_v0  ;;  %462 = vmatmul.f32.vlgmr.msrb.gmra.mxu1 %v12848_v0 }
  0x81   :  { %12837 = vst [vmem:[#allocation124_spill] sm:$0xff] %v9412_v4  ;;  %728 = vmatpush.msra.mxu2 %v12856_v18  ;;  %677 = vmatpush.msra.mxu1 %v9284_v61  ;;  %v104_v18 = vld [vmem:[#allocation5 + $0x118] sm:$0xff]  ;;  %v9559_v4 = vand.u32 4294901760, %v9540_v48 }
  0x82   :  { %12838 = vst [vmem:[#allocation125_spill] sm:$0xff] %v9414_v11  ;;  %503 = vmatmul.f32.vlgmr.msrb.gmra.mxu2 %v12848_v0 }
  0x83   :  { %12839 = vst [vmem:[#allocation126_spill] sm:$0xff] %v9420_v24  ;;  %v9460_v24 = vand.u32 4294901760, %v9440_v38  ;;  %732 = vmatpush.msra.mxu2 %v9337_v3  ;;  %679 = vmatpush.msra.mxu1 %v9288_v6  ;;  %v9542_v3 = vand.u32 4294901760, %v107_v37  ;;  %v857_v50 = vsub.f32 %v9540_v48, %v9559_v4 }
  0x84   :  { %12840 = vst [vmem:[#allocation127_spill] sm:$0xff] %v9423_v14 }
  0x85   :  { %12841 = vst [vmem:[#allocation128_spill] sm:$0xff] %v9426_v13  ;;  %v600_v30 = vsub.f32 %v9440_v38, %v9460_v24  ;;  %736 = vmatpush.msra.mxu2 %v9345_v39  ;;  %681 = vmatpush.msra.mxu1 %v9312_v35  ;;  %v9554_v39 = vand.u32 4294901760, %v104_v18 }
  0x86   :  { %12842 = vst [vmem:[#allocation129_spill] sm:$0xff] %v9432_v41  ;;  %v9474_v41 = vand.u32 4294901760, %v588_v45 }
  0x87   :  { %12843 = vst [vmem:[#allocation130_spill] sm:$0xff] %v9437_v31  ;;  %v9488_v45 = vand.u32 4294901760, %v600_v30  ;;  %v116_v30 = vld [vmem:[#allocation5 + $0x178] sm:$0xff]  ;;  %740 = vmatpush.msra.mxu2 %v9367_v25  ;;  %683 = vmatpush.msra.mxu1 %v9326_v63  ;;  %v9564_v25 = vsub.f32 %v107_v37, %v9542_v3  ;;  %v9580_v37 = vsub.f32 %v104_v18, %v9554_v39 }
  0x88   :  { %12844 = vst [vmem:[#allocation131_spill] sm:$0xff] %v9440_v38  ;;  %590 = vmatpush.msrb.mxu3 %v9474_v41  ;;  %v9518_v49 = vand.u32 4294901760, %v116_v30  ;;  %v9584_v38 = vand.u32 4294901760, %v95_v1  ;;  %658 = vmatmul.f32.vlgmr.msra.gmra.mxu0 %v12848_v0 }
  0x89   :  { %12845 = vst [vmem:[#allocation132_spill] sm:$0xff] %v9449_v59  ;;  %744 = vmatpush.msra.mxu2 %v9380_v26  ;;  %685 = vmatpush.msra.mxu1 %v9353_v34  ;;  %v9576_v26 = vand.u32 4294901760, %v9552_v10  ;;  %v9591_v2 = vand.u32 4294901760, %v9564_v25 }
  0x8a   :  { %12846 = vst [vmem:[#allocation133_spill] sm:$0xff] %v9455_v57  ;;  %596 = vmatpush.msrb.mxu3 %v9482_v22  ;;  %v9531_v53 = vsub.f32 %v116_v30, %v9518_v49  ;;  %v101_v30 = vld [vmem:[#allocation5 + $0x100] sm:$0xff]  ;;  %808 = vmatpush.msrb.mxu0 %v9518_v49  ;;  %v9626_v57 = vand.u32 4294901760, %v89_v58 }
  0x8b   :  { %12847 = vst [vmem:[#allocation134_spill] sm:$0xff] %v9460_v24  ;;  %v9566_v36 = vand.u32 4294901760, %v101_v30  ;;  %748 = vmatpush.msra.mxu2 %v9409_v5  ;;  %687 = vmatpush.msra.mxu1 %v9369_v28  ;;  %v9599_v5 = vsub.f32 %v98_v16, %v9570_v62  ;;  %v9615_v16 = vsub.f32 %v95_v1, %v9584_v38 }
  0x8c   :  { %12849 = vst [vmem:[#allocation135_spill] sm:$0xff] %v9466_v7  ;;  %602 = vmatpush.msrb.mxu3 %v9488_v45  ;;  %v9547_v19 = vand.u32 4294901760, %v9531_v53  ;;  %810 = vmatpush.msrb.mxu0 %v9524_v51 }
  0x8d   :  { %12850 = vst [vmem:[#allocation136_spill] sm:$0xff] %v9474_v41  ;;  %v9594_v18 = vsub.f32 %v101_v30, %v9566_v36  ;;  %689 = vmatpush.msra.mxu1 %v9385_v9  ;;  %752 = vmatpush.msra.mxu2 %v9423_v14  ;;  %v9608_v30 = vand.u32 4294901760, %v9580_v37  ;;  %v9617_v14 = vand.u32 4294901760, %v857_v50  ;;  %v869_v41 = vsub.f32 %v9564_v25, %v9591_v2  ;;  %v83_v50 = vld [vmem:[#allocation5 + $0x70] sm:$0xff] }
  0x8e   :  { %12851 = vst [vmem:[#allocation137_spill] sm:$0xff] %v9482_v22  ;;  %771 = vmatpush.msra.mxu3 %v9136_v29  ;;  %v851_v13 = vsub.f32 %v9531_v53, %v9547_v19  ;;  %812 = vmatpush.msrb.mxu0 %v9533_v23  ;;  %v9610_v22 = vand.u32 4294901760, %v92_v12  ;;  %v9631_v1 = vand.u32 4294901760, %v9599_v5 }
  0x8f   :  { %12852 = vst [vmem:[#allocation138_spill] sm:$0xff] %v9488_v45  ;;  %v863_v45 = vsub.f32 %v9552_v10, %v9576_v26  ;;  %691 = vmatpush.msra.mxu1 %v9398_v27  ;;  %604 = vmatmul.f32.vlgmr.msrb.gmra.mxu3 %v12848_v0  ;;  %v9624_v7 = vand.u32 4294901760, %v9594_v18 }
  0x90   :  { %773 = vmatpush.msra.mxu3 %v9154_v42  ;;  %12855 = vst [vmem:[#allocation139_spill] sm:$0xff] %v9518_v49  ;;  %v9601_v8 = vand.u32 4294901760, %v851_v13  ;;  %v86_v13 = vld [vmem:[#allocation5 + $0x88] sm:$0xff]  ;;  %814 = vmatpush.msrb.mxu0 %v9542_v3 }
  0x91   :  { %12857 = vst [vmem:[#allocation140_spill] sm:$0xff] %v9524_v51  ;;  %756 = vmatpush.msra.mxu2 %v9437_v31  ;;  %693 = vmatpush.msra.mxu1 %v9414_v11  ;;  %v9634_v47 = vand.u32 4294901760, %v863_v45  ;;  %v875_v31 = vsub.f32 %v9580_v37, %v9608_v30  ;;  %v9650_v45 = vand.u32 4294901760, %v869_v41 }
  0x92   :  { %775 = vmatpush.msra.mxu3 %v9173_v33  ;;  %12858 = vst [vmem:[#allocation141_spill] sm:$0xff] %v9531_v53  ;;  %816 = vmatpush.msrb.mxu0 %v9554_v39 }
  0x93   :  { %12859 = vst [vmem:[#allocation142_spill] sm:$0xff] %v9533_v23  ;;  %853 = vmatpush.msrb.mxu1 %v9601_v8  ;;  %760 = vmatpush.msra.mxu2 %v9449_v59  ;;  %v887_v59 = vsub.f32 %v9599_v5, %v9631_v1  ;;  %v9665_v41 = vand.u32 4294901760, %v875_v31 }
  0x94   :  { %777 = vmatpush.msra.mxu3 %v9214_v54  ;;  %12860 = vst [vmem:[#allocation143_spill] sm:$0xff] %v9540_v48  ;;  %818 = vmatpush.msrb.mxu0 %v9566_v36 }
  0x95   :  { %12861 = vst [vmem:[#allocation144_spill] sm:$0xff] %v9542_v3  ;;  %859 = vmatpush.msrb.mxu1 %v9617_v14  ;;  %764 = vmatpush.msra.mxu2 %v9460_v24 }
  0x96   :  { %779 = vmatpush.msra.mxu3 %v9238_v15  ;;  %12862 = vst [vmem:[#allocation145_spill] sm:$0xff] %v9547_v19  ;;  %820 = vmatpush.msrb.mxu0 %v9570_v62 }
  0x97   :  { %12863 = vst [vmem:[#allocation146_spill] sm:$0xff] %v9552_v10  ;;  %865 = vmatpush.msrb.mxu1 %v9634_v47  ;;  %766 = vmatmul.f32.vlgmr.msra.gmra.mxu2 %v12848_v0 }
  0x98   :  { %781 = vmatpush.msra.mxu3 %v9253_v56  ;;  %12864 = vst [vmem:[#allocation147_spill] sm:$0xff] %v9554_v39  ;;  %822 = vmatpush.msrb.mxu0 %v9584_v38  ;;  %v9692_v56 = vand.u32 4294901760, %v887_v59 }
  0x99   :  { %12865 = vst [vmem:[#allocation148_spill] sm:$0xff] %v9559_v4  ;;  %871 = vmatpush.msrb.mxu1 %v9650_v45  ;;  %951 = vmatpush.msrb.mxu2 %v9531_v53 }
  0x9a   :  { %783 = vmatpush.msra.mxu3 %v9268_v43  ;;  %12866 = vst [vmem:[#allocation149_spill] sm:$0xff] %v9564_v25  ;;  %824 = vmatpush.msrb.mxu0 %v9610_v22 }
  0x9b   :  { %12867 = vst [vmem:[#allocation150_spill] sm:$0xff] %v9566_v36  ;;  %877 = vmatpush.msrb.mxu1 %v9665_v41  ;;  %954 = vmatpush.msrb.mxu2 %v9540_v48 }
  0x9c   :  { %785 = vmatpush.msra.mxu3 %v9284_v61  ;;  %12868 = vst [vmem:[#allocation151_spill] sm:$0xff] %v9570_v62  ;;  %697 = vmatmul.f32.vlgmr.msra.gmra.mxu1 %v12848_v0 }
  0x9d   :  { %12869 = vst [vmem:[#allocation152_spill] sm:$0xff] %v9576_v26  ;;  %826 = vmatpush.msrb.mxu0 %v9626_v57  ;;  %957 = vmatpush.msrb.mxu2 %v9552_v10 }
  0x9e   :  { %787 = vmatpush.msra.mxu3 %v9288_v6  ;;  %12870 = vst [vmem:[#allocation153_spill] sm:$0xff] %v9580_v37  ;;  %v9658_v6 = vand.u32 4294901760, %v83_v50 }
  0x9f   :  { %12871 = vst [vmem:[#allocation154_spill] sm:$0xff] %v9584_v38  ;;  %960 = vmatpush.msrb.mxu2 %v9564_v25 }
  0xa0   :  { %789 = vmatpush.msra.mxu3 %v9312_v35  ;;  %12872 = vst [vmem:[#allocation155_spill] sm:$0xff] %v9591_v2  ;;  %v9656_v35 = vsub.f32 %v89_v58, %v9626_v57 }
  0xa1   :  { %12873 = vst [vmem:[#allocation156_spill] sm:$0xff] %v9594_v18  ;;  %963 = vmatpush.msrb.mxu2 %v9580_v37 }
  0xa2   :  { %791 = vmatpush.msra.mxu3 %v9326_v63  ;;  %12874 = vst [vmem:[#allocation157_spill] sm:$0xff] %v9599_v5  ;;  %v9642_v63 = vand.u32 4294901760, %v86_v13 }
  0xa3   :  { %12875 = vst [vmem:[#allocation158_spill] sm:$0xff] %v9601_v8  ;;  %v80_v8 = vld [vmem:[#allocation5 + $0x58] sm:$0xff]  ;;  %966 = vmatpush.msrb.mxu2 %v9594_v18 }
  0xa4   :  { %793 = vmatpush.msra.mxu3 %v9353_v34  ;;  %12876 = vst [vmem:[#allocation159_spill] sm:$0xff] %v9608_v30  ;;  %v9640_v34 = vsub.f32 %v92_v12, %v9610_v22  ;;  %v881_v12 = vsub.f32 %v9594_v18, %v9624_v7  ;;  %v9672_v58 = vsub.f32 %v86_v13, %v9642_v63  ;;  %v9674_v61 = vand.u32 4294901760, %v80_v8 }
  0xa5   :  { %12877 = vst [vmem:[#allocation160_spill] sm:$0xff] %v9610_v22  ;;  %v9688_v13 = vsub.f32 %v83_v50, %v9658_v6  ;;  %828 = vmatpush.msrb.mxu0 %v9642_v63  ;;  %969 = vmatpush.msrb.mxu2 %v9599_v5 }
  0xa6   :  { %12878 = vst [vmem:[#allocation161_spill] sm:$0xff] %v9615_v16  ;;  %795 = vmatpush.msra.mxu3 %v9369_v28  ;;  %v9647_v28 = vand.u32 4294901760, %v9615_v16  ;;  %v9681_v31 = vand.u32 4294901760, %v881_v12  ;;  %v9704_v50 = vsub.f32 %v80_v8, %v9674_v61 }
  0xa7   :  { %12879 = vst [vmem:[#allocation162_spill] sm:$0xff] %v9617_v14  ;;  %v77_v14 = vld [vmem:[#allocation5 + $0x40] sm:$0xff]  ;;  %v9717_v54 = vand.u32 4294901760, %v9688_v13  ;;  %830 = vmatpush.msrb.mxu0 %v9658_v6  ;;  %972 = vmatpush.msrb.mxu2 %v9615_v16 }
  0xa8   :  { %12880 = vst [vmem:[#allocation163_spill] sm:$0xff] %v9624_v7  ;;  %797 = vmatpush.msra.mxu3 %v9385_v9  ;;  %v9669_v9 = vand.u32 4294901760, %v9640_v34  ;;  %v893_v24 = vsub.f32 %v9615_v16, %v9647_v28  ;;  %v9690_v43 = vand.u32 4294901760, %v77_v14  ;;  %883 = vmatpush.msrb.mxu1 %v9681_v31  ;;  %v9733_v53 = vand.u32 4294901760, %v9704_v50 }
  0xa9   :  { %12881 = vst [vmem:[#allocation164_spill] sm:$0xff] %v9626_v57  ;;  %832 = vmatpush.msrb.mxu0 %v9674_v61  ;;  %975 = vmatpush.msrb.mxu2 %v9640_v34 }
  0xaa   :  { %12882 = vst [vmem:[#allocation165_spill] sm:$0xff] %v9631_v1  ;;  %799 = vmatpush.msra.mxu3 %v9398_v27  ;;  %v9685_v27 = vand.u32 4294901760, %v9656_v35  ;;  %v899_v12 = vsub.f32 %v9640_v34, %v9669_v9  ;;  %v9708_v15 = vand.u32 4294901760, %v893_v24  ;;  %v9720_v8 = vsub.f32 %v77_v14, %v9690_v43  ;;  %889 = vmatpush.msrb.mxu1 %v9692_v56 }
  0xab   :  { %12883 = vst [vmem:[#allocation166_spill] sm:$0xff] %v9634_v47  ;;  %v74_v47 = vld [vmem:[#allocation5 + $0x28] sm:$0xff]  ;;  %834 = vmatpush.msrb.mxu0 %v9690_v43  ;;  %978 = vmatpush.msrb.mxu2 %v9656_v35 }
  0xac   :  { %12884 = vst [vmem:[#allocation167_spill] sm:$0xff] %v9640_v34  ;;  %801 = vmatpush.msra.mxu3 %v9414_v11  ;;  %v71_v11 = vld [vmem:[#allocation5 + $0x10] sm:$0xff]  ;;  %v9706_v59 = vand.u32 4294901760, %v74_v47  ;;  %v9727_v24 = vand.u32 4294901760, %v899_v12  ;;  %895 = vmatpush.msrb.mxu1 %v9708_v15  ;;  %v917_v12 = vsub.f32 %v9688_v13, %v9717_v54  ;;  %v9747_v48 = vand.u32 4294901760, %v9720_v8 }
  0xad   :  { %12885 = vst [vmem:[#allocation168_spill] sm:$0xff] %v9642_v63  ;;  %803 = vmatmul.f32.vlgmr.msra.gmra.mxu3 %v12848_v0  ;;  %v9722_v33 = vand.u32 4294901760, %v71_v11  ;;  %981 = vmatpush.msrb.mxu2 %v9672_v58 }
  0xae   :  { %12886 = vst [vmem:[#allocation169_spill] sm:$0xff] %v9647_v28  ;;  %1004 = vmatpush.msrb.mxu3 %v9518_v49  ;;  %v9736_v14 = vsub.f32 %v74_v47, %v9706_v59  ;;  %901 = vmatpush.msrb.mxu1 %v9727_v24 }
  0xaf   :  { %12887 = vst [vmem:[#allocation170_spill] sm:$0xff] %v9650_v45  ;;  %v9701_v45 = vand.u32 4294901760, %v9672_v58  ;;  %v9750_v42 = vsub.f32 %v71_v11, %v9722_v33  ;;  %v9766_v11 = vand.u32 4294901760, %v917_v12  ;;  %836 = vmatpush.msrb.mxu0 %v9706_v59  ;;  %984 = vmatpush.msrb.mxu2 %v9688_v13 }
  0xb0   :  { %12888 = vst [vmem:[#allocation171_spill] sm:$0xff] %v9656_v35  ;;  %1006 = vmatpush.msrb.mxu3 %v9524_v51 }
  0xb1   :  { %12889 = vst [vmem:[#allocation172_spill] sm:$0xff] %v9658_v6  ;;  %838 = vmatpush.msrb.mxu0 %v9722_v33  ;;  %987 = vmatpush.msrb.mxu2 %v9704_v50 }
  0xb2   :  { %12890 = vst [vmem:[#allocation173_spill] sm:$0xff] %v9665_v41  ;;  %v905_v41 = vsub.f32 %v9656_v35, %v9685_v27  ;;  %1008 = vmatpush.msrb.mxu3 %v9533_v23  ;;  %844 = vmatmul.f32.vlgmr.msrb.gmra.mxu0 %v12848_v0 }
  0xb3   :  { %12891 = vst [vmem:[#allocation174_spill] sm:$0xff] %v9669_v9  ;;  %1045 = vmatpush.msra.mxu0 %v9547_v19  ;;  %990 = vmatpush.msrb.mxu2 %v9720_v8  ;;  %v13000_v19 = vld [vmem:[#allocation133_spill] sm:$0xff] }
  0xb4   :  { %12892 = vst [vmem:[#allocation175_spill] sm:$0xff] %v9672_v58  ;;  %1010 = vmatpush.msrb.mxu3 %v9542_v3 }
  0xb5   :  { %12893 = vst [vmem:[#allocation176_spill] sm:$0xff] %v9674_v61  ;;  %1049 = vmatpush.msra.mxu0 %v9559_v4  ;;  %993 = vmatpush.msrb.mxu2 %v9736_v14  ;;  %v12996_v4 = vld [vmem:[#allocation74_spill] sm:$0xff] }
  0xb6   :  { %12894 = vst [vmem:[#allocation177_spill] sm:$0xff] %v9681_v31  ;;  %v911_v31 = vsub.f32 %v9672_v58, %v9701_v45  ;;  %1012 = vmatpush.msrb.mxu3 %v9554_v39 }
  0xb7   :  { %12895 = vst [vmem:[#allocation178_spill] sm:$0xff] %v9685_v27  ;;  %1053 = vmatpush.msra.mxu0 %v9576_v26  ;;  %996 = vmatpush.msrb.mxu2 %v9750_v42  ;;  %v12936_v26 = vld [vmem:[#allocation17_spill] sm:$0xff] }
  0xb8   :  { %12896 = vst [vmem:[#allocation179_spill] sm:$0xff] %v9688_v13  ;;  %v9755_v47 = vand.u32 4294901760, %v911_v31  ;;  %v929_v31 = vsub.f32 %v9720_v8, %v9747_v48  ;;  %1014 = vmatpush.msrb.mxu3 %v9566_v36  ;;  %999 = vmatmul.f32.vlgmr.msrb.gmra.mxu2 %v12848_v0 }
  0xb9   :  { %12897 = vst [vmem:[#allocation180_spill] sm:$0xff] %v9690_v43  ;;  %1057 = vmatpush.msra.mxu0 %v9591_v2  ;;  %v12933_v2 = vld [vmem:[#allocation16_spill] sm:$0xff] }
  0xba   :  { %12898 = vst [vmem:[#allocation181_spill] sm:$0xff] %v9692_v56  ;;  %v9741_v56 = vand.u32 4294901760, %v905_v41  ;;  %v923_v41 = vsub.f32 %v9704_v50, %v9733_v53  ;;  %1016 = vmatpush.msrb.mxu3 %v9570_v62 }
  0xbb   :  { %12899 = vst [vmem:[#allocation182_spill] sm:$0xff] %v9701_v45  ;;  %1061 = vmatpush.msra.mxu0 %v9608_v30  ;;  %v12932_v30 = vld [vmem:[#allocation54_spill] sm:$0xff] }
  0xbc   :  { %12900 = vst [vmem:[#allocation183_spill] sm:$0xff] %v9704_v50  ;;  %907 = vmatpush.msrb.mxu1 %v9741_v56  ;;  %v9777_v37 = vand.u32 4294901760, %v923_v41  ;;  %1018 = vmatpush.msrb.mxu3 %v9584_v38  ;;  %v67_v50 = vld [vmem:[#allocation2 + $0x8] sm:$0xff] }
  0xbd   :  { %12901 = vst [vmem:[#allocation184_spill] sm:$0xff] %v9706_v59  ;;  %1065 = vmatpush.msra.mxu0 %v9624_v7  ;;  %v12930_v7 = vld [vmem:[#allocation15_spill] sm:$0xff] }
  0xbe   :  { %12902 = vst [vmem:[#allocation185_spill] sm:$0xff] %v9708_v15  ;;  %v9761_v15 = vand.u32 4294901760, %v9736_v14  ;;  %913 = vmatpush.msrb.mxu1 %v9755_v47  ;;  %1020 = vmatpush.msrb.mxu3 %v9610_v22 }
  0xbf   :  { %12903 = vst [vmem:[#allocation186_spill] sm:$0xff] %v9717_v54  ;;  %1069 = vmatpush.msra.mxu0 %v9631_v1  ;;  %v12929_v1 = vld [vmem:[#allocation51_spill] sm:$0xff] }
  0xc0   :  { %12904 = vst [vmem:[#allocation187_spill] sm:$0xff] %v9720_v8  ;;  %v935_v12 = vsub.f32 %v9736_v14, %v9761_v15  ;;  %919 = vmatpush.msrb.mxu1 %v9766_v11  ;;  %1022 = vmatpush.msrb.mxu3 %v9626_v57 }
  0xc1   :  { %12905 = vst [vmem:[#allocation188_spill] sm:$0xff] %v9722_v33  ;;  %1073 = vmatpush.msra.mxu0 %v9647_v28  ;;  %v12926_v28 = vld [vmem:[#allocation14_spill] sm:$0xff] }
  0xc2   :  { %12906 = vst [vmem:[#allocation189_spill] sm:$0xff] %v9727_v24  ;;  %v9772_v24 = vand.u32 4294901760, %v9750_v42  ;;  %925 = vmatpush.msrb.mxu1 %v9777_v37  ;;  %v9793_v41 = vand.u32 4294901760, %v935_v12  ;;  %1024 = vmatpush.msrb.mxu3 %v9642_v63  ;;  %v12921_v12 = vld [vmem:[#allocation35_spill] sm:$0xff] }
  0xc3   :  { %12907 = vst [vmem:[#allocation190_spill] sm:$0xff] %v9733_v53  ;;  %1077 = vmatpush.msra.mxu0 %v9669_v9  ;;  %v12924_v9 = vld [vmem:[#allocation13_spill] sm:$0xff] }
  0xc4   :  { %12908 = vst [vmem:[#allocation191_spill] sm:$0xff] %v9736_v14  ;;  %1026 = vmatpush.msrb.mxu3 %v9658_v6 }
  0xc5   :  { %12909 = vst [vmem:[#allocation192_spill] sm:$0xff] %v9741_v56  ;;  %v9785_v56 = vand.u32 4294901760, %v929_v31  ;;  %1081 = vmatpush.msra.mxu0 %v9685_v27  ;;  %v12922_v27 = vld [vmem:[#allocation12_spill] sm:$0xff] }
  0xc6   :  { %12910 = vst [vmem:[#allocation193_spill] sm:$0xff] %v9747_v48  ;;  %1028 = vmatpush.msrb.mxu3 %v9674_v61  ;;  %1200 = vmatpush.msra.mxu2 %v12922_v27 }
  0xc7   :  { %12911 = vst [vmem:[#allocation194_spill] sm:$0xff] %v9750_v42  ;;  %931 = vmatpush.msrb.mxu1 %v9785_v56  ;;  %1085 = vmatpush.msra.mxu0 %v9701_v45  ;;  %v12923_v45 = vld [vmem:[#allocation38_spill] sm:$0xff] }
  0xc8   :  { %12912 = vst [vmem:[#allocation195_spill] sm:$0xff] %v9755_v47  ;;  %v941_v47 = vsub.f32 %v9750_v42, %v9772_v24  ;;  %1030 = vmatpush.msrb.mxu3 %v9690_v43  ;;  %1202 = vmatpush.msra.mxu2 %v12924_v9 }
  0xc9   :  { %12913 = vst [vmem:[#allocation196_spill] sm:$0xff] %v9761_v15  ;;  %937 = vmatpush.msrb.mxu1 %v9793_v41  ;;  %1089 = vmatpush.msra.mxu0 %v9717_v54  ;;  %v12925_v54 = vld [vmem:[#allocation43_spill] sm:$0xff] }
  0xca   :  { %12914 = vst [vmem:[#allocation197_spill] sm:$0xff] %v9766_v11  ;;  %v9799_v31 = vand.u32 4294901760, %v941_v47  ;;  %1032 = vmatpush.msrb.mxu3 %v9706_v59  ;;  %v12920_v47 = vld [vmem:[#allocation34_spill] sm:$0xff]  ;;  %1204 = vmatpush.msra.mxu2 %v12926_v28 }
  0xcb   :  { %12915 = vst [vmem:[#allocation198_spill] sm:$0xff] %v9772_v24  ;;  %1093 = vmatpush.msra.mxu0 %v9733_v53  ;;  %v12927_v53 = vld [vmem:[#allocation47_spill] sm:$0xff] }
  0xcc   :  { %12916 = vst [vmem:[#allocation199_spill] sm:$0xff] %v9777_v37  ;;  %943 = vmatpush.msrb.mxu1 %v9799_v31  ;;  %1034 = vmatpush.msrb.mxu3 %v9722_v33 }
  0xcd   :  { %12917 = vst [vmem:[#allocation200_spill] sm:$0xff] %v9785_v56  ;;  %1038 = vmatmul.f32.vlgmr.msrb.gmra.mxu3 %v12848_v0  ;;  %945 = vmatmul.f32.vlgmr.msrb.gmra.mxu1 %v12848_v0 }
  0xce   :  { %12918 = vst [vmem:[#allocation201_spill] sm:$0xff] %v9793_v41  ;;  %1112 = vmatpush.msra.mxu1 %v9518_v49  ;;  %1245 = vmatpush.msra.mxu3 %v12920_v47  ;;  %v357_v47 = vpop.f32.mrf.mxu3  ;;  %v66_v41 = vld [vmem:[#allocation2] sm:$0xff] }
  0xcf   :  { %12919 = vst [vmem:[#allocation202_spill] sm:$0xff] %v9799_v31  ;;  %1097 = vmatpush.msra.mxu0 %v9747_v48  ;;  %v12928_v48 = vld [vmem:[#allocation18_spill] sm:$0xff]  ;;  %1206 = vmatpush.msra.mxu2 %v12930_v7 }
  0xd0   :  { %1114 = vmatpush.msra.mxu1 %v9524_v51  ;;  %1251 = vmatpush.msra.mxu3 %v12921_v12  ;;  %v318_v12 = vpop.f32.mrf.mxu2 }
  0xd1   :  { %1101 = vmatpush.msra.mxu0 %v9761_v15  ;;  %v12931_v15 = vld [vmem:[#allocation19_spill] sm:$0xff]  ;;  %1208 = vmatpush.msra.mxu2 %v12933_v2 }
  0xd2   :  { %1116 = vmatpush.msra.mxu1 %v9533_v23  ;;  %1257 = vmatpush.msra.mxu3 %v12923_v45  ;;  %v264_v45 = vpop.f32.mrf.mxu1 }
  0xd3   :  { %1105 = vmatpush.msra.mxu0 %v9772_v24  ;;  %v12934_v24 = vld [vmem:[#allocation20_spill] sm:$0xff]  ;;  %1210 = vmatpush.msra.mxu2 %v12936_v26 }
  0xd4   :  { %1118 = vmatpush.msra.mxu1 %v9542_v3  ;;  %1263 = vmatpush.msra.mxu3 %v12925_v54 }
  0xd5   :  { %1107 = vmatmul.f32.vlgmr.msra.gmra.mxu0 %v12848_v0  ;;  %1212 = vmatpush.msra.mxu2 %v8995_v17 }
  0xd6   :  { %1120 = vmatpush.msra.mxu1 %v9554_v39  ;;  %1269 = vmatpush.msra.mxu3 %v12927_v53  ;;  %v12935_v53 = vld [vmem:[#allocation58_spill] sm:$0xff] }
  0xd7   :  { %1343 = vmatpush.msrb.mxu0 %v12928_v48  ;;  %v12937_v48 = vld [vmem:[#allocation22_spill] sm:$0xff]  ;;  %1214 = vmatpush.msra.mxu2 %v9004_v20 }
  0xd8   :  { %1122 = vmatpush.msra.mxu1 %v9566_v36  ;;  %1275 = vmatpush.msra.mxu3 %v12929_v1  ;;  %v12938_v1 = vld [vmem:[#allocation65_spill] sm:$0xff] }
  0xd9   :  { %1346 = vmatpush.msrb.mxu0 %v12931_v15  ;;  %v12939_v15 = vld [vmem:[#allocation23_spill] sm:$0xff]  ;;  %1216 = vmatpush.msra.mxu2 %v9037_v32 }
  0xda   :  { %1124 = vmatpush.msra.mxu1 %v9570_v62  ;;  %1281 = vmatpush.msra.mxu3 %v12932_v30  ;;  %v12940_v30 = vld [vmem:[#allocation70_spill] sm:$0xff] }
  0xdb   :  { %1349 = vmatpush.msrb.mxu0 %v12934_v24  ;;  %v12941_v24 = vld [vmem:[#allocation28_spill] sm:$0xff]  ;;  %1218 = vmatpush.msra.mxu2 %v9065_v44 }
  0xdc   :  { %1126 = vmatpush.msra.mxu1 %v9584_v38  ;;  %1287 = vmatpush.msra.mxu3 %v12935_v53  ;;  %v12942_v53 = vld [vmem:[#allocation73_spill] sm:$0xff] }
  0xdd   :  { %1352 = vmatpush.msrb.mxu0 %v12937_v48  ;;  %v12944_v48 = vld [vmem:[#allocation78_spill] sm:$0xff]  ;;  %1220 = vmatpush.msra.mxu2 %v9070_v46 }
  0xde   :  { %1128 = vmatpush.msra.mxu1 %v9610_v22  ;;  %1293 = vmatpush.msra.mxu3 %v12938_v1  ;;  %v12966_v1 = vld [vmem:[#allocation86_spill] sm:$0xff] }
  0xdf   :  { %1355 = vmatpush.msrb.mxu0 %v12939_v15  ;;  %v12945_v15 = vld [vmem:[#allocation33_spill] sm:$0xff]  ;;  %1222 = vmatpush.msra.mxu2 %v9086_v52 }
  0xe0   :  { %1130 = vmatpush.msra.mxu1 %v9626_v57  ;;  %1299 = vmatpush.msra.mxu3 %v12940_v30  ;;  %v12946_v30 = vld [vmem:[#allocation80_spill] sm:$0xff] }
  0xe1   :  { %1358 = vmatpush.msrb.mxu0 %v12941_v24  ;;  %v12947_v24 = vld [vmem:[#allocation40_spill] sm:$0xff]  ;;  %1224 = vmatpush.msra.mxu2 %v9090_v55 }
  0xe2   :  { %1132 = vmatpush.msra.mxu1 %v9642_v63  ;;  %1305 = vmatpush.msra.mxu3 %v12942_v53  ;;  %v12948_v53 = vld [vmem:[#allocation84_spill] sm:$0xff] }
  0xe3   :  { %1226 = vmatpush.msra.mxu2 %v9106_v60 }
  0xe4   :  { %1134 = vmatpush.msra.mxu1 %v9658_v6  ;;  %1311 = vmatpush.msra.mxu3 %v12944_v48  ;;  %v12950_v48 = vld [vmem:[#allocation87_spill] sm:$0xff] }
  0xe5   :  { %1228 = vmatpush.msra.mxu2 %v9134_v21 }
  0xe6   :  { %1136 = vmatpush.msra.mxu1 %v9674_v61  ;;  %1317 = vmatpush.msra.mxu3 %v12946_v30  ;;  %v12952_v30 = vld [vmem:[#allocation92_spill] sm:$0xff] }
  0xe7   :  { %1230 = vmatpush.msra.mxu2 %v9152_v40 }
  0xe8   :  { %1138 = vmatpush.msra.mxu1 %v9690_v43  ;;  %1323 = vmatpush.msra.mxu3 %v12948_v53  ;;  %v12964_v53 = vld [vmem:[#allocation77_spill] sm:$0xff] }
  0xea   :  { %1140 = vmatpush.msra.mxu1 %v9706_v59  ;;  %1329 = vmatpush.msra.mxu3 %v12950_v48  ;;  %v12960_v48 = vld [vmem:[#allocation62_spill] sm:$0xff] }
  0xeb   :  { %v13006_v59 = vld [vmem:[#allocation138_spill] sm:$0xff] }
  0xec   :  { %1142 = vmatpush.msra.mxu1 %v9722_v33  ;;  %1335 = vmatpush.msra.mxu3 %v12952_v30  ;;  %v12957_v30 = vld [vmem:[#allocation25_spill] sm:$0xff] }
  0xed   :  { %1144 = vmatmul.f32.vlgmr.msra.gmra.mxu1 %v12848_v0  ;;  %v12943_v0 = vld [vmem:[#allocation31_spill] sm:$0xff]  ;;  %1437 = vmatpush.msrb.mxu2 %v12957_v30 }
  0xee   :  { %1396 = vmatpush.msrb.mxu1 %v12922_v27  ;;  %1361 = vmatpush.msrb.mxu0 %v12943_v0  ;;  %v12949_v0 = vld [vmem:[#allocation44_spill] sm:$0xff]  ;;  %v12962_v30 = vld [vmem:[#allocation67_spill] sm:$0xff] }
  0xef   :  { %1504 = vmatpush.msrb.mxu3 %v12922_v27  ;;  %v13003_v27 = vld [vmem:[#allocation136_spill] sm:$0xff] }
  0xf0   :  { %1398 = vmatpush.msrb.mxu1 %v12924_v9  ;;  %1364 = vmatpush.msrb.mxu0 %v12945_v15  ;;  %v12951_v15 = vld [vmem:[#allocation49_spill] sm:$0xff] }
  0xf1   :  { %1506 = vmatpush.msrb.mxu3 %v12924_v9 }
  0xf2   :  { %1400 = vmatpush.msrb.mxu1 %v12926_v28  ;;  %1367 = vmatpush.msrb.mxu0 %v12947_v24  ;;  %v12953_v24 = vld [vmem:[#allocation53_spill] sm:$0xff] }
  0xf3   :  { %1508 = vmatpush.msrb.mxu3 %v12926_v28  ;;  %v12997_v28 = vld [vmem:[#allocation129_spill] sm:$0xff] }
  0xf4   :  { %1402 = vmatpush.msrb.mxu1 %v12930_v7  ;;  %1370 = vmatpush.msrb.mxu0 %v12949_v0  ;;  %v12954_v0 = vld [vmem:[#allocation55_spill] sm:$0xff] }
  0xf5   :  { %1510 = vmatpush.msrb.mxu3 %v12930_v7  ;;  %v12973_v7 = vld [vmem:[#allocation89_spill] sm:$0xff] }
  0xf6   :  { %1404 = vmatpush.msrb.mxu1 %v12933_v2  ;;  %1373 = vmatpush.msrb.mxu0 %v12951_v15  ;;  %v12955_v15 = vld [vmem:[#allocation59_spill] sm:$0xff] }
  0xf7   :  { %1512 = vmatpush.msrb.mxu3 %v12933_v2  ;;  %v12970_v2 = vld [vmem:[#allocation85_spill] sm:$0xff] }
  0xf8   :  { %1406 = vmatpush.msrb.mxu1 %v12936_v26  ;;  %1376 = vmatpush.msrb.mxu0 %v12953_v24  ;;  %v12956_v24 = vld [vmem:[#allocation66_spill] sm:$0xff] }
  0xf9   :  { %1514 = vmatpush.msrb.mxu3 %v12936_v26  ;;  %v12967_v26 = vld [vmem:[#allocation82_spill] sm:$0xff] }
  0xfa   :  { %1408 = vmatpush.msrb.mxu1 %v8995_v17  ;;  %1379 = vmatpush.msrb.mxu0 %v12954_v0  ;;  %v12958_v0 = vld [vmem:[#allocation71_spill] sm:$0xff] }
  0xfb   :  { %1516 = vmatpush.msrb.mxu3 %v8995_v17  ;;  %v12969_v17 = vld [vmem:[#allocation90_spill] sm:$0xff] }
  0xfc   :  { %1410 = vmatpush.msrb.mxu1 %v9004_v20  ;;  %1382 = vmatpush.msrb.mxu0 %v12955_v15  ;;  %v12959_v15 = vld [vmem:[#allocation26_spill] sm:$0xff] }
  0xfd   :  { %1441 = vmatpush.msrb.mxu2 %v12959_v15  ;;  %1518 = vmatpush.msrb.mxu3 %v9004_v20  ;;  %v12965_v15 = vld [vmem:[#allocation30_spill] sm:$0xff]  ;;  %v12972_v20 = vld [vmem:[#allocation96_spill] sm:$0xff] }
  0xfe   :  { %1412 = vmatpush.msrb.mxu1 %v9037_v32  ;;  %1385 = vmatpush.msrb.mxu0 %v12956_v24  ;;  %v12961_v24 = vld [vmem:[#allocation27_spill] sm:$0xff] }
  0xff   :  { %1445 = vmatpush.msrb.mxu2 %v12961_v24  ;;  %1520 = vmatpush.msrb.mxu3 %v9037_v32  ;;  %v12968_v24 = vld [vmem:[#allocation36_spill] sm:$0xff]  ;;  %v12976_v32 = vld [vmem:[#allocation94_spill] sm:$0xff] }
 0x100   :  { %1414 = vmatpush.msrb.mxu1 %v9065_v44  ;;  %1388 = vmatpush.msrb.mxu0 %v12958_v0  ;;  %v12963_v0 = vld [vmem:[#allocation29_spill] sm:$0xff] }
 0x101   :  { %1449 = vmatpush.msrb.mxu2 %v12963_v0  ;;  %1522 = vmatpush.msrb.mxu3 %v9065_v44  ;;  %v12971_v0 = vld [vmem:[#allocation37_spill] sm:$0xff]  ;;  %v12979_v44 = vld [vmem:[#allocation95_spill] sm:$0xff] }
 0x102   :  { %1416 = vmatpush.msrb.mxu1 %v9070_v46  ;;  %1541 = vmatpush.msra.mxu0 %v9136_v29 }
 0x103   :  { %1453 = vmatpush.msrb.mxu2 %v12965_v15  ;;  %1524 = vmatpush.msrb.mxu3 %v9070_v46  ;;  %v12975_v15 = vld [vmem:[#allocation105_spill] sm:$0xff] }
 0x104   :  { %1418 = vmatpush.msrb.mxu1 %v9086_v52  ;;  %1543 = vmatpush.msra.mxu0 %v12960_v48  ;;  %v12982_v46 = vld [vmem:[#allocation101_spill] sm:$0xff] }
 0x105   :  { %1457 = vmatpush.msrb.mxu2 %v12968_v24  ;;  %1526 = vmatpush.msrb.mxu3 %v9086_v52  ;;  %v12978_v24 = vld [vmem:[#allocation109_spill] sm:$0xff]  ;;  %v12985_v52 = vld [vmem:[#allocation104_spill] sm:$0xff] }
 0x106   :  { %1420 = vmatpush.msrb.mxu1 %v9090_v55  ;;  %1545 = vmatpush.msra.mxu0 %v12962_v30 }
 0x107   :  { %1461 = vmatpush.msrb.mxu2 %v12971_v0  ;;  %1528 = vmatpush.msrb.mxu3 %v9090_v55  ;;  %v12981_v0 = vld [vmem:[#allocation112_spill] sm:$0xff]  ;;  %v12988_v55 = vld [vmem:[#allocation110_spill] sm:$0xff] }
 0x108   :  { %1422 = vmatpush.msrb.mxu1 %v9106_v60  ;;  %1547 = vmatpush.msra.mxu0 %v12964_v53 }
 0x109   :  { %1530 = vmatpush.msrb.mxu3 %v9106_v60  ;;  %v12990_v60 = vld [vmem:[#allocation122_spill] sm:$0xff] }
 0x10a   :  { %1424 = vmatpush.msrb.mxu1 %v9134_v21  ;;  %1549 = vmatpush.msra.mxu0 %v12967_v26 }
 0x10b   :  { %1532 = vmatpush.msrb.mxu3 %v9134_v21  ;;  %v12994_v21 = vld [vmem:[#allocation126_spill] sm:$0xff] }
 0x10c   :  { %1426 = vmatpush.msrb.mxu1 %v9152_v40  ;;  %1551 = vmatpush.msra.mxu0 %v12970_v2 }
 0x10d   :  { %1534 = vmatpush.msrb.mxu3 %v9152_v40  ;;  %v12998_v40 = vld [vmem:[#allocation121_spill] sm:$0xff] }
 0x10e   :  { %1586 = vmatpush.msra.mxu1 %v12966_v1  ;;  %1553 = vmatpush.msra.mxu0 %v12973_v7  ;;  %v12974_v1 = vld [vmem:[#allocation42_spill] sm:$0xff] }
 0x10f   :  { %1465 = vmatpush.msrb.mxu2 %v12974_v1  ;;  %v12984_v1 = vld [vmem:[#allocation115_spill] sm:$0xff] }
 0x110   :  { %1592 = vmatpush.msra.mxu1 %v12969_v17  ;;  %1555 = vmatpush.msra.mxu0 %v12976_v32  ;;  %v12977_v17 = vld [vmem:[#allocation48_spill] sm:$0xff] }
 0x111   :  { %1469 = vmatpush.msrb.mxu2 %v12977_v17  ;;  %v12987_v17 = vld [vmem:[#allocation119_spill] sm:$0xff] }
 0x112   :  { %1598 = vmatpush.msra.mxu1 %v12972_v20  ;;  %1557 = vmatpush.msra.mxu0 %v12979_v44  ;;  %v12980_v20 = vld [vmem:[#allocation52_spill] sm:$0xff]  ;;  %v605_v43 = vpop.f32.mrf.mxu3 }
 0x113   :  { %1473 = vmatpush.msrb.mxu2 %v12980_v20  ;;  %v117_v20 = vld [vmem:[#allocation7] sm:$0x7] }
 0x114   :  { %1604 = vmatpush.msra.mxu1 %v12975_v15  ;;  %1559 = vmatpush.msra.mxu0 %v12982_v46  ;;  %v12983_v15 = vld [vmem:[#allocation56_spill] sm:$0xff]  ;;  %v9971_v54 = vperm.slane %v117_v20, 0 }
 0x115   :  { %1477 = vmatpush.msrb.mxu2 %v12983_v15  ;;  %v12991_v15 = vld [vmem:[#allocation114_spill] sm:$0xff] }
 0x116   :  { %1610 = vmatpush.msra.mxu1 %v12978_v24  ;;  %1561 = vmatpush.msra.mxu0 %v12985_v52  ;;  %v12986_v24 = vld [vmem:[#allocation60_spill] sm:$0xff]  ;;  %12993 = vst [vmem:[#allocation62_spill] sm:$0xff] %v9971_v54 }
 0x117   :  { %1481 = vmatpush.msrb.mxu2 %v12986_v24  ;;  %v12995_v24 = vld [vmem:[#allocation118_spill] sm:$0xff] }
 0x118   :  { %1616 = vmatpush.msra.mxu1 %v12981_v0  ;;  %1563 = vmatpush.msra.mxu0 %v12988_v55  ;;  %v12989_v0 = vld [vmem:[#allocation63_spill] sm:$0xff] }
 0x119   :  { %1485 = vmatpush.msrb.mxu2 %v12989_v0  ;;  %v12999_v0 = vld [vmem:[#allocation79_spill] sm:$0xff] }
 0x11a   :  { %1622 = vmatpush.msra.mxu1 %v12984_v1  ;;  %1565 = vmatpush.msra.mxu0 %v12991_v15  ;;  %v12992_v1 = vld [vmem:[#allocation68_spill] sm:$0xff] }
 0x11b   :  { %1489 = vmatpush.msrb.mxu2 %v12992_v1  ;;  %v13001_v1 = vld [vmem:[#allocation125_spill] sm:$0xff] }
 0x11c   :  { %1628 = vmatpush.msra.mxu1 %v12987_v17  ;;  %1567 = vmatpush.msra.mxu0 %v12995_v24  ;;  %v163_v17 = vpop.f32.mrf.mxu0 }
 0x11d   :  { %1493 = vmatpush.msrb.mxu2 %v12996_v4  ;;  %v9984_v4 = vperm.slane %v117_v20, 1 }
 0x11e   :  { %1634 = vmatpush.msra.mxu1 %v12990_v60  ;;  %1569 = vmatpush.msra.mxu0 %v12998_v40  ;;  %v164_v60 = vadd.f32 %v163_v17, %v9971_v54  ;;  %v504_v17 = vpop.f32.mrf.mxu2  ;;  %v463_v54 = vpop.f32.mrf.mxu1 }
 0x11f   :  { %1497 = vmatpush.msrb.mxu2 %v12999_v0  ;;  %13004 = vst [vmem:[#allocation67_spill] sm:$0xff] %v9984_v4 }
 0x120   :  { %1640 = vmatpush.msra.mxu1 %v12994_v21  ;;  %1571 = vmatpush.msra.mxu0 %v13001_v1  ;;  %v13002_v21 = vld [vmem:[#allocation135_spill] sm:$0xff]  ;;  %v265_v9 = vadd.f32 %v264_v45, %v164_v60 }
 0x122   :  { %1646 = vmatpush.msra.mxu1 %v12997_v28  ;;  %v13005_v28 = vld [vmem:[#allocation137_spill] sm:$0xff]  ;;  %v319_v33 = vadd.f32 %v318_v12, %v265_v9 }
 0x124   :  { %1652 = vmatpush.msra.mxu1 %v13000_v19  ;;  %v426_v0 = vpop.f32.mrf.mxu0  ;;  %v505_v19 = vadd.f32 %v504_v17, %v9984_v4  ;;  %v358_v42 = vadd.f32 %v357_v47, %v319_v33 }
 0x126   :  { %1658 = vmatpush.msra.mxu1 %v13002_v21  ;;  %v606_v14 = vadd.f32 %v605_v43, %v505_v19  ;;  %v427_v21 = vadd.f32 %v426_v0, %v358_v42  ;;  %v698_v31 = vpop.f32.mrf.mxu1  ;;  %v767_v8 = vpop.f32.mrf.mxu2 }
 0x128   :  { %1664 = vmatpush.msra.mxu1 %v13003_v27  ;;  %v464_v61 = vadd.f32 %v463_v54, %v427_v21 }
 0x12a   :  { %1670 = vmatpush.msra.mxu1 %v13005_v28  ;;  %v1148_v9 = vadd.f32 %v464_v61, %v66_v41 }
 0x12c   :  { %1676 = vmatpush.msra.mxu1 %v13006_v59  ;;  %v659_v60 = vpop.f32.mrf.mxu0  ;;  %v8732_v59 = vmul.f32 -1.442695, %v1148_v9 }
 0x12d   :  { %v660_v45 = vadd.f32 %v659_v60, %v606_v14  ;;  %v9989_v14 = vperm.slane %v117_v20, 2 }
 0x12e   :  { %8755 = vpow2.f32 %v8732_v59 }
 0x12f   :  { %v699_v27 = vadd.f32 %v698_v31, %v660_v45 }
 0x130   :  { %v804_v12 = vpop.f32.mrf.mxu3 }
 0x131   :  { %v768_v28 = vadd.f32 %v767_v8, %v699_v27 }
 0x133   :  { %v805_v6 = vadd.f32 %v804_v12, %v768_v28 }
 0x134   :  { %v8756_v33 = vpop.eup %8755  ;;  %v845_v54 = vpop.f32.mrf.mxu0 }
 0x135   :  { %v1168_v56 = vadd.f32 %v805_v6, %v67_v50  ;;  %v1152_v19 = vadd.f32 1.0, %v8756_v33  ;;  %v846_v61 = vadd.f32 %v845_v54, %v9989_v14 }
 0x137   :  { %v8733_v17 = vmul.f32 -1.442695, %v1168_v56  ;;  %vm1158_vm0 = vweird.f32 %v1152_v19  ;;  %v1164_v9 = vand.u32 2147483648, %v1152_v19 }
 0x139   :  { %8757 = vpow2.f32 %v8733_v17  ;;  %v1162_v17 = vand.u32 2147483647, %v1152_v19 }
 0x13a   :  { %8759 = vrcp.f32 %v1152_v19 }
 0x13b   :  { %v1000_v41 = vpop.f32.mrf.mxu2  ;;  %vm1163_vm5 = vcmp.eq.f32.partialorder %v1162_v17, 8.507059e+37  ;;  %v13007_v17 = vld [vmem:[#allocation72_spill] sm:$0xff] }
 0x13f   :  { %v8758_v43 = vpop.eup %8757 }
 0x140   :  { %v1172_v42 = vadd.f32 1.0, %v8758_v43  ;;  %v8760_v21 = vpop.eup %8759 }
 0x141   :  { %v1154_v27 = vmul.f32 %v8760_v21, %v1152_v19  ;;  %vm1159_vm1 = vweird.f32 %v8760_v21 }
 0x142   :  { %8761 = vrcp.f32 %v1172_v42  ;;  %vm1160_vm2 = vmor %vm1158_vm0, %vm1159_vm1  ;;  %vm1178_vm3 = vweird.f32 %v1172_v42 }
 0x143   :  { %v1155_v50 = vsub.f32 1.0, %v1154_v27  ;;  %v1184_v27 = vand.u32 2147483648, %v1172_v42 }
 0x145   :  { %v1156_v47 = vmul.f32 %v8760_v21, %v1155_v50 }
 0x147   :  { %v1157_v20 = vadd.f32 %v8760_v21, %v1156_v47 }
 0x148   :  { %v8762_v6 = vpop.eup %8761 }
 0x149   :  { %v1174_v59 = vmul.f32 %v8762_v6, %v1172_v42  ;;  %v1161_v43 = vsel %vm1160_vm2, %v8760_v21, %v1157_v20  ;;  %vm1179_vm4 = vweird.f32 %v8762_v6 }
 0x14a   :  { %v946_v28 = vpop.f32.mrf.mxu1  ;;  %vm1180_vm6 = vmor %vm1178_vm3, %vm1179_vm4 }
 0x14b   :  { %v947_v8 = vadd.f32 %v946_v28, %v846_v61  ;;  %v1175_v60 = vsub.f32 1.0, %v1174_v59  ;;  %v1165_v61 = vor.u32 1.1754944e-38, %v1164_v9 }
 0x14d   :  { %v1001_v56 = vadd.f32 %v1000_v41, %v947_v8  ;;  %v1176_v33 = vmul.f32 %v8762_v6, %v1175_v60  ;;  %v68_v8 = vld [vmem:[#allocation2 + $0x10] sm:$0xff]  ;;  %v1166_v41 = vsel %vm1163_vm5, %v1165_v61, %v1161_v43 }
 0x14e   :  { %v13008_v43 = vld [vmem:[#allocation76_spill] sm:$0xff]  ;;  %v13009_v61 = vld [vmem:[#allocation81_spill] sm:$0xff] }
 0x14f   :  { %v1177_v50 = vadd.f32 %v8762_v6, %v1176_v33 }
 0x150   :  { %v1039_v31 = vpop.f32.mrf.mxu3 }
 0x151   :  { %v1040_v0 = vadd.f32 %v1039_v31, %v1001_v56  ;;  %v1182_v56 = vand.u32 2147483647, %v1172_v42  ;;  %v1185_v31 = vor.u32 1.1754944e-38, %v1184_v27  ;;  %v13010_v27 = vld [vmem:[#allocation64_spill] sm:$0xff] }
 0x152   :  { %v1108_v45 = vpop.f32.mrf.mxu0 }
 0x153   :  { %v1109_v12 = vadd.f32 %v1108_v45, %v1040_v0  ;;  %v1181_v0 = vsel %vm1180_vm6, %v8762_v6, %v1177_v50  ;;  %vm1183_vm7 = vcmp.eq.f32.partialorder %v1182_v56, 8.507059e+37  ;;  %v13014_v50 = vld [vmem:[#allocation75_spill] sm:$0xff] }
 0x154   :  { %v1186_v19 = vsel %vm1183_vm7, %v1185_v31, %v1181_v0  ;;  %v13015_v56 = vld [vmem:[#allocation99_spill] sm:$0xff]  ;;  %v13019_v0 = vld [vmem:[#allocation106_spill] sm:$0xff] }
 0x155   :  { %v1191_v21 = vsub.f32 1.0, %v1186_v19  ;;  %v1193_v20 = vmul.f32 0.0, %v1186_v19  ;;  %v13017_v31 = vld [vmem:[#allocation103_spill] sm:$0xff]  ;;  %v13020_v19 = vld [vmem:[#allocation93_spill] sm:$0xff] }
 0x16a   :  { %v1145_v54 = vpop.f32.mrf.mxu1 }
 0x16b   :  { %v1146_v28 = vadd.f32 %v1145_v54, %v1109_v12 }
 0x16d   :  { %v1188_v59 = vmul.f32 %v1166_v41, %v1146_v28  ;;  %v13011_v28 = vld [vmem:[#allocation91_spill] sm:$0xff]  ;;  %v13013_v41 = vld [vmem:[#allocation97_spill] sm:$0xff] }
 0x16f   :  { %v1189_v47 = vadd.f32 %v1188_v59, %v68_v8  ;;  %v13012_v8 = vld [vmem:[#allocation69_spill] sm:$0xff]  ;;  %v13016_v59 = vld [vmem:[#allocation83_spill] sm:$0xff] }
 0x171   :  { %8763 = vtanh.f32 %v1189_v47  ;;  %v13018_v47 = vld [vmem:[#allocation88_spill] sm:$0xff] }
 0x177   :  { %v8764_v60 = vpop.eup %8763 }
 0x178   :  { %v1192_v45 = vmul.f32 %v8764_v60, %v1191_v21  ;;  %v13021_v21 = vld [vmem:[#allocation108_spill] sm:$0xff]  ;;  %v13022_v60 = vld [vmem:[#allocation98_spill] sm:$0xff] }
 0x17a   :  { %v9992_v9 = vadd.f32 %v1193_v20, %v1192_v45  ;;  %v13023_v45 = vld [vmem:[#allocation113_spill] sm:$0xff]  ;;  %v13024_v20 = vld [vmem:[#allocation100_spill] sm:$0xff] }
 0x17c   :  { %v9995_v12 = vand.u32 4294901760, %v9992_v9 }
 0x17e   :  { %1337 = vmatmul.f32.vlgmr.msra.gmra.mxu3 %v9995_v12  ;;  %v10000_v42 = vsub.f32 %v9992_v9, %v9995_v12 }
 0x17f   :  { %1737 = vmatpush.msra.mxu3 %v9136_v29 }
 0x180   :  { %1391 = vmatmul.f32.vlgmr.msrb.gmra.mxu0 %v10000_v42  ;;  %v10005_v6 = vand.u32 4294901760, %v10000_v42 }
 0x181   :  { %1739 = vmatpush.msra.mxu3 %v12960_v48  ;;  %1778 = vmatpush.msrb.mxu0 %v13007_v17 }
 0x182   :  { %1430 = vmatmul.f32.vlgmr.msrb.gmra.mxu1 %v10005_v6  ;;  %v1234_v33 = vsub.f32 %v10000_v42, %v10005_v6 }
 0x183   :  { %1741 = vmatpush.msra.mxu3 %v12962_v30  ;;  %1782 = vmatpush.msrb.mxu0 %v13008_v43 }
 0x184   :  { %1845 = vmatpush.msrb.mxu1 %v9136_v29  ;;  %v10015_v54 = vand.u32 4294901760, %v1234_v33  ;;  %v13025_v33 = vld [vmem:[#allocation116_spill] sm:$0xff] }
 0x185   :  { %1743 = vmatpush.msra.mxu3 %v12964_v53  ;;  %1786 = vmatpush.msrb.mxu0 %v13009_v61 }
 0x186   :  { %1847 = vmatpush.msrb.mxu1 %v12960_v48  ;;  %1236 = vmatmul.f32.vlgmr.msra.gmra.mxu2 %v10015_v54 }
 0x187   :  { %1536 = vmatmul.f32.vlgmr.msrb.gmra.mxu3 %v9995_v12  ;;  %1684 = vmatpush.msra.mxu2 %v13010_v27 }
 0x188   :  { %1745 = vmatpush.msra.mxu3 %v12967_v26  ;;  %1790 = vmatpush.msrb.mxu0 %v13011_v28 }
 0x189   :  { %1849 = vmatpush.msrb.mxu1 %v12962_v30  ;;  %1577 = vmatmul.f32.vlgmr.msra.gmra.mxu0 %v10015_v54 }
 0x18a   :  { %1687 = vmatpush.msra.mxu2 %v13012_v8  ;;  %1747 = vmatpush.msra.mxu3 %v12970_v2 }
 0x18b   :  { %1794 = vmatpush.msrb.mxu0 %v13013_v41  ;;  %1851 = vmatpush.msrb.mxu1 %v12964_v53 }
 0x18c   :  { %1678 = vmatmul.f32.vlgmr.msra.gmra.mxu1 %v9995_v12  ;;  %1690 = vmatpush.msra.mxu2 %v13014_v50 }
 0x18d   :  { %1749 = vmatpush.msra.mxu3 %v12973_v7  ;;  %1798 = vmatpush.msrb.mxu0 %v13015_v56 }
 0x18e   :  { %1853 = vmatpush.msrb.mxu1 %v12967_v26  ;;  %1693 = vmatpush.msra.mxu2 %v13016_v59 }
 0x18f   :  { %1751 = vmatpush.msra.mxu3 %v12976_v32  ;;  %1802 = vmatpush.msrb.mxu0 %v13017_v31 }
 0x190   :  { %1855 = vmatpush.msrb.mxu1 %v12970_v2  ;;  %1499 = vmatmul.f32.vlgmr.msrb.gmra.mxu2 %v9995_v12 }
 0x191   :  { %1696 = vmatpush.msra.mxu2 %v13018_v47  ;;  %1753 = vmatpush.msra.mxu3 %v12979_v44 }
 0x192   :  { %1806 = vmatpush.msrb.mxu0 %v13019_v0  ;;  %1857 = vmatpush.msrb.mxu1 %v12973_v7  ;;  %v13039_v0 = vld [vmem:[#allocation124_spill] sm:$0xff] }
 0x193   :  { %1699 = vmatpush.msra.mxu2 %v13020_v19  ;;  %1755 = vmatpush.msra.mxu3 %v12982_v46  ;;  %v13026_v19 = vld [vmem:[#allocation102_spill] sm:$0xff] }
 0x194   :  { %1810 = vmatpush.msrb.mxu0 %v13021_v21  ;;  %1859 = vmatpush.msrb.mxu1 %v12976_v32  ;;  %v13027_v21 = vld [vmem:[#allocation123_spill] sm:$0xff] }
 0x195   :  { %1702 = vmatpush.msra.mxu2 %v13022_v60  ;;  %1757 = vmatpush.msra.mxu3 %v12985_v52  ;;  %v13028_v60 = vld [vmem:[#allocation107_spill] sm:$0xff] }
 0x196   :  { %1814 = vmatpush.msrb.mxu0 %v13023_v45  ;;  %1861 = vmatpush.msrb.mxu1 %v12979_v44  ;;  %v13029_v45 = vld [vmem:[#allocation127_spill] sm:$0xff] }
 0x197   :  { %1705 = vmatpush.msra.mxu2 %v13024_v20  ;;  %1759 = vmatpush.msra.mxu3 %v12988_v55  ;;  %v13030_v20 = vld [vmem:[#allocation111_spill] sm:$0xff] }
 0x198   :  { %1818 = vmatpush.msrb.mxu0 %v13025_v33  ;;  %1863 = vmatpush.msrb.mxu1 %v12982_v46  ;;  %v13031_v33 = vld [vmem:[#allocation130_spill] sm:$0xff] }
 0x199   :  { %1708 = vmatpush.msra.mxu2 %v13026_v19  ;;  %1761 = vmatpush.msra.mxu3 %v12991_v15  ;;  %v13032_v19 = vld [vmem:[#allocation117_spill] sm:$0xff] }
 0x19a   :  { %1822 = vmatpush.msrb.mxu0 %v13027_v21  ;;  %1865 = vmatpush.msrb.mxu1 %v12985_v52  ;;  %v13033_v21 = vld [vmem:[#allocation132_spill] sm:$0xff] }
 0x19b   :  { %1711 = vmatpush.msra.mxu2 %v13028_v60  ;;  %1763 = vmatpush.msra.mxu3 %v12995_v24  ;;  %v13035_v60 = vld [vmem:[#allocation158_spill] sm:$0xff] }
 0x19c   :  { %1826 = vmatpush.msrb.mxu0 %v13029_v45  ;;  %1867 = vmatpush.msrb.mxu1 %v12988_v55  ;;  %v13034_v45 = vld [vmem:[#allocation120_spill] sm:$0xff] }
 0x19d   :  { %1714 = vmatpush.msra.mxu2 %v13030_v20  ;;  %1765 = vmatpush.msra.mxu3 %v12998_v40  ;;  %v13036_v20 = vld [vmem:[#allocation134_spill] sm:$0xff] }
 0x19e   :  { %1830 = vmatpush.msrb.mxu0 %v13031_v33  ;;  %1869 = vmatpush.msrb.mxu1 %v12991_v15  ;;  %v13037_v33 = vld [vmem:[#allocation162_spill] sm:$0xff] }
 0x19f   :  { %1717 = vmatpush.msra.mxu2 %v13032_v19  ;;  %1767 = vmatpush.msra.mxu3 %v13001_v1  ;;  %v13038_v19 = vld [vmem:[#allocation141_spill] sm:$0xff] }
 0x1a0   :  { %1834 = vmatpush.msrb.mxu0 %v13033_v21  ;;  %1871 = vmatpush.msrb.mxu1 %v12995_v24  ;;  %v13040_v21 = vld [vmem:[#allocation166_spill] sm:$0xff] }
 0x1a1   :  { %1771 = vmatmul.f32.vlgmr.msra.gmra.mxu3 %v10005_v6  ;;  %1720 = vmatpush.msra.mxu2 %v13034_v45  ;;  %v13041_v45 = vld [vmem:[#allocation143_spill] sm:$0xff] }
 0x1a2   :  { %1927 = vmatpush.msrb.mxu3 %v13035_v60  ;;  %1838 = vmatpush.msrb.mxu0 %v13036_v20  ;;  %v13042_v20 = vld [vmem:[#allocation128_spill] sm:$0xff]  ;;  %v13043_v60 = vld [vmem:[#allocation170_spill] sm:$0xff] }
 0x1a3   :  { %1873 = vmatpush.msrb.mxu1 %v12998_v40  ;;  %1840 = vmatmul.f32.vlgmr.msrb.gmra.mxu0 %v9995_v12 }
 0x1a4   :  { %1933 = vmatpush.msrb.mxu3 %v13037_v33  ;;  %2025 = vmatpush.msra.mxu0 %v13038_v19  ;;  %v13044_v19 = vld [vmem:[#allocation131_spill] sm:$0xff] }
 0x1a5   :  { %1723 = vmatpush.msra.mxu2 %v13039_v0  ;;  %1875 = vmatpush.msrb.mxu1 %v13001_v1  ;;  %v13045_v0 = vld [vmem:[#allocation173_spill] sm:$0xff] }
 0x1a6   :  { %1877 = vmatmul.f32.vlgmr.msrb.gmra.mxu1 %v9995_v12  ;;  %1939 = vmatpush.msrb.mxu3 %v13040_v21 }
 0x1a7   :  { %2028 = vmatpush.msra.mxu0 %v13041_v45  ;;  %2078 = vmatpush.msra.mxu1 %v9518_v49  ;;  %v13046_v45 = vld [vmem:[#allocation177_spill] sm:$0xff] }
 0x1a8   :  { %1726 = vmatpush.msra.mxu2 %v13042_v20  ;;  %1945 = vmatpush.msrb.mxu3 %v13043_v60  ;;  %v13047_v20 = vld [vmem:[#allocation153_spill] sm:$0xff] }
 0x1a9   :  { %2031 = vmatpush.msra.mxu0 %v9552_v10  ;;  %2080 = vmatpush.msra.mxu1 %v9524_v51  ;;  %v13048_v10 = vld [vmem:[#allocation181_spill] sm:$0xff] }
 0x1aa   :  { %1729 = vmatpush.msra.mxu2 %v13044_v19  ;;  %1951 = vmatpush.msrb.mxu3 %v13045_v0 }
 0x1ab   :  { %1732 = vmatmul.f32.vlgmr.msra.gmra.mxu2 %v10000_v42  ;;  %2034 = vmatpush.msra.mxu0 %v9564_v25  ;;  %v13049_v25 = vld [vmem:[#allocation185_spill] sm:$0xff] }
 0x1ac   :  { %1882 = vmatpush.msrb.mxu2 %v9518_v49  ;;  %2082 = vmatpush.msra.mxu1 %v9533_v23 }
 0x1ad   :  { %1957 = vmatpush.msrb.mxu3 %v13046_v45  ;;  %2037 = vmatpush.msra.mxu0 %v13047_v20  ;;  %v13050_v20 = vld [vmem:[#allocation189_spill] sm:$0xff] }
 0x1ae   :  { %1884 = vmatpush.msrb.mxu2 %v9524_v51  ;;  %2084 = vmatpush.msra.mxu1 %v9542_v3 }
 0x1af   :  { %1963 = vmatpush.msrb.mxu3 %v13048_v10  ;;  %2040 = vmatpush.msra.mxu0 %v9594_v18  ;;  %v13051_v18 = vld [vmem:[#allocation192_spill] sm:$0xff]  ;;  %v13074_v10 = vld [vmem:[#allocation15_spill] sm:$0xff] }
 0x1b0   :  { %1886 = vmatpush.msrb.mxu2 %v9533_v23  ;;  %2086 = vmatpush.msra.mxu1 %v9554_v39 }
 0x1b1   :  { %1969 = vmatpush.msrb.mxu3 %v13049_v25  ;;  %2043 = vmatpush.msra.mxu0 %v9599_v5  ;;  %v13052_v5 = vld [vmem:[#allocation195_spill] sm:$0xff] }
 0x1b2   :  { %1888 = vmatpush.msrb.mxu2 %v9542_v3  ;;  %2088 = vmatpush.msra.mxu1 %v9566_v36  ;;  %v13073_v25 = vld [vmem:[#allocation43_spill] sm:$0xff] }
 0x1b3   :  { %1975 = vmatpush.msrb.mxu3 %v13050_v20  ;;  %2046 = vmatpush.msra.mxu0 %v9615_v16  ;;  %v13069_v16 = vld [vmem:[#allocation145_spill] sm:$0xff]  ;;  %v13071_v20 = vld [vmem:[#allocation14_spill] sm:$0xff] }
 0x1b4   :  { %1890 = vmatpush.msrb.mxu2 %v9554_v39  ;;  %2090 = vmatpush.msra.mxu1 %v9570_v62 }
 0x1b5   :  { %1981 = vmatpush.msrb.mxu3 %v13051_v18  ;;  %2049 = vmatpush.msra.mxu0 %v9640_v34  ;;  %v13057_v34 = vld [vmem:[#allocation187_spill] sm:$0xff] }
 0x1b6   :  { %1892 = vmatpush.msrb.mxu2 %v9566_v36  ;;  %2092 = vmatpush.msra.mxu1 %v9584_v38  ;;  %v13060_v18 = vld [vmem:[#allocation191_spill] sm:$0xff] }
 0x1b7   :  { %1987 = vmatpush.msrb.mxu3 %v13052_v5  ;;  %2052 = vmatpush.msra.mxu0 %v9656_v35  ;;  %v13053_v35 = vld [vmem:[#allocation200_spill] sm:$0xff]  ;;  %v13054_v5 = vld [vmem:[#allocation183_spill] sm:$0xff] }
 0x1b8   :  { %1894 = vmatpush.msrb.mxu2 %v9570_v62  ;;  %2094 = vmatpush.msra.mxu1 %v9610_v22 }
 0x1b9   :  { %1993 = vmatpush.msrb.mxu3 %v9766_v11  ;;  %2055 = vmatpush.msra.mxu0 %v9672_v58  ;;  %v13055_v11 = vld [vmem:[#allocation172_spill] sm:$0xff]  ;;  %v13056_v58 = vld [vmem:[#allocation201_spill] sm:$0xff] }
 0x1ba   :  { %1896 = vmatpush.msrb.mxu2 %v9584_v38  ;;  %2096 = vmatpush.msra.mxu1 %v9626_v57 }
 0x1bb   :  { %1999 = vmatpush.msrb.mxu3 %v9777_v37  ;;  %2058 = vmatpush.msra.mxu0 %v9688_v13  ;;  %v13058_v37 = vld [vmem:[#allocation176_spill] sm:$0xff]  ;;  %v13059_v13 = vld [vmem:[#allocation202_spill] sm:$0xff] }
 0x1bc   :  { %1898 = vmatpush.msrb.mxu2 %v9610_v22  ;;  %2098 = vmatpush.msra.mxu1 %v9642_v63 }
 0x1bd   :  { %2005 = vmatpush.msrb.mxu3 %v13053_v35  ;;  %2061 = vmatpush.msra.mxu0 %v13054_v5  ;;  %v13061_v35 = vld [vmem:[#allocation180_spill] sm:$0xff]  ;;  %v13062_v5 = vld [vmem:[#allocation194_spill] sm:$0xff] }
 0x1be   :  { %1900 = vmatpush.msrb.mxu2 %v9626_v57  ;;  %2100 = vmatpush.msra.mxu1 %v13055_v11 }
 0x1bf   :  { %2011 = vmatpush.msrb.mxu3 %v13056_v58  ;;  %2064 = vmatpush.msra.mxu0 %v13057_v34  ;;  %v13063_v34 = vld [vmem:[#allocation184_spill] sm:$0xff]  ;;  %v13067_v58 = vld [vmem:[#allocation13_spill] sm:$0xff] }
 0x1c0   :  { %1902 = vmatpush.msrb.mxu2 %v9642_v63  ;;  %2102 = vmatpush.msra.mxu1 %v13058_v37 }
 0x1c1   :  { %2017 = vmatpush.msrb.mxu3 %v13059_v13  ;;  %2067 = vmatpush.msra.mxu0 %v13060_v18  ;;  %v13064_v18 = vld [vmem:[#allocation188_spill] sm:$0xff] }
 0x1c2   :  { %1904 = vmatpush.msrb.mxu2 %v13055_v11  ;;  %2104 = vmatpush.msra.mxu1 %v13061_v35  ;;  %v13065_v13 = vld [vmem:[#allocation12_spill] sm:$0xff] }
 0x1c3   :  { %2019 = vmatmul.f32.vlgmr.msrb.gmra.mxu3 %v9995_v12  ;;  %2070 = vmatpush.msra.mxu0 %v13062_v5  ;;  %v13066_v5 = vld [vmem:[#allocation34_spill] sm:$0xff] }
 0x1c4   :  { %2186 = vmatpush.msra.mxu3 %v9518_v49  ;;  %1906 = vmatpush.msrb.mxu2 %v13058_v37 }
 0x1c5   :  { %2106 = vmatpush.msra.mxu1 %v13063_v34  ;;  %2073 = vmatmul.f32.vlgmr.msra.gmra.mxu0 %v10000_v42  ;;  %v13068_v42 = vld [vmem:[#allocation35_spill] sm:$0xff] }
 0x1c6   :  { %2188 = vmatpush.msra.mxu3 %v9524_v51  ;;  %1908 = vmatpush.msrb.mxu2 %v13061_v35 }
 0x1c7   :  { %2108 = vmatpush.msra.mxu1 %v13064_v18  ;;  %2274 = vmatpush.msrb.mxu0 %v13065_v13 }
 0x1c8   :  { %2112 = vmatmul.f32.vlgmr.msra.gmra.mxu1 %v10005_v6  ;;  %2190 = vmatpush.msra.mxu3 %v9533_v23  ;;  %v13070_v6 = vld [vmem:[#allocation38_spill] sm:$0xff] }
 0x1c9   :  { %1910 = vmatpush.msrb.mxu2 %v13063_v34  ;;  %2319 = vmatpush.msrb.mxu1 %v13066_v5  ;;  %v13072_v5 = vld [vmem:[#allocation148_spill] sm:$0xff] }
 0x1ca   :  { %2192 = vmatpush.msra.mxu3 %v9542_v3  ;;  %2276 = vmatpush.msrb.mxu0 %v13067_v58 }
 0x1cb   :  { %1912 = vmatpush.msrb.mxu2 %v13064_v18  ;;  %2325 = vmatpush.msrb.mxu1 %v13068_v42  ;;  %v13075_v42 = vld [vmem:[#allocation152_spill] sm:$0xff] }
 0x1cc   :  { %1918 = vmatmul.f32.vlgmr.msrb.gmra.mxu2 %v10015_v54  ;;  %2194 = vmatpush.msra.mxu3 %v9554_v39  ;;  %v13076_v54 = vld [vmem:[#allocation47_spill] sm:$0xff] }
 0x1cd   :  { %2119 = vmatpush.msra.mxu2 %v13069_v16  ;;  %2331 = vmatpush.msrb.mxu1 %v13070_v6  ;;  %v13077_v16 = vld [vmem:[#allocation16_spill] sm:$0xff]  ;;  %v13078_v6 = vld [vmem:[#allocation155_spill] sm:$0xff] }
 0x1ce   :  { %2196 = vmatpush.msra.mxu3 %v9566_v36  ;;  %2278 = vmatpush.msrb.mxu0 %v13071_v20  ;;  %v13079_v36 = vld [vmem:[#allocation51_spill] sm:$0xff] }
 0x1cf   :  { %2123 = vmatpush.msra.mxu2 %v13072_v5  ;;  %2337 = vmatpush.msrb.mxu1 %v13073_v25  ;;  %v13080_v5 = vld [vmem:[#allocation17_spill] sm:$0xff]  ;;  %v13081_v25 = vld [vmem:[#allocation159_spill] sm:$0xff] }
 0x1d0   :  { %2198 = vmatpush.msra.mxu3 %v9570_v62  ;;  %2280 = vmatpush.msrb.mxu0 %v13074_v10  ;;  %v13082_v62 = vld [vmem:[#allocation54_spill] sm:$0xff] }
 0x1d1   :  { %2127 = vmatpush.msra.mxu2 %v13075_v42  ;;  %2343 = vmatpush.msrb.mxu1 %v13076_v54  ;;  %v13083_v42 = vld [vmem:[#allocation21_spill] sm:$0xff]  ;;  %v13084_v54 = vld [vmem:[#allocation163_spill] sm:$0xff] }
 0x1d2   :  { %2200 = vmatpush.msra.mxu3 %v9584_v38  ;;  %2282 = vmatpush.msrb.mxu0 %v13077_v16  ;;  %v13085_v38 = vld [vmem:[#allocation58_spill] sm:$0xff] }
 0x1d3   :  { %2131 = vmatpush.msra.mxu2 %v13078_v6  ;;  %2349 = vmatpush.msrb.mxu1 %v13079_v36  ;;  %v13086_v6 = vld [vmem:[#allocation24_spill] sm:$0xff]  ;;  %v13087_v36 = vld [vmem:[#allocation165_spill] sm:$0xff] }
 0x1d4   :  { %2202 = vmatpush.msra.mxu3 %v9610_v22  ;;  %2284 = vmatpush.msrb.mxu0 %v13080_v5  ;;  %v13088_v22 = vld [vmem:[#allocation65_spill] sm:$0xff] }
 0x1d5   :  { %2135 = vmatpush.msra.mxu2 %v13081_v25  ;;  %2355 = vmatpush.msrb.mxu1 %v13082_v62  ;;  %v13089_v25 = vld [vmem:[#allocation32_spill] sm:$0xff]  ;;  %v13090_v62 = vld [vmem:[#allocation169_spill] sm:$0xff] }
 0x1d6   :  { %2204 = vmatpush.msra.mxu3 %v9626_v57  ;;  %2286 = vmatpush.msrb.mxu0 %v13083_v42  ;;  %v13091_v57 = vld [vmem:[#allocation70_spill] sm:$0xff] }
 0x1d7   :  { %2139 = vmatpush.msra.mxu2 %v13084_v54  ;;  %2361 = vmatpush.msrb.mxu1 %v13085_v38  ;;  %v13092_v54 = vld [vmem:[#allocation39_spill] sm:$0xff]  ;;  %v13093_v38 = vld [vmem:[#allocation174_spill] sm:$0xff] }
 0x1d8   :  { %2206 = vmatpush.msra.mxu3 %v9642_v63  ;;  %2288 = vmatpush.msrb.mxu0 %v13086_v6  ;;  %v13094_v63 = vld [vmem:[#allocation73_spill] sm:$0xff] }
 0x1d9   :  { %2143 = vmatpush.msra.mxu2 %v13087_v36  ;;  %2367 = vmatpush.msrb.mxu1 %v13088_v22  ;;  %v13095_v36 = vld [vmem:[#allocation41_spill] sm:$0xff]  ;;  %v13096_v22 = vld [vmem:[#allocation178_spill] sm:$0xff] }
 0x1da   :  { %2208 = vmatpush.msra.mxu3 %v13055_v11  ;;  %2290 = vmatpush.msrb.mxu0 %v13089_v25  ;;  %v13097_v11 = vld [vmem:[#allocation78_spill] sm:$0xff] }
 0x1db   :  { %2147 = vmatpush.msra.mxu2 %v13090_v62  ;;  %2373 = vmatpush.msrb.mxu1 %v13091_v57  ;;  %v13098_v62 = vld [vmem:[#allocation45_spill] sm:$0xff]  ;;  %v13099_v57 = vld [vmem:[#allocation182_spill] sm:$0xff] }
 0x1dc   :  { %2210 = vmatpush.msra.mxu3 %v13058_v37  ;;  %2292 = vmatpush.msrb.mxu0 %v13092_v54  ;;  %v13100_v37 = vld [vmem:[#allocation80_spill] sm:$0xff] }
 0x1dd   :  { %2151 = vmatpush.msra.mxu2 %v13093_v38  ;;  %2379 = vmatpush.msrb.mxu1 %v13094_v63  ;;  %v13101_v38 = vld [vmem:[#allocation46_spill] sm:$0xff] }
 0x1de   :  { %2212 = vmatpush.msra.mxu3 %v13061_v35  ;;  %2294 = vmatpush.msrb.mxu0 %v13095_v36  ;;  %v13102_v63 = vld [vmem:[#allocation186_spill] sm:$0xff]  ;;  %v13110_v35 = vld [vmem:[#allocation196_spill] sm:$0xff] }
 0x1df   :  { %2155 = vmatpush.msra.mxu2 %v13096_v22  ;;  %2385 = vmatpush.msrb.mxu1 %v13097_v11  ;;  %v13103_v22 = vld [vmem:[#allocation84_spill] sm:$0xff]  ;;  %v13104_v11 = vld [vmem:[#allocation190_spill] sm:$0xff] }
 0x1e0   :  { %2214 = vmatpush.msra.mxu3 %v13063_v34  ;;  %2296 = vmatpush.msrb.mxu0 %v13098_v62  ;;  %v13105_v34 = vld [vmem:[#allocation50_spill] sm:$0xff] }
 0x1e1   :  { %2159 = vmatpush.msra.mxu2 %v13099_v57  ;;  %2391 = vmatpush.msrb.mxu1 %v13100_v37  ;;  %v13106_v57 = vld [vmem:[#allocation87_spill] sm:$0xff]  ;;  %v13107_v37 = vld [vmem:[#allocation193_spill] sm:$0xff] }
 0x1e2   :  { %2216 = vmatpush.msra.mxu3 %v13064_v18  ;;  %2298 = vmatpush.msrb.mxu0 %v13101_v38  ;;  %v13108_v18 = vld [vmem:[#allocation57_spill] sm:$0xff] }
 0x1e3   :  { %2163 = vmatpush.msra.mxu2 %v13102_v63  ;;  %2218 = vmatmul.f32.vlgmr.msra.gmra.mxu3 %v9995_v12  ;;  %v13109_v63 = vld [vmem:[#allocation92_spill] sm:$0xff] }
 0x1e4   :  { %2470 = vmatpush.msrb.mxu3 %v13065_v13  ;;  %2397 = vmatpush.msrb.mxu1 %v13103_v22  ;;  %v13112_v22 = vld [vmem:[#allocation198_spill] sm:$0xff] }
 0x1e5   :  { %2167 = vmatpush.msra.mxu2 %v13104_v11  ;;  %2300 = vmatpush.msrb.mxu0 %v13105_v34  ;;  %v13111_v11 = vld [vmem:[#allocation61_spill] sm:$0xff] }
 0x1e6   :  { %2472 = vmatpush.msrb.mxu3 %v13067_v58  ;;  %2403 = vmatpush.msrb.mxu1 %v13106_v57  ;;  %v13117_v57 = vld [vmem:[#allocation20_spill] sm:$0xff] }
 0x1e7   :  { %2171 = vmatpush.msra.mxu2 %v13107_v37  ;;  %2302 = vmatpush.msrb.mxu0 %v13108_v18  ;;  %v13113_v37 = vld [vmem:[#allocation18_spill] sm:$0xff] }
 0x1e8   :  { %2474 = vmatpush.msrb.mxu3 %v13071_v20  ;;  %2409 = vmatpush.msrb.mxu1 %v13109_v63  ;;  %v13115_v63 = vld [vmem:[#allocation19_spill] sm:$0xff] }
 0x1e9   :  { %2175 = vmatpush.msra.mxu2 %v13110_v35  ;;  %2304 = vmatpush.msrb.mxu0 %v13111_v11  ;;  %v13114_v35 = vld [vmem:[#allocation25_spill] sm:$0xff] }
 0x1ea   :  { %2578 = vmatpush.msra.mxu1 %v13065_v13  ;;  %2476 = vmatpush.msrb.mxu3 %v13074_v10  ;;  %v1196_v13 = vld [vmem:[#allocation2 + $0x18] sm:$0xff] }
 0x1eb   :  { %2179 = vmatpush.msra.mxu2 %v13112_v22  ;;  %2511 = vmatpush.msra.mxu0 %v13114_v35  ;;  %v13116_v22 = vld [vmem:[#allocation26_spill] sm:$0xff]  ;;  %v13121_v35 = vld [vmem:[#allocation23_spill] sm:$0xff] }
 0x1ec   :  { %2580 = vmatpush.msra.mxu1 %v13067_v58  ;;  %2181 = vmatmul.f32.vlgmr.msra.gmra.mxu2 %v9995_v12  ;;  %v13118_v12 = vld [vmem:[#allocation27_spill] sm:$0xff] }
 0x1ed   :  { %2478 = vmatpush.msrb.mxu3 %v13077_v16  ;;  %2417 = vmatpush.msrb.mxu2 %v13113_v37  ;;  %v13119_v37 = vld [vmem:[#allocation22_spill] sm:$0xff] }
 0x1ee   :  { %2582 = vmatpush.msra.mxu1 %v13071_v20  ;;  %2515 = vmatpush.msra.mxu0 %v13116_v22  ;;  %v13123_v22 = vld [vmem:[#allocation28_spill] sm:$0xff] }
 0x1ef   :  { %2480 = vmatpush.msrb.mxu3 %v13080_v5  ;;  %2420 = vmatpush.msrb.mxu2 %v13115_v63  ;;  %v13120_v63 = vld [vmem:[#allocation29_spill] sm:$0xff] }
 0x1f0   :  { %2584 = vmatpush.msra.mxu1 %v13074_v10  ;;  %2519 = vmatpush.msra.mxu0 %v13118_v12  ;;  %v13125_v12 = vld [vmem:[#allocation31_spill] sm:$0xff] }
 0x1f1   :  { %2482 = vmatpush.msrb.mxu3 %v13083_v42  ;;  %2423 = vmatpush.msrb.mxu2 %v13117_v57  ;;  %v13122_v57 = vld [vmem:[#allocation30_spill] sm:$0xff] }
 0x1f2   :  { %2586 = vmatpush.msra.mxu1 %v13077_v16  ;;  %2523 = vmatpush.msra.mxu0 %v13120_v63  ;;  %v13127_v63 = vld [vmem:[#allocation33_spill] sm:$0xff] }
 0x1f3   :  { %2484 = vmatpush.msrb.mxu3 %v13086_v6  ;;  %2426 = vmatpush.msrb.mxu2 %v13119_v37  ;;  %v13124_v37 = vld [vmem:[#allocation36_spill] sm:$0xff] }
 0x1f4   :  { %2588 = vmatpush.msra.mxu1 %v13080_v5  ;;  %2527 = vmatpush.msra.mxu0 %v13122_v57  ;;  %v13129_v57 = vld [vmem:[#allocation40_spill] sm:$0xff] }
 0x1f5   :  { %2486 = vmatpush.msrb.mxu3 %v13089_v25  ;;  %2429 = vmatpush.msrb.mxu2 %v13121_v35  ;;  %v13126_v35 = vld [vmem:[#allocation37_spill] sm:$0xff] }
 0x1f6   :  { %2590 = vmatpush.msra.mxu1 %v13083_v42  ;;  %2531 = vmatpush.msra.mxu0 %v13124_v37  ;;  %v13131_v37 = vld [vmem:[#allocation44_spill] sm:$0xff] }
 0x1f7   :  { %2488 = vmatpush.msrb.mxu3 %v13092_v54  ;;  %2432 = vmatpush.msrb.mxu2 %v13123_v22  ;;  %v13128_v22 = vld [vmem:[#allocation42_spill] sm:$0xff] }
 0x1f8   :  { %2592 = vmatpush.msra.mxu1 %v13086_v6  ;;  %2535 = vmatpush.msra.mxu0 %v13126_v35  ;;  %v13133_v35 = vld [vmem:[#allocation49_spill] sm:$0xff] }
 0x1f9   :  { %2490 = vmatpush.msrb.mxu3 %v13095_v36  ;;  %2435 = vmatpush.msrb.mxu2 %v13125_v12  ;;  %v13130_v12 = vld [vmem:[#allocation48_spill] sm:$0xff] }
 0x1fa   :  { %2594 = vmatpush.msra.mxu1 %v13089_v25  ;;  %2539 = vmatpush.msra.mxu0 %v13128_v22  ;;  %v13135_v22 = vld [vmem:[#allocation53_spill] sm:$0xff] }
 0x1fb   :  { %2492 = vmatpush.msrb.mxu3 %v13098_v62  ;;  %2438 = vmatpush.msrb.mxu2 %v13127_v63  ;;  %v13132_v63 = vld [vmem:[#allocation52_spill] sm:$0xff] }
 0x1fc   :  { %2596 = vmatpush.msra.mxu1 %v13092_v54  ;;  %2543 = vmatpush.msra.mxu0 %v13130_v12  ;;  %v13138_v12 = vld [vmem:[#allocation55_spill] sm:$0xff] }
 0x1fd   :  { %2494 = vmatpush.msrb.mxu3 %v13101_v38  ;;  %2441 = vmatpush.msrb.mxu2 %v13129_v57  ;;  %v13134_v57 = vld [vmem:[#allocation56_spill] sm:$0xff] }
 0x1fe   :  { %2598 = vmatpush.msra.mxu1 %v13095_v36  ;;  %2547 = vmatpush.msra.mxu0 %v13132_v63  ;;  %v13136_v36 = vld [vmem:[#allocation86_spill] sm:$0xff]  ;;  %v13141_v63 = vld [vmem:[#allocation59_spill] sm:$0xff] }
 0x1ff   :  { %2496 = vmatpush.msrb.mxu3 %v13105_v34  ;;  %2444 = vmatpush.msrb.mxu2 %v13131_v37  ;;  %v13137_v37 = vld [vmem:[#allocation60_spill] sm:$0xff] }
 0x200   :  { %2600 = vmatpush.msra.mxu1 %v13098_v62  ;;  %2551 = vmatpush.msra.mxu0 %v13134_v57  ;;  %v13139_v62 = vld [vmem:[#allocation90_spill] sm:$0xff]  ;;  %v13145_v57 = vld [vmem:[#allocation105_spill] sm:$0xff] }
 0x201   :  { %2498 = vmatpush.msrb.mxu3 %v13108_v18  ;;  %2447 = vmatpush.msrb.mxu2 %v13133_v35  ;;  %v13140_v35 = vld [vmem:[#allocation63_spill] sm:$0xff] }
 0x202   :  { %2602 = vmatpush.msra.mxu1 %v13101_v38  ;;  %2555 = vmatpush.msra.mxu0 %v13137_v37  ;;  %v13142_v38 = vld [vmem:[#allocation96_spill] sm:$0xff]  ;;  %v13146_v37 = vld [vmem:[#allocation74_spill] sm:$0xff] }
 0x203   :  { %2500 = vmatpush.msrb.mxu3 %v13111_v11  ;;  %2450 = vmatpush.msrb.mxu2 %v13135_v22  ;;  %v13143_v22 = vld [vmem:[#allocation68_spill] sm:$0xff] }
 0x204   :  { %2604 = vmatpush.msra.mxu1 %v13105_v34  ;;  %2559 = vmatpush.msra.mxu0 %v13140_v35  ;;  %v13149_v35 = vld [vmem:[#allocation79_spill] sm:$0xff] }
 0x205   :  { %2660 = vmatpush.msra.mxu3 %v13136_v36  ;;  %2453 = vmatpush.msrb.mxu2 %v13138_v12  ;;  %v13144_v36 = vld [vmem:[#allocation66_spill] sm:$0xff]  ;;  %v13147_v12 = vld [vmem:[#allocation71_spill] sm:$0xff] }
 0x206   :  { %2606 = vmatpush.msra.mxu1 %v13108_v18  ;;  %2563 = vmatpush.msra.mxu0 %v13143_v22 }
 0x207   :  { %2666 = vmatpush.msra.mxu3 %v13139_v62  ;;  %2456 = vmatpush.msrb.mxu2 %v13141_v63  ;;  %v13148_v62 = vld [vmem:[#allocation109_spill] sm:$0xff]  ;;  %v13150_v63 = vld [vmem:[#allocation112_spill] sm:$0xff] }
 0x208   :  { %2608 = vmatpush.msra.mxu1 %v13111_v11  ;;  %2567 = vmatpush.msra.mxu0 %v13146_v37  ;;  %v13153_v37 = vld [vmem:[#allocation122_spill] sm:$0xff] }
 0x209   :  { %2672 = vmatpush.msra.mxu3 %v13142_v38  ;;  %2459 = vmatpush.msrb.mxu2 %v13144_v36  ;;  %v13151_v38 = vld [vmem:[#allocation115_spill] sm:$0xff] }
 0x20a   :  { %2571 = vmatpush.msra.mxu0 %v13149_v35  ;;  %v13152_v36 = vld [vmem:[#allocation119_spill] sm:$0xff]  ;;  %v13155_v35 = vld [vmem:[#allocation129_spill] sm:$0xff] }
 0x20b   :  { %2678 = vmatpush.msra.mxu3 %v13145_v57  ;;  %2462 = vmatpush.msrb.mxu2 %v13147_v12  ;;  %v13161_v12 = vld [vmem:[#allocation62_spill] sm:$0xff] }
 0x20d   :  { %2684 = vmatpush.msra.mxu3 %v13148_v62  ;;  %2615 = vmatpush.msra.mxu2 %v9136_v29  ;;  %v13154_v62 = vld [vmem:[#allocation126_spill] sm:$0xff] }
 0x20f   :  { %2690 = vmatpush.msra.mxu3 %v13150_v63  ;;  %2617 = vmatpush.msra.mxu2 %v12960_v48  ;;  %v13156_v63 = vld [vmem:[#allocation133_spill] sm:$0xff] }
 0x211   :  { %2696 = vmatpush.msra.mxu3 %v13151_v38  ;;  %2619 = vmatpush.msra.mxu2 %v12962_v30  ;;  %v13157_v38 = vld [vmem:[#allocation135_spill] sm:$0xff] }
 0x213   :  { %2702 = vmatpush.msra.mxu3 %v13152_v36  ;;  %2621 = vmatpush.msra.mxu2 %v12964_v53  ;;  %v13158_v36 = vld [vmem:[#allocation136_spill] sm:$0xff] }
 0x215   :  { %2708 = vmatpush.msra.mxu3 %v13153_v37  ;;  %2623 = vmatpush.msra.mxu2 %v12967_v26  ;;  %v13159_v37 = vld [vmem:[#allocation137_spill] sm:$0xff] }
 0x217   :  { %2714 = vmatpush.msra.mxu3 %v13154_v62  ;;  %2625 = vmatpush.msra.mxu2 %v12970_v2  ;;  %v13160_v62 = vld [vmem:[#allocation138_spill] sm:$0xff] }
 0x219   :  { %2720 = vmatpush.msra.mxu3 %v13155_v35  ;;  %2627 = vmatpush.msra.mxu2 %v12973_v7  ;;  %v1237_v35 = vpop.f32.mrf.mxu2 }
 0x21a   :  { %v1238_v57 = vadd.f32 %v1237_v35, %v13161_v12 }
 0x21b   :  { %2726 = vmatpush.msra.mxu3 %v13156_v63  ;;  %2629 = vmatpush.msra.mxu2 %v12976_v32  ;;  %v1392_v63 = vpop.f32.mrf.mxu0 }
 0x21d   :  { %2732 = vmatpush.msra.mxu3 %v13157_v38  ;;  %2631 = vmatpush.msra.mxu2 %v12979_v44  ;;  %v1431_v38 = vpop.f32.mrf.mxu1 }
 0x21f   :  { %2738 = vmatpush.msra.mxu3 %v13158_v36  ;;  %2633 = vmatpush.msra.mxu2 %v12982_v46  ;;  %v1338_v36 = vpop.f32.mrf.mxu3 }
 0x221   :  { %2744 = vmatpush.msra.mxu3 %v13159_v37  ;;  %2635 = vmatpush.msra.mxu2 %v12985_v52  ;;  %v1339_v37 = vadd.f32 %v1338_v36, %v1238_v57  ;;  %v1500_v22 = vpop.f32.mrf.mxu2 }
 0x223   :  { %2750 = vmatpush.msra.mxu3 %v13160_v62  ;;  %2637 = vmatpush.msra.mxu2 %v12988_v55  ;;  %v1578_v11 = vpop.f32.mrf.mxu0  ;;  %v1393_v62 = vadd.f32 %v1392_v63, %v1339_v37  ;;  %v1197_v63 = vld [vmem:[#allocation2 + $0x20] sm:$0xff] }
 0x224   :  { %v1579_v18 = vadd.f32 %v1578_v11, %v9984_v4 }
 0x225   :  { %2639 = vmatpush.msra.mxu2 %v12991_v15  ;;  %v1679_v34 = vpop.f32.mrf.mxu1  ;;  %v1432_v25 = vadd.f32 %v1431_v38, %v1393_v62 }
 0x226   :  { %v1680_v42 = vadd.f32 %v1679_v34, %v1579_v18 }
 0x227   :  { %2641 = vmatpush.msra.mxu2 %v12995_v24  ;;  %v1537_v54 = vpop.f32.mrf.mxu3  ;;  %v1501_v16 = vadd.f32 %v1500_v22, %v1432_v25 }
 0x229   :  { %2643 = vmatpush.msra.mxu2 %v12998_v40  ;;  %v1538_v58 = vadd.f32 %v1537_v54, %v1501_v16 }
 0x22b   :  { %2645 = vmatpush.msra.mxu2 %v13001_v1  ;;  %v1841_v35 = vpop.f32.mrf.mxu0  ;;  %v2222_v39 = vadd.f32 %v1538_v58, %v1196_v13 }
 0x22d   :  { %v1878_v57 = vpop.f32.mrf.mxu1  ;;  %v8734_v3 = vmul.f32 -1.442695, %v2222_v39 }
 0x22e   :  { %v1733_v6 = vpop.f32.mrf.mxu2 }
 0x22f   :  { %v1734_v5 = vadd.f32 %v1733_v6, %v1680_v42  ;;  %v1772_v10 = vpop.f32.mrf.mxu3  ;;  %8765 = vpow2.f32 %v8734_v3 }
 0x231   :  { %v1773_v20 = vadd.f32 %v1772_v10, %v1734_v5 }
 0x233   :  { %v1842_v12 = vadd.f32 %v1841_v35, %v1773_v20 }
 0x235   :  { %v1879_v36 = vadd.f32 %v1878_v57, %v1842_v12  ;;  %v8766_v4 = vpop.eup %8765 }
 0x236   :  { %v2226_v38 = vadd.f32 1.0, %v8766_v4 }
 0x237   :  { %v2242_v37 = vadd.f32 %v1879_v36, %v1197_v63 }
 0x238   :  { %v2238_v12 = vand.u32 2147483648, %v2226_v38  ;;  %vm2232_vm9 = vweird.f32 %v2226_v38  ;;  %v2236_v57 = vand.u32 2147483647, %v2226_v38 }
 0x239   :  { %v8735_v11 = vmul.f32 -1.442695, %v2242_v37 }
 0x23a   :  { %vm2237_vm11 = vcmp.eq.f32.partialorder %v2236_v57, 8.507059e+37 }
 0x23b   :  { %8767 = vpow2.f32 %v8735_v11 }
 0x23c   :  { %8769 = vrcp.f32 %v2226_v38 }
 0x241   :  { %v8768_v62 = vpop.eup %8767 }
 0x242   :  { %v2246_v34 = vadd.f32 1.0, %v8768_v62  ;;  %v8770_v25 = vpop.eup %8769  ;;  %v2074_v3 = vpop.f32.mrf.mxu0 }
 0x243   :  { %v2228_v10 = vmul.f32 %v8770_v25, %v2226_v38  ;;  %vm2233_vm8 = vweird.f32 %v8770_v25 }
 0x244   :  { %8771 = vrcp.f32 %v2246_v34  ;;  %vm2234_vm10 = vmor %vm2232_vm9, %vm2233_vm8  ;;  %vm2252_vm13 = vweird.f32 %v2246_v34 }
 0x245   :  { %v2229_v16 = vsub.f32 1.0, %v2228_v10  ;;  %v2113_v4 = vpop.f32.mrf.mxu1 }
 0x246   :  { %v2020_v58 = vpop.f32.mrf.mxu3 }
 0x247   :  { %v2230_v20 = vmul.f32 %v8770_v25, %v2229_v16 }
 0x249   :  { %v2231_v54 = vadd.f32 %v8770_v25, %v2230_v20  ;;  %v2256_v20 = vand.u32 2147483647, %v2246_v34 }
 0x24a   :  { %v8772_v18 = vpop.eup %8771 }
 0x24b   :  { %v2248_v13 = vmul.f32 %v8772_v18, %v2246_v34  ;;  %v2235_v11 = vsel %vm2234_vm10, %v8770_v25, %v2231_v54  ;;  %vm2253_vm12 = vweird.f32 %v8772_v18  ;;  %vm2257_vm15 = vcmp.eq.f32.partialorder %v2256_v20, 8.507059e+37  ;;  %v13173_v20 = vld [vmem:[#allocation111_spill] sm:$0xff] }
 0x24c   :  { %vm2254_vm14 = vmor %vm2252_vm13, %vm2253_vm12 }
 0x24d   :  { %v2249_v6 = vsub.f32 1.0, %v2248_v13 }
 0x24f   :  { %v1919_v5 = vpop.f32.mrf.mxu2  ;;  %v2250_v63 = vmul.f32 %v8772_v18, %v2249_v6 }
 0x250   :  { %v1920_v22 = vadd.f32 %v1919_v5, %v9989_v14  ;;  %v2239_v5 = vor.u32 1.1754944e-38, %v2238_v12 }
 0x252   :  { %v2021_v39 = vadd.f32 %v2020_v58, %v1920_v22  ;;  %v1198_v22 = vld [vmem:[#allocation2 + $0x28] sm:$0xff]  ;;  %v2240_v16 = vsel %vm2237_vm11, %v2239_v5, %v2235_v11  ;;  %v2251_v58 = vadd.f32 %v8772_v18, %v2250_v63  ;;  %v13162_v63 = vld [vmem:[#allocation106_spill] sm:$0xff]  ;;  %v13166_v5 = vld [vmem:[#allocation113_spill] sm:$0xff] }
 0x253   :  { %v13164_v11 = vld [vmem:[#allocation108_spill] sm:$0xff] }
 0x254   :  { %v2075_v42 = vadd.f32 %v2074_v3, %v2021_v39  ;;  %v2258_v39 = vand.u32 2147483648, %v2246_v34  ;;  %v2255_v38 = vsel %vm2254_vm14, %v8772_v18, %v2251_v58  ;;  %v13170_v58 = vld [vmem:[#allocation123_spill] sm:$0xff] }
 0x256   :  { %v2114_v35 = vadd.f32 %v2113_v4, %v2075_v42  ;;  %v2259_v42 = vor.u32 1.1754944e-38, %v2258_v39  ;;  %v13171_v39 = vld [vmem:[#allocation107_spill] sm:$0xff] }
 0x258   :  { %v2260_v6 = vsel %vm2257_vm15, %v2259_v42, %v2255_v38  ;;  %v13175_v38 = vld [vmem:[#allocation117_spill] sm:$0xff]  ;;  %v13176_v42 = vld [vmem:[#allocation132_spill] sm:$0xff] }
 0x259   :  { %v2265_v25 = vsub.f32 1.0, %v2260_v6  ;;  %v2267_v12 = vmul.f32 %v2260_v6, %v9992_v9  ;;  %v13177_v6 = vld [vmem:[#allocation120_spill] sm:$0xff] }
 0x266   :  { %v2219_v62 = vpop.f32.mrf.mxu3 }
 0x26f   :  { %v2182_v36 = vpop.f32.mrf.mxu2 }
 0x270   :  { %v2183_v37 = vadd.f32 %v2182_v36, %v2114_v35 }
 0x272   :  { %v2220_v10 = vadd.f32 %v2219_v62, %v2183_v37  ;;  %v13163_v37 = vld [vmem:[#allocation93_spill] sm:$0xff]  ;;  %v13165_v62 = vld [vmem:[#allocation98_spill] sm:$0xff] }
 0x274   :  { %v2262_v13 = vmul.f32 %v2240_v16, %v2220_v10  ;;  %v13167_v10 = vld [vmem:[#allocation100_spill] sm:$0xff]  ;;  %v13169_v16 = vld [vmem:[#allocation102_spill] sm:$0xff] }
 0x276   :  { %v2263_v3 = vadd.f32 %v2262_v13, %v1198_v22  ;;  %v13168_v22 = vld [vmem:[#allocation116_spill] sm:$0xff]  ;;  %v13172_v13 = vld [vmem:[#allocation127_spill] sm:$0xff] }
 0x278   :  { %8773 = vtanh.f32 %v2263_v3  ;;  %v13174_v3 = vld [vmem:[#allocation130_spill] sm:$0xff] }
 0x27e   :  { %v8774_v54 = vpop.eup %8773 }
 0x27f   :  { %v2266_v4 = vmul.f32 %v8774_v54, %v2265_v25  ;;  %v13178_v25 = vld [vmem:[#allocation158_spill] sm:$0xff] }
 0x280   :  { %v13179_v54 = vld [vmem:[#allocation134_spill] sm:$0xff] }
 0x281   :  { %v10318_v35 = vadd.f32 %v2267_v12, %v2266_v4  ;;  %v13180_v4 = vld [vmem:[#allocation141_spill] sm:$0xff]  ;;  %v13181_v12 = vld [vmem:[#allocation124_spill] sm:$0xff] }
 0x283   :  { %v10321_v57 = vand.u32 4294901760, %v10318_v35 }
 0x285   :  { %2411 = vmatmul.f32.vlgmr.msrb.gmra.mxu1 %v10321_v57  ;;  %v10326_v34 = vsub.f32 %v10318_v35, %v10321_v57 }
 0x286   :  { %2811 = vmatpush.msrb.mxu1 %v9136_v29 }
 0x287   :  { %2465 = vmatmul.f32.vlgmr.msrb.gmra.mxu2 %v10326_v34  ;;  %v10331_v18 = vand.u32 4294901760, %v10326_v34 }
 0x288   :  { %2813 = vmatpush.msrb.mxu1 %v12960_v48  ;;  %2852 = vmatpush.msrb.mxu2 %v13007_v17 }
 0x289   :  { %2504 = vmatmul.f32.vlgmr.msrb.gmra.mxu3 %v10331_v18  ;;  %v2308_v9 = vsub.f32 %v10326_v34, %v10331_v18 }
 0x28a   :  { %2815 = vmatpush.msrb.mxu1 %v12962_v30  ;;  %2856 = vmatpush.msrb.mxu2 %v13008_v43 }
 0x28b   :  { %2919 = vmatpush.msrb.mxu3 %v9136_v29  ;;  %v10341_v36 = vand.u32 4294901760, %v2308_v9  ;;  %v13182_v9 = vld [vmem:[#allocation143_spill] sm:$0xff] }
 0x28c   :  { %2817 = vmatpush.msrb.mxu1 %v12964_v53  ;;  %2860 = vmatpush.msrb.mxu2 %v13009_v61 }
 0x28d   :  { %2921 = vmatpush.msrb.mxu3 %v12960_v48  ;;  %2310 = vmatmul.f32.vlgmr.msrb.gmra.mxu0 %v10341_v36 }
 0x28e   :  { %2610 = vmatmul.f32.vlgmr.msra.gmra.mxu1 %v10321_v57  ;;  %2758 = vmatpush.msrb.mxu0 %v13010_v27 }
 0x28f   :  { %2819 = vmatpush.msrb.mxu1 %v12967_v26  ;;  %2864 = vmatpush.msrb.mxu2 %v13011_v28 }
 0x290   :  { %2923 = vmatpush.msrb.mxu3 %v12962_v30  ;;  %2651 = vmatmul.f32.vlgmr.msra.gmra.mxu2 %v10341_v36 }
 0x291   :  { %2761 = vmatpush.msrb.mxu0 %v13012_v8  ;;  %2821 = vmatpush.msrb.mxu1 %v12970_v2 }
 0x292   :  { %2868 = vmatpush.msrb.mxu2 %v13013_v41  ;;  %2925 = vmatpush.msrb.mxu3 %v12964_v53 }
 0x293   :  { %2752 = vmatmul.f32.vlgmr.msra.gmra.mxu3 %v10321_v57  ;;  %2764 = vmatpush.msrb.mxu0 %v13014_v50 }
 0x294   :  { %2823 = vmatpush.msrb.mxu1 %v12973_v7  ;;  %2872 = vmatpush.msrb.mxu2 %v13015_v56 }
 0x295   :  { %2927 = vmatpush.msrb.mxu3 %v12967_v26  ;;  %2767 = vmatpush.msrb.mxu0 %v13016_v59 }
 0x296   :  { %2825 = vmatpush.msrb.mxu1 %v12976_v32  ;;  %2876 = vmatpush.msrb.mxu2 %v13017_v31 }
 0x297   :  { %2929 = vmatpush.msrb.mxu3 %v12970_v2  ;;  %2573 = vmatmul.f32.vlgmr.msra.gmra.mxu0 %v10321_v57 }
 0x298   :  { %2770 = vmatpush.msrb.mxu0 %v13018_v47  ;;  %2827 = vmatpush.msrb.mxu1 %v12979_v44 }
 0x299   :  { %2880 = vmatpush.msrb.mxu2 %v13162_v63  ;;  %2931 = vmatpush.msrb.mxu3 %v12973_v7 }
 0x29a   :  { %2773 = vmatpush.msrb.mxu0 %v13163_v37  ;;  %2829 = vmatpush.msrb.mxu1 %v12982_v46 }
 0x29b   :  { %2884 = vmatpush.msrb.mxu2 %v13164_v11  ;;  %2933 = vmatpush.msrb.mxu3 %v12976_v32 }
 0x29c   :  { %2776 = vmatpush.msrb.mxu0 %v13165_v62  ;;  %2831 = vmatpush.msrb.mxu1 %v12985_v52 }
 0x29d   :  { %2888 = vmatpush.msrb.mxu2 %v13166_v5  ;;  %2935 = vmatpush.msrb.mxu3 %v12979_v44 }
 0x29e   :  { %2779 = vmatpush.msrb.mxu0 %v13167_v10  ;;  %2833 = vmatpush.msrb.mxu1 %v12988_v55 }
 0x29f   :  { %2892 = vmatpush.msrb.mxu2 %v13168_v22  ;;  %2937 = vmatpush.msrb.mxu3 %v12982_v46 }
 0x2a0   :  { %2782 = vmatpush.msrb.mxu0 %v13169_v16  ;;  %2835 = vmatpush.msrb.mxu1 %v12991_v15 }
 0x2a1   :  { %2896 = vmatpush.msrb.mxu2 %v13170_v58  ;;  %2939 = vmatpush.msrb.mxu3 %v12985_v52 }
 0x2a2   :  { %2785 = vmatpush.msrb.mxu0 %v13171_v39  ;;  %2837 = vmatpush.msrb.mxu1 %v12995_v24 }
 0x2a3   :  { %2900 = vmatpush.msrb.mxu2 %v13172_v13  ;;  %2941 = vmatpush.msrb.mxu3 %v12988_v55 }
 0x2a4   :  { %2788 = vmatpush.msrb.mxu0 %v13173_v20  ;;  %2839 = vmatpush.msrb.mxu1 %v12998_v40  ;;  %v13216_v20 = vld [vmem:[#allocation191_spill] sm:$0xff] }
 0x2a5   :  { %2904 = vmatpush.msrb.mxu2 %v13174_v3  ;;  %2943 = vmatpush.msrb.mxu3 %v12991_v15  ;;  %v13213_v3 = vld [vmem:[#allocation187_spill] sm:$0xff] }
 0x2a6   :  { %2791 = vmatpush.msrb.mxu0 %v13175_v38  ;;  %2841 = vmatpush.msrb.mxu1 %v13001_v1  ;;  %v13210_v38 = vld [vmem:[#allocation183_spill] sm:$0xff] }
 0x2a7   :  { %2908 = vmatpush.msrb.mxu2 %v13176_v42  ;;  %2945 = vmatpush.msrb.mxu3 %v12995_v24  ;;  %v13207_v42 = vld [vmem:[#allocation179_spill] sm:$0xff] }
 0x2a8   :  { %2845 = vmatmul.f32.vlgmr.msrb.gmra.mxu1 %v10331_v18  ;;  %2794 = vmatpush.msrb.mxu0 %v13177_v6  ;;  %v13204_v6 = vld [vmem:[#allocation175_spill] sm:$0xff] }
 0x2a9   :  { %3001 = vmatpush.msra.mxu1 %v13178_v25  ;;  %2912 = vmatpush.msrb.mxu2 %v13179_v54  ;;  %v13183_v54 = vld [vmem:[#allocation128_spill] sm:$0xff]  ;;  %v13184_v25 = vld [vmem:[#allocation146_spill] sm:$0xff] }
 0x2aa   :  { %2947 = vmatpush.msrb.mxu3 %v12998_v40  ;;  %2914 = vmatmul.f32.vlgmr.msrb.gmra.mxu2 %v10321_v57 }
 0x2ab   :  { %3007 = vmatpush.msra.mxu1 %v13037_v33  ;;  %3099 = vmatpush.msra.mxu2 %v13180_v4  ;;  %v13198_v4 = vld [vmem:[#allocation167_spill] sm:$0xff] }
 0x2ac   :  { %2797 = vmatpush.msrb.mxu0 %v13181_v12  ;;  %2949 = vmatpush.msrb.mxu3 %v13001_v1  ;;  %v13185_v12 = vld [vmem:[#allocation149_spill] sm:$0xff]  ;;  %v13201_v33 = vld [vmem:[#allocation171_spill] sm:$0xff] }
 0x2ad   :  { %2951 = vmatmul.f32.vlgmr.msrb.gmra.mxu3 %v10321_v57  ;;  %3013 = vmatpush.msra.mxu1 %v13040_v21  ;;  %v13195_v21 = vld [vmem:[#allocation161_spill] sm:$0xff] }
 0x2ae   :  { %3102 = vmatpush.msra.mxu2 %v13182_v9  ;;  %3152 = vmatpush.msra.mxu3 %v9518_v49  ;;  %v13192_v9 = vld [vmem:[#allocation157_spill] sm:$0xff] }
 0x2af   :  { %2800 = vmatpush.msrb.mxu0 %v13183_v54  ;;  %3019 = vmatpush.msra.mxu1 %v13043_v60  ;;  %v13186_v54 = vld [vmem:[#allocation153_spill] sm:$0xff] }
 0x2b0   :  { %3105 = vmatpush.msra.mxu2 %v13184_v25  ;;  %3154 = vmatpush.msra.mxu3 %v9524_v51  ;;  %v13187_v25 = vld [vmem:[#allocation144_spill] sm:$0xff]  ;;  %v13188_v60 = vld [vmem:[#allocation181_spill] sm:$0xff] }
 0x2b1   :  { %2803 = vmatpush.msrb.mxu0 %v13044_v19  ;;  %3025 = vmatpush.msra.mxu1 %v13045_v0  ;;  %v13189_v19 = vld [vmem:[#allocation156_spill] sm:$0xff]  ;;  %v13190_v0 = vld [vmem:[#allocation147_spill] sm:$0xff] }
 0x2b2   :  { %2806 = vmatmul.f32.vlgmr.msrb.gmra.mxu0 %v10326_v34  ;;  %3108 = vmatpush.msra.mxu2 %v13185_v12  ;;  %v13191_v12 = vld [vmem:[#allocation185_spill] sm:$0xff] }
 0x2b3   :  { %2956 = vmatpush.msra.mxu0 %v9518_v49  ;;  %3156 = vmatpush.msra.mxu3 %v9533_v23 }
 0x2b4   :  { %3031 = vmatpush.msra.mxu1 %v13046_v45  ;;  %3111 = vmatpush.msra.mxu2 %v13186_v54  ;;  %v13193_v45 = vld [vmem:[#allocation150_spill] sm:$0xff]  ;;  %v13194_v54 = vld [vmem:[#allocation189_spill] sm:$0xff] }
 0x2b5   :  { %2958 = vmatpush.msra.mxu0 %v9524_v51  ;;  %3158 = vmatpush.msra.mxu3 %v13187_v25 }
 0x2b6   :  { %3037 = vmatpush.msra.mxu1 %v13188_v60  ;;  %3114 = vmatpush.msra.mxu2 %v13189_v19  ;;  %v13196_v60 = vld [vmem:[#allocation151_spill] sm:$0xff]  ;;  %v13197_v19 = vld [vmem:[#allocation192_spill] sm:$0xff] }
 0x2b7   :  { %2960 = vmatpush.msra.mxu0 %v9533_v23  ;;  %3160 = vmatpush.msra.mxu3 %v13190_v0 }
 0x2b8   :  { %3043 = vmatpush.msra.mxu1 %v13191_v12  ;;  %3117 = vmatpush.msra.mxu2 %v13192_v9  ;;  %v13199_v12 = vld [vmem:[#allocation154_spill] sm:$0xff]  ;;  %v13200_v9 = vld [vmem:[#allocation195_spill] sm:$0xff] }
 0x2b9   :  { %2962 = vmatpush.msra.mxu0 %v13187_v25  ;;  %3162 = vmatpush.msra.mxu3 %v13193_v45 }
 0x2ba   :  { %3049 = vmatpush.msra.mxu1 %v13194_v54  ;;  %3120 = vmatpush.msra.mxu2 %v13195_v21  ;;  %v13202_v54 = vld [vmem:[#allocation160_spill] sm:$0xff]  ;;  %v13203_v21 = vld [vmem:[#allocation197_spill] sm:$0xff] }
 0x2bb   :  { %2964 = vmatpush.msra.mxu0 %v13190_v0  ;;  %3164 = vmatpush.msra.mxu3 %v13196_v60 }
 0x2bc   :  { %3055 = vmatpush.msra.mxu1 %v13197_v19  ;;  %3123 = vmatpush.msra.mxu2 %v13198_v4  ;;  %v13205_v19 = vld [vmem:[#allocation164_spill] sm:$0xff]  ;;  %v13206_v4 = vld [vmem:[#allocation199_spill] sm:$0xff] }
 0x2bd   :  { %2966 = vmatpush.msra.mxu0 %v13193_v45  ;;  %3166 = vmatpush.msra.mxu3 %v13199_v12 }
 0x2be   :  { %3061 = vmatpush.msra.mxu1 %v13200_v9  ;;  %3126 = vmatpush.msra.mxu2 %v13201_v33  ;;  %v13208_v9 = vld [vmem:[#allocation168_spill] sm:$0xff] }
 0x2bf   :  { %2968 = vmatpush.msra.mxu0 %v13196_v60  ;;  %3168 = vmatpush.msra.mxu3 %v13202_v54  ;;  %v13209_v33 = vld [vmem:[#allocation200_spill] sm:$0xff] }
 0x2c0   :  { %3067 = vmatpush.msra.mxu1 %v13203_v21  ;;  %3129 = vmatpush.msra.mxu2 %v13204_v6  ;;  %v13211_v21 = vld [vmem:[#allocation172_spill] sm:$0xff]  ;;  %v13212_v6 = vld [vmem:[#allocation201_spill] sm:$0xff] }
 0x2c1   :  { %2970 = vmatpush.msra.mxu0 %v13199_v12  ;;  %3170 = vmatpush.msra.mxu3 %v13205_v19 }
 0x2c2   :  { %3073 = vmatpush.msra.mxu1 %v13206_v4  ;;  %3132 = vmatpush.msra.mxu2 %v13207_v42  ;;  %v13214_v4 = vld [vmem:[#allocation176_spill] sm:$0xff]  ;;  %v13215_v42 = vld [vmem:[#allocation202_spill] sm:$0xff] }
 0x2c3   :  { %2972 = vmatpush.msra.mxu0 %v13202_v54  ;;  %3172 = vmatpush.msra.mxu3 %v13208_v9 }
 0x2c4   :  { %3079 = vmatpush.msra.mxu1 %v13209_v33  ;;  %3135 = vmatpush.msra.mxu2 %v13210_v38  ;;  %v13217_v33 = vld [vmem:[#allocation180_spill] sm:$0xff]  ;;  %v13218_v38 = vld [vmem:[#allocation194_spill] sm:$0xff] }
 0x2c5   :  { %2974 = vmatpush.msra.mxu0 %v13205_v19  ;;  %3174 = vmatpush.msra.mxu3 %v13211_v21 }
 0x2c6   :  { %3085 = vmatpush.msra.mxu1 %v13212_v6  ;;  %3138 = vmatpush.msra.mxu2 %v13213_v3  ;;  %v13219_v3 = vld [vmem:[#allocation184_spill] sm:$0xff]  ;;  %v13223_v6 = vld [vmem:[#allocation13_spill] sm:$0xff] }
 0x2c7   :  { %2976 = vmatpush.msra.mxu0 %v13208_v9  ;;  %3176 = vmatpush.msra.mxu3 %v13214_v4 }
 0x2c8   :  { %3091 = vmatpush.msra.mxu1 %v13215_v42  ;;  %3141 = vmatpush.msra.mxu2 %v13216_v20  ;;  %v13220_v20 = vld [vmem:[#allocation188_spill] sm:$0xff] }
 0x2c9   :  { %2978 = vmatpush.msra.mxu0 %v13211_v21  ;;  %3178 = vmatpush.msra.mxu3 %v13217_v33  ;;  %v13221_v42 = vld [vmem:[#allocation12_spill] sm:$0xff] }
 0x2ca   :  { %3093 = vmatmul.f32.vlgmr.msra.gmra.mxu1 %v10321_v57  ;;  %3144 = vmatpush.msra.mxu2 %v13218_v38  ;;  %v13222_v38 = vld [vmem:[#allocation34_spill] sm:$0xff] }
 0x2cb   :  { %3260 = vmatpush.msrb.mxu1 %v9518_v49  ;;  %2980 = vmatpush.msra.mxu0 %v13214_v4  ;;  %v13230_v49 = vld [vmem:[#allocation15_spill] sm:$0xff] }
 0x2cc   :  { %3180 = vmatpush.msra.mxu3 %v13219_v3  ;;  %3147 = vmatmul.f32.vlgmr.msra.gmra.mxu2 %v10326_v34  ;;  %v13224_v34 = vld [vmem:[#allocation35_spill] sm:$0xff] }
 0x2cd   :  { %3262 = vmatpush.msrb.mxu1 %v9524_v51  ;;  %2982 = vmatpush.msra.mxu0 %v13217_v33  ;;  %v13225_v51 = vld [vmem:[#allocation145_spill] sm:$0xff] }
 0x2ce   :  { %3182 = vmatpush.msra.mxu3 %v13220_v20  ;;  %3348 = vmatpush.msrb.mxu2 %v13221_v42 }
 0x2cf   :  { %3186 = vmatmul.f32.vlgmr.msra.gmra.mxu3 %v10331_v18  ;;  %3264 = vmatpush.msrb.mxu1 %v9533_v23  ;;  %v13226_v18 = vld [vmem:[#allocation38_spill] sm:$0xff] }
 0x2d0   :  { %2984 = vmatpush.msra.mxu0 %v13219_v3  ;;  %3393 = vmatpush.msrb.mxu3 %v13222_v38  ;;  %v13227_v23 = vld [vmem:[#allocation14_spill] sm:$0xff]  ;;  %v13228_v38 = vld [vmem:[#allocation148_spill] sm:$0xff] }
 0x2d1   :  { %3266 = vmatpush.msrb.mxu1 %v13187_v25  ;;  %3350 = vmatpush.msrb.mxu2 %v13223_v6  ;;  %v13229_v25 = vld [vmem:[#allocation43_spill] sm:$0xff] }
 0x2d2   :  { %2986 = vmatpush.msra.mxu0 %v13220_v20  ;;  %3399 = vmatpush.msrb.mxu3 %v13224_v34  ;;  %v13231_v34 = vld [vmem:[#allocation152_spill] sm:$0xff] }
 0x2d3   :  { %2992 = vmatmul.f32.vlgmr.msra.gmra.mxu0 %v10341_v36  ;;  %3268 = vmatpush.msrb.mxu1 %v13190_v0  ;;  %v13232_v36 = vld [vmem:[#allocation47_spill] sm:$0xff] }
 0x2d4   :  { %3193 = vmatpush.msrb.mxu0 %v13225_v51  ;;  %3405 = vmatpush.msrb.mxu3 %v13226_v18  ;;  %v13233_v51 = vld [vmem:[#allocation16_spill] sm:$0xff]  ;;  %v13234_v18 = vld [vmem:[#allocation155_spill] sm:$0xff] }
 0x2d5   :  { %3270 = vmatpush.msrb.mxu1 %v13193_v45  ;;  %3352 = vmatpush.msrb.mxu2 %v13227_v23  ;;  %v13235_v45 = vld [vmem:[#allocation51_spill] sm:$0xff] }
 0x2d6   :  { %3197 = vmatpush.msrb.mxu0 %v13228_v38  ;;  %3411 = vmatpush.msrb.mxu3 %v13229_v25  ;;  %v13236_v38 = vld [vmem:[#allocation17_spill] sm:$0xff]  ;;  %v13237_v25 = vld [vmem:[#allocation159_spill] sm:$0xff] }
 0x2d7   :  { %3272 = vmatpush.msrb.mxu1 %v13196_v60  ;;  %3354 = vmatpush.msrb.mxu2 %v13230_v49  ;;  %v13238_v60 = vld [vmem:[#allocation54_spill] sm:$0xff] }
 0x2d8   :  { %3201 = vmatpush.msrb.mxu0 %v13231_v34  ;;  %3417 = vmatpush.msrb.mxu3 %v13232_v36  ;;  %v13239_v34 = vld [vmem:[#allocation21_spill] sm:$0xff]  ;;  %v13240_v36 = vld [vmem:[#allocation163_spill] sm:$0xff] }
 0x2d9   :  { %3274 = vmatpush.msrb.mxu1 %v13199_v12  ;;  %3356 = vmatpush.msrb.mxu2 %v13233_v51  ;;  %v13241_v12 = vld [vmem:[#allocation58_spill] sm:$0xff] }
 0x2da   :  { %3205 = vmatpush.msrb.mxu0 %v13234_v18  ;;  %3423 = vmatpush.msrb.mxu3 %v13235_v45  ;;  %v13242_v18 = vld [vmem:[#allocation24_spill] sm:$0xff]  ;;  %v13243_v45 = vld [vmem:[#allocation165_spill] sm:$0xff] }
 0x2db   :  { %3276 = vmatpush.msrb.mxu1 %v13202_v54  ;;  %3358 = vmatpush.msrb.mxu2 %v13236_v38  ;;  %v13244_v54 = vld [vmem:[#allocation65_spill] sm:$0xff] }
 0x2dc   :  { %3209 = vmatpush.msrb.mxu0 %v13237_v25  ;;  %3429 = vmatpush.msrb.mxu3 %v13238_v60  ;;  %v13245_v25 = vld [vmem:[#allocation32_spill] sm:$0xff]  ;;  %v13246_v60 = vld [vmem:[#allocation169_spill] sm:$0xff] }
 0x2dd   :  { %3278 = vmatpush.msrb.mxu1 %v13205_v19  ;;  %3360 = vmatpush.msrb.mxu2 %v13239_v34  ;;  %v13247_v19 = vld [vmem:[#allocation70_spill] sm:$0xff] }
 0x2de   :  { %3213 = vmatpush.msrb.mxu0 %v13240_v36  ;;  %3435 = vmatpush.msrb.mxu3 %v13241_v12  ;;  %v13248_v36 = vld [vmem:[#allocation39_spill] sm:$0xff]  ;;  %v13249_v12 = vld [vmem:[#allocation174_spill] sm:$0xff] }
 0x2df   :  { %3280 = vmatpush.msrb.mxu1 %v13208_v9  ;;  %3362 = vmatpush.msrb.mxu2 %v13242_v18  ;;  %v13250_v9 = vld [vmem:[#allocation73_spill] sm:$0xff] }
 0x2e0   :  { %3217 = vmatpush.msrb.mxu0 %v13243_v45  ;;  %3441 = vmatpush.msrb.mxu3 %v13244_v54  ;;  %v13251_v45 = vld [vmem:[#allocation41_spill] sm:$0xff]  ;;  %v13252_v54 = vld [vmem:[#allocation178_spill] sm:$0xff] }
 0x2e1   :  { %3282 = vmatpush.msrb.mxu1 %v13211_v21  ;;  %3364 = vmatpush.msrb.mxu2 %v13245_v25  ;;  %v13253_v21 = vld [vmem:[#allocation78_spill] sm:$0xff] }
 0x2e2   :  { %3221 = vmatpush.msrb.mxu0 %v13246_v60  ;;  %3447 = vmatpush.msrb.mxu3 %v13247_v19  ;;  %v13254_v60 = vld [vmem:[#allocation45_spill] sm:$0xff]  ;;  %v13255_v19 = vld [vmem:[#allocation182_spill] sm:$0xff] }
 0x2e3   :  { %3284 = vmatpush.msrb.mxu1 %v13214_v4  ;;  %3366 = vmatpush.msrb.mxu2 %v13248_v36  ;;  %v13256_v4 = vld [vmem:[#allocation80_spill] sm:$0xff] }
 0x2e4   :  { %3225 = vmatpush.msrb.mxu0 %v13249_v12  ;;  %3453 = vmatpush.msrb.mxu3 %v13250_v9  ;;  %v13257_v12 = vld [vmem:[#allocation46_spill] sm:$0xff] }
 0x2e5   :  { %3286 = vmatpush.msrb.mxu1 %v13217_v33  ;;  %3368 = vmatpush.msrb.mxu2 %v13251_v45  ;;  %v13258_v9 = vld [vmem:[#allocation186_spill] sm:$0xff]  ;;  %v13266_v33 = vld [vmem:[#allocation196_spill] sm:$0xff] }
 0x2e6   :  { %3229 = vmatpush.msrb.mxu0 %v13252_v54  ;;  %3459 = vmatpush.msrb.mxu3 %v13253_v21  ;;  %v13259_v54 = vld [vmem:[#allocation84_spill] sm:$0xff]  ;;  %v13260_v21 = vld [vmem:[#allocation190_spill] sm:$0xff] }
 0x2e7   :  { %3288 = vmatpush.msrb.mxu1 %v13219_v3  ;;  %3370 = vmatpush.msrb.mxu2 %v13254_v60  ;;  %v13261_v3 = vld [vmem:[#allocation50_spill] sm:$0xff] }
 0x2e8   :  { %3233 = vmatpush.msrb.mxu0 %v13255_v19  ;;  %3465 = vmatpush.msrb.mxu3 %v13256_v4  ;;  %v13262_v19 = vld [vmem:[#allocation87_spill] sm:$0xff]  ;;  %v13263_v4 = vld [vmem:[#allocation193_spill] sm:$0xff] }
 0x2e9   :  { %3290 = vmatpush.msrb.mxu1 %v13220_v20  ;;  %3372 = vmatpush.msrb.mxu2 %v13257_v12  ;;  %v13264_v20 = vld [vmem:[#allocation57_spill] sm:$0xff] }
 0x2ea   :  { %3237 = vmatpush.msrb.mxu0 %v13258_v9  ;;  %3292 = vmatmul.f32.vlgmr.msrb.gmra.mxu1 %v10321_v57  ;;  %v13265_v9 = vld [vmem:[#allocation92_spill] sm:$0xff] }
 0x2eb   :  { %3544 = vmatpush.msra.mxu1 %v13221_v42  ;;  %3471 = vmatpush.msrb.mxu3 %v13259_v54  ;;  %v13268_v54 = vld [vmem:[#allocation198_spill] sm:$0xff] }
 0x2ec   :  { %3241 = vmatpush.msrb.mxu0 %v13260_v21  ;;  %3374 = vmatpush.msrb.mxu2 %v13261_v3  ;;  %v13267_v21 = vld [vmem:[#allocation61_spill] sm:$0xff] }
 0x2ed   :  { %3546 = vmatpush.msra.mxu1 %v13223_v6  ;;  %3477 = vmatpush.msrb.mxu3 %v13262_v19  ;;  %v13273_v19 = vld [vmem:[#allocation20_spill] sm:$0xff] }
 0x2ee   :  { %3245 = vmatpush.msrb.mxu0 %v13263_v4  ;;  %3376 = vmatpush.msrb.mxu2 %v13264_v20  ;;  %v13269_v4 = vld [vmem:[#allocation18_spill] sm:$0xff] }
 0x2ef   :  { %3548 = vmatpush.msra.mxu1 %v13227_v23  ;;  %3483 = vmatpush.msrb.mxu3 %v13265_v9  ;;  %v13271_v9 = vld [vmem:[#allocation19_spill] sm:$0xff] }
 0x2f0   :  { %3249 = vmatpush.msrb.mxu0 %v13266_v33  ;;  %3378 = vmatpush.msrb.mxu2 %v13267_v21  ;;  %v13270_v33 = vld [vmem:[#allocation25_spill] sm:$0xff] }
 0x2f1   :  { %3652 = vmatpush.msra.mxu3 %v13221_v42  ;;  %3550 = vmatpush.msra.mxu1 %v13230_v49 }
 0x2f2   :  { %3253 = vmatpush.msrb.mxu0 %v13268_v54  ;;  %3585 = vmatpush.msra.mxu2 %v13270_v33  ;;  %v13272_v54 = vld [vmem:[#allocation26_spill] sm:$0xff]  ;;  %v13277_v33 = vld [vmem:[#allocation23_spill] sm:$0xff] }
 0x2f3   :  { %3654 = vmatpush.msra.mxu3 %v13223_v6  ;;  %3255 = vmatmul.f32.vlgmr.msrb.gmra.mxu0 %v10321_v57  ;;  %v13274_v57 = vld [vmem:[#allocation27_spill] sm:$0xff] }
 0x2f4   :  { %3552 = vmatpush.msra.mxu1 %v13233_v51  ;;  %3491 = vmatpush.msra.mxu0 %v13269_v4  ;;  %v13275_v4 = vld [vmem:[#allocation22_spill] sm:$0xff] }
 0x2f5   :  { %3656 = vmatpush.msra.mxu3 %v13227_v23  ;;  %3589 = vmatpush.msra.mxu2 %v13272_v54  ;;  %v13279_v54 = vld [vmem:[#allocation28_spill] sm:$0xff] }
 0x2f6   :  { %3554 = vmatpush.msra.mxu1 %v13236_v38  ;;  %3494 = vmatpush.msra.mxu0 %v13271_v9  ;;  %v13276_v9 = vld [vmem:[#allocation29_spill] sm:$0xff] }
 0x2f7   :  { %3658 = vmatpush.msra.mxu3 %v13230_v49  ;;  %3593 = vmatpush.msra.mxu2 %v13274_v57  ;;  %v13281_v57 = vld [vmem:[#allocation31_spill] sm:$0xff] }
 0x2f8   :  { %3556 = vmatpush.msra.mxu1 %v13239_v34  ;;  %3497 = vmatpush.msra.mxu0 %v13273_v19  ;;  %v13278_v19 = vld [vmem:[#allocation30_spill] sm:$0xff] }
 0x2f9   :  { %3660 = vmatpush.msra.mxu3 %v13233_v51  ;;  %3597 = vmatpush.msra.mxu2 %v13276_v9  ;;  %v13283_v9 = vld [vmem:[#allocation33_spill] sm:$0xff] }
 0x2fa   :  { %3558 = vmatpush.msra.mxu1 %v13242_v18  ;;  %3500 = vmatpush.msra.mxu0 %v13275_v4  ;;  %v13280_v4 = vld [vmem:[#allocation36_spill] sm:$0xff] }
 0x2fb   :  { %3662 = vmatpush.msra.mxu3 %v13236_v38  ;;  %3601 = vmatpush.msra.mxu2 %v13278_v19  ;;  %v13285_v19 = vld [vmem:[#allocation40_spill] sm:$0xff] }
 0x2fc   :  { %3560 = vmatpush.msra.mxu1 %v13245_v25  ;;  %3503 = vmatpush.msra.mxu0 %v13277_v33  ;;  %v13282_v33 = vld [vmem:[#allocation37_spill] sm:$0xff] }
 0x2fd   :  { %3664 = vmatpush.msra.mxu3 %v13239_v34  ;;  %3605 = vmatpush.msra.mxu2 %v13280_v4  ;;  %v13287_v4 = vld [vmem:[#allocation44_spill] sm:$0xff] }
 0x2fe   :  { %3562 = vmatpush.msra.mxu1 %v13248_v36  ;;  %3506 = vmatpush.msra.mxu0 %v13279_v54  ;;  %v13284_v54 = vld [vmem:[#allocation42_spill] sm:$0xff] }
 0x2ff   :  { %3666 = vmatpush.msra.mxu3 %v13242_v18  ;;  %3609 = vmatpush.msra.mxu2 %v13282_v33  ;;  %v13289_v33 = vld [vmem:[#allocation49_spill] sm:$0xff] }
 0x300   :  { %3564 = vmatpush.msra.mxu1 %v13251_v45  ;;  %3509 = vmatpush.msra.mxu0 %v13281_v57  ;;  %v13286_v57 = vld [vmem:[#allocation48_spill] sm:$0xff] }
 0x301   :  { %3668 = vmatpush.msra.mxu3 %v13245_v25  ;;  %3613 = vmatpush.msra.mxu2 %v13284_v54  ;;  %v13291_v54 = vld [vmem:[#allocation53_spill] sm:$0xff] }
 0x302   :  { %3566 = vmatpush.msra.mxu1 %v13254_v60  ;;  %3512 = vmatpush.msra.mxu0 %v13283_v9  ;;  %v13288_v9 = vld [vmem:[#allocation52_spill] sm:$0xff] }
 0x303   :  { %3670 = vmatpush.msra.mxu3 %v13248_v36  ;;  %3617 = vmatpush.msra.mxu2 %v13286_v57  ;;  %v13294_v57 = vld [vmem:[#allocation55_spill] sm:$0xff] }
 0x304   :  { %3568 = vmatpush.msra.mxu1 %v13257_v12  ;;  %3515 = vmatpush.msra.mxu0 %v13285_v19  ;;  %v13290_v19 = vld [vmem:[#allocation56_spill] sm:$0xff] }
 0x305   :  { %3672 = vmatpush.msra.mxu3 %v13251_v45  ;;  %3621 = vmatpush.msra.mxu2 %v13288_v9  ;;  %v13292_v45 = vld [vmem:[#allocation86_spill] sm:$0xff]  ;;  %v13297_v9 = vld [vmem:[#allocation59_spill] sm:$0xff] }
 0x306   :  { %3570 = vmatpush.msra.mxu1 %v13261_v3  ;;  %3518 = vmatpush.msra.mxu0 %v13287_v4  ;;  %v13293_v4 = vld [vmem:[#allocation60_spill] sm:$0xff] }
 0x307   :  { %3674 = vmatpush.msra.mxu3 %v13254_v60  ;;  %3625 = vmatpush.msra.mxu2 %v13290_v19  ;;  %v13295_v60 = vld [vmem:[#allocation90_spill] sm:$0xff]  ;;  %v13301_v19 = vld [vmem:[#allocation105_spill] sm:$0xff] }
 0x308   :  { %3572 = vmatpush.msra.mxu1 %v13264_v20  ;;  %3521 = vmatpush.msra.mxu0 %v13289_v33  ;;  %v13296_v33 = vld [vmem:[#allocation63_spill] sm:$0xff] }
 0x309   :  { %3676 = vmatpush.msra.mxu3 %v13257_v12  ;;  %3629 = vmatpush.msra.mxu2 %v13293_v4  ;;  %v13298_v12 = vld [vmem:[#allocation96_spill] sm:$0xff]  ;;  %v13302_v4 = vld [vmem:[#allocation74_spill] sm:$0xff] }
 0x30a   :  { %3574 = vmatpush.msra.mxu1 %v13267_v21  ;;  %3524 = vmatpush.msra.mxu0 %v13291_v54  ;;  %v13299_v54 = vld [vmem:[#allocation68_spill] sm:$0xff] }
 0x30b   :  { %3678 = vmatpush.msra.mxu3 %v13261_v3  ;;  %3633 = vmatpush.msra.mxu2 %v13296_v33  ;;  %v13305_v33 = vld [vmem:[#allocation79_spill] sm:$0xff] }
 0x30c   :  { %3734 = vmatpush.msrb.mxu1 %v13292_v45  ;;  %3527 = vmatpush.msra.mxu0 %v13294_v57  ;;  %v13300_v45 = vld [vmem:[#allocation66_spill] sm:$0xff]  ;;  %v13303_v57 = vld [vmem:[#allocation71_spill] sm:$0xff] }
 0x30d   :  { %3680 = vmatpush.msra.mxu3 %v13264_v20  ;;  %3637 = vmatpush.msra.mxu2 %v13299_v54  ;;  %v13318_v3 = vld [vmem:[#allocation67_spill] sm:$0xff] }
 0x30e   :  { %3740 = vmatpush.msrb.mxu1 %v13295_v60  ;;  %3530 = vmatpush.msra.mxu0 %v13297_v9  ;;  %v13304_v60 = vld [vmem:[#allocation109_spill] sm:$0xff]  ;;  %v13306_v9 = vld [vmem:[#allocation112_spill] sm:$0xff] }
 0x30f   :  { %3682 = vmatpush.msra.mxu3 %v13267_v21  ;;  %3641 = vmatpush.msra.mxu2 %v13302_v4  ;;  %v13309_v4 = vld [vmem:[#allocation122_spill] sm:$0xff] }
 0x310   :  { %3746 = vmatpush.msrb.mxu1 %v13298_v12  ;;  %3533 = vmatpush.msra.mxu0 %v13300_v45  ;;  %v13307_v12 = vld [vmem:[#allocation115_spill] sm:$0xff] }
 0x311   :  { %3645 = vmatpush.msra.mxu2 %v13305_v33  ;;  %v13308_v45 = vld [vmem:[#allocation119_spill] sm:$0xff]  ;;  %v13311_v33 = vld [vmem:[#allocation129_spill] sm:$0xff] }
 0x312   :  { %3752 = vmatpush.msrb.mxu1 %v13301_v19  ;;  %3536 = vmatpush.msra.mxu0 %v13303_v57  ;;  %v2466_v57 = vpop.f32.mrf.mxu2  ;;  %v13317_v19 = vld [vmem:[#allocation62_spill] sm:$0xff] }
 0x314   :  { %3758 = vmatpush.msrb.mxu1 %v13304_v60  ;;  %3689 = vmatpush.msrb.mxu0 %v9136_v29  ;;  %v13310_v60 = vld [vmem:[#allocation126_spill] sm:$0xff] }
 0x316   :  { %3764 = vmatpush.msrb.mxu1 %v13306_v9  ;;  %3691 = vmatpush.msrb.mxu0 %v12960_v48  ;;  %v13312_v9 = vld [vmem:[#allocation133_spill] sm:$0xff] }
 0x318   :  { %3770 = vmatpush.msrb.mxu1 %v13307_v12  ;;  %3693 = vmatpush.msrb.mxu0 %v12962_v30  ;;  %v13313_v12 = vld [vmem:[#allocation135_spill] sm:$0xff] }
 0x31a   :  { %3776 = vmatpush.msrb.mxu1 %v13308_v45  ;;  %3695 = vmatpush.msrb.mxu0 %v12964_v53  ;;  %v13314_v45 = vld [vmem:[#allocation136_spill] sm:$0xff] }
 0x31c   :  { %3782 = vmatpush.msrb.mxu1 %v13309_v4  ;;  %3697 = vmatpush.msrb.mxu0 %v12967_v26  ;;  %v2311_v4 = vpop.f32.mrf.mxu0 }
 0x31d   :  { %v2312_v54 = vadd.f32 %v2311_v4, %v13317_v19 }
 0x31e   :  { %3788 = vmatpush.msrb.mxu1 %v13310_v60  ;;  %3699 = vmatpush.msrb.mxu0 %v12970_v2  ;;  %v13315_v60 = vld [vmem:[#allocation137_spill] sm:$0xff] }
 0x320   :  { %3794 = vmatpush.msrb.mxu1 %v13311_v33  ;;  %3701 = vmatpush.msrb.mxu0 %v12973_v7  ;;  %v13316_v33 = vld [vmem:[#allocation138_spill] sm:$0xff] }
 0x322   :  { %3800 = vmatpush.msrb.mxu1 %v13312_v9  ;;  %3703 = vmatpush.msrb.mxu0 %v12976_v32  ;;  %v2412_v9 = vpop.f32.mrf.mxu1 }
 0x324   :  { %3806 = vmatpush.msrb.mxu1 %v13313_v12  ;;  %3705 = vmatpush.msrb.mxu0 %v12979_v44  ;;  %v2505_v12 = vpop.f32.mrf.mxu3  ;;  %v2574_v21 = vpop.f32.mrf.mxu0 }
 0x326   :  { %3812 = vmatpush.msrb.mxu1 %v13314_v45  ;;  %3707 = vmatpush.msrb.mxu0 %v12982_v46  ;;  %v2413_v45 = vadd.f32 %v2412_v9, %v2312_v54  ;;  %v2270_v54 = vld [vmem:[#allocation2 + $0x30] sm:$0xff] }
 0x328   :  { %3818 = vmatpush.msrb.mxu1 %v13315_v60  ;;  %3709 = vmatpush.msrb.mxu0 %v12985_v52  ;;  %v2652_v60 = vpop.f32.mrf.mxu2  ;;  %v2467_v20 = vadd.f32 %v2466_v57, %v2413_v45  ;;  %v2271_v45 = vld [vmem:[#allocation2 + $0x38] sm:$0xff] }
 0x32a   :  { %3824 = vmatpush.msrb.mxu1 %v13316_v33  ;;  %3711 = vmatpush.msrb.mxu0 %v12988_v55  ;;  %v2653_v33 = vadd.f32 %v2652_v60, %v13318_v3  ;;  %v2611_v36 = vpop.f32.mrf.mxu1  ;;  %v2506_v18 = vadd.f32 %v2505_v12, %v2467_v20 }
 0x32c   :  { %3713 = vmatpush.msrb.mxu0 %v12991_v15  ;;  %v2753_v25 = vpop.f32.mrf.mxu3  ;;  %v2575_v38 = vadd.f32 %v2574_v21, %v2506_v18 }
 0x32d   :  { %v2754_v4 = vadd.f32 %v2753_v25, %v2653_v33 }
 0x32e   :  { %3715 = vmatpush.msrb.mxu0 %v12995_v24  ;;  %v2612_v23 = vadd.f32 %v2611_v36, %v2575_v38 }
 0x32f   :  { %v2807_v34 = vpop.f32.mrf.mxu0 }
 0x330   :  { %3717 = vmatpush.msrb.mxu0 %v12998_v40  ;;  %v2808_v19 = vadd.f32 %v2807_v34, %v2754_v4  ;;  %v2915_v9 = vpop.f32.mrf.mxu2  ;;  %v3296_v42 = vadd.f32 %v2612_v23, %v2270_v54 }
 0x332   :  { %3719 = vmatpush.msrb.mxu0 %v13001_v1  ;;  %v2846_v51 = vpop.f32.mrf.mxu1  ;;  %v8736_v1 = vmul.f32 -1.442695, %v3296_v42 }
 0x333   :  { %v2847_v49 = vadd.f32 %v2846_v51, %v2808_v19 }
 0x334   :  { %v2952_v0 = vpop.f32.mrf.mxu3  ;;  %8775 = vpow2.f32 %v8736_v1 }
 0x335   :  { %v2916_v6 = vadd.f32 %v2915_v9, %v2847_v49 }
 0x337   :  { %v2953_v40 = vadd.f32 %v2952_v0, %v2916_v6 }
 0x339   :  { %v3316_v57 = vadd.f32 %v2953_v40, %v2271_v45 }
 0x33a   :  { %v8776_v3 = vpop.eup %8775 }
 0x33b   :  { %v8737_v60 = vmul.f32 -1.442695, %v3316_v57  ;;  %v3300_v20 = vadd.f32 1.0, %v8776_v3 }
 0x33d   :  { %8777 = vpow2.f32 %v8737_v60  ;;  %v3312_v36 = vand.u32 2147483648, %v3300_v20  ;;  %vm3306_vm1 = vweird.f32 %v3300_v20  ;;  %v3310_v54 = vand.u32 2147483647, %v3300_v20 }
 0x33e   :  { %8779 = vrcp.f32 %v3300_v20 }
 0x33f   :  { %vm3311_vm3 = vcmp.eq.f32.partialorder %v3310_v54, 8.507059e+37 }
 0x343   :  { %v8778_v33 = vpop.eup %8777 }
 0x344   :  { %v3320_v21 = vadd.f32 1.0, %v8778_v33  ;;  %v8780_v25 = vpop.eup %8779 }
 0x345   :  { %v3302_v19 = vmul.f32 %v8780_v25, %v3300_v20  ;;  %vm3307_vm0 = vweird.f32 %v8780_v25 }
 0x346   :  { %8781 = vrcp.f32 %v3320_v21  ;;  %vm3308_vm2 = vmor %vm3306_vm1, %vm3307_vm0  ;;  %vm3326_vm5 = vweird.f32 %v3320_v21 }
 0x347   :  { %v3303_v38 = vsub.f32 1.0, %v3302_v19  ;;  %v3094_v0 = vpop.f32.mrf.mxu1 }
 0x349   :  { %v3304_v40 = vmul.f32 %v8780_v25, %v3303_v38  ;;  %v2272_v38 = vld [vmem:[#allocation2 + $0x40] sm:$0xff] }
 0x34b   :  { %v3305_v18 = vadd.f32 %v8780_v25, %v3304_v40  ;;  %v3330_v40 = vand.u32 2147483647, %v3320_v21 }
 0x34c   :  { %v8782_v23 = vpop.eup %8781 }
 0x34d   :  { %v3322_v6 = vmul.f32 %v8782_v23, %v3320_v21  ;;  %v3309_v60 = vsel %vm3308_vm2, %v8780_v25, %v3305_v18  ;;  %vm3327_vm4 = vweird.f32 %v8782_v23  ;;  %vm3331_vm7 = vcmp.eq.f32.partialorder %v3330_v40, 8.507059e+37  ;;  %v13330_v40 = vld [vmem:[#allocation124_spill] sm:$0xff] }
 0x34e   :  { %vm3328_vm6 = vmor %vm3326_vm5, %vm3327_vm4 }
 0x34f   :  { %v3148_v1 = vpop.f32.mrf.mxu2  ;;  %v3323_v34 = vsub.f32 1.0, %v3322_v6 }
 0x350   :  { %v2993_v51 = vpop.f32.mrf.mxu0 }
 0x351   :  { %v2994_v49 = vadd.f32 %v2993_v51, %v9989_v14  ;;  %v3324_v9 = vmul.f32 %v8782_v23, %v3323_v34  ;;  %v3313_v51 = vor.u32 1.1754944e-38, %v3312_v36 }
 0x352   :  { %v3187_v3 = vpop.f32.mrf.mxu3 }
 0x353   :  { %v3095_v42 = vadd.f32 %v3094_v0, %v2994_v49  ;;  %v3325_v49 = vadd.f32 %v8782_v23, %v3324_v9  ;;  %v3314_v0 = vsel %vm3311_vm3, %v3313_v51, %v3309_v60  ;;  %v13321_v60 = vld [vmem:[#allocation130_spill] sm:$0xff]  ;;  %v13323_v51 = vld [vmem:[#allocation125_spill] sm:$0xff] }
 0x355   :  { %v3149_v12 = vadd.f32 %v3148_v1, %v3095_v42  ;;  %v3332_v42 = vand.u32 2147483648, %v3320_v21  ;;  %v3329_v20 = vsel %vm3328_vm6, %v8782_v23, %v3325_v49  ;;  %v13325_v49 = vld [vmem:[#allocation120_spill] sm:$0xff] }
 0x357   :  { %v3188_v4 = vadd.f32 %v3187_v3, %v3149_v12  ;;  %v3333_v12 = vor.u32 1.1754944e-38, %v3332_v42  ;;  %v13328_v42 = vld [vmem:[#allocation162_spill] sm:$0xff] }
 0x359   :  { %v3334_v34 = vsel %vm3331_vm7, %v3333_v12, %v3329_v20  ;;  %v13332_v20 = vld [vmem:[#allocation143_spill] sm:$0xff] }
 0x35a   :  { %v3339_v25 = vsub.f32 1.0, %v3334_v34  ;;  %v3341_v36 = vmul.f32 %v3334_v34, %v10318_v35  ;;  %v13333_v12 = vld [vmem:[#allocation139_spill] sm:$0xff]  ;;  %v13334_v34 = vld [vmem:[#allocation128_spill] sm:$0xff] }
 0x367   :  { %v3293_v33 = vpop.f32.mrf.mxu1 }
 0x370   :  { %v3256_v45 = vpop.f32.mrf.mxu0 }
 0x371   :  { %v3257_v57 = vadd.f32 %v3256_v45, %v3188_v4  ;;  %v13319_v45 = vld [vmem:[#allocation111_spill] sm:$0xff] }
 0x373   :  { %v3294_v19 = vadd.f32 %v3293_v33, %v3257_v57  ;;  %v13320_v57 = vld [vmem:[#allocation121_spill] sm:$0xff] }
 0x374   :  { %v13322_v33 = vld [vmem:[#allocation117_spill] sm:$0xff] }
 0x375   :  { %v3336_v6 = vmul.f32 %v3314_v0, %v3294_v19  ;;  %v13324_v19 = vld [vmem:[#allocation132_spill] sm:$0xff]  ;;  %v13327_v0 = vld [vmem:[#allocation134_spill] sm:$0xff] }
 0x377   :  { %v3337_v1 = vadd.f32 %v3336_v6, %v2272_v38  ;;  %v13326_v38 = vld [vmem:[#allocation158_spill] sm:$0xff]  ;;  %v13329_v6 = vld [vmem:[#allocation141_spill] sm:$0xff] }
 0x379   :  { %8783 = vtanh.f32 %v3337_v1  ;;  %v13331_v1 = vld [vmem:[#allocation166_spill] sm:$0xff] }
 0x37f   :  { %v8784_v18 = vpop.eup %8783 }
 0x380   :  { %v3340_v3 = vmul.f32 %v8784_v18, %v3339_v25  ;;  %v13335_v25 = vld [vmem:[#allocation170_spill] sm:$0xff] }
 0x381   :  { %v13336_v18 = vld [vmem:[#allocation146_spill] sm:$0xff] }
 0x382   :  { %v10644_v4 = vadd.f32 %v3341_v36, %v3340_v3  ;;  %v13337_v3 = vld [vmem:[#allocation140_spill] sm:$0xff]  ;;  %v13338_v36 = vld [vmem:[#allocation131_spill] sm:$0xff] }
 0x384   :  { %v10647_v54 = vand.u32 4294901760, %v10644_v4 }
 0x386   :  { %3485 = vmatmul.f32.vlgmr.msrb.gmra.mxu3 %v10647_v54  ;;  %v10652_v21 = vsub.f32 %v10644_v4, %v10647_v54 }
 0x387   :  { %3885 = vmatpush.msrb.mxu3 %v9136_v29 }
 0x388   :  { %3539 = vmatmul.f32.vlgmr.msra.gmra.mxu0 %v10652_v21  ;;  %v10657_v23 = vand.u32 4294901760, %v10652_v21 }
 0x389   :  { %3887 = vmatpush.msrb.mxu3 %v12960_v48  ;;  %3926 = vmatpush.msra.mxu0 %v13007_v17 }
 0x38a   :  { %3578 = vmatmul.f32.vlgmr.msra.gmra.mxu1 %v10657_v23  ;;  %v3382_v35 = vsub.f32 %v10652_v21, %v10657_v23 }
 0x38b   :  { %3889 = vmatpush.msrb.mxu3 %v12962_v30  ;;  %3930 = vmatpush.msra.mxu0 %v13008_v43 }
 0x38c   :  { %3993 = vmatpush.msra.mxu1 %v9136_v29  ;;  %v10667_v9 = vand.u32 4294901760, %v3382_v35  ;;  %v13339_v35 = vld [vmem:[#allocation173_spill] sm:$0xff] }
 0x38d   :  { %3891 = vmatpush.msrb.mxu3 %v12964_v53  ;;  %3934 = vmatpush.msra.mxu0 %v13009_v61 }
 0x38e   :  { %3995 = vmatpush.msra.mxu1 %v12960_v48  ;;  %3384 = vmatmul.f32.vlgmr.msrb.gmra.mxu2 %v10667_v9 }
 0x38f   :  { %3684 = vmatmul.f32.vlgmr.msra.gmra.mxu3 %v10647_v54  ;;  %3832 = vmatpush.msrb.mxu2 %v13010_v27 }
 0x390   :  { %3893 = vmatpush.msrb.mxu3 %v12967_v26  ;;  %3938 = vmatpush.msra.mxu0 %v13011_v28 }
 0x391   :  { %3997 = vmatpush.msra.mxu1 %v12962_v30  ;;  %3725 = vmatmul.f32.vlgmr.msrb.gmra.mxu0 %v10667_v9 }
 0x392   :  { %3835 = vmatpush.msrb.mxu2 %v13012_v8  ;;  %3895 = vmatpush.msrb.mxu3 %v12970_v2 }
 0x393   :  { %3942 = vmatpush.msra.mxu0 %v13013_v41  ;;  %3999 = vmatpush.msra.mxu1 %v12964_v53 }
 0x394   :  { %3826 = vmatmul.f32.vlgmr.msrb.gmra.mxu1 %v10647_v54  ;;  %3838 = vmatpush.msrb.mxu2 %v13014_v50 }
 0x395   :  { %3897 = vmatpush.msrb.mxu3 %v12973_v7  ;;  %3946 = vmatpush.msra.mxu0 %v13015_v56 }
 0x396   :  { %4001 = vmatpush.msra.mxu1 %v12967_v26  ;;  %3841 = vmatpush.msrb.mxu2 %v13016_v59 }
 0x397   :  { %3899 = vmatpush.msrb.mxu3 %v12976_v32  ;;  %3950 = vmatpush.msra.mxu0 %v13017_v31 }
 0x398   :  { %4003 = vmatpush.msra.mxu1 %v12970_v2  ;;  %3647 = vmatmul.f32.vlgmr.msra.gmra.mxu2 %v10647_v54 }
 0x399   :  { %3844 = vmatpush.msrb.mxu2 %v13018_v47  ;;  %3901 = vmatpush.msrb.mxu3 %v12979_v44 }
 0x39a   :  { %3954 = vmatpush.msra.mxu0 %v13162_v63  ;;  %4005 = vmatpush.msra.mxu1 %v12973_v7 }
 0x39b   :  { %3847 = vmatpush.msrb.mxu2 %v13163_v37  ;;  %3903 = vmatpush.msrb.mxu3 %v12982_v46 }
 0x39c   :  { %3958 = vmatpush.msra.mxu0 %v13164_v11  ;;  %4007 = vmatpush.msra.mxu1 %v12976_v32 }
 0x39d   :  { %3850 = vmatpush.msrb.mxu2 %v13165_v62  ;;  %3905 = vmatpush.msrb.mxu3 %v12985_v52 }
 0x39e   :  { %3962 = vmatpush.msra.mxu0 %v13166_v5  ;;  %4009 = vmatpush.msra.mxu1 %v12979_v44 }
 0x39f   :  { %3853 = vmatpush.msrb.mxu2 %v13167_v10  ;;  %3907 = vmatpush.msrb.mxu3 %v12988_v55 }
 0x3a0   :  { %3966 = vmatpush.msra.mxu0 %v13168_v22  ;;  %4011 = vmatpush.msra.mxu1 %v12982_v46 }
 0x3a1   :  { %3856 = vmatpush.msrb.mxu2 %v13169_v16  ;;  %3909 = vmatpush.msrb.mxu3 %v12991_v15 }
 0x3a2   :  { %3970 = vmatpush.msra.mxu0 %v13170_v58  ;;  %4013 = vmatpush.msra.mxu1 %v12985_v52 }
 0x3a3   :  { %3859 = vmatpush.msrb.mxu2 %v13171_v39  ;;  %3911 = vmatpush.msrb.mxu3 %v12995_v24 }
 0x3a4   :  { %3974 = vmatpush.msra.mxu0 %v13172_v13  ;;  %4015 = vmatpush.msra.mxu1 %v12988_v55 }
 0x3a5   :  { %3862 = vmatpush.msrb.mxu2 %v13319_v45  ;;  %3913 = vmatpush.msrb.mxu3 %v13320_v57  ;;  %v13373_v45 = vld [vmem:[#allocation191_spill] sm:$0xff] }
 0x3a6   :  { %3978 = vmatpush.msra.mxu0 %v13321_v60  ;;  %4017 = vmatpush.msra.mxu1 %v12991_v15  ;;  %v13370_v60 = vld [vmem:[#allocation187_spill] sm:$0xff] }
 0x3a7   :  { %3865 = vmatpush.msrb.mxu2 %v13322_v33  ;;  %3915 = vmatpush.msrb.mxu3 %v13323_v51  ;;  %v13367_v33 = vld [vmem:[#allocation183_spill] sm:$0xff] }
 0x3a8   :  { %3982 = vmatpush.msra.mxu0 %v13324_v19  ;;  %4019 = vmatpush.msra.mxu1 %v12995_v24  ;;  %v13364_v19 = vld [vmem:[#allocation179_spill] sm:$0xff] }
 0x3a9   :  { %3919 = vmatmul.f32.vlgmr.msrb.gmra.mxu3 %v10657_v23  ;;  %3868 = vmatpush.msrb.mxu2 %v13325_v49  ;;  %v13361_v49 = vld [vmem:[#allocation175_spill] sm:$0xff] }
 0x3aa   :  { %4075 = vmatpush.msra.mxu3 %v13326_v38  ;;  %3986 = vmatpush.msra.mxu0 %v13327_v0  ;;  %v13355_v0 = vld [vmem:[#allocation167_spill] sm:$0xff] }
 0x3ab   :  { %4021 = vmatpush.msra.mxu1 %v13320_v57  ;;  %3988 = vmatmul.f32.vlgmr.msra.gmra.mxu0 %v10647_v54  ;;  %v13358_v38 = vld [vmem:[#allocation171_spill] sm:$0xff] }
 0x3ac   :  { %4081 = vmatpush.msra.mxu3 %v13328_v42  ;;  %4173 = vmatpush.msrb.mxu0 %v13329_v6  ;;  %v13349_v6 = vld [vmem:[#allocation157_spill] sm:$0xff] }
 0x3ad   :  { %3871 = vmatpush.msrb.mxu2 %v13330_v40  ;;  %4023 = vmatpush.msra.mxu1 %v13323_v51  ;;  %v13340_v40 = vld [vmem:[#allocation149_spill] sm:$0xff] }
 0x3ae   :  { %4025 = vmatmul.f32.vlgmr.msra.gmra.mxu1 %v10647_v54  ;;  %4087 = vmatpush.msra.mxu3 %v13331_v1  ;;  %v13342_v1 = vld [vmem:[#allocation177_spill] sm:$0xff] }
 0x3af   :  { %4176 = vmatpush.msrb.mxu0 %v13332_v20  ;;  %4226 = vmatpush.msrb.mxu1 %v13333_v12  ;;  %v13341_v20 = vld [vmem:[#allocation142_spill] sm:$0xff]  ;;  %v13352_v42 = vld [vmem:[#allocation161_spill] sm:$0xff] }
 0x3b0   :  { %3874 = vmatpush.msrb.mxu2 %v13334_v34  ;;  %4093 = vmatpush.msra.mxu3 %v13335_v25  ;;  %v13343_v34 = vld [vmem:[#allocation153_spill] sm:$0xff] }
 0x3b1   :  { %4179 = vmatpush.msrb.mxu0 %v13336_v18  ;;  %4228 = vmatpush.msrb.mxu1 %v13337_v3  ;;  %v13344_v18 = vld [vmem:[#allocation144_spill] sm:$0xff]  ;;  %v13345_v25 = vld [vmem:[#allocation181_spill] sm:$0xff] }
 0x3b2   :  { %3877 = vmatpush.msrb.mxu2 %v13338_v36  ;;  %4099 = vmatpush.msra.mxu3 %v13339_v35  ;;  %v13346_v36 = vld [vmem:[#allocation156_spill] sm:$0xff]  ;;  %v13347_v35 = vld [vmem:[#allocation147_spill] sm:$0xff] }
 0x3b3   :  { %3880 = vmatmul.f32.vlgmr.msrb.gmra.mxu2 %v10652_v21  ;;  %4182 = vmatpush.msrb.mxu0 %v13340_v40  ;;  %v13348_v40 = vld [vmem:[#allocation185_spill] sm:$0xff] }
 0x3b4   :  { %4030 = vmatpush.msra.mxu2 %v13333_v12  ;;  %4230 = vmatpush.msrb.mxu1 %v13341_v20 }
 0x3b5   :  { %4105 = vmatpush.msra.mxu3 %v13342_v1  ;;  %4185 = vmatpush.msrb.mxu0 %v13343_v34  ;;  %v13350_v1 = vld [vmem:[#allocation150_spill] sm:$0xff]  ;;  %v13351_v34 = vld [vmem:[#allocation189_spill] sm:$0xff] }
 0x3b6   :  { %4032 = vmatpush.msra.mxu2 %v13337_v3  ;;  %4232 = vmatpush.msrb.mxu1 %v13344_v18 }
 0x3b7   :  { %4111 = vmatpush.msra.mxu3 %v13345_v25  ;;  %4188 = vmatpush.msrb.mxu0 %v13346_v36  ;;  %v13353_v25 = vld [vmem:[#allocation151_spill] sm:$0xff]  ;;  %v13354_v36 = vld [vmem:[#allocation192_spill] sm:$0xff] }
 0x3b8   :  { %4034 = vmatpush.msra.mxu2 %v13341_v20  ;;  %4234 = vmatpush.msrb.mxu1 %v13347_v35 }
 0x3b9   :  { %4117 = vmatpush.msra.mxu3 %v13348_v40  ;;  %4191 = vmatpush.msrb.mxu0 %v13349_v6  ;;  %v13356_v40 = vld [vmem:[#allocation154_spill] sm:$0xff]  ;;  %v13357_v6 = vld [vmem:[#allocation195_spill] sm:$0xff] }
 0x3ba   :  { %4036 = vmatpush.msra.mxu2 %v13344_v18  ;;  %4236 = vmatpush.msrb.mxu1 %v13350_v1 }
 0x3bb   :  { %4123 = vmatpush.msra.mxu3 %v13351_v34  ;;  %4194 = vmatpush.msrb.mxu0 %v13352_v42  ;;  %v13359_v34 = vld [vmem:[#allocation160_spill] sm:$0xff]  ;;  %v13360_v42 = vld [vmem:[#allocation197_spill] sm:$0xff] }
 0x3bc   :  { %4038 = vmatpush.msra.mxu2 %v13347_v35  ;;  %4238 = vmatpush.msrb.mxu1 %v13353_v25 }
 0x3bd   :  { %4129 = vmatpush.msra.mxu3 %v13354_v36  ;;  %4197 = vmatpush.msrb.mxu0 %v13355_v0  ;;  %v13362_v36 = vld [vmem:[#allocation164_spill] sm:$0xff]  ;;  %v13363_v0 = vld [vmem:[#allocation199_spill] sm:$0xff] }
 0x3be   :  { %4040 = vmatpush.msra.mxu2 %v13350_v1  ;;  %4240 = vmatpush.msrb.mxu1 %v13356_v40 }
 0x3bf   :  { %4135 = vmatpush.msra.mxu3 %v13357_v6  ;;  %4200 = vmatpush.msrb.mxu0 %v13358_v38  ;;  %v13365_v6 = vld [vmem:[#allocation168_spill] sm:$0xff] }
 0x3c0   :  { %4042 = vmatpush.msra.mxu2 %v13353_v25  ;;  %4242 = vmatpush.msrb.mxu1 %v13359_v34  ;;  %v13366_v38 = vld [vmem:[#allocation200_spill] sm:$0xff] }
 0x3c1   :  { %4141 = vmatpush.msra.mxu3 %v13360_v42  ;;  %4203 = vmatpush.msrb.mxu0 %v13361_v49  ;;  %v13368_v42 = vld [vmem:[#allocation172_spill] sm:$0xff]  ;;  %v13369_v49 = vld [vmem:[#allocation201_spill] sm:$0xff] }
 0x3c2   :  { %4044 = vmatpush.msra.mxu2 %v13356_v40  ;;  %4244 = vmatpush.msrb.mxu1 %v13362_v36 }
 0x3c3   :  { %4147 = vmatpush.msra.mxu3 %v13363_v0  ;;  %4206 = vmatpush.msrb.mxu0 %v13364_v19  ;;  %v13371_v0 = vld [vmem:[#allocation176_spill] sm:$0xff]  ;;  %v13372_v19 = vld [vmem:[#allocation202_spill] sm:$0xff] }
 0x3c4   :  { %4046 = vmatpush.msra.mxu2 %v13359_v34  ;;  %4246 = vmatpush.msrb.mxu1 %v13365_v6 }
 0x3c5   :  { %4153 = vmatpush.msra.mxu3 %v13366_v38  ;;  %4209 = vmatpush.msrb.mxu0 %v13367_v33  ;;  %v13374_v38 = vld [vmem:[#allocation180_spill] sm:$0xff]  ;;  %v13375_v33 = vld [vmem:[#allocation194_spill] sm:$0xff] }
 0x3c6   :  { %4048 = vmatpush.msra.mxu2 %v13362_v36  ;;  %4248 = vmatpush.msrb.mxu1 %v13368_v42 }
 0x3c7   :  { %4159 = vmatpush.msra.mxu3 %v13369_v49  ;;  %4212 = vmatpush.msrb.mxu0 %v13370_v60  ;;  %v13376_v60 = vld [vmem:[#allocation184_spill] sm:$0xff]  ;;  %v13380_v49 = vld [vmem:[#allocation13_spill] sm:$0xff] }
 0x3c8   :  { %4050 = vmatpush.msra.mxu2 %v13365_v6  ;;  %4250 = vmatpush.msrb.mxu1 %v13371_v0 }
 0x3c9   :  { %4165 = vmatpush.msra.mxu3 %v13372_v19  ;;  %4215 = vmatpush.msrb.mxu0 %v13373_v45  ;;  %v13377_v45 = vld [vmem:[#allocation188_spill] sm:$0xff] }
 0x3ca   :  { %4052 = vmatpush.msra.mxu2 %v13368_v42  ;;  %4252 = vmatpush.msrb.mxu1 %v13374_v38  ;;  %v13378_v19 = vld [vmem:[#allocation12_spill] sm:$0xff] }
 0x3cb   :  { %4167 = vmatmul.f32.vlgmr.msra.gmra.mxu3 %v10647_v54  ;;  %4218 = vmatpush.msrb.mxu0 %v13375_v33  ;;  %v13379_v33 = vld [vmem:[#allocation34_spill] sm:$0xff] }
 0x3cc   :  { %4334 = vmatpush.msrb.mxu3 %v13333_v12  ;;  %4054 = vmatpush.msra.mxu2 %v13371_v0  ;;  %v13387_v12 = vld [vmem:[#allocation15_spill] sm:$0xff] }
 0x3cd   :  { %4254 = vmatpush.msrb.mxu1 %v13376_v60  ;;  %4221 = vmatmul.f32.vlgmr.msrb.gmra.mxu0 %v10652_v21  ;;  %v13381_v21 = vld [vmem:[#allocation35_spill] sm:$0xff] }
 0x3ce   :  { %4336 = vmatpush.msrb.mxu3 %v13337_v3  ;;  %4056 = vmatpush.msra.mxu2 %v13374_v38  ;;  %v13382_v3 = vld [vmem:[#allocation145_spill] sm:$0xff] }
 0x3cf   :  { %4256 = vmatpush.msrb.mxu1 %v13377_v45  ;;  %4422 = vmatpush.msra.mxu0 %v13378_v19 }
 0x3d0   :  { %4260 = vmatmul.f32.vlgmr.msrb.gmra.mxu1 %v10657_v23  ;;  %4338 = vmatpush.msrb.mxu3 %v13341_v20  ;;  %v13383_v23 = vld [vmem:[#allocation38_spill] sm:$0xff] }
 0x3d1   :  { %4058 = vmatpush.msra.mxu2 %v13376_v60  ;;  %4467 = vmatpush.msra.mxu1 %v13379_v33  ;;  %v13384_v20 = vld [vmem:[#allocation14_spill] sm:$0xff]  ;;  %v13385_v33 = vld [vmem:[#allocation148_spill] sm:$0xff] }
 0x3d2   :  { %4340 = vmatpush.msrb.mxu3 %v13344_v18  ;;  %4424 = vmatpush.msra.mxu0 %v13380_v49  ;;  %v13386_v18 = vld [vmem:[#allocation43_spill] sm:$0xff] }
 0x3d3   :  { %4060 = vmatpush.msra.mxu2 %v13377_v45  ;;  %4473 = vmatpush.msra.mxu1 %v13381_v21  ;;  %v13388_v21 = vld [vmem:[#allocation152_spill] sm:$0xff] }
 0x3d4   :  { %4066 = vmatmul.f32.vlgmr.msra.gmra.mxu2 %v10667_v9  ;;  %4342 = vmatpush.msrb.mxu3 %v13347_v35  ;;  %v13389_v9 = vld [vmem:[#allocation47_spill] sm:$0xff] }
 0x3d5   :  { %4267 = vmatpush.msrb.mxu2 %v13382_v3  ;;  %4479 = vmatpush.msra.mxu1 %v13383_v23  ;;  %v13390_v3 = vld [vmem:[#allocation16_spill] sm:$0xff]  ;;  %v13391_v23 = vld [vmem:[#allocation155_spill] sm:$0xff] }
 0x3d6   :  { %4344 = vmatpush.msrb.mxu3 %v13350_v1  ;;  %4426 = vmatpush.msra.mxu0 %v13384_v20  ;;  %v13392_v1 = vld [vmem:[#allocation51_spill] sm:$0xff] }
 0x3d7   :  { %4271 = vmatpush.msrb.mxu2 %v13385_v33  ;;  %4485 = vmatpush.msra.mxu1 %v13386_v18  ;;  %v13393_v33 = vld [vmem:[#allocation17_spill] sm:$0xff]  ;;  %v13394_v18 = vld [vmem:[#allocation159_spill] sm:$0xff] }
 0x3d8   :  { %4346 = vmatpush.msrb.mxu3 %v13353_v25  ;;  %4428 = vmatpush.msra.mxu0 %v13387_v12  ;;  %v13395_v25 = vld [vmem:[#allocation54_spill] sm:$0xff]  ;;  %v3344_v35 = vld [vmem:[#allocation2 + $0x48] sm:$0xff] }
 0x3d9   :  { %4275 = vmatpush.msrb.mxu2 %v13388_v21  ;;  %4491 = vmatpush.msra.mxu1 %v13389_v9  ;;  %v13396_v21 = vld [vmem:[#allocation21_spill] sm:$0xff]  ;;  %v13397_v9 = vld [vmem:[#allocation163_spill] sm:$0xff] }
 0x3da   :  { %4348 = vmatpush.msrb.mxu3 %v13356_v40  ;;  %4430 = vmatpush.msra.mxu0 %v13390_v3  ;;  %v13398_v40 = vld [vmem:[#allocation58_spill] sm:$0xff] }
 0x3db   :  { %4279 = vmatpush.msrb.mxu2 %v13391_v23  ;;  %4497 = vmatpush.msra.mxu1 %v13392_v1  ;;  %v13399_v23 = vld [vmem:[#allocation24_spill] sm:$0xff]  ;;  %v13400_v1 = vld [vmem:[#allocation165_spill] sm:$0xff] }
 0x3dc   :  { %4350 = vmatpush.msrb.mxu3 %v13359_v34  ;;  %4432 = vmatpush.msra.mxu0 %v13393_v33  ;;  %v13401_v34 = vld [vmem:[#allocation65_spill] sm:$0xff] }
 0x3dd   :  { %4283 = vmatpush.msrb.mxu2 %v13394_v18  ;;  %4503 = vmatpush.msra.mxu1 %v13395_v25  ;;  %v13402_v18 = vld [vmem:[#allocation32_spill] sm:$0xff]  ;;  %v13403_v25 = vld [vmem:[#allocation169_spill] sm:$0xff] }
 0x3de   :  { %4352 = vmatpush.msrb.mxu3 %v13362_v36  ;;  %4434 = vmatpush.msra.mxu0 %v13396_v21  ;;  %v13404_v36 = vld [vmem:[#allocation70_spill] sm:$0xff] }
 0x3df   :  { %4287 = vmatpush.msrb.mxu2 %v13397_v9  ;;  %4509 = vmatpush.msra.mxu1 %v13398_v40  ;;  %v13405_v9 = vld [vmem:[#allocation39_spill] sm:$0xff]  ;;  %v13406_v40 = vld [vmem:[#allocation174_spill] sm:$0xff] }
 0x3e0   :  { %4354 = vmatpush.msrb.mxu3 %v13365_v6  ;;  %4436 = vmatpush.msra.mxu0 %v13399_v23  ;;  %v13407_v6 = vld [vmem:[#allocation73_spill] sm:$0xff] }
 0x3e1   :  { %4291 = vmatpush.msrb.mxu2 %v13400_v1  ;;  %4515 = vmatpush.msra.mxu1 %v13401_v34  ;;  %v13408_v1 = vld [vmem:[#allocation41_spill] sm:$0xff]  ;;  %v13409_v34 = vld [vmem:[#allocation178_spill] sm:$0xff] }
 0x3e2   :  { %4356 = vmatpush.msrb.mxu3 %v13368_v42  ;;  %4438 = vmatpush.msra.mxu0 %v13402_v18  ;;  %v13410_v42 = vld [vmem:[#allocation78_spill] sm:$0xff] }
 0x3e3   :  { %4295 = vmatpush.msrb.mxu2 %v13403_v25  ;;  %4521 = vmatpush.msra.mxu1 %v13404_v36  ;;  %v13411_v25 = vld [vmem:[#allocation45_spill] sm:$0xff]  ;;  %v13412_v36 = vld [vmem:[#allocation182_spill] sm:$0xff] }
 0x3e4   :  { %4358 = vmatpush.msrb.mxu3 %v13371_v0  ;;  %4440 = vmatpush.msra.mxu0 %v13405_v9  ;;  %v13413_v0 = vld [vmem:[#allocation80_spill] sm:$0xff] }
 0x3e5   :  { %4299 = vmatpush.msrb.mxu2 %v13406_v40  ;;  %4527 = vmatpush.msra.mxu1 %v13407_v6  ;;  %v13414_v40 = vld [vmem:[#allocation46_spill] sm:$0xff] }
 0x3e6   :  { %4360 = vmatpush.msrb.mxu3 %v13374_v38  ;;  %4442 = vmatpush.msra.mxu0 %v13408_v1  ;;  %v13415_v6 = vld [vmem:[#allocation186_spill] sm:$0xff]  ;;  %v13423_v38 = vld [vmem:[#allocation196_spill] sm:$0xff] }
 0x3e7   :  { %4303 = vmatpush.msrb.mxu2 %v13409_v34  ;;  %4533 = vmatpush.msra.mxu1 %v13410_v42  ;;  %v13416_v34 = vld [vmem:[#allocation84_spill] sm:$0xff]  ;;  %v13417_v42 = vld [vmem:[#allocation190_spill] sm:$0xff] }
 0x3e8   :  { %4362 = vmatpush.msrb.mxu3 %v13376_v60  ;;  %4444 = vmatpush.msra.mxu0 %v13411_v25  ;;  %v13418_v60 = vld [vmem:[#allocation50_spill] sm:$0xff] }
 0x3e9   :  { %4307 = vmatpush.msrb.mxu2 %v13412_v36  ;;  %4539 = vmatpush.msra.mxu1 %v13413_v0  ;;  %v13419_v36 = vld [vmem:[#allocation87_spill] sm:$0xff]  ;;  %v13420_v0 = vld [vmem:[#allocation193_spill] sm:$0xff] }
 0x3ea   :  { %4364 = vmatpush.msrb.mxu3 %v13377_v45  ;;  %4446 = vmatpush.msra.mxu0 %v13414_v40  ;;  %v13421_v45 = vld [vmem:[#allocation57_spill] sm:$0xff] }
 0x3eb   :  { %4311 = vmatpush.msrb.mxu2 %v13415_v6  ;;  %4366 = vmatmul.f32.vlgmr.msrb.gmra.mxu3 %v10647_v54  ;;  %v13422_v6 = vld [vmem:[#allocation92_spill] sm:$0xff] }
 0x3ec   :  { %4618 = vmatpush.msra.mxu3 %v13378_v19  ;;  %4545 = vmatpush.msra.mxu1 %v13416_v34  ;;  %v13425_v34 = vld [vmem:[#allocation198_spill] sm:$0xff] }
 0x3ed   :  { %4315 = vmatpush.msrb.mxu2 %v13417_v42  ;;  %4448 = vmatpush.msra.mxu0 %v13418_v60  ;;  %v13424_v42 = vld [vmem:[#allocation61_spill] sm:$0xff] }
 0x3ee   :  { %4620 = vmatpush.msra.mxu3 %v13380_v49  ;;  %4551 = vmatpush.msra.mxu1 %v13419_v36  ;;  %v13430_v36 = vld [vmem:[#allocation20_spill] sm:$0xff] }
 0x3ef   :  { %4319 = vmatpush.msrb.mxu2 %v13420_v0  ;;  %4450 = vmatpush.msra.mxu0 %v13421_v45  ;;  %v13426_v0 = vld [vmem:[#allocation18_spill] sm:$0xff] }
 0x3f0   :  { %4622 = vmatpush.msra.mxu3 %v13384_v20  ;;  %4557 = vmatpush.msra.mxu1 %v13422_v6  ;;  %v13428_v6 = vld [vmem:[#allocation19_spill] sm:$0xff] }
 0x3f1   :  { %4323 = vmatpush.msrb.mxu2 %v13423_v38  ;;  %4452 = vmatpush.msra.mxu0 %v13424_v42  ;;  %v13427_v38 = vld [vmem:[#allocation25_spill] sm:$0xff] }
 0x3f2   :  { %4726 = vmatpush.msrb.mxu1 %v13378_v19  ;;  %4624 = vmatpush.msra.mxu3 %v13387_v12 }
 0x3f3   :  { %4327 = vmatpush.msrb.mxu2 %v13425_v34  ;;  %4659 = vmatpush.msrb.mxu0 %v13427_v38  ;;  %v13429_v34 = vld [vmem:[#allocation26_spill] sm:$0xff]  ;;  %v13434_v38 = vld [vmem:[#allocation23_spill] sm:$0xff] }
 0x3f4   :  { %4728 = vmatpush.msrb.mxu1 %v13380_v49  ;;  %4329 = vmatmul.f32.vlgmr.msrb.gmra.mxu2 %v10647_v54  ;;  %v13431_v54 = vld [vmem:[#allocation27_spill] sm:$0xff] }
 0x3f5   :  { %4626 = vmatpush.msra.mxu3 %v13390_v3  ;;  %4565 = vmatpush.msra.mxu2 %v13426_v0  ;;  %v13432_v0 = vld [vmem:[#allocation22_spill] sm:$0xff] }
 0x3f6   :  { %4730 = vmatpush.msrb.mxu1 %v13384_v20  ;;  %4663 = vmatpush.msrb.mxu0 %v13429_v34  ;;  %v13436_v34 = vld [vmem:[#allocation28_spill] sm:$0xff] }
 0x3f7   :  { %4628 = vmatpush.msra.mxu3 %v13393_v33  ;;  %4568 = vmatpush.msra.mxu2 %v13428_v6  ;;  %v13433_v6 = vld [vmem:[#allocation29_spill] sm:$0xff] }
 0x3f8   :  { %4732 = vmatpush.msrb.mxu1 %v13387_v12  ;;  %4667 = vmatpush.msrb.mxu0 %v13431_v54  ;;  %v13438_v54 = vld [vmem:[#allocation31_spill] sm:$0xff] }
 0x3f9   :  { %4630 = vmatpush.msra.mxu3 %v13396_v21  ;;  %4571 = vmatpush.msra.mxu2 %v13430_v36  ;;  %v13435_v36 = vld [vmem:[#allocation30_spill] sm:$0xff] }
 0x3fa   :  { %4734 = vmatpush.msrb.mxu1 %v13390_v3  ;;  %4671 = vmatpush.msrb.mxu0 %v13433_v6  ;;  %v13440_v6 = vld [vmem:[#allocation33_spill] sm:$0xff] }
 0x3fb   :  { %4632 = vmatpush.msra.mxu3 %v13399_v23  ;;  %4574 = vmatpush.msra.mxu2 %v13432_v0  ;;  %v13437_v0 = vld [vmem:[#allocation36_spill] sm:$0xff] }
 0x3fc   :  { %4736 = vmatpush.msrb.mxu1 %v13393_v33  ;;  %4675 = vmatpush.msrb.mxu0 %v13435_v36  ;;  %v13442_v36 = vld [vmem:[#allocation40_spill] sm:$0xff] }
 0x3fd   :  { %4634 = vmatpush.msra.mxu3 %v13402_v18  ;;  %4577 = vmatpush.msra.mxu2 %v13434_v38  ;;  %v13439_v38 = vld [vmem:[#allocation37_spill] sm:$0xff] }
 0x3fe   :  { %4738 = vmatpush.msrb.mxu1 %v13396_v21  ;;  %4679 = vmatpush.msrb.mxu0 %v13437_v0  ;;  %v13444_v0 = vld [vmem:[#allocation44_spill] sm:$0xff] }
 0x3ff   :  { %4636 = vmatpush.msra.mxu3 %v13405_v9  ;;  %4580 = vmatpush.msra.mxu2 %v13436_v34  ;;  %v13441_v34 = vld [vmem:[#allocation42_spill] sm:$0xff] }
 0x400   :  { %4740 = vmatpush.msrb.mxu1 %v13399_v23  ;;  %4683 = vmatpush.msrb.mxu0 %v13439_v38  ;;  %v13446_v38 = vld [vmem:[#allocation49_spill] sm:$0xff] }
 0x401   :  { %4638 = vmatpush.msra.mxu3 %v13408_v1  ;;  %4583 = vmatpush.msra.mxu2 %v13438_v54  ;;  %v13443_v54 = vld [vmem:[#allocation48_spill] sm:$0xff] }
 0x402   :  { %4742 = vmatpush.msrb.mxu1 %v13402_v18  ;;  %4687 = vmatpush.msrb.mxu0 %v13441_v34  ;;  %v13448_v34 = vld [vmem:[#allocation53_spill] sm:$0xff] }
 0x403   :  { %4640 = vmatpush.msra.mxu3 %v13411_v25  ;;  %4586 = vmatpush.msra.mxu2 %v13440_v6  ;;  %v13445_v6 = vld [vmem:[#allocation52_spill] sm:$0xff] }
 0x404   :  { %4744 = vmatpush.msrb.mxu1 %v13405_v9  ;;  %4691 = vmatpush.msrb.mxu0 %v13443_v54  ;;  %v13451_v54 = vld [vmem:[#allocation55_spill] sm:$0xff] }
 0x405   :  { %4642 = vmatpush.msra.mxu3 %v13414_v40  ;;  %4589 = vmatpush.msra.mxu2 %v13442_v36  ;;  %v13447_v36 = vld [vmem:[#allocation56_spill] sm:$0xff] }
 0x406   :  { %4746 = vmatpush.msrb.mxu1 %v13408_v1  ;;  %4695 = vmatpush.msrb.mxu0 %v13445_v6  ;;  %v13449_v1 = vld [vmem:[#allocation86_spill] sm:$0xff]  ;;  %v13454_v6 = vld [vmem:[#allocation59_spill] sm:$0xff] }
 0x407   :  { %4644 = vmatpush.msra.mxu3 %v13418_v60  ;;  %4592 = vmatpush.msra.mxu2 %v13444_v0  ;;  %v13450_v0 = vld [vmem:[#allocation60_spill] sm:$0xff] }
 0x408   :  { %4748 = vmatpush.msrb.mxu1 %v13411_v25  ;;  %4699 = vmatpush.msrb.mxu0 %v13447_v36  ;;  %v13452_v25 = vld [vmem:[#allocation90_spill] sm:$0xff]  ;;  %v13458_v36 = vld [vmem:[#allocation105_spill] sm:$0xff] }
 0x409   :  { %4646 = vmatpush.msra.mxu3 %v13421_v45  ;;  %4595 = vmatpush.msra.mxu2 %v13446_v38  ;;  %v13453_v38 = vld [vmem:[#allocation63_spill] sm:$0xff] }
 0x40a   :  { %4750 = vmatpush.msrb.mxu1 %v13414_v40  ;;  %4703 = vmatpush.msrb.mxu0 %v13450_v0  ;;  %v13455_v40 = vld [vmem:[#allocation96_spill] sm:$0xff]  ;;  %v13459_v0 = vld [vmem:[#allocation74_spill] sm:$0xff] }
 0x40b   :  { %4648 = vmatpush.msra.mxu3 %v13424_v42  ;;  %4598 = vmatpush.msra.mxu2 %v13448_v34  ;;  %v13456_v34 = vld [vmem:[#allocation68_spill] sm:$0xff] }
 0x40c   :  { %4752 = vmatpush.msrb.mxu1 %v13418_v60  ;;  %4707 = vmatpush.msrb.mxu0 %v13453_v38  ;;  %v13462_v38 = vld [vmem:[#allocation79_spill] sm:$0xff] }
 0x40d   :  { %4808 = vmatpush.msrb.mxu3 %v13449_v1  ;;  %4601 = vmatpush.msra.mxu2 %v13451_v54  ;;  %v13457_v1 = vld [vmem:[#allocation66_spill] sm:$0xff]  ;;  %v13460_v54 = vld [vmem:[#allocation71_spill] sm:$0xff] }
 0x40e   :  { %4754 = vmatpush.msrb.mxu1 %v13421_v45  ;;  %4711 = vmatpush.msrb.mxu0 %v13456_v34  ;;  %v13475_v45 = vld [vmem:[#allocation67_spill] sm:$0xff] }
 0x40f   :  { %4814 = vmatpush.msrb.mxu3 %v13452_v25  ;;  %4604 = vmatpush.msra.mxu2 %v13454_v6  ;;  %v13461_v25 = vld [vmem:[#allocation109_spill] sm:$0xff]  ;;  %v13463_v6 = vld [vmem:[#allocation112_spill] sm:$0xff] }
 0x410   :  { %4756 = vmatpush.msrb.mxu1 %v13424_v42  ;;  %4715 = vmatpush.msrb.mxu0 %v13459_v0  ;;  %v13466_v0 = vld [vmem:[#allocation122_spill] sm:$0xff] }
 0x411   :  { %4820 = vmatpush.msrb.mxu3 %v13455_v40  ;;  %4607 = vmatpush.msra.mxu2 %v13457_v1  ;;  %v13464_v40 = vld [vmem:[#allocation115_spill] sm:$0xff] }
 0x412   :  { %4719 = vmatpush.msrb.mxu0 %v13462_v38  ;;  %v13465_v1 = vld [vmem:[#allocation119_spill] sm:$0xff]  ;;  %v13468_v38 = vld [vmem:[#allocation129_spill] sm:$0xff] }
 0x413   :  { %4826 = vmatpush.msrb.mxu3 %v13458_v36  ;;  %4610 = vmatpush.msra.mxu2 %v13460_v54  ;;  %v13474_v54 = vld [vmem:[#allocation62_spill] sm:$0xff] }
 0x415   :  { %4832 = vmatpush.msrb.mxu3 %v13461_v25  ;;  %4763 = vmatpush.msrb.mxu2 %v9136_v29  ;;  %v13467_v25 = vld [vmem:[#allocation126_spill] sm:$0xff] }
 0x417   :  { %4838 = vmatpush.msrb.mxu3 %v13463_v6  ;;  %4765 = vmatpush.msrb.mxu2 %v12960_v48  ;;  %v13469_v6 = vld [vmem:[#allocation133_spill] sm:$0xff] }
 0x419   :  { %4844 = vmatpush.msrb.mxu3 %v13464_v40  ;;  %4767 = vmatpush.msrb.mxu2 %v12962_v30  ;;  %v13470_v40 = vld [vmem:[#allocation135_spill] sm:$0xff] }
 0x41b   :  { %4850 = vmatpush.msrb.mxu3 %v13465_v1  ;;  %4769 = vmatpush.msrb.mxu2 %v12964_v53  ;;  %v13471_v1 = vld [vmem:[#allocation136_spill] sm:$0xff] }
 0x41d   :  { %4856 = vmatpush.msrb.mxu3 %v13466_v0  ;;  %4771 = vmatpush.msrb.mxu2 %v12967_v26  ;;  %v13472_v0 = vld [vmem:[#allocation137_spill] sm:$0xff] }
 0x41f   :  { %4862 = vmatpush.msrb.mxu3 %v13467_v25  ;;  %4773 = vmatpush.msrb.mxu2 %v12970_v2  ;;  %v13473_v25 = vld [vmem:[#allocation138_spill] sm:$0xff] }
 0x421   :  { %4868 = vmatpush.msrb.mxu3 %v13468_v38  ;;  %4775 = vmatpush.msrb.mxu2 %v12973_v7  ;;  %v3385_v38 = vpop.f32.mrf.mxu2 }
 0x422   :  { %v3386_v36 = vadd.f32 %v3385_v38, %v13474_v54 }
 0x423   :  { %4874 = vmatpush.msrb.mxu3 %v13469_v6  ;;  %4777 = vmatpush.msrb.mxu2 %v12976_v32  ;;  %v3540_v6 = vpop.f32.mrf.mxu0 }
 0x425   :  { %4880 = vmatpush.msrb.mxu3 %v13470_v40  ;;  %4779 = vmatpush.msrb.mxu2 %v12979_v44  ;;  %v3579_v40 = vpop.f32.mrf.mxu1 }
 0x427   :  { %4886 = vmatpush.msrb.mxu3 %v13471_v1  ;;  %4781 = vmatpush.msrb.mxu2 %v12982_v46  ;;  %v3486_v1 = vpop.f32.mrf.mxu3 }
 0x429   :  { %4892 = vmatpush.msrb.mxu3 %v13472_v0  ;;  %4783 = vmatpush.msrb.mxu2 %v12985_v52  ;;  %v3487_v0 = vadd.f32 %v3486_v1, %v3386_v36  ;;  %v3648_v34 = vpop.f32.mrf.mxu2 }
 0x42b   :  { %4898 = vmatpush.msrb.mxu3 %v13473_v25  ;;  %4785 = vmatpush.msrb.mxu2 %v12988_v55  ;;  %v3726_v42 = vpop.f32.mrf.mxu0  ;;  %v3541_v25 = vadd.f32 %v3540_v6, %v3487_v0  ;;  %v3345_v0 = vld [vmem:[#allocation2 + $0x50] sm:$0xff] }
 0x42c   :  { %v3727_v60 = vadd.f32 %v3726_v42, %v13475_v45 }
 0x42d   :  { %4787 = vmatpush.msrb.mxu2 %v12991_v15  ;;  %v3827_v9 = vpop.f32.mrf.mxu1  ;;  %v3580_v23 = vadd.f32 %v3579_v40, %v3541_v25 }
 0x42e   :  { %v3828_v33 = vadd.f32 %v3827_v9, %v3727_v60 }
 0x42f   :  { %4789 = vmatpush.msrb.mxu2 %v12995_v24  ;;  %v3685_v18 = vpop.f32.mrf.mxu3  ;;  %v3649_v12 = vadd.f32 %v3648_v34, %v3580_v23 }
 0x431   :  { %4791 = vmatpush.msrb.mxu2 %v13320_v57  ;;  %v3686_v19 = vadd.f32 %v3685_v18, %v3649_v12 }
 0x433   :  { %4793 = vmatpush.msrb.mxu2 %v13323_v51  ;;  %v3989_v38 = vpop.f32.mrf.mxu0  ;;  %v4370_v51 = vadd.f32 %v3686_v19, %v3344_v35 }
 0x435   :  { %v4026_v1 = vpop.f32.mrf.mxu1  ;;  %v8738_v57 = vmul.f32 -1.442695, %v4370_v51 }
 0x436   :  { %v3881_v21 = vpop.f32.mrf.mxu2 }
 0x437   :  { %v3882_v3 = vadd.f32 %v3881_v21, %v3828_v33  ;;  %v3920_v20 = vpop.f32.mrf.mxu3  ;;  %8785 = vpow2.f32 %v8738_v57 }
 0x439   :  { %v3921_v49 = vadd.f32 %v3920_v20, %v3882_v3 }
 0x43b   :  { %v3990_v54 = vadd.f32 %v3989_v38, %v3921_v49 }
 0x43d   :  { %v4027_v36 = vadd.f32 %v4026_v1, %v3990_v54  ;;  %v8786_v45 = vpop.eup %8785 }
 0x43e   :  { %v4374_v40 = vadd.f32 1.0, %v8786_v45 }
 0x43f   :  { %v4390_v6 = vadd.f32 %v4027_v36, %v3345_v0 }
 0x440   :  { %v4386_v54 = vand.u32 2147483648, %v4374_v40  ;;  %vm4380_vm9 = vweird.f32 %v4374_v40  ;;  %v4384_v1 = vand.u32 2147483647, %v4374_v40 }
 0x441   :  { %v8739_v42 = vmul.f32 -1.442695, %v4390_v6 }
 0x442   :  { %vm4385_vm11 = vcmp.eq.f32.partialorder %v4384_v1, 8.507059e+37 }
 0x443   :  { %8787 = vpow2.f32 %v8739_v42 }
 0x444   :  { %8789 = vrcp.f32 %v4374_v40 }
 0x449   :  { %v8788_v60 = vpop.eup %8787 }
 0x44a   :  { %v4394_v33 = vadd.f32 1.0, %v8788_v60  ;;  %v8790_v34 = vpop.eup %8789  ;;  %v4222_v57 = vpop.f32.mrf.mxu0 }
 0x44b   :  { %v4376_v12 = vmul.f32 %v8790_v34, %v4374_v40  ;;  %vm4381_vm8 = vweird.f32 %v8790_v34 }
 0x44c   :  { %8791 = vrcp.f32 %v4394_v33  ;;  %vm4382_vm10 = vmor %vm4380_vm9, %vm4381_vm8  ;;  %vm4400_vm13 = vweird.f32 %v4394_v33 }
 0x44d   :  { %v4377_v25 = vsub.f32 1.0, %v4376_v12  ;;  %v4261_v45 = vpop.f32.mrf.mxu1 }
 0x44e   :  { %v4168_v18 = vpop.f32.mrf.mxu3 }
 0x44f   :  { %v4378_v35 = vmul.f32 %v8790_v34, %v4377_v25 }
 0x451   :  { %v4379_v9 = vadd.f32 %v8790_v34, %v4378_v35  ;;  %v4404_v35 = vand.u32 2147483647, %v4394_v33 }
 0x452   :  { %v8792_v19 = vpop.eup %8791 }
 0x453   :  { %v4396_v3 = vmul.f32 %v8792_v19, %v4394_v33  ;;  %v4383_v42 = vsel %vm4382_vm10, %v8790_v34, %v4379_v9  ;;  %vm4401_vm12 = vweird.f32 %v8792_v19  ;;  %vm4405_vm15 = vcmp.eq.f32.partialorder %v4404_v35, 8.507059e+37  ;;  %v13487_v35 = vld [vmem:[#allocation124_spill] sm:$0xff] }
 0x454   :  { %vm4402_vm14 = vmor %vm4400_vm13, %vm4401_vm12 }
 0x455   :  { %v4397_v23 = vsub.f32 1.0, %v4396_v3 }
 0x457   :  { %v4067_v20 = vpop.f32.mrf.mxu2  ;;  %v4398_v0 = vmul.f32 %v8792_v19, %v4397_v23 }
 0x458   :  { %v4068_v49 = vadd.f32 %v4067_v20, %v9989_v14  ;;  %v4387_v20 = vor.u32 1.1754944e-38, %v4386_v54 }
 0x45a   :  { %v4169_v51 = vadd.f32 %v4168_v18, %v4068_v49  ;;  %v3346_v49 = vld [vmem:[#allocation2 + $0x58] sm:$0xff]  ;;  %v4388_v25 = vsel %vm4385_vm11, %v4387_v20, %v4383_v42  ;;  %v4399_v18 = vadd.f32 %v8792_v19, %v4398_v0  ;;  %v13476_v0 = vld [vmem:[#allocation111_spill] sm:$0xff] }
 0x45b   :  { %v13478_v42 = vld [vmem:[#allocation130_spill] sm:$0xff]  ;;  %v13480_v20 = vld [vmem:[#allocation125_spill] sm:$0xff] }
 0x45c   :  { %v4223_v21 = vadd.f32 %v4222_v57, %v4169_v51  ;;  %v4406_v51 = vand.u32 2147483648, %v4394_v33  ;;  %v4403_v40 = vsel %vm4402_vm14, %v8792_v19, %v4399_v18  ;;  %v13484_v18 = vld [vmem:[#allocation134_spill] sm:$0xff] }
 0x45e   :  { %v4262_v38 = vadd.f32 %v4261_v45, %v4223_v21  ;;  %v4407_v21 = vor.u32 1.1754944e-38, %v4406_v51  ;;  %v13485_v51 = vld [vmem:[#allocation162_spill] sm:$0xff] }
 0x460   :  { %v4408_v23 = vsel %vm4405_vm15, %v4407_v21, %v4403_v40  ;;  %v13489_v40 = vld [vmem:[#allocation143_spill] sm:$0xff] }
 0x461   :  { %v4413_v34 = vsub.f32 1.0, %v4408_v23  ;;  %v4415_v54 = vmul.f32 %v4408_v23, %v10644_v4  ;;  %v13490_v21 = vld [vmem:[#allocation139_spill] sm:$0xff]  ;;  %v13491_v23 = vld [vmem:[#allocation128_spill] sm:$0xff] }
 0x46e   :  { %v4367_v60 = vpop.f32.mrf.mxu3 }
 0x477   :  { %v4330_v36 = vpop.f32.mrf.mxu2 }
 0x478   :  { %v4331_v6 = vadd.f32 %v4330_v36, %v4262_v38 }
 0x47a   :  { %v4368_v12 = vadd.f32 %v4367_v60, %v4331_v6  ;;  %v13477_v6 = vld [vmem:[#allocation121_spill] sm:$0xff] }
 0x47b   :  { %v13479_v60 = vld [vmem:[#allocation117_spill] sm:$0xff] }
 0x47c   :  { %v4410_v3 = vmul.f32 %v4388_v25, %v4368_v12  ;;  %v13481_v12 = vld [vmem:[#allocation132_spill] sm:$0xff]  ;;  %v13483_v25 = vld [vmem:[#allocation158_spill] sm:$0xff] }
 0x47e   :  { %v4411_v57 = vadd.f32 %v4410_v3, %v3346_v49  ;;  %v13482_v49 = vld [vmem:[#allocation120_spill] sm:$0xff]  ;;  %v13486_v3 = vld [vmem:[#allocation141_spill] sm:$0xff] }
 0x480   :  { %8793 = vtanh.f32 %v4411_v57  ;;  %v13488_v57 = vld [vmem:[#allocation166_spill] sm:$0xff] }
 0x486   :  { %v8794_v9 = vpop.eup %8793 }
 0x487   :  { %v4414_v45 = vmul.f32 %v8794_v9, %v4413_v34  ;;  %v13492_v34 = vld [vmem:[#allocation170_spill] sm:$0xff] }
 0x488   :  { %v13493_v9 = vld [vmem:[#allocation146_spill] sm:$0xff] }
 0x489   :  { %v10970_v38 = vadd.f32 %v4415_v54, %v4414_v45  ;;  %v13494_v45 = vld [vmem:[#allocation140_spill] sm:$0xff]  ;;  %v13495_v54 = vld [vmem:[#allocation131_spill] sm:$0xff] }
 0x48b   :  { %v10973_v1 = vand.u32 4294901760, %v10970_v38 }
 0x48d   :  { %4559 = vmatmul.f32.vlgmr.msra.gmra.mxu1 %v10973_v1  ;;  %v10978_v33 = vsub.f32 %v10970_v38, %v10973_v1 }
 0x48e   :  { %4959 = vmatpush.msra.mxu1 %v9136_v29 }
 0x48f   :  { %4613 = vmatmul.f32.vlgmr.msra.gmra.mxu2 %v10978_v33  ;;  %v10983_v19 = vand.u32 4294901760, %v10978_v33 }
 0x490   :  { %4961 = vmatpush.msra.mxu1 %v12960_v48  ;;  %5000 = vmatpush.msra.mxu2 %v13007_v17 }
 0x491   :  { %4652 = vmatmul.f32.vlgmr.msra.gmra.mxu3 %v10983_v19  ;;  %v4456_v4 = vsub.f32 %v10978_v33, %v10983_v19 }
 0x492   :  { %4963 = vmatpush.msra.mxu1 %v12962_v30  ;;  %5004 = vmatpush.msra.mxu2 %v13008_v43 }
 0x493   :  { %5067 = vmatpush.msra.mxu3 %v9136_v29  ;;  %v10993_v36 = vand.u32 4294901760, %v4456_v4  ;;  %v13496_v4 = vld [vmem:[#allocation173_spill] sm:$0xff] }
 0x494   :  { %4965 = vmatpush.msra.mxu1 %v12964_v53  ;;  %5008 = vmatpush.msra.mxu2 %v13009_v61 }
 0x495   :  { %5069 = vmatpush.msra.mxu3 %v12960_v48  ;;  %4458 = vmatmul.f32.vlgmr.msra.gmra.mxu0 %v10993_v36 }
 0x496   :  { %4758 = vmatmul.f32.vlgmr.msrb.gmra.mxu1 %v10973_v1  ;;  %4906 = vmatpush.msra.mxu0 %v13010_v27 }
 0x497   :  { %4967 = vmatpush.msra.mxu1 %v12967_v26  ;;  %5012 = vmatpush.msra.mxu2 %v13011_v28 }
 0x498   :  { %5071 = vmatpush.msra.mxu3 %v12962_v30  ;;  %4799 = vmatmul.f32.vlgmr.msrb.gmra.mxu2 %v10993_v36 }
 0x499   :  { %4909 = vmatpush.msra.mxu0 %v13012_v8  ;;  %4969 = vmatpush.msra.mxu1 %v12970_v2 }
 0x49a   :  { %5016 = vmatpush.msra.mxu2 %v13013_v41  ;;  %5073 = vmatpush.msra.mxu3 %v12964_v53 }
 0x49b   :  { %4900 = vmatmul.f32.vlgmr.msrb.gmra.mxu3 %v10973_v1  ;;  %4912 = vmatpush.msra.mxu0 %v13014_v50 }
 0x49c   :  { %4971 = vmatpush.msra.mxu1 %v12973_v7  ;;  %5020 = vmatpush.msra.mxu2 %v13015_v56 }
 0x49d   :  { %5075 = vmatpush.msra.mxu3 %v12967_v26  ;;  %4915 = vmatpush.msra.mxu0 %v13016_v59 }
 0x49e   :  { %4973 = vmatpush.msra.mxu1 %v12976_v32  ;;  %5024 = vmatpush.msra.mxu2 %v13017_v31 }
 0x49f   :  { %5077 = vmatpush.msra.mxu3 %v12970_v2  ;;  %4721 = vmatmul.f32.vlgmr.msrb.gmra.mxu0 %v10973_v1 }
 0x4a0   :  { %4918 = vmatpush.msra.mxu0 %v13018_v47  ;;  %4975 = vmatpush.msra.mxu1 %v12979_v44 }
 0x4a1   :  { %5028 = vmatpush.msra.mxu2 %v13162_v63  ;;  %5079 = vmatpush.msra.mxu3 %v12973_v7 }
 0x4a2   :  { %4921 = vmatpush.msra.mxu0 %v13163_v37  ;;  %4977 = vmatpush.msra.mxu1 %v12982_v46 }
 0x4a3   :  { %5032 = vmatpush.msra.mxu2 %v13164_v11  ;;  %5081 = vmatpush.msra.mxu3 %v12976_v32 }
 0x4a4   :  { %4924 = vmatpush.msra.mxu0 %v13165_v62  ;;  %4979 = vmatpush.msra.mxu1 %v12985_v52 }
 0x4a5   :  { %5036 = vmatpush.msra.mxu2 %v13166_v5  ;;  %5083 = vmatpush.msra.mxu3 %v12979_v44 }
 0x4a6   :  { %4927 = vmatpush.msra.mxu0 %v13167_v10  ;;  %4981 = vmatpush.msra.mxu1 %v12988_v55 }
 0x4a7   :  { %5040 = vmatpush.msra.mxu2 %v13168_v22  ;;  %5085 = vmatpush.msra.mxu3 %v12982_v46 }
 0x4a8   :  { %4930 = vmatpush.msra.mxu0 %v13169_v16  ;;  %4983 = vmatpush.msra.mxu1 %v12991_v15 }
 0x4a9   :  { %5044 = vmatpush.msra.mxu2 %v13170_v58  ;;  %5087 = vmatpush.msra.mxu3 %v12985_v52 }
 0x4aa   :  { %4933 = vmatpush.msra.mxu0 %v13171_v39  ;;  %4985 = vmatpush.msra.mxu1 %v12995_v24 }
 0x4ab   :  { %5048 = vmatpush.msra.mxu2 %v13172_v13  ;;  %5089 = vmatpush.msra.mxu3 %v12988_v55 }
 0x4ac   :  { %4936 = vmatpush.msra.mxu0 %v13476_v0  ;;  %4987 = vmatpush.msra.mxu1 %v13477_v6  ;;  %v13530_v0 = vld [vmem:[#allocation191_spill] sm:$0xff] }
 0x4ad   :  { %5052 = vmatpush.msra.mxu2 %v13478_v42  ;;  %5091 = vmatpush.msra.mxu3 %v12991_v15  ;;  %v13527_v42 = vld [vmem:[#allocation187_spill] sm:$0xff] }
 0x4ae   :  { %4939 = vmatpush.msra.mxu0 %v13479_v60  ;;  %4989 = vmatpush.msra.mxu1 %v13480_v20  ;;  %v13524_v60 = vld [vmem:[#allocation183_spill] sm:$0xff] }
 0x4af   :  { %5056 = vmatpush.msra.mxu2 %v13481_v12  ;;  %5093 = vmatpush.msra.mxu3 %v12995_v24  ;;  %v13521_v12 = vld [vmem:[#allocation179_spill] sm:$0xff] }
 0x4b0   :  { %4993 = vmatmul.f32.vlgmr.msra.gmra.mxu1 %v10983_v19  ;;  %4942 = vmatpush.msra.mxu0 %v13482_v49  ;;  %v13518_v49 = vld [vmem:[#allocation175_spill] sm:$0xff] }
 0x4b1   :  { %5149 = vmatpush.msrb.mxu1 %v13483_v25  ;;  %5060 = vmatpush.msra.mxu2 %v13484_v18  ;;  %v13512_v18 = vld [vmem:[#allocation167_spill] sm:$0xff] }
 0x4b2   :  { %5095 = vmatpush.msra.mxu3 %v13477_v6  ;;  %5062 = vmatmul.f32.vlgmr.msra.gmra.mxu2 %v10973_v1  ;;  %v13515_v25 = vld [vmem:[#allocation171_spill] sm:$0xff] }
 0x4b3   :  { %5155 = vmatpush.msrb.mxu1 %v13485_v51  ;;  %5247 = vmatpush.msrb.mxu2 %v13486_v3  ;;  %v13506_v3 = vld [vmem:[#allocation157_spill] sm:$0xff] }
 0x4b4   :  { %4945 = vmatpush.msra.mxu0 %v13487_v35  ;;  %5097 = vmatpush.msra.mxu3 %v13480_v20  ;;  %v13497_v35 = vld [vmem:[#allocation149_spill] sm:$0xff] }
 0x4b5   :  { %5099 = vmatmul.f32.vlgmr.msra.gmra.mxu3 %v10973_v1  ;;  %5161 = vmatpush.msrb.mxu1 %v13488_v57  ;;  %v13499_v57 = vld [vmem:[#allocation177_spill] sm:$0xff] }
 0x4b6   :  { %5250 = vmatpush.msrb.mxu2 %v13489_v40  ;;  %5300 = vmatpush.msrb.mxu3 %v13490_v21  ;;  %v13498_v40 = vld [vmem:[#allocation142_spill] sm:$0xff]  ;;  %v13509_v51 = vld [vmem:[#allocation161_spill] sm:$0xff] }
 0x4b7   :  { %4948 = vmatpush.msra.mxu0 %v13491_v23  ;;  %5167 = vmatpush.msrb.mxu1 %v13492_v34  ;;  %v13500_v23 = vld [vmem:[#allocation153_spill] sm:$0xff] }
 0x4b8   :  { %5253 = vmatpush.msrb.mxu2 %v13493_v9  ;;  %5302 = vmatpush.msrb.mxu3 %v13494_v45  ;;  %v13501_v9 = vld [vmem:[#allocation144_spill] sm:$0xff]  ;;  %v13502_v34 = vld [vmem:[#allocation181_spill] sm:$0xff] }
 0x4b9   :  { %4951 = vmatpush.msra.mxu0 %v13495_v54  ;;  %5173 = vmatpush.msrb.mxu1 %v13496_v4  ;;  %v13503_v54 = vld [vmem:[#allocation156_spill] sm:$0xff]  ;;  %v13504_v4 = vld [vmem:[#allocation147_spill] sm:$0xff] }
 0x4ba   :  { %4954 = vmatmul.f32.vlgmr.msra.gmra.mxu0 %v10978_v33  ;;  %5256 = vmatpush.msrb.mxu2 %v13497_v35  ;;  %v13505_v35 = vld [vmem:[#allocation185_spill] sm:$0xff] }
 0x4bb   :  { %5104 = vmatpush.msrb.mxu0 %v13490_v21  ;;  %5304 = vmatpush.msrb.mxu3 %v13498_v40 }
 0x4bc   :  { %5179 = vmatpush.msrb.mxu1 %v13499_v57  ;;  %5259 = vmatpush.msrb.mxu2 %v13500_v23  ;;  %v13507_v57 = vld [vmem:[#allocation150_spill] sm:$0xff]  ;;  %v13508_v23 = vld [vmem:[#allocation189_spill] sm:$0xff] }
 0x4bd   :  { %5106 = vmatpush.msrb.mxu0 %v13494_v45  ;;  %5306 = vmatpush.msrb.mxu3 %v13501_v9 }
 0x4be   :  { %5185 = vmatpush.msrb.mxu1 %v13502_v34  ;;  %5262 = vmatpush.msrb.mxu2 %v13503_v54  ;;  %v13510_v34 = vld [vmem:[#allocation151_spill] sm:$0xff]  ;;  %v13511_v54 = vld [vmem:[#allocation192_spill] sm:$0xff] }
 0x4bf   :  { %5108 = vmatpush.msrb.mxu0 %v13498_v40  ;;  %5308 = vmatpush.msrb.mxu3 %v13504_v4 }
 0x4c0   :  { %5191 = vmatpush.msrb.mxu1 %v13505_v35  ;;  %5265 = vmatpush.msrb.mxu2 %v13506_v3  ;;  %v13513_v35 = vld [vmem:[#allocation154_spill] sm:$0xff]  ;;  %v13514_v3 = vld [vmem:[#allocation195_spill] sm:$0xff] }
 0x4c1   :  { %5110 = vmatpush.msrb.mxu0 %v13501_v9  ;;  %5310 = vmatpush.msrb.mxu3 %v13507_v57 }
 0x4c2   :  { %5197 = vmatpush.msrb.mxu1 %v13508_v23  ;;  %5268 = vmatpush.msrb.mxu2 %v13509_v51  ;;  %v13516_v23 = vld [vmem:[#allocation160_spill] sm:$0xff]  ;;  %v13517_v51 = vld [vmem:[#allocation197_spill] sm:$0xff] }
 0x4c3   :  { %5112 = vmatpush.msrb.mxu0 %v13504_v4  ;;  %5312 = vmatpush.msrb.mxu3 %v13510_v34 }
 0x4c4   :  { %5203 = vmatpush.msrb.mxu1 %v13511_v54  ;;  %5271 = vmatpush.msrb.mxu2 %v13512_v18  ;;  %v13519_v54 = vld [vmem:[#allocation164_spill] sm:$0xff]  ;;  %v13520_v18 = vld [vmem:[#allocation199_spill] sm:$0xff] }
 0x4c5   :  { %5114 = vmatpush.msrb.mxu0 %v13507_v57  ;;  %5314 = vmatpush.msrb.mxu3 %v13513_v35 }
 0x4c6   :  { %5209 = vmatpush.msrb.mxu1 %v13514_v3  ;;  %5274 = vmatpush.msrb.mxu2 %v13515_v25  ;;  %v13522_v3 = vld [vmem:[#allocation168_spill] sm:$0xff] }
 0x4c7   :  { %5116 = vmatpush.msrb.mxu0 %v13510_v34  ;;  %5316 = vmatpush.msrb.mxu3 %v13516_v23  ;;  %v13523_v25 = vld [vmem:[#allocation200_spill] sm:$0xff] }
 0x4c8   :  { %5215 = vmatpush.msrb.mxu1 %v13517_v51  ;;  %5277 = vmatpush.msrb.mxu2 %v13518_v49  ;;  %v13525_v51 = vld [vmem:[#allocation172_spill] sm:$0xff]  ;;  %v13526_v49 = vld [vmem:[#allocation201_spill] sm:$0xff] }
 0x4c9   :  { %5118 = vmatpush.msrb.mxu0 %v13513_v35  ;;  %5318 = vmatpush.msrb.mxu3 %v13519_v54 }
 0x4ca   :  { %5221 = vmatpush.msrb.mxu1 %v13520_v18  ;;  %5280 = vmatpush.msrb.mxu2 %v13521_v12  ;;  %v13528_v18 = vld [vmem:[#allocation176_spill] sm:$0xff]  ;;  %v13529_v12 = vld [vmem:[#allocation202_spill] sm:$0xff] }
 0x4cb   :  { %5120 = vmatpush.msrb.mxu0 %v13516_v23  ;;  %5320 = vmatpush.msrb.mxu3 %v13522_v3 }
 0x4cc   :  { %5227 = vmatpush.msrb.mxu1 %v13523_v25  ;;  %5283 = vmatpush.msrb.mxu2 %v13524_v60  ;;  %v13531_v25 = vld [vmem:[#allocation180_spill] sm:$0xff]  ;;  %v13532_v60 = vld [vmem:[#allocation194_spill] sm:$0xff] }
 0x4cd   :  { %5122 = vmatpush.msrb.mxu0 %v13519_v54  ;;  %5322 = vmatpush.msrb.mxu3 %v13525_v51 }
 0x4ce   :  { %5233 = vmatpush.msrb.mxu1 %v13526_v49  ;;  %5286 = vmatpush.msrb.mxu2 %v13527_v42  ;;  %v13533_v42 = vld [vmem:[#allocation184_spill] sm:$0xff]  ;;  %v13537_v49 = vld [vmem:[#allocation13_spill] sm:$0xff] }
 0x4cf   :  { %5124 = vmatpush.msrb.mxu0 %v13522_v3  ;;  %5324 = vmatpush.msrb.mxu3 %v13528_v18 }
 0x4d0   :  { %5239 = vmatpush.msrb.mxu1 %v13529_v12  ;;  %5289 = vmatpush.msrb.mxu2 %v13530_v0  ;;  %v13534_v0 = vld [vmem:[#allocation188_spill] sm:$0xff] }
 0x4d1   :  { %5126 = vmatpush.msrb.mxu0 %v13525_v51  ;;  %5326 = vmatpush.msrb.mxu3 %v13531_v25  ;;  %v13535_v12 = vld [vmem:[#allocation12_spill] sm:$0xff] }
 0x4d2   :  { %5241 = vmatmul.f32.vlgmr.msrb.gmra.mxu1 %v10973_v1  ;;  %5292 = vmatpush.msrb.mxu2 %v13532_v60  ;;  %v13536_v60 = vld [vmem:[#allocation34_spill] sm:$0xff] }
 0x4d3   :  { %5408 = vmatpush.msra.mxu1 %v13490_v21  ;;  %5128 = vmatpush.msrb.mxu0 %v13528_v18  ;;  %v13544_v21 = vld [vmem:[#allocation15_spill] sm:$0xff] }
 0x4d4   :  { %5328 = vmatpush.msrb.mxu3 %v13533_v42  ;;  %5295 = vmatmul.f32.vlgmr.msrb.gmra.mxu2 %v10978_v33  ;;  %v13538_v33 = vld [vmem:[#allocation35_spill] sm:$0xff] }
 0x4d5   :  { %5410 = vmatpush.msra.mxu1 %v13494_v45  ;;  %5130 = vmatpush.msrb.mxu0 %v13531_v25  ;;  %v13539_v45 = vld [vmem:[#allocation145_spill] sm:$0xff] }
 0x4d6   :  { %5330 = vmatpush.msrb.mxu3 %v13534_v0  ;;  %5496 = vmatpush.msra.mxu2 %v13535_v12 }
 0x4d7   :  { %5334 = vmatmul.f32.vlgmr.msrb.gmra.mxu3 %v10983_v19  ;;  %5412 = vmatpush.msra.mxu1 %v13498_v40  ;;  %v13540_v19 = vld [vmem:[#allocation38_spill] sm:$0xff] }
 0x4d8   :  { %5132 = vmatpush.msrb.mxu0 %v13533_v42  ;;  %5541 = vmatpush.msra.mxu3 %v13536_v60  ;;  %v13541_v40 = vld [vmem:[#allocation14_spill] sm:$0xff]  ;;  %v13542_v60 = vld [vmem:[#allocation148_spill] sm:$0xff] }
 0x4d9   :  { %5414 = vmatpush.msra.mxu1 %v13501_v9  ;;  %5498 = vmatpush.msra.mxu2 %v13537_v49  ;;  %v13543_v9 = vld [vmem:[#allocation43_spill] sm:$0xff] }
 0x4da   :  { %5134 = vmatpush.msrb.mxu0 %v13534_v0  ;;  %5547 = vmatpush.msra.mxu3 %v13538_v33  ;;  %v13545_v33 = vld [vmem:[#allocation152_spill] sm:$0xff] }
 0x4db   :  { %5140 = vmatmul.f32.vlgmr.msrb.gmra.mxu0 %v10993_v36  ;;  %5416 = vmatpush.msra.mxu1 %v13504_v4  ;;  %v13546_v36 = vld [vmem:[#allocation47_spill] sm:$0xff] }
 0x4dc   :  { %5341 = vmatpush.msra.mxu0 %v13539_v45  ;;  %5553 = vmatpush.msra.mxu3 %v13540_v19  ;;  %v13547_v45 = vld [vmem:[#allocation16_spill] sm:$0xff]  ;;  %v13548_v19 = vld [vmem:[#allocation155_spill] sm:$0xff] }
 0x4dd   :  { %5418 = vmatpush.msra.mxu1 %v13507_v57  ;;  %5500 = vmatpush.msra.mxu2 %v13541_v40  ;;  %v13549_v57 = vld [vmem:[#allocation51_spill] sm:$0xff] }
 0x4de   :  { %5345 = vmatpush.msra.mxu0 %v13542_v60  ;;  %5559 = vmatpush.msra.mxu3 %v13543_v9  ;;  %v13550_v60 = vld [vmem:[#allocation17_spill] sm:$0xff]  ;;  %v13551_v9 = vld [vmem:[#allocation159_spill] sm:$0xff] }
 0x4df   :  { %5420 = vmatpush.msra.mxu1 %v13510_v34  ;;  %5502 = vmatpush.msra.mxu2 %v13544_v21  ;;  %v13552_v34 = vld [vmem:[#allocation54_spill] sm:$0xff] }
 0x4e0   :  { %5349 = vmatpush.msra.mxu0 %v13545_v33  ;;  %5565 = vmatpush.msra.mxu3 %v13546_v36  ;;  %v13553_v33 = vld [vmem:[#allocation21_spill] sm:$0xff]  ;;  %v13554_v36 = vld [vmem:[#allocation163_spill] sm:$0xff] }
 0x4e1   :  { %5422 = vmatpush.msra.mxu1 %v13513_v35  ;;  %5504 = vmatpush.msra.mxu2 %v13547_v45  ;;  %v13555_v35 = vld [vmem:[#allocation58_spill] sm:$0xff] }
 0x4e2   :  { %5353 = vmatpush.msra.mxu0 %v13548_v19  ;;  %5571 = vmatpush.msra.mxu3 %v13549_v57  ;;  %v13556_v19 = vld [vmem:[#allocation24_spill] sm:$0xff]  ;;  %v13557_v57 = vld [vmem:[#allocation165_spill] sm:$0xff] }
 0x4e3   :  { %5424 = vmatpush.msra.mxu1 %v13516_v23  ;;  %5506 = vmatpush.msra.mxu2 %v13550_v60  ;;  %v13558_v23 = vld [vmem:[#allocation65_spill] sm:$0xff] }
 0x4e4   :  { %5357 = vmatpush.msra.mxu0 %v13551_v9  ;;  %5577 = vmatpush.msra.mxu3 %v13552_v34  ;;  %v13559_v9 = vld [vmem:[#allocation32_spill] sm:$0xff]  ;;  %v13560_v34 = vld [vmem:[#allocation169_spill] sm:$0xff] }
 0x4e5   :  { %5426 = vmatpush.msra.mxu1 %v13519_v54  ;;  %5508 = vmatpush.msra.mxu2 %v13553_v33  ;;  %v13561_v54 = vld [vmem:[#allocation70_spill] sm:$0xff] }
 0x4e6   :  { %5361 = vmatpush.msra.mxu0 %v13554_v36  ;;  %5583 = vmatpush.msra.mxu3 %v13555_v35  ;;  %v13562_v36 = vld [vmem:[#allocation39_spill] sm:$0xff]  ;;  %v13563_v35 = vld [vmem:[#allocation174_spill] sm:$0xff] }
 0x4e7   :  { %5428 = vmatpush.msra.mxu1 %v13522_v3  ;;  %5510 = vmatpush.msra.mxu2 %v13556_v19  ;;  %v13564_v3 = vld [vmem:[#allocation73_spill] sm:$0xff] }
 0x4e8   :  { %5365 = vmatpush.msra.mxu0 %v13557_v57  ;;  %5589 = vmatpush.msra.mxu3 %v13558_v23  ;;  %v13565_v57 = vld [vmem:[#allocation41_spill] sm:$0xff]  ;;  %v13566_v23 = vld [vmem:[#allocation178_spill] sm:$0xff] }
 0x4e9   :  { %5430 = vmatpush.msra.mxu1 %v13525_v51  ;;  %5512 = vmatpush.msra.mxu2 %v13559_v9  ;;  %v13567_v51 = vld [vmem:[#allocation78_spill] sm:$0xff] }
 0x4ea   :  { %5369 = vmatpush.msra.mxu0 %v13560_v34  ;;  %5595 = vmatpush.msra.mxu3 %v13561_v54  ;;  %v13568_v34 = vld [vmem:[#allocation45_spill] sm:$0xff]  ;;  %v13569_v54 = vld [vmem:[#allocation182_spill] sm:$0xff] }
 0x4eb   :  { %5432 = vmatpush.msra.mxu1 %v13528_v18  ;;  %5514 = vmatpush.msra.mxu2 %v13562_v36  ;;  %v13570_v18 = vld [vmem:[#allocation80_spill] sm:$0xff] }
 0x4ec   :  { %5373 = vmatpush.msra.mxu0 %v13563_v35  ;;  %5601 = vmatpush.msra.mxu3 %v13564_v3  ;;  %v13571_v35 = vld [vmem:[#allocation46_spill] sm:$0xff] }
 0x4ed   :  { %5434 = vmatpush.msra.mxu1 %v13531_v25  ;;  %5516 = vmatpush.msra.mxu2 %v13565_v57  ;;  %v13572_v3 = vld [vmem:[#allocation186_spill] sm:$0xff]  ;;  %v13580_v25 = vld [vmem:[#allocation196_spill] sm:$0xff] }
 0x4ee   :  { %5377 = vmatpush.msra.mxu0 %v13566_v23  ;;  %5607 = vmatpush.msra.mxu3 %v13567_v51  ;;  %v13573_v23 = vld [vmem:[#allocation84_spill] sm:$0xff]  ;;  %v13574_v51 = vld [vmem:[#allocation190_spill] sm:$0xff] }
 0x4ef   :  { %5436 = vmatpush.msra.mxu1 %v13533_v42  ;;  %5518 = vmatpush.msra.mxu2 %v13568_v34  ;;  %v13575_v42 = vld [vmem:[#allocation50_spill] sm:$0xff] }
 0x4f0   :  { %5381 = vmatpush.msra.mxu0 %v13569_v54  ;;  %5613 = vmatpush.msra.mxu3 %v13570_v18  ;;  %v13576_v54 = vld [vmem:[#allocation87_spill] sm:$0xff]  ;;  %v13577_v18 = vld [vmem:[#allocation193_spill] sm:$0xff] }
 0x4f1   :  { %5438 = vmatpush.msra.mxu1 %v13534_v0  ;;  %5520 = vmatpush.msra.mxu2 %v13571_v35  ;;  %v13578_v0 = vld [vmem:[#allocation57_spill] sm:$0xff] }
 0x4f2   :  { %5385 = vmatpush.msra.mxu0 %v13572_v3  ;;  %5440 = vmatmul.f32.vlgmr.msra.gmra.mxu1 %v10973_v1  ;;  %v13579_v3 = vld [vmem:[#allocation92_spill] sm:$0xff] }
 0x4f3   :  { %5692 = vmatpush.msrb.mxu1 %v13535_v12  ;;  %5619 = vmatpush.msra.mxu3 %v13573_v23  ;;  %v13582_v23 = vld [vmem:[#allocation198_spill] sm:$0xff] }
 0x4f4   :  { %5389 = vmatpush.msra.mxu0 %v13574_v51  ;;  %5522 = vmatpush.msra.mxu2 %v13575_v42  ;;  %v13581_v51 = vld [vmem:[#allocation61_spill] sm:$0xff] }
 0x4f5   :  { %5694 = vmatpush.msrb.mxu1 %v13537_v49  ;;  %5625 = vmatpush.msra.mxu3 %v13576_v54  ;;  %v13587_v54 = vld [vmem:[#allocation20_spill] sm:$0xff] }
 0x4f6   :  { %5393 = vmatpush.msra.mxu0 %v13577_v18  ;;  %5524 = vmatpush.msra.mxu2 %v13578_v0  ;;  %v13583_v18 = vld [vmem:[#allocation18_spill] sm:$0xff] }
 0x4f7   :  { %5696 = vmatpush.msrb.mxu1 %v13541_v40  ;;  %5631 = vmatpush.msra.mxu3 %v13579_v3  ;;  %v13585_v3 = vld [vmem:[#allocation19_spill] sm:$0xff] }
 0x4f8   :  { %5397 = vmatpush.msra.mxu0 %v13580_v25  ;;  %5526 = vmatpush.msra.mxu2 %v13581_v51  ;;  %v13584_v25 = vld [vmem:[#allocation25_spill] sm:$0xff] }
 0x4f9   :  { %5800 = vmatpush.msrb.mxu3 %v13535_v12  ;;  %5698 = vmatpush.msrb.mxu1 %v13544_v21 }
 0x4fa   :  { %5401 = vmatpush.msra.mxu0 %v13582_v23  ;;  %5733 = vmatpush.msrb.mxu2 %v13584_v25  ;;  %v13586_v23 = vld [vmem:[#allocation26_spill] sm:$0xff]  ;;  %v13591_v25 = vld [vmem:[#allocation23_spill] sm:$0xff] }
 0x4fb   :  { %5802 = vmatpush.msrb.mxu3 %v13537_v49  ;;  %5403 = vmatmul.f32.vlgmr.msra.gmra.mxu0 %v10973_v1  ;;  %v13588_v1 = vld [vmem:[#allocation27_spill] sm:$0xff] }
 0x4fc   :  { %5700 = vmatpush.msrb.mxu1 %v13547_v45  ;;  %5639 = vmatpush.msrb.mxu0 %v13583_v18  ;;  %v13589_v18 = vld [vmem:[#allocation22_spill] sm:$0xff] }
 0x4fd   :  { %5804 = vmatpush.msrb.mxu3 %v13541_v40  ;;  %5737 = vmatpush.msrb.mxu2 %v13586_v23  ;;  %v13593_v23 = vld [vmem:[#allocation28_spill] sm:$0xff] }
 0x4fe   :  { %5702 = vmatpush.msrb.mxu1 %v13550_v60  ;;  %5642 = vmatpush.msrb.mxu0 %v13585_v3  ;;  %v13590_v3 = vld [vmem:[#allocation29_spill] sm:$0xff] }
 0x4ff   :  { %5806 = vmatpush.msrb.mxu3 %v13544_v21  ;;  %5741 = vmatpush.msrb.mxu2 %v13588_v1  ;;  %v13595_v1 = vld [vmem:[#allocation31_spill] sm:$0xff] }
 0x500   :  { %5704 = vmatpush.msrb.mxu1 %v13553_v33  ;;  %5645 = vmatpush.msrb.mxu0 %v13587_v54  ;;  %v13592_v54 = vld [vmem:[#allocation30_spill] sm:$0xff] }
 0x501   :  { %5808 = vmatpush.msrb.mxu3 %v13547_v45  ;;  %5745 = vmatpush.msrb.mxu2 %v13590_v3  ;;  %v13597_v3 = vld [vmem:[#allocation33_spill] sm:$0xff] }
 0x502   :  { %5706 = vmatpush.msrb.mxu1 %v13556_v19  ;;  %5648 = vmatpush.msrb.mxu0 %v13589_v18  ;;  %v13594_v18 = vld [vmem:[#allocation36_spill] sm:$0xff] }
 0x503   :  { %5810 = vmatpush.msrb.mxu3 %v13550_v60  ;;  %5749 = vmatpush.msrb.mxu2 %v13592_v54  ;;  %v13599_v54 = vld [vmem:[#allocation40_spill] sm:$0xff] }
 0x504   :  { %5708 = vmatpush.msrb.mxu1 %v13559_v9  ;;  %5651 = vmatpush.msrb.mxu0 %v13591_v25  ;;  %v13596_v25 = vld [vmem:[#allocation37_spill] sm:$0xff] }
 0x505   :  { %5812 = vmatpush.msrb.mxu3 %v13553_v33  ;;  %5753 = vmatpush.msrb.mxu2 %v13594_v18  ;;  %v13601_v18 = vld [vmem:[#allocation44_spill] sm:$0xff] }
 0x506   :  { %5710 = vmatpush.msrb.mxu1 %v13562_v36  ;;  %5654 = vmatpush.msrb.mxu0 %v13593_v23  ;;  %v13598_v23 = vld [vmem:[#allocation42_spill] sm:$0xff] }
 0x507   :  { %5814 = vmatpush.msrb.mxu3 %v13556_v19  ;;  %5757 = vmatpush.msrb.mxu2 %v13596_v25  ;;  %v13603_v25 = vld [vmem:[#allocation49_spill] sm:$0xff] }
 0x508   :  { %5712 = vmatpush.msrb.mxu1 %v13565_v57  ;;  %5657 = vmatpush.msrb.mxu0 %v13595_v1  ;;  %v13600_v1 = vld [vmem:[#allocation48_spill] sm:$0xff] }
 0x509   :  { %5816 = vmatpush.msrb.mxu3 %v13559_v9  ;;  %5761 = vmatpush.msrb.mxu2 %v13598_v23  ;;  %v13605_v23 = vld [vmem:[#allocation53_spill] sm:$0xff] }
 0x50a   :  { %5714 = vmatpush.msrb.mxu1 %v13568_v34  ;;  %5660 = vmatpush.msrb.mxu0 %v13597_v3  ;;  %v13602_v3 = vld [vmem:[#allocation52_spill] sm:$0xff] }
 0x50b   :  { %5818 = vmatpush.msrb.mxu3 %v13562_v36  ;;  %5765 = vmatpush.msrb.mxu2 %v13600_v1  ;;  %v13608_v1 = vld [vmem:[#allocation55_spill] sm:$0xff] }
 0x50c   :  { %5716 = vmatpush.msrb.mxu1 %v13571_v35  ;;  %5663 = vmatpush.msrb.mxu0 %v13599_v54  ;;  %v13604_v54 = vld [vmem:[#allocation56_spill] sm:$0xff] }
 0x50d   :  { %5820 = vmatpush.msrb.mxu3 %v13565_v57  ;;  %5769 = vmatpush.msrb.mxu2 %v13602_v3  ;;  %v13606_v57 = vld [vmem:[#allocation86_spill] sm:$0xff]  ;;  %v13611_v3 = vld [vmem:[#allocation59_spill] sm:$0xff] }
 0x50e   :  { %5718 = vmatpush.msrb.mxu1 %v13575_v42  ;;  %5666 = vmatpush.msrb.mxu0 %v13601_v18  ;;  %v13607_v18 = vld [vmem:[#allocation60_spill] sm:$0xff] }
 0x50f   :  { %5822 = vmatpush.msrb.mxu3 %v13568_v34  ;;  %5773 = vmatpush.msrb.mxu2 %v13604_v54  ;;  %v13609_v34 = vld [vmem:[#allocation90_spill] sm:$0xff]  ;;  %v13615_v54 = vld [vmem:[#allocation105_spill] sm:$0xff] }
 0x510   :  { %5720 = vmatpush.msrb.mxu1 %v13578_v0  ;;  %5669 = vmatpush.msrb.mxu0 %v13603_v25  ;;  %v13610_v25 = vld [vmem:[#allocation63_spill] sm:$0xff] }
 0x511   :  { %5824 = vmatpush.msrb.mxu3 %v13571_v35  ;;  %5777 = vmatpush.msrb.mxu2 %v13607_v18  ;;  %v13612_v35 = vld [vmem:[#allocation96_spill] sm:$0xff]  ;;  %v13616_v18 = vld [vmem:[#allocation74_spill] sm:$0xff] }
 0x512   :  { %5722 = vmatpush.msrb.mxu1 %v13581_v51  ;;  %5672 = vmatpush.msrb.mxu0 %v13605_v23  ;;  %v13613_v23 = vld [vmem:[#allocation68_spill] sm:$0xff] }
 0x513   :  { %5826 = vmatpush.msrb.mxu3 %v13575_v42  ;;  %5781 = vmatpush.msrb.mxu2 %v13610_v25  ;;  %v13619_v25 = vld [vmem:[#allocation79_spill] sm:$0xff] }
 0x514   :  { %5882 = vmatpush.msra.mxu1 %v13606_v57  ;;  %5675 = vmatpush.msrb.mxu0 %v13608_v1  ;;  %v13614_v57 = vld [vmem:[#allocation66_spill] sm:$0xff]  ;;  %v13617_v1 = vld [vmem:[#allocation71_spill] sm:$0xff] }
 0x515   :  { %5828 = vmatpush.msrb.mxu3 %v13578_v0  ;;  %5785 = vmatpush.msrb.mxu2 %v13613_v23  ;;  %v13632_v42 = vld [vmem:[#allocation67_spill] sm:$0xff] }
 0x516   :  { %5888 = vmatpush.msra.mxu1 %v13609_v34  ;;  %5678 = vmatpush.msrb.mxu0 %v13611_v3  ;;  %v13618_v34 = vld [vmem:[#allocation109_spill] sm:$0xff]  ;;  %v13620_v3 = vld [vmem:[#allocation112_spill] sm:$0xff] }
 0x517   :  { %5830 = vmatpush.msrb.mxu3 %v13581_v51  ;;  %5789 = vmatpush.msrb.mxu2 %v13616_v18  ;;  %v13623_v18 = vld [vmem:[#allocation122_spill] sm:$0xff] }
 0x518   :  { %5894 = vmatpush.msra.mxu1 %v13612_v35  ;;  %5681 = vmatpush.msrb.mxu0 %v13614_v57  ;;  %v13621_v35 = vld [vmem:[#allocation115_spill] sm:$0xff] }
 0x519   :  { %5793 = vmatpush.msrb.mxu2 %v13619_v25  ;;  %v13622_v57 = vld [vmem:[#allocation119_spill] sm:$0xff]  ;;  %v13625_v25 = vld [vmem:[#allocation129_spill] sm:$0xff] }
 0x51a   :  { %5900 = vmatpush.msra.mxu1 %v13615_v54  ;;  %5684 = vmatpush.msrb.mxu0 %v13617_v1  ;;  %v4614_v1 = vpop.f32.mrf.mxu2  ;;  %v13631_v54 = vld [vmem:[#allocation62_spill] sm:$0xff] }
 0x51c   :  { %5906 = vmatpush.msra.mxu1 %v13618_v34  ;;  %5837 = vmatpush.msra.mxu0 %v9136_v29  ;;  %v13624_v34 = vld [vmem:[#allocation126_spill] sm:$0xff] }
 0x51e   :  { %5912 = vmatpush.msra.mxu1 %v13620_v3  ;;  %5839 = vmatpush.msra.mxu0 %v12960_v48  ;;  %v13626_v3 = vld [vmem:[#allocation133_spill] sm:$0xff] }
 0x520   :  { %5918 = vmatpush.msra.mxu1 %v13621_v35  ;;  %5841 = vmatpush.msra.mxu0 %v12962_v30  ;;  %v13627_v35 = vld [vmem:[#allocation135_spill] sm:$0xff] }
 0x522   :  { %5924 = vmatpush.msra.mxu1 %v13622_v57  ;;  %5843 = vmatpush.msra.mxu0 %v12964_v53  ;;  %v13628_v57 = vld [vmem:[#allocation136_spill] sm:$0xff] }
 0x524   :  { %5930 = vmatpush.msra.mxu1 %v13623_v18  ;;  %5845 = vmatpush.msra.mxu0 %v12967_v26  ;;  %v4459_v18 = vpop.f32.mrf.mxu0 }
 0x525   :  { %v4460_v23 = vadd.f32 %v4459_v18, %v13631_v54 }
 0x526   :  { %5936 = vmatpush.msra.mxu1 %v13624_v34  ;;  %5847 = vmatpush.msra.mxu0 %v12970_v2  ;;  %v13629_v34 = vld [vmem:[#allocation137_spill] sm:$0xff] }
 0x528   :  { %5942 = vmatpush.msra.mxu1 %v13625_v25  ;;  %5849 = vmatpush.msra.mxu0 %v12973_v7  ;;  %v13630_v25 = vld [vmem:[#allocation138_spill] sm:$0xff] }
 0x52a   :  { %5948 = vmatpush.msra.mxu1 %v13626_v3  ;;  %5851 = vmatpush.msra.mxu0 %v12976_v32  ;;  %v4560_v3 = vpop.f32.mrf.mxu1 }
 0x52c   :  { %5954 = vmatpush.msra.mxu1 %v13627_v35  ;;  %5853 = vmatpush.msra.mxu0 %v12979_v44  ;;  %v4653_v35 = vpop.f32.mrf.mxu3  ;;  %v4722_v51 = vpop.f32.mrf.mxu0 }
 0x52e   :  { %5960 = vmatpush.msra.mxu1 %v13628_v57  ;;  %5855 = vmatpush.msra.mxu0 %v12982_v46  ;;  %v4561_v57 = vadd.f32 %v4560_v3, %v4460_v23  ;;  %v4418_v3 = vld [vmem:[#allocation2 + $0x60] sm:$0xff] }
 0x530   :  { %5966 = vmatpush.msra.mxu1 %v13629_v34  ;;  %5857 = vmatpush.msra.mxu0 %v12985_v52  ;;  %v4800_v34 = vpop.f32.mrf.mxu2  ;;  %v4615_v0 = vadd.f32 %v4614_v1, %v4561_v57  ;;  %v4419_v57 = vld [vmem:[#allocation2 + $0x68] sm:$0xff] }
 0x532   :  { %5972 = vmatpush.msra.mxu1 %v13630_v25  ;;  %5859 = vmatpush.msra.mxu0 %v12988_v55  ;;  %v4801_v25 = vadd.f32 %v4800_v34, %v13632_v42  ;;  %v4759_v36 = vpop.f32.mrf.mxu1  ;;  %v4654_v19 = vadd.f32 %v4653_v35, %v4615_v0 }
 0x534   :  { %5861 = vmatpush.msra.mxu0 %v12991_v15  ;;  %v4901_v9 = vpop.f32.mrf.mxu3  ;;  %v4723_v60 = vadd.f32 %v4722_v51, %v4654_v19 }
 0x535   :  { %v4902_v18 = vadd.f32 %v4901_v9, %v4801_v25 }
 0x536   :  { %5863 = vmatpush.msra.mxu0 %v12995_v24  ;;  %v4760_v40 = vadd.f32 %v4759_v36, %v4723_v60 }
 0x537   :  { %v4955_v33 = vpop.f32.mrf.mxu0 }
 0x538   :  { %5865 = vmatpush.msra.mxu0 %v13477_v6  ;;  %v4956_v54 = vadd.f32 %v4955_v33, %v4902_v18  ;;  %v5063_v23 = vpop.f32.mrf.mxu2  ;;  %v5444_v12 = vadd.f32 %v4760_v40, %v4418_v3 }
 0x53a   :  { %5867 = vmatpush.msra.mxu0 %v13480_v20  ;;  %v4994_v45 = vpop.f32.mrf.mxu1  ;;  %v8740_v20 = vmul.f32 -1.442695, %v5444_v12 }
 0x53b   :  { %v4995_v21 = vadd.f32 %v4994_v45, %v4956_v54 }
 0x53c   :  { %v5100_v4 = vpop.f32.mrf.mxu3  ;;  %8795 = vpow2.f32 %v8740_v20 }
 0x53d   :  { %v5064_v49 = vadd.f32 %v5063_v23, %v4995_v21 }
 0x53f   :  { %v5101_v6 = vadd.f32 %v5100_v4, %v5064_v49 }
 0x541   :  { %v5464_v1 = vadd.f32 %v5101_v6, %v4419_v57 }
 0x542   :  { %v8796_v42 = vpop.eup %8795 }
 0x543   :  { %v8741_v34 = vmul.f32 -1.442695, %v5464_v1  ;;  %v5448_v0 = vadd.f32 1.0, %v8796_v42 }
 0x545   :  { %8797 = vpow2.f32 %v8741_v34  ;;  %v5460_v36 = vand.u32 2147483648, %v5448_v0  ;;  %vm5454_vm1 = vweird.f32 %v5448_v0  ;;  %v5458_v3 = vand.u32 2147483647, %v5448_v0 }
 0x546   :  { %8799 = vrcp.f32 %v5448_v0 }
 0x547   :  { %vm5459_vm3 = vcmp.eq.f32.partialorder %v5458_v3, 8.507059e+37 }
 0x54b   :  { %v8798_v25 = vpop.eup %8797 }
 0x54c   :  { %v5468_v51 = vadd.f32 1.0, %v8798_v25  ;;  %v8800_v35 = vpop.eup %8799 }
 0x54d   :  { %v5450_v9 = vmul.f32 %v8800_v35, %v5448_v0  ;;  %vm5455_vm0 = vweird.f32 %v8800_v35 }
 0x54e   :  { %8801 = vrcp.f32 %v5468_v51  ;;  %vm5456_vm2 = vmor %vm5454_vm1, %vm5455_vm0  ;;  %vm5474_vm5 = vweird.f32 %v5468_v51 }
 0x54f   :  { %v5451_v45 = vsub.f32 1.0, %v5450_v9  ;;  %v5242_v49 = vpop.f32.mrf.mxu1 }
 0x551   :  { %v5452_v6 = vmul.f32 %v8800_v35, %v5451_v45  ;;  %v4420_v45 = vld [vmem:[#allocation2 + $0x70] sm:$0xff] }
 0x553   :  { %v5453_v19 = vadd.f32 %v8800_v35, %v5452_v6  ;;  %v5478_v6 = vand.u32 2147483647, %v5468_v51 }
 0x554   :  { %v8802_v40 = vpop.eup %8801 }
 0x555   :  { %v5470_v54 = vmul.f32 %v8802_v40, %v5468_v51  ;;  %v5457_v34 = vsel %vm5456_vm2, %v8800_v35, %v5453_v19  ;;  %vm5475_vm4 = vweird.f32 %v8802_v40  ;;  %vm5479_vm7 = vcmp.eq.f32.partialorder %v5478_v6, 8.507059e+37  ;;  %v13644_v6 = vld [vmem:[#allocation124_spill] sm:$0xff] }
 0x556   :  { %vm5476_vm6 = vmor %vm5474_vm5, %vm5475_vm4 }
 0x557   :  { %v5296_v20 = vpop.f32.mrf.mxu2  ;;  %v5471_v33 = vsub.f32 1.0, %v5470_v54 }
 0x558   :  { %v5141_v60 = vpop.f32.mrf.mxu0 }
 0x559   :  { %v5142_v21 = vadd.f32 %v5141_v60, %v9989_v14  ;;  %v5472_v23 = vmul.f32 %v8802_v40, %v5471_v33  ;;  %v5461_v60 = vor.u32 1.1754944e-38, %v5460_v36 }
 0x55a   :  { %v5335_v42 = vpop.f32.mrf.mxu3 }
 0x55b   :  { %v5243_v12 = vadd.f32 %v5242_v49, %v5142_v21  ;;  %v5473_v21 = vadd.f32 %v8802_v40, %v5472_v23  ;;  %v5462_v49 = vsel %vm5459_vm3, %v5461_v60, %v5457_v34  ;;  %v13635_v34 = vld [vmem:[#allocation130_spill] sm:$0xff]  ;;  %v13637_v60 = vld [vmem:[#allocation125_spill] sm:$0xff] }
 0x55d   :  { %v5297_v4 = vadd.f32 %v5296_v20, %v5243_v12  ;;  %v5480_v12 = vand.u32 2147483648, %v5468_v51  ;;  %v5477_v0 = vsel %vm5476_vm6, %v8802_v40, %v5473_v21  ;;  %v13639_v21 = vld [vmem:[#allocation120_spill] sm:$0xff] }
 0x55f   :  { %v5336_v18 = vadd.f32 %v5335_v42, %v5297_v4  ;;  %v5481_v4 = vor.u32 1.1754944e-38, %v5480_v12  ;;  %v13642_v12 = vld [vmem:[#allocation162_spill] sm:$0xff] }
 0x561   :  { %v5482_v33 = vsel %vm5479_vm7, %v5481_v4, %v5477_v0  ;;  %v13646_v0 = vld [vmem:[#allocation143_spill] sm:$0xff] }
 0x562   :  { %v5487_v35 = vsub.f32 1.0, %v5482_v33  ;;  %v5489_v36 = vmul.f32 %v5482_v33, %v10970_v38  ;;  %v13647_v4 = vld [vmem:[#allocation139_spill] sm:$0xff]  ;;  %v13648_v33 = vld [vmem:[#allocation128_spill] sm:$0xff] }
 0x56f   :  { %v5441_v25 = vpop.f32.mrf.mxu1 }
 0x578   :  { %v5404_v57 = vpop.f32.mrf.mxu0 }
 0x579   :  { %v5405_v1 = vadd.f32 %v5404_v57, %v5336_v18  ;;  %v13633_v57 = vld [vmem:[#allocation111_spill] sm:$0xff] }
 0x57b   :  { %v5442_v9 = vadd.f32 %v5441_v25, %v5405_v1  ;;  %v13634_v1 = vld [vmem:[#allocation121_spill] sm:$0xff] }
 0x57c   :  { %v13636_v25 = vld [vmem:[#allocation117_spill] sm:$0xff] }
 0x57d   :  { %v5484_v54 = vmul.f32 %v5462_v49, %v5442_v9  ;;  %v13638_v9 = vld [vmem:[#allocation132_spill] sm:$0xff]  ;;  %v13641_v49 = vld [vmem:[#allocation134_spill] sm:$0xff] }
 0x57f   :  { %v5485_v20 = vadd.f32 %v5484_v54, %v4420_v45  ;;  %v13640_v45 = vld [vmem:[#allocation158_spill] sm:$0xff]  ;;  %v13643_v54 = vld [vmem:[#allocation141_spill] sm:$0xff] }
 0x581   :  { %8803 = vtanh.f32 %v5485_v20  ;;  %v13645_v20 = vld [vmem:[#allocation166_spill] sm:$0xff] }
 0x587   :  { %v8804_v19 = vpop.eup %8803 }
 0x588   :  { %v5488_v42 = vmul.f32 %v8804_v19, %v5487_v35  ;;  %v13649_v35 = vld [vmem:[#allocation170_spill] sm:$0xff] }
 0x589   :  { %v13650_v19 = vld [vmem:[#allocation146_spill] sm:$0xff] }
 0x58a   :  { %v11296_v18 = vadd.f32 %v5489_v36, %v5488_v42  ;;  %v13651_v42 = vld [vmem:[#allocation140_spill] sm:$0xff]  ;;  %v13652_v36 = vld [vmem:[#allocation131_spill] sm:$0xff] }
 0x58c   :  { %v11299_v3 = vand.u32 4294901760, %v11296_v18 }
 0x58e   :  { %5633 = vmatmul.f32.vlgmr.msra.gmra.mxu3 %v11299_v3  ;;  %v11304_v51 = vsub.f32 %v11296_v18, %v11299_v3 }
 0x58f   :  { %6033 = vmatpush.msra.mxu3 %v9136_v29 }
 0x590   :  { %5687 = vmatmul.f32.vlgmr.msrb.gmra.mxu0 %v11304_v51  ;;  %v11309_v40 = vand.u32 4294901760, %v11304_v51 }
 0x591   :  { %6035 = vmatpush.msra.mxu3 %v12960_v48  ;;  %6074 = vmatpush.msrb.mxu0 %v13007_v17 }
 0x592   :  { %5726 = vmatmul.f32.vlgmr.msrb.gmra.mxu1 %v11309_v40  ;;  %v5530_v38 = vsub.f32 %v11304_v51, %v11309_v40 }
 0x593   :  { %6037 = vmatpush.msra.mxu3 %v12962_v30  ;;  %6078 = vmatpush.msrb.mxu0 %v13008_v43 }
 0x594   :  { %6141 = vmatpush.msrb.mxu1 %v9136_v29  ;;  %v11319_v23 = vand.u32 4294901760, %v5530_v38  ;;  %v13653_v38 = vld [vmem:[#allocation173_spill] sm:$0xff] }
 0x595   :  { %6039 = vmatpush.msra.mxu3 %v12964_v53  ;;  %6082 = vmatpush.msrb.mxu0 %v13009_v61 }
 0x596   :  { %6143 = vmatpush.msrb.mxu1 %v12960_v48  ;;  %5532 = vmatmul.f32.vlgmr.msra.gmra.mxu2 %v11319_v23 }
 0x597   :  { %5832 = vmatmul.f32.vlgmr.msrb.gmra.mxu3 %v11299_v3  ;;  %5980 = vmatpush.msra.mxu2 %v13010_v27 }
 0x598   :  { %6041 = vmatpush.msra.mxu3 %v12967_v26  ;;  %6086 = vmatpush.msrb.mxu0 %v13011_v28 }
 0x599   :  { %6145 = vmatpush.msrb.mxu1 %v12962_v30  ;;  %5873 = vmatmul.f32.vlgmr.msra.gmra.mxu0 %v11319_v23 }
 0x59a   :  { %5983 = vmatpush.msra.mxu2 %v13012_v8  ;;  %6043 = vmatpush.msra.mxu3 %v12970_v2 }
 0x59b   :  { %6090 = vmatpush.msrb.mxu0 %v13013_v41  ;;  %6147 = vmatpush.msrb.mxu1 %v12964_v53 }
 0x59c   :  { %5974 = vmatmul.f32.vlgmr.msra.gmra.mxu1 %v11299_v3  ;;  %5986 = vmatpush.msra.mxu2 %v13014_v50 }
 0x59d   :  { %6045 = vmatpush.msra.mxu3 %v12973_v7  ;;  %6094 = vmatpush.msrb.mxu0 %v13015_v56 }
 0x59e   :  { %6149 = vmatpush.msrb.mxu1 %v12967_v26  ;;  %5989 = vmatpush.msra.mxu2 %v13016_v59 }
 0x59f   :  { %6047 = vmatpush.msra.mxu3 %v12976_v32  ;;  %6098 = vmatpush.msrb.mxu0 %v13017_v31 }
 0x5a0   :  { %6151 = vmatpush.msrb.mxu1 %v12970_v2  ;;  %5795 = vmatmul.f32.vlgmr.msrb.gmra.mxu2 %v11299_v3 }
 0x5a1   :  { %5992 = vmatpush.msra.mxu2 %v13018_v47  ;;  %6049 = vmatpush.msra.mxu3 %v12979_v44 }
 0x5a2   :  { %6102 = vmatpush.msrb.mxu0 %v13162_v63  ;;  %6153 = vmatpush.msrb.mxu1 %v12973_v7 }
 0x5a3   :  { %5995 = vmatpush.msra.mxu2 %v13163_v37  ;;  %6051 = vmatpush.msra.mxu3 %v12982_v46 }
 0x5a4   :  { %6106 = vmatpush.msrb.mxu0 %v13164_v11  ;;  %6155 = vmatpush.msrb.mxu1 %v12976_v32 }
 0x5a5   :  { %5998 = vmatpush.msra.mxu2 %v13165_v62  ;;  %6053 = vmatpush.msra.mxu3 %v12985_v52 }
 0x5a6   :  { %6110 = vmatpush.msrb.mxu0 %v13166_v5  ;;  %6157 = vmatpush.msrb.mxu1 %v12979_v44 }
 0x5a7   :  { %6001 = vmatpush.msra.mxu2 %v13167_v10  ;;  %6055 = vmatpush.msra.mxu3 %v12988_v55 }
 0x5a8   :  { %6114 = vmatpush.msrb.mxu0 %v13168_v22  ;;  %6159 = vmatpush.msrb.mxu1 %v12982_v46 }
 0x5a9   :  { %6004 = vmatpush.msra.mxu2 %v13169_v16  ;;  %6057 = vmatpush.msra.mxu3 %v12991_v15 }
 0x5aa   :  { %6118 = vmatpush.msrb.mxu0 %v13170_v58  ;;  %6161 = vmatpush.msrb.mxu1 %v12985_v52 }
 0x5ab   :  { %6007 = vmatpush.msra.mxu2 %v13171_v39  ;;  %6059 = vmatpush.msra.mxu3 %v12995_v24 }
 0x5ac   :  { %6122 = vmatpush.msrb.mxu0 %v13172_v13  ;;  %6163 = vmatpush.msrb.mxu1 %v12988_v55 }
 0x5ad   :  { %6010 = vmatpush.msra.mxu2 %v13633_v57  ;;  %6061 = vmatpush.msra.mxu3 %v13634_v1  ;;  %v13687_v57 = vld [vmem:[#allocation191_spill] sm:$0xff] }
 0x5ae   :  { %6126 = vmatpush.msrb.mxu0 %v13635_v34  ;;  %6165 = vmatpush.msrb.mxu1 %v12991_v15  ;;  %v13684_v34 = vld [vmem:[#allocation187_spill] sm:$0xff] }
 0x5af   :  { %6013 = vmatpush.msra.mxu2 %v13636_v25  ;;  %6063 = vmatpush.msra.mxu3 %v13637_v60  ;;  %v13681_v25 = vld [vmem:[#allocation183_spill] sm:$0xff] }
 0x5b0   :  { %6130 = vmatpush.msrb.mxu0 %v13638_v9  ;;  %6167 = vmatpush.msrb.mxu1 %v12995_v24  ;;  %v13678_v9 = vld [vmem:[#allocation179_spill] sm:$0xff] }
 0x5b1   :  { %6067 = vmatmul.f32.vlgmr.msra.gmra.mxu3 %v11309_v40  ;;  %6016 = vmatpush.msra.mxu2 %v13639_v21  ;;  %v13675_v21 = vld [vmem:[#allocation175_spill] sm:$0xff] }
 0x5b2   :  { %6223 = vmatpush.msrb.mxu3 %v13640_v45  ;;  %6134 = vmatpush.msrb.mxu0 %v13641_v49  ;;  %v13669_v49 = vld [vmem:[#allocation167_spill] sm:$0xff] }
 0x5b3   :  { %6169 = vmatpush.msrb.mxu1 %v13634_v1  ;;  %6136 = vmatmul.f32.vlgmr.msrb.gmra.mxu0 %v11299_v3  ;;  %v13672_v45 = vld [vmem:[#allocation171_spill] sm:$0xff] }
 0x5b4   :  { %6229 = vmatpush.msrb.mxu3 %v13642_v12  ;;  %6321 = vmatpush.msra.mxu0 %v13643_v54  ;;  %v13663_v54 = vld [vmem:[#allocation157_spill] sm:$0xff] }
 0x5b5   :  { %6019 = vmatpush.msra.mxu2 %v13644_v6  ;;  %6171 = vmatpush.msrb.mxu1 %v13637_v60  ;;  %v13654_v6 = vld [vmem:[#allocation149_spill] sm:$0xff] }
 0x5b6   :  { %6173 = vmatmul.f32.vlgmr.msrb.gmra.mxu1 %v11299_v3  ;;  %6235 = vmatpush.msrb.mxu3 %v13645_v20  ;;  %v13656_v20 = vld [vmem:[#allocation177_spill] sm:$0xff] }
 0x5b7   :  { %6324 = vmatpush.msra.mxu0 %v13646_v0  ;;  %6374 = vmatpush.msra.mxu1 %v13647_v4  ;;  %v13655_v0 = vld [vmem:[#allocation142_spill] sm:$0xff]  ;;  %v13666_v12 = vld [vmem:[#allocation161_spill] sm:$0xff] }
 0x5b8   :  { %6022 = vmatpush.msra.mxu2 %v13648_v33  ;;  %6241 = vmatpush.msrb.mxu3 %v13649_v35  ;;  %v13657_v33 = vld [vmem:[#allocation153_spill] sm:$0xff] }
 0x5b9   :  { %6327 = vmatpush.msra.mxu0 %v13650_v19  ;;  %6376 = vmatpush.msra.mxu1 %v13651_v42  ;;  %v13658_v19 = vld [vmem:[#allocation144_spill] sm:$0xff]  ;;  %v13659_v35 = vld [vmem:[#allocation181_spill] sm:$0xff] }
 0x5ba   :  { %6025 = vmatpush.msra.mxu2 %v13652_v36  ;;  %6247 = vmatpush.msrb.mxu3 %v13653_v38  ;;  %v13660_v36 = vld [vmem:[#allocation156_spill] sm:$0xff]  ;;  %v13661_v38 = vld [vmem:[#allocation147_spill] sm:$0xff] }
 0x5bb   :  { %6028 = vmatmul.f32.vlgmr.msra.gmra.mxu2 %v11304_v51  ;;  %6330 = vmatpush.msra.mxu0 %v13654_v6  ;;  %v13662_v6 = vld [vmem:[#allocation185_spill] sm:$0xff] }
 0x5bc   :  { %6178 = vmatpush.msrb.mxu2 %v13647_v4  ;;  %6378 = vmatpush.msra.mxu1 %v13655_v0 }
 0x5bd   :  { %6253 = vmatpush.msrb.mxu3 %v13656_v20  ;;  %6333 = vmatpush.msra.mxu0 %v13657_v33  ;;  %v13664_v20 = vld [vmem:[#allocation150_spill] sm:$0xff]  ;;  %v13665_v33 = vld [vmem:[#allocation189_spill] sm:$0xff] }
 0x5be   :  { %6180 = vmatpush.msrb.mxu2 %v13651_v42  ;;  %6380 = vmatpush.msra.mxu1 %v13658_v19 }
 0x5bf   :  { %6259 = vmatpush.msrb.mxu3 %v13659_v35  ;;  %6336 = vmatpush.msra.mxu0 %v13660_v36  ;;  %v13667_v35 = vld [vmem:[#allocation151_spill] sm:$0xff]  ;;  %v13668_v36 = vld [vmem:[#allocation192_spill] sm:$0xff] }
 0x5c0   :  { %6182 = vmatpush.msrb.mxu2 %v13655_v0  ;;  %6382 = vmatpush.msra.mxu1 %v13661_v38 }
 0x5c1   :  { %6265 = vmatpush.msrb.mxu3 %v13662_v6  ;;  %6339 = vmatpush.msra.mxu0 %v13663_v54  ;;  %v13670_v6 = vld [vmem:[#allocation154_spill] sm:$0xff]  ;;  %v13671_v54 = vld [vmem:[#allocation195_spill] sm:$0xff] }
 0x5c2   :  { %6184 = vmatpush.msrb.mxu2 %v13658_v19  ;;  %6384 = vmatpush.msra.mxu1 %v13664_v20 }
 0x5c3   :  { %6271 = vmatpush.msrb.mxu3 %v13665_v33  ;;  %6342 = vmatpush.msra.mxu0 %v13666_v12  ;;  %v13673_v33 = vld [vmem:[#allocation160_spill] sm:$0xff]  ;;  %v13674_v12 = vld [vmem:[#allocation197_spill] sm:$0xff] }
 0x5c4   :  { %6186 = vmatpush.msrb.mxu2 %v13661_v38  ;;  %6386 = vmatpush.msra.mxu1 %v13667_v35 }
 0x5c5   :  { %6277 = vmatpush.msrb.mxu3 %v13668_v36  ;;  %6345 = vmatpush.msra.mxu0 %v13669_v49  ;;  %v13676_v36 = vld [vmem:[#allocation164_spill] sm:$0xff]  ;;  %v13677_v49 = vld [vmem:[#allocation199_spill] sm:$0xff] }
 0x5c6   :  { %6188 = vmatpush.msrb.mxu2 %v13664_v20  ;;  %6388 = vmatpush.msra.mxu1 %v13670_v6 }
 0x5c7   :  { %6283 = vmatpush.msrb.mxu3 %v13671_v54  ;;  %6348 = vmatpush.msra.mxu0 %v13672_v45  ;;  %v13679_v54 = vld [vmem:[#allocation168_spill] sm:$0xff] }
 0x5c8   :  { %6190 = vmatpush.msrb.mxu2 %v13667_v35  ;;  %6390 = vmatpush.msra.mxu1 %v13673_v33  ;;  %v13680_v45 = vld [vmem:[#allocation200_spill] sm:$0xff] }
 0x5c9   :  { %6289 = vmatpush.msrb.mxu3 %v13674_v12  ;;  %6351 = vmatpush.msra.mxu0 %v13675_v21  ;;  %v13682_v12 = vld [vmem:[#allocation172_spill] sm:$0xff]  ;;  %v13683_v21 = vld [vmem:[#allocation201_spill] sm:$0xff] }
 0x5ca   :  { %6192 = vmatpush.msrb.mxu2 %v13670_v6  ;;  %6392 = vmatpush.msra.mxu1 %v13676_v36 }
 0x5cb   :  { %6295 = vmatpush.msrb.mxu3 %v13677_v49  ;;  %6354 = vmatpush.msra.mxu0 %v13678_v9  ;;  %v13685_v49 = vld [vmem:[#allocation176_spill] sm:$0xff]  ;;  %v13686_v9 = vld [vmem:[#allocation202_spill] sm:$0xff] }
 0x5cc   :  { %6194 = vmatpush.msrb.mxu2 %v13673_v33  ;;  %6394 = vmatpush.msra.mxu1 %v13679_v54 }
 0x5cd   :  { %6301 = vmatpush.msrb.mxu3 %v13680_v45  ;;  %6357 = vmatpush.msra.mxu0 %v13681_v25  ;;  %v13688_v45 = vld [vmem:[#allocation180_spill] sm:$0xff]  ;;  %v13689_v25 = vld [vmem:[#allocation194_spill] sm:$0xff] }
 0x5ce   :  { %6196 = vmatpush.msrb.mxu2 %v13676_v36  ;;  %6396 = vmatpush.msra.mxu1 %v13682_v12 }
 0x5cf   :  { %6307 = vmatpush.msrb.mxu3 %v13683_v21  ;;  %6360 = vmatpush.msra.mxu0 %v13684_v34  ;;  %v13690_v34 = vld [vmem:[#allocation184_spill] sm:$0xff]  ;;  %v13694_v21 = vld [vmem:[#allocation13_spill] sm:$0xff] }
 0x5d0   :  { %6198 = vmatpush.msrb.mxu2 %v13679_v54  ;;  %6398 = vmatpush.msra.mxu1 %v13685_v49 }
 0x5d1   :  { %6313 = vmatpush.msrb.mxu3 %v13686_v9  ;;  %6363 = vmatpush.msra.mxu0 %v13687_v57  ;;  %v13691_v57 = vld [vmem:[#allocation188_spill] sm:$0xff] }
 0x5d2   :  { %6200 = vmatpush.msrb.mxu2 %v13682_v12  ;;  %6400 = vmatpush.msra.mxu1 %v13688_v45  ;;  %v13692_v9 = vld [vmem:[#allocation12_spill] sm:$0xff] }
 0x5d3   :  { %6315 = vmatmul.f32.vlgmr.msrb.gmra.mxu3 %v11299_v3  ;;  %6366 = vmatpush.msra.mxu0 %v13689_v25  ;;  %v13693_v25 = vld [vmem:[#allocation34_spill] sm:$0xff] }
 0x5d4   :  { %6482 = vmatpush.msra.mxu3 %v13647_v4  ;;  %6202 = vmatpush.msrb.mxu2 %v13685_v49  ;;  %v13701_v4 = vld [vmem:[#allocation15_spill] sm:$0xff] }
 0x5d5   :  { %6402 = vmatpush.msra.mxu1 %v13690_v34  ;;  %6369 = vmatmul.f32.vlgmr.msra.gmra.mxu0 %v11304_v51  ;;  %v13695_v51 = vld [vmem:[#allocation35_spill] sm:$0xff] }
 0x5d6   :  { %6484 = vmatpush.msra.mxu3 %v13651_v42  ;;  %6204 = vmatpush.msrb.mxu2 %v13688_v45  ;;  %v13696_v42 = vld [vmem:[#allocation145_spill] sm:$0xff] }
 0x5d7   :  { %6404 = vmatpush.msra.mxu1 %v13691_v57  ;;  %6570 = vmatpush.msrb.mxu0 %v13692_v9 }
 0x5d8   :  { %6408 = vmatmul.f32.vlgmr.msra.gmra.mxu1 %v11309_v40  ;;  %6486 = vmatpush.msra.mxu3 %v13655_v0  ;;  %v13697_v40 = vld [vmem:[#allocation38_spill] sm:$0xff] }
 0x5d9   :  { %6206 = vmatpush.msrb.mxu2 %v13690_v34  ;;  %6615 = vmatpush.msrb.mxu1 %v13693_v25  ;;  %v13698_v0 = vld [vmem:[#allocation14_spill] sm:$0xff]  ;;  %v13699_v25 = vld [vmem:[#allocation148_spill] sm:$0xff] }
 0x5da   :  { %6488 = vmatpush.msra.mxu3 %v13658_v19  ;;  %6572 = vmatpush.msrb.mxu0 %v13694_v21  ;;  %v13700_v19 = vld [vmem:[#allocation43_spill] sm:$0xff] }
 0x5db   :  { %6208 = vmatpush.msrb.mxu2 %v13691_v57  ;;  %6621 = vmatpush.msrb.mxu1 %v13695_v51  ;;  %v13702_v51 = vld [vmem:[#allocation152_spill] sm:$0xff] }
 0x5dc   :  { %6214 = vmatmul.f32.vlgmr.msrb.gmra.mxu2 %v11319_v23  ;;  %6490 = vmatpush.msra.mxu3 %v13661_v38  ;;  %v13703_v23 = vld [vmem:[#allocation47_spill] sm:$0xff]  ;;  %v5492_v38 = vld [vmem:[#allocation2 + $0x78] sm:$0xff] }
 0x5dd   :  { %6415 = vmatpush.msra.mxu2 %v13696_v42  ;;  %6627 = vmatpush.msrb.mxu1 %v13697_v40  ;;  %v13704_v42 = vld [vmem:[#allocation16_spill] sm:$0xff]  ;;  %v13705_v40 = vld [vmem:[#allocation155_spill] sm:$0xff] }
 0x5de   :  { %6492 = vmatpush.msra.mxu3 %v13664_v20  ;;  %6574 = vmatpush.msrb.mxu0 %v13698_v0  ;;  %v13706_v20 = vld [vmem:[#allocation51_spill] sm:$0xff] }
 0x5df   :  { %6419 = vmatpush.msra.mxu2 %v13699_v25  ;;  %6633 = vmatpush.msrb.mxu1 %v13700_v19  ;;  %v13707_v25 = vld [vmem:[#allocation17_spill] sm:$0xff]  ;;  %v13708_v19 = vld [vmem:[#allocation159_spill] sm:$0xff] }
 0x5e0   :  { %6494 = vmatpush.msra.mxu3 %v13667_v35  ;;  %6576 = vmatpush.msrb.mxu0 %v13701_v4  ;;  %v13709_v35 = vld [vmem:[#allocation54_spill] sm:$0xff] }
 0x5e1   :  { %6423 = vmatpush.msra.mxu2 %v13702_v51  ;;  %6639 = vmatpush.msrb.mxu1 %v13703_v23  ;;  %v13710_v51 = vld [vmem:[#allocation21_spill] sm:$0xff]  ;;  %v13711_v23 = vld [vmem:[#allocation163_spill] sm:$0xff] }
 0x5e2   :  { %6496 = vmatpush.msra.mxu3 %v13670_v6  ;;  %6578 = vmatpush.msrb.mxu0 %v13704_v42  ;;  %v13712_v6 = vld [vmem:[#allocation58_spill] sm:$0xff] }
 0x5e3   :  { %6427 = vmatpush.msra.mxu2 %v13705_v40  ;;  %6645 = vmatpush.msrb.mxu1 %v13706_v20  ;;  %v13713_v40 = vld [vmem:[#allocation24_spill] sm:$0xff]  ;;  %v13714_v20 = vld [vmem:[#allocation165_spill] sm:$0xff] }
 0x5e4   :  { %6498 = vmatpush.msra.mxu3 %v13673_v33  ;;  %6580 = vmatpush.msrb.mxu0 %v13707_v25  ;;  %v13715_v33 = vld [vmem:[#allocation65_spill] sm:$0xff] }
 0x5e5   :  { %6431 = vmatpush.msra.mxu2 %v13708_v19  ;;  %6651 = vmatpush.msrb.mxu1 %v13709_v35  ;;  %v13716_v19 = vld [vmem:[#allocation32_spill] sm:$0xff]  ;;  %v13717_v35 = vld [vmem:[#allocation169_spill] sm:$0xff] }
 0x5e6   :  { %6500 = vmatpush.msra.mxu3 %v13676_v36  ;;  %6582 = vmatpush.msrb.mxu0 %v13710_v51  ;;  %v13718_v36 = vld [vmem:[#allocation70_spill] sm:$0xff] }
 0x5e7   :  { %6435 = vmatpush.msra.mxu2 %v13711_v23  ;;  %6657 = vmatpush.msrb.mxu1 %v13712_v6  ;;  %v13719_v23 = vld [vmem:[#allocation39_spill] sm:$0xff]  ;;  %v13720_v6 = vld [vmem:[#allocation174_spill] sm:$0xff] }
 0x5e8   :  { %6502 = vmatpush.msra.mxu3 %v13679_v54  ;;  %6584 = vmatpush.msrb.mxu0 %v13713_v40  ;;  %v13721_v54 = vld [vmem:[#allocation73_spill] sm:$0xff] }
 0x5e9   :  { %6439 = vmatpush.msra.mxu2 %v13714_v20  ;;  %6663 = vmatpush.msrb.mxu1 %v13715_v33  ;;  %v13722_v20 = vld [vmem:[#allocation41_spill] sm:$0xff]  ;;  %v13723_v33 = vld [vmem:[#allocation178_spill] sm:$0xff] }
 0x5ea   :  { %6504 = vmatpush.msra.mxu3 %v13682_v12  ;;  %6586 = vmatpush.msrb.mxu0 %v13716_v19  ;;  %v13724_v12 = vld [vmem:[#allocation78_spill] sm:$0xff] }
 0x5eb   :  { %6443 = vmatpush.msra.mxu2 %v13717_v35  ;;  %6669 = vmatpush.msrb.mxu1 %v13718_v36  ;;  %v13725_v35 = vld [vmem:[#allocation45_spill] sm:$0xff]  ;;  %v13726_v36 = vld [vmem:[#allocation182_spill] sm:$0xff] }
 0x5ec   :  { %6506 = vmatpush.msra.mxu3 %v13685_v49  ;;  %6588 = vmatpush.msrb.mxu0 %v13719_v23  ;;  %v13727_v49 = vld [vmem:[#allocation80_spill] sm:$0xff] }
 0x5ed   :  { %6447 = vmatpush.msra.mxu2 %v13720_v6  ;;  %6675 = vmatpush.msrb.mxu1 %v13721_v54  ;;  %v13728_v6 = vld [vmem:[#allocation46_spill] sm:$0xff] }
 0x5ee   :  { %6508 = vmatpush.msra.mxu3 %v13688_v45  ;;  %6590 = vmatpush.msrb.mxu0 %v13722_v20  ;;  %v13729_v54 = vld [vmem:[#allocation186_spill] sm:$0xff]  ;;  %v13737_v45 = vld [vmem:[#allocation196_spill] sm:$0xff] }
 0x5ef   :  { %6451 = vmatpush.msra.mxu2 %v13723_v33  ;;  %6681 = vmatpush.msrb.mxu1 %v13724_v12  ;;  %v13730_v33 = vld [vmem:[#allocation84_spill] sm:$0xff]  ;;  %v13731_v12 = vld [vmem:[#allocation190_spill] sm:$0xff] }
 0x5f0   :  { %6510 = vmatpush.msra.mxu3 %v13690_v34  ;;  %6592 = vmatpush.msrb.mxu0 %v13725_v35  ;;  %v13732_v34 = vld [vmem:[#allocation50_spill] sm:$0xff] }
 0x5f1   :  { %6455 = vmatpush.msra.mxu2 %v13726_v36  ;;  %6687 = vmatpush.msrb.mxu1 %v13727_v49  ;;  %v13733_v36 = vld [vmem:[#allocation87_spill] sm:$0xff]  ;;  %v13734_v49 = vld [vmem:[#allocation193_spill] sm:$0xff] }
 0x5f2   :  { %6512 = vmatpush.msra.mxu3 %v13691_v57  ;;  %6594 = vmatpush.msrb.mxu0 %v13728_v6  ;;  %v13735_v57 = vld [vmem:[#allocation57_spill] sm:$0xff] }
 0x5f3   :  { %6459 = vmatpush.msra.mxu2 %v13729_v54  ;;  %6514 = vmatmul.f32.vlgmr.msra.gmra.mxu3 %v11299_v3  ;;  %v13736_v54 = vld [vmem:[#allocation92_spill] sm:$0xff] }
 0x5f4   :  { %6766 = vmatpush.msrb.mxu3 %v13692_v9  ;;  %6693 = vmatpush.msrb.mxu1 %v13730_v33  ;;  %v13739_v33 = vld [vmem:[#allocation198_spill] sm:$0xff] }
 0x5f5   :  { %6463 = vmatpush.msra.mxu2 %v13731_v12  ;;  %6596 = vmatpush.msrb.mxu0 %v13732_v34  ;;  %v13738_v12 = vld [vmem:[#allocation61_spill] sm:$0xff] }
 0x5f6   :  { %6768 = vmatpush.msrb.mxu3 %v13694_v21  ;;  %6699 = vmatpush.msrb.mxu1 %v13733_v36  ;;  %v13744_v36 = vld [vmem:[#allocation20_spill] sm:$0xff] }
 0x5f7   :  { %6467 = vmatpush.msra.mxu2 %v13734_v49  ;;  %6598 = vmatpush.msrb.mxu0 %v13735_v57  ;;  %v13740_v49 = vld [vmem:[#allocation18_spill] sm:$0xff] }
 0x5f8   :  { %6770 = vmatpush.msrb.mxu3 %v13698_v0  ;;  %6705 = vmatpush.msrb.mxu1 %v13736_v54  ;;  %v13742_v54 = vld [vmem:[#allocation19_spill] sm:$0xff] }
 0x5f9   :  { %6471 = vmatpush.msra.mxu2 %v13737_v45  ;;  %6600 = vmatpush.msrb.mxu0 %v13738_v12  ;;  %v13741_v45 = vld [vmem:[#allocation25_spill] sm:$0xff] }
 0x5fa   :  { %6874 = vmatpush.msra.mxu1 %v13692_v9  ;;  %6772 = vmatpush.msrb.mxu3 %v13701_v4 }
 0x5fb   :  { %6475 = vmatpush.msra.mxu2 %v13739_v33  ;;  %6807 = vmatpush.msra.mxu0 %v13741_v45  ;;  %v13743_v33 = vld [vmem:[#allocation26_spill] sm:$0xff]  ;;  %v13748_v45 = vld [vmem:[#allocation23_spill] sm:$0xff] }
 0x5fc   :  { %6876 = vmatpush.msra.mxu1 %v13694_v21  ;;  %6477 = vmatmul.f32.vlgmr.msra.gmra.mxu2 %v11299_v3  ;;  %v13745_v3 = vld [vmem:[#allocation27_spill] sm:$0xff] }
 0x5fd   :  { %6774 = vmatpush.msrb.mxu3 %v13704_v42  ;;  %6713 = vmatpush.msrb.mxu2 %v13740_v49  ;;  %v13746_v49 = vld [vmem:[#allocation22_spill] sm:$0xff] }
 0x5fe   :  { %6878 = vmatpush.msra.mxu1 %v13698_v0  ;;  %6811 = vmatpush.msra.mxu0 %v13743_v33  ;;  %v13750_v33 = vld [vmem:[#allocation28_spill] sm:$0xff] }
 0x5ff   :  { %6776 = vmatpush.msrb.mxu3 %v13707_v25  ;;  %6716 = vmatpush.msrb.mxu2 %v13742_v54  ;;  %v13747_v54 = vld [vmem:[#allocation29_spill] sm:$0xff] }
 0x600   :  { %6880 = vmatpush.msra.mxu1 %v13701_v4  ;;  %6815 = vmatpush.msra.mxu0 %v13745_v3  ;;  %v13752_v3 = vld [vmem:[#allocation31_spill] sm:$0xff] }
 0x601   :  { %6778 = vmatpush.msrb.mxu3 %v13710_v51  ;;  %6719 = vmatpush.msrb.mxu2 %v13744_v36  ;;  %v13749_v36 = vld [vmem:[#allocation30_spill] sm:$0xff] }
 0x602   :  { %6882 = vmatpush.msra.mxu1 %v13704_v42  ;;  %6819 = vmatpush.msra.mxu0 %v13747_v54  ;;  %v13754_v54 = vld [vmem:[#allocation33_spill] sm:$0xff] }
 0x603   :  { %6780 = vmatpush.msrb.mxu3 %v13713_v40  ;;  %6722 = vmatpush.msrb.mxu2 %v13746_v49  ;;  %v13751_v49 = vld [vmem:[#allocation36_spill] sm:$0xff] }
 0x604   :  { %6884 = vmatpush.msra.mxu1 %v13707_v25  ;;  %6823 = vmatpush.msra.mxu0 %v13749_v36  ;;  %v13756_v36 = vld [vmem:[#allocation40_spill] sm:$0xff] }
 0x605   :  { %6782 = vmatpush.msrb.mxu3 %v13716_v19  ;;  %6725 = vmatpush.msrb.mxu2 %v13748_v45  ;;  %v13753_v45 = vld [vmem:[#allocation37_spill] sm:$0xff] }
 0x606   :  { %6886 = vmatpush.msra.mxu1 %v13710_v51  ;;  %6827 = vmatpush.msra.mxu0 %v13751_v49  ;;  %v13758_v49 = vld [vmem:[#allocation44_spill] sm:$0xff] }
 0x607   :  { %6784 = vmatpush.msrb.mxu3 %v13719_v23  ;;  %6728 = vmatpush.msrb.mxu2 %v13750_v33  ;;  %v13755_v33 = vld [vmem:[#allocation42_spill] sm:$0xff] }
 0x608   :  { %6888 = vmatpush.msra.mxu1 %v13713_v40  ;;  %6831 = vmatpush.msra.mxu0 %v13753_v45  ;;  %v13760_v45 = vld [vmem:[#allocation49_spill] sm:$0xff] }
 0x609   :  { %6786 = vmatpush.msrb.mxu3 %v13722_v20  ;;  %6731 = vmatpush.msrb.mxu2 %v13752_v3  ;;  %v13757_v3 = vld [vmem:[#allocation48_spill] sm:$0xff] }
 0x60a   :  { %6890 = vmatpush.msra.mxu1 %v13716_v19  ;;  %6835 = vmatpush.msra.mxu0 %v13755_v33  ;;  %v13762_v33 = vld [vmem:[#allocation53_spill] sm:$0xff] }
 0x60b   :  { %6788 = vmatpush.msrb.mxu3 %v13725_v35  ;;  %6734 = vmatpush.msrb.mxu2 %v13754_v54  ;;  %v13759_v54 = vld [vmem:[#allocation52_spill] sm:$0xff] }
 0x60c   :  { %6892 = vmatpush.msra.mxu1 %v13719_v23  ;;  %6839 = vmatpush.msra.mxu0 %v13757_v3  ;;  %v13765_v3 = vld [vmem:[#allocation55_spill] sm:$0xff] }
 0x60d   :  { %6790 = vmatpush.msrb.mxu3 %v13728_v6  ;;  %6737 = vmatpush.msrb.mxu2 %v13756_v36  ;;  %v13761_v36 = vld [vmem:[#allocation56_spill] sm:$0xff] }
 0x60e   :  { %6894 = vmatpush.msra.mxu1 %v13722_v20  ;;  %6843 = vmatpush.msra.mxu0 %v13759_v54  ;;  %v13763_v20 = vld [vmem:[#allocation86_spill] sm:$0xff]  ;;  %v13768_v54 = vld [vmem:[#allocation59_spill] sm:$0xff] }
 0x60f   :  { %6792 = vmatpush.msrb.mxu3 %v13732_v34  ;;  %6740 = vmatpush.msrb.mxu2 %v13758_v49  ;;  %v13764_v49 = vld [vmem:[#allocation60_spill] sm:$0xff] }
 0x610   :  { %6896 = vmatpush.msra.mxu1 %v13725_v35  ;;  %6847 = vmatpush.msra.mxu0 %v13761_v36  ;;  %v13766_v35 = vld [vmem:[#allocation90_spill] sm:$0xff]  ;;  %v13772_v36 = vld [vmem:[#allocation105_spill] sm:$0xff] }
 0x611   :  { %6794 = vmatpush.msrb.mxu3 %v13735_v57  ;;  %6743 = vmatpush.msrb.mxu2 %v13760_v45  ;;  %v13767_v45 = vld [vmem:[#allocation63_spill] sm:$0xff] }
 0x612   :  { %6898 = vmatpush.msra.mxu1 %v13728_v6  ;;  %6851 = vmatpush.msra.mxu0 %v13764_v49  ;;  %v13769_v6 = vld [vmem:[#allocation96_spill] sm:$0xff]  ;;  %v13773_v49 = vld [vmem:[#allocation74_spill] sm:$0xff] }
 0x613   :  { %6796 = vmatpush.msrb.mxu3 %v13738_v12  ;;  %6746 = vmatpush.msrb.mxu2 %v13762_v33  ;;  %v13770_v33 = vld [vmem:[#allocation68_spill] sm:$0xff] }
 0x614   :  { %6900 = vmatpush.msra.mxu1 %v13732_v34  ;;  %6855 = vmatpush.msra.mxu0 %v13767_v45  ;;  %v13776_v45 = vld [vmem:[#allocation79_spill] sm:$0xff] }
 0x615   :  { %6956 = vmatpush.msra.mxu3 %v13763_v20  ;;  %6749 = vmatpush.msrb.mxu2 %v13765_v3  ;;  %v13771_v20 = vld [vmem:[#allocation66_spill] sm:$0xff]  ;;  %v13774_v3 = vld [vmem:[#allocation71_spill] sm:$0xff] }
 0x616   :  { %6902 = vmatpush.msra.mxu1 %v13735_v57  ;;  %6859 = vmatpush.msra.mxu0 %v13770_v33  ;;  %v13789_v57 = vld [vmem:[#allocation67_spill] sm:$0xff] }
 0x617   :  { %6962 = vmatpush.msra.mxu3 %v13766_v35  ;;  %6752 = vmatpush.msrb.mxu2 %v13768_v54  ;;  %v13775_v35 = vld [vmem:[#allocation109_spill] sm:$0xff]  ;;  %v13777_v54 = vld [vmem:[#allocation112_spill] sm:$0xff] }
 0x618   :  { %6904 = vmatpush.msra.mxu1 %v13738_v12  ;;  %6863 = vmatpush.msra.mxu0 %v13773_v49  ;;  %v13780_v49 = vld [vmem:[#allocation122_spill] sm:$0xff] }
 0x619   :  { %6968 = vmatpush.msra.mxu3 %v13769_v6  ;;  %6755 = vmatpush.msrb.mxu2 %v13771_v20  ;;  %v13778_v6 = vld [vmem:[#allocation115_spill] sm:$0xff] }
 0x61a   :  { %6867 = vmatpush.msra.mxu0 %v13776_v45  ;;  %v13779_v20 = vld [vmem:[#allocation119_spill] sm:$0xff]  ;;  %v13782_v45 = vld [vmem:[#allocation129_spill] sm:$0xff] }
 0x61b   :  { %6974 = vmatpush.msra.mxu3 %v13772_v36  ;;  %6758 = vmatpush.msrb.mxu2 %v13774_v3  ;;  %v13788_v3 = vld [vmem:[#allocation62_spill] sm:$0xff] }
 0x61d   :  { %6980 = vmatpush.msra.mxu3 %v13775_v35  ;;  %6911 = vmatpush.msra.mxu2 %v9136_v29  ;;  %v13781_v35 = vld [vmem:[#allocation126_spill] sm:$0xff] }
 0x61f   :  { %6986 = vmatpush.msra.mxu3 %v13777_v54  ;;  %6913 = vmatpush.msra.mxu2 %v12960_v48  ;;  %v13783_v54 = vld [vmem:[#allocation133_spill] sm:$0xff] }
 0x621   :  { %6992 = vmatpush.msra.mxu3 %v13778_v6  ;;  %6915 = vmatpush.msra.mxu2 %v12962_v30  ;;  %v13784_v6 = vld [vmem:[#allocation135_spill] sm:$0xff] }
 0x623   :  { %6998 = vmatpush.msra.mxu3 %v13779_v20  ;;  %6917 = vmatpush.msra.mxu2 %v12964_v53  ;;  %v13785_v20 = vld [vmem:[#allocation136_spill] sm:$0xff] }
 0x625   :  { %7004 = vmatpush.msra.mxu3 %v13780_v49  ;;  %6919 = vmatpush.msra.mxu2 %v12967_v26  ;;  %v13786_v49 = vld [vmem:[#allocation137_spill] sm:$0xff] }
 0x627   :  { %7010 = vmatpush.msra.mxu3 %v13781_v35  ;;  %6921 = vmatpush.msra.mxu2 %v12970_v2  ;;  %v13787_v35 = vld [vmem:[#allocation138_spill] sm:$0xff] }
 0x629   :  { %7016 = vmatpush.msra.mxu3 %v13782_v45  ;;  %6923 = vmatpush.msra.mxu2 %v12973_v7  ;;  %v5533_v45 = vpop.f32.mrf.mxu2 }
 0x62a   :  { %v5534_v36 = vadd.f32 %v5533_v45, %v13788_v3 }
 0x62b   :  { %7022 = vmatpush.msra.mxu3 %v13783_v54  ;;  %6925 = vmatpush.msra.mxu2 %v12976_v32  ;;  %v5688_v54 = vpop.f32.mrf.mxu0 }
 0x62d   :  { %7028 = vmatpush.msra.mxu3 %v13784_v6  ;;  %6927 = vmatpush.msra.mxu2 %v12979_v44  ;;  %v5727_v6 = vpop.f32.mrf.mxu1 }
 0x62f   :  { %7034 = vmatpush.msra.mxu3 %v13785_v20  ;;  %6929 = vmatpush.msra.mxu2 %v12982_v46  ;;  %v5634_v20 = vpop.f32.mrf.mxu3 }
 0x631   :  { %7040 = vmatpush.msra.mxu3 %v13786_v49  ;;  %6931 = vmatpush.msra.mxu2 %v12985_v52  ;;  %v5635_v49 = vadd.f32 %v5634_v20, %v5534_v36  ;;  %v5796_v33 = vpop.f32.mrf.mxu2 }
 0x633   :  { %7046 = vmatpush.msra.mxu3 %v13787_v35  ;;  %6933 = vmatpush.msra.mxu2 %v12988_v55  ;;  %v5874_v12 = vpop.f32.mrf.mxu0  ;;  %v5689_v35 = vadd.f32 %v5688_v54, %v5635_v49  ;;  %v5493_v49 = vld [vmem:[#allocation2 + $0x80] sm:$0xff] }
 0x634   :  { %v5875_v34 = vadd.f32 %v5874_v12, %v13789_v57 }
 0x635   :  { %6935 = vmatpush.msra.mxu2 %v12991_v15  ;;  %v5975_v23 = vpop.f32.mrf.mxu1  ;;  %v5728_v40 = vadd.f32 %v5727_v6, %v5689_v35 }
 0x636   :  { %v5976_v25 = vadd.f32 %v5975_v23, %v5875_v34 }
 0x637   :  { %6937 = vmatpush.msra.mxu2 %v12995_v24  ;;  %v5833_v19 = vpop.f32.mrf.mxu3  ;;  %v5797_v4 = vadd.f32 %v5796_v33, %v5728_v40 }
 0x639   :  { %6939 = vmatpush.msra.mxu2 %v13634_v1  ;;  %v5834_v9 = vadd.f32 %v5833_v19, %v5797_v4 }
 0x63b   :  { %6941 = vmatpush.msra.mxu2 %v13637_v60  ;;  %v6137_v45 = vpop.f32.mrf.mxu0  ;;  %v6518_v60 = vadd.f32 %v5834_v9, %v5492_v38 }
 0x63d   :  { %v6174_v20 = vpop.f32.mrf.mxu1  ;;  %v8742_v1 = vmul.f32 -1.442695, %v6518_v60 }
 0x63e   :  { %v6029_v51 = vpop.f32.mrf.mxu2 }
 0x63f   :  { %v6030_v42 = vadd.f32 %v6029_v51, %v5976_v25  ;;  %v6068_v0 = vpop.f32.mrf.mxu3  ;;  %8805 = vpow2.f32 %v8742_v1 }
 0x641   :  { %v6069_v21 = vadd.f32 %v6068_v0, %v6030_v42 }
 0x643   :  { %v6138_v3 = vadd.f32 %v6137_v45, %v6069_v21 }
 0x645   :  { %v6175_v36 = vadd.f32 %v6174_v20, %v6138_v3  ;;  %v8806_v57 = vpop.eup %8805 }
 0x646   :  { %v6522_v6 = vadd.f32 1.0, %v8806_v57 }
 0x647   :  { %v6538_v54 = vadd.f32 %v6175_v36, %v5493_v49 }
 0x648   :  { %v6534_v3 = vand.u32 2147483648, %v6522_v6  ;;  %vm6528_vm9 = vweird.f32 %v6522_v6  ;;  %v6532_v20 = vand.u32 2147483647, %v6522_v6 }
 0x649   :  { %v8743_v12 = vmul.f32 -1.442695, %v6538_v54 }
 0x64a   :  { %vm6533_vm11 = vcmp.eq.f32.partialorder %v6532_v20, 8.507059e+37 }
 0x64b   :  { %8807 = vpow2.f32 %v8743_v12 }
 0x64c   :  { %8809 = vrcp.f32 %v6522_v6 }
 0x651   :  { %v8808_v34 = vpop.eup %8807 }
 0x652   :  { %v6542_v25 = vadd.f32 1.0, %v8808_v34  ;;  %v8810_v33 = vpop.eup %8809  ;;  %v6370_v1 = vpop.f32.mrf.mxu0 }
 0x653   :  { %v6524_v4 = vmul.f32 %v8810_v33, %v6522_v6  ;;  %vm6529_vm8 = vweird.f32 %v8810_v33 }
 0x654   :  { %8811 = vrcp.f32 %v6542_v25  ;;  %vm6530_vm10 = vmor %vm6528_vm9, %vm6529_vm8  ;;  %vm6548_vm13 = vweird.f32 %v6542_v25 }
 0x655   :  { %v6525_v35 = vsub.f32 1.0, %v6524_v4  ;;  %v6409_v57 = vpop.f32.mrf.mxu1 }
 0x656   :  { %v6316_v19 = vpop.f32.mrf.mxu3 }
 0x657   :  { %v6526_v38 = vmul.f32 %v8810_v33, %v6525_v35 }
 0x659   :  { %v6527_v23 = vadd.f32 %v8810_v33, %v6526_v38  ;;  %v6552_v38 = vand.u32 2147483647, %v6542_v25 }
 0x65a   :  { %v8812_v9 = vpop.eup %8811 }
 0x65b   :  { %v6544_v42 = vmul.f32 %v8812_v9, %v6542_v25  ;;  %v6531_v12 = vsel %vm6530_vm10, %v8810_v33, %v6527_v23  ;;  %vm6549_vm12 = vweird.f32 %v8812_v9  ;;  %vm6553_vm15 = vcmp.eq.f32.partialorder %v6552_v38, 8.507059e+37  ;;  %v13801_v38 = vld [vmem:[#allocation124_spill] sm:$0xff] }
 0x65c   :  { %vm6550_vm14 = vmor %vm6548_vm13, %vm6549_vm12 }
 0x65d   :  { %v6545_v40 = vsub.f32 1.0, %v6544_v42 }
 0x65f   :  { %v6215_v0 = vpop.f32.mrf.mxu2  ;;  %v6546_v49 = vmul.f32 %v8812_v9, %v6545_v40 }
 0x660   :  { %v6216_v21 = vadd.f32 %v6215_v0, %v9989_v14  ;;  %v6535_v0 = vor.u32 1.1754944e-38, %v6534_v3 }
 0x662   :  { %v6317_v60 = vadd.f32 %v6316_v19, %v6216_v21  ;;  %v5494_v21 = vld [vmem:[#allocation2 + $0x88] sm:$0xff]  ;;  %v6536_v35 = vsel %vm6533_vm11, %v6535_v0, %v6531_v12  ;;  %v6547_v19 = vadd.f32 %v8812_v9, %v6546_v49  ;;  %v13792_v12 = vld [vmem:[#allocation130_spill] sm:$0xff]  ;;  %v13794_v0 = vld [vmem:[#allocation125_spill] sm:$0xff] }
 0x663   :  { %v13790_v49 = vld [vmem:[#allocation111_spill] sm:$0xff] }
 0x664   :  { %v6371_v51 = vadd.f32 %v6370_v1, %v6317_v60  ;;  %v6554_v60 = vand.u32 2147483648, %v6542_v25  ;;  %v6551_v6 = vsel %vm6550_vm14, %v8812_v9, %v6547_v19  ;;  %v13798_v19 = vld [vmem:[#allocation134_spill] sm:$0xff] }
 0x666   :  { %v6410_v45 = vadd.f32 %v6409_v57, %v6371_v51  ;;  %v6555_v51 = vor.u32 1.1754944e-38, %v6554_v60  ;;  %v13799_v60 = vld [vmem:[#allocation162_spill] sm:$0xff] }
 0x668   :  { %v6556_v40 = vsel %vm6553_vm15, %v6555_v51, %v6551_v6  ;;  %v13803_v6 = vld [vmem:[#allocation143_spill] sm:$0xff] }
 0x669   :  { %v6561_v33 = vsub.f32 1.0, %v6556_v40  ;;  %v6563_v3 = vmul.f32 %v6556_v40, %v11296_v18  ;;  %v13804_v51 = vld [vmem:[#allocation139_spill] sm:$0xff]  ;;  %v13805_v40 = vld [vmem:[#allocation128_spill] sm:$0xff] }
 0x676   :  { %v6515_v34 = vpop.f32.mrf.mxu3 }
 0x67f   :  { %v6478_v36 = vpop.f32.mrf.mxu2 }
 0x680   :  { %v6479_v54 = vadd.f32 %v6478_v36, %v6410_v45 }
 0x682   :  { %v6516_v4 = vadd.f32 %v6515_v34, %v6479_v54  ;;  %v13791_v54 = vld [vmem:[#allocation121_spill] sm:$0xff] }
 0x683   :  { %v13793_v34 = vld [vmem:[#allocation117_spill] sm:$0xff] }
 0x684   :  { %v6558_v42 = vmul.f32 %v6536_v35, %v6516_v4  ;;  %v13795_v4 = vld [vmem:[#allocation132_spill] sm:$0xff]  ;;  %v13797_v35 = vld [vmem:[#allocation158_spill] sm:$0xff] }
 0x686   :  { %v6559_v1 = vadd.f32 %v6558_v42, %v5494_v21  ;;  %v13796_v21 = vld [vmem:[#allocation120_spill] sm:$0xff]  ;;  %v13800_v42 = vld [vmem:[#allocation141_spill] sm:$0xff] }
 0x688   :  { %8813 = vtanh.f32 %v6559_v1  ;;  %v13802_v1 = vld [vmem:[#allocation166_spill] sm:$0xff] }
 0x68e   :  { %v8814_v23 = vpop.eup %8813 }
 0x68f   :  { %v6562_v57 = vmul.f32 %v8814_v23, %v6561_v33  ;;  %v13806_v33 = vld [vmem:[#allocation170_spill] sm:$0xff] }
 0x690   :  { %v13807_v23 = vld [vmem:[#allocation146_spill] sm:$0xff] }
 0x691   :  { %v11622_v45 = vadd.f32 %v6563_v3, %v6562_v57  ;;  %v13808_v57 = vld [vmem:[#allocation140_spill] sm:$0xff]  ;;  %v13809_v3 = vld [vmem:[#allocation131_spill] sm:$0xff] }
 0x693   :  { %v11625_v20 = vand.u32 4294901760, %v11622_v45 }
 0x695   :  { %6707 = vmatmul.f32.vlgmr.msrb.gmra.mxu1 %v11625_v20  ;;  %v11630_v25 = vsub.f32 %v11622_v45, %v11625_v20 }
 0x696   :  { %7107 = vmatpush.msrb.mxu1 %v9136_v29 }
 0x697   :  { %6761 = vmatmul.f32.vlgmr.msrb.gmra.mxu2 %v11630_v25  ;;  %v11635_v9 = vand.u32 4294901760, %v11630_v25 }
 0x698   :  { %7109 = vmatpush.msrb.mxu1 %v12960_v48  ;;  %7148 = vmatpush.msrb.mxu2 %v13007_v17 }
 0x699   :  { %6800 = vmatmul.f32.vlgmr.msrb.gmra.mxu3 %v11635_v9  ;;  %v6604_v18 = vsub.f32 %v11630_v25, %v11635_v9 }
 0x69a   :  { %7111 = vmatpush.msrb.mxu1 %v12962_v30  ;;  %7152 = vmatpush.msrb.mxu2 %v13008_v43 }
 0x69b   :  { %7215 = vmatpush.msrb.mxu3 %v9136_v29  ;;  %v11645_v36 = vand.u32 4294901760, %v6604_v18  ;;  %v13810_v18 = vld [vmem:[#allocation173_spill] sm:$0xff] }
 0x69c   :  { %7113 = vmatpush.msrb.mxu1 %v12964_v53  ;;  %7156 = vmatpush.msrb.mxu2 %v13009_v61 }
 0x69d   :  { %7217 = vmatpush.msrb.mxu3 %v12960_v48  ;;  %6606 = vmatmul.f32.vlgmr.msrb.gmra.mxu0 %v11645_v36 }
 0x69e   :  { %6906 = vmatmul.f32.vlgmr.msra.gmra.mxu1 %v11625_v20  ;;  %7054 = vmatpush.msrb.mxu0 %v13010_v27 }
 0x69f   :  { %7115 = vmatpush.msrb.mxu1 %v12967_v26  ;;  %7160 = vmatpush.msrb.mxu2 %v13011_v28 }
 0x6a0   :  { %7219 = vmatpush.msrb.mxu3 %v12962_v30  ;;  %6947 = vmatmul.f32.vlgmr.msra.gmra.mxu2 %v11645_v36 }
 0x6a1   :  { %7057 = vmatpush.msrb.mxu0 %v13012_v8  ;;  %7117 = vmatpush.msrb.mxu1 %v12970_v2 }
 0x6a2   :  { %7164 = vmatpush.msrb.mxu2 %v13013_v41  ;;  %7221 = vmatpush.msrb.mxu3 %v12964_v53 }
 0x6a3   :  { %7048 = vmatmul.f32.vlgmr.msra.gmra.mxu3 %v11625_v20  ;;  %7060 = vmatpush.msrb.mxu0 %v13014_v50 }
 0x6a4   :  { %7119 = vmatpush.msrb.mxu1 %v12973_v7  ;;  %7168 = vmatpush.msrb.mxu2 %v13015_v56 }
 0x6a5   :  { %7223 = vmatpush.msrb.mxu3 %v12967_v26  ;;  %7063 = vmatpush.msrb.mxu0 %v13016_v59 }
 0x6a6   :  { %7121 = vmatpush.msrb.mxu1 %v12976_v32  ;;  %7172 = vmatpush.msrb.mxu2 %v13017_v31 }
 0x6a7   :  { %7225 = vmatpush.msrb.mxu3 %v12970_v2  ;;  %6869 = vmatmul.f32.vlgmr.msra.gmra.mxu0 %v11625_v20 }
 0x6a8   :  { %7066 = vmatpush.msrb.mxu0 %v13018_v47  ;;  %7123 = vmatpush.msrb.mxu1 %v12979_v44 }
 0x6a9   :  { %7176 = vmatpush.msrb.mxu2 %v13162_v63  ;;  %7227 = vmatpush.msrb.mxu3 %v12973_v7 }
 0x6aa   :  { %7069 = vmatpush.msrb.mxu0 %v13163_v37  ;;  %7125 = vmatpush.msrb.mxu1 %v12982_v46 }
 0x6ab   :  { %7180 = vmatpush.msrb.mxu2 %v13164_v11  ;;  %7229 = vmatpush.msrb.mxu3 %v12976_v32 }
 0x6ac   :  { %7072 = vmatpush.msrb.mxu0 %v13165_v62  ;;  %7127 = vmatpush.msrb.mxu1 %v12985_v52 }
 0x6ad   :  { %7184 = vmatpush.msrb.mxu2 %v13166_v5  ;;  %7231 = vmatpush.msrb.mxu3 %v12979_v44 }
 0x6ae   :  { %7075 = vmatpush.msrb.mxu0 %v13167_v10  ;;  %7129 = vmatpush.msrb.mxu1 %v12988_v55 }
 0x6af   :  { %7188 = vmatpush.msrb.mxu2 %v13168_v22  ;;  %7233 = vmatpush.msrb.mxu3 %v12982_v46 }
 0x6b0   :  { %7078 = vmatpush.msrb.mxu0 %v13169_v16  ;;  %7131 = vmatpush.msrb.mxu1 %v12991_v15 }
 0x6b1   :  { %7192 = vmatpush.msrb.mxu2 %v13170_v58  ;;  %7235 = vmatpush.msrb.mxu3 %v12985_v52 }
 0x6b2   :  { %7081 = vmatpush.msrb.mxu0 %v13171_v39  ;;  %7133 = vmatpush.msrb.mxu1 %v12995_v24 }
 0x6b3   :  { %7196 = vmatpush.msrb.mxu2 %v13172_v13  ;;  %7237 = vmatpush.msrb.mxu3 %v12988_v55 }
 0x6b4   :  { %7084 = vmatpush.msrb.mxu0 %v13790_v49  ;;  %7135 = vmatpush.msrb.mxu1 %v13791_v54  ;;  %v13844_v49 = vld [vmem:[#allocation191_spill] sm:$0xff] }
 0x6b5   :  { %7200 = vmatpush.msrb.mxu2 %v13792_v12  ;;  %7239 = vmatpush.msrb.mxu3 %v12991_v15  ;;  %v13841_v12 = vld [vmem:[#allocation187_spill] sm:$0xff] }
 0x6b6   :  { %7087 = vmatpush.msrb.mxu0 %v13793_v34  ;;  %7137 = vmatpush.msrb.mxu1 %v13794_v0  ;;  %v13838_v34 = vld [vmem:[#allocation183_spill] sm:$0xff] }
 0x6b7   :  { %7204 = vmatpush.msrb.mxu2 %v13795_v4  ;;  %7241 = vmatpush.msrb.mxu3 %v12995_v24  ;;  %v13835_v4 = vld [vmem:[#allocation179_spill] sm:$0xff] }
 0x6b8   :  { %7141 = vmatmul.f32.vlgmr.msrb.gmra.mxu1 %v11635_v9  ;;  %7090 = vmatpush.msrb.mxu0 %v13796_v21  ;;  %v13832_v21 = vld [vmem:[#allocation175_spill] sm:$0xff] }
 0x6b9   :  { %7297 = vmatpush.msra.mxu1 %v13797_v35  ;;  %7208 = vmatpush.msrb.mxu2 %v13798_v19  ;;  %v13826_v19 = vld [vmem:[#allocation167_spill] sm:$0xff] }
 0x6ba   :  { %7243 = vmatpush.msrb.mxu3 %v13791_v54  ;;  %7210 = vmatmul.f32.vlgmr.msrb.gmra.mxu2 %v11625_v20  ;;  %v13829_v35 = vld [vmem:[#allocation171_spill] sm:$0xff] }
 0x6bb   :  { %7303 = vmatpush.msra.mxu1 %v13799_v60  ;;  %7395 = vmatpush.msra.mxu2 %v13800_v42  ;;  %v13820_v42 = vld [vmem:[#allocation157_spill] sm:$0xff] }
 0x6bc   :  { %7093 = vmatpush.msrb.mxu0 %v13801_v38  ;;  %7245 = vmatpush.msrb.mxu3 %v13794_v0  ;;  %v13811_v38 = vld [vmem:[#allocation149_spill] sm:$0xff] }
 0x6bd   :  { %7247 = vmatmul.f32.vlgmr.msrb.gmra.mxu3 %v11625_v20  ;;  %7309 = vmatpush.msra.mxu1 %v13802_v1  ;;  %v13813_v1 = vld [vmem:[#allocation177_spill] sm:$0xff] }
 0x6be   :  { %7398 = vmatpush.msra.mxu2 %v13803_v6  ;;  %7448 = vmatpush.msra.mxu3 %v13804_v51  ;;  %v13812_v6 = vld [vmem:[#allocation142_spill] sm:$0xff]  ;;  %v13823_v60 = vld [vmem:[#allocation161_spill] sm:$0xff] }
 0x6bf   :  { %7096 = vmatpush.msrb.mxu0 %v13805_v40  ;;  %7315 = vmatpush.msra.mxu1 %v13806_v33  ;;  %v13814_v40 = vld [vmem:[#allocation153_spill] sm:$0xff] }
 0x6c0   :  { %7401 = vmatpush.msra.mxu2 %v13807_v23  ;;  %7450 = vmatpush.msra.mxu3 %v13808_v57  ;;  %v13815_v23 = vld [vmem:[#allocation144_spill] sm:$0xff]  ;;  %v13816_v33 = vld [vmem:[#allocation181_spill] sm:$0xff] }
 0x6c1   :  { %7099 = vmatpush.msrb.mxu0 %v13809_v3  ;;  %7321 = vmatpush.msra.mxu1 %v13810_v18  ;;  %v13817_v3 = vld [vmem:[#allocation156_spill] sm:$0xff]  ;;  %v13818_v18 = vld [vmem:[#allocation147_spill] sm:$0xff] }
 0x6c2   :  { %7102 = vmatmul.f32.vlgmr.msrb.gmra.mxu0 %v11630_v25  ;;  %7404 = vmatpush.msra.mxu2 %v13811_v38  ;;  %v13819_v38 = vld [vmem:[#allocation185_spill] sm:$0xff] }
 0x6c3   :  { %7252 = vmatpush.msra.mxu0 %v13804_v51  ;;  %7452 = vmatpush.msra.mxu3 %v13812_v6 }
 0x6c4   :  { %7327 = vmatpush.msra.mxu1 %v13813_v1  ;;  %7407 = vmatpush.msra.mxu2 %v13814_v40  ;;  %v13821_v1 = vld [vmem:[#allocation150_spill] sm:$0xff]  ;;  %v13822_v40 = vld [vmem:[#allocation189_spill] sm:$0xff] }
 0x6c5   :  { %7254 = vmatpush.msra.mxu0 %v13808_v57  ;;  %7454 = vmatpush.msra.mxu3 %v13815_v23 }
 0x6c6   :  { %7333 = vmatpush.msra.mxu1 %v13816_v33  ;;  %7410 = vmatpush.msra.mxu2 %v13817_v3  ;;  %v13824_v33 = vld [vmem:[#allocation151_spill] sm:$0xff]  ;;  %v13825_v3 = vld [vmem:[#allocation192_spill] sm:$0xff] }
 0x6c7   :  { %7256 = vmatpush.msra.mxu0 %v13812_v6  ;;  %7456 = vmatpush.msra.mxu3 %v13818_v18 }
 0x6c8   :  { %7339 = vmatpush.msra.mxu1 %v13819_v38  ;;  %7413 = vmatpush.msra.mxu2 %v13820_v42  ;;  %v13827_v38 = vld [vmem:[#allocation154_spill] sm:$0xff]  ;;  %v13828_v42 = vld [vmem:[#allocation195_spill] sm:$0xff] }
 0x6c9   :  { %7258 = vmatpush.msra.mxu0 %v13815_v23  ;;  %7458 = vmatpush.msra.mxu3 %v13821_v1 }
 0x6ca   :  { %7345 = vmatpush.msra.mxu1 %v13822_v40  ;;  %7416 = vmatpush.msra.mxu2 %v13823_v60  ;;  %v13830_v40 = vld [vmem:[#allocation160_spill] sm:$0xff]  ;;  %v13831_v60 = vld [vmem:[#allocation197_spill] sm:$0xff] }
 0x6cb   :  { %7260 = vmatpush.msra.mxu0 %v13818_v18  ;;  %7460 = vmatpush.msra.mxu3 %v13824_v33 }
 0x6cc   :  { %7351 = vmatpush.msra.mxu1 %v13825_v3  ;;  %7419 = vmatpush.msra.mxu2 %v13826_v19  ;;  %v13833_v3 = vld [vmem:[#allocation164_spill] sm:$0xff]  ;;  %v13834_v19 = vld [vmem:[#allocation199_spill] sm:$0xff] }
 0x6cd   :  { %7262 = vmatpush.msra.mxu0 %v13821_v1  ;;  %7462 = vmatpush.msra.mxu3 %v13827_v38 }
 0x6ce   :  { %7357 = vmatpush.msra.mxu1 %v13828_v42  ;;  %7422 = vmatpush.msra.mxu2 %v13829_v35  ;;  %v13836_v42 = vld [vmem:[#allocation168_spill] sm:$0xff] }
 0x6cf   :  { %7264 = vmatpush.msra.mxu0 %v13824_v33  ;;  %7464 = vmatpush.msra.mxu3 %v13830_v40  ;;  %v13837_v35 = vld [vmem:[#allocation200_spill] sm:$0xff] }
 0x6d0   :  { %7363 = vmatpush.msra.mxu1 %v13831_v60  ;;  %7425 = vmatpush.msra.mxu2 %v13832_v21  ;;  %v13839_v60 = vld [vmem:[#allocation172_spill] sm:$0xff]  ;;  %v13840_v21 = vld [vmem:[#allocation201_spill] sm:$0xff] }
 0x6d1   :  { %7266 = vmatpush.msra.mxu0 %v13827_v38  ;;  %7466 = vmatpush.msra.mxu3 %v13833_v3 }
 0x6d2   :  { %7369 = vmatpush.msra.mxu1 %v13834_v19  ;;  %7428 = vmatpush.msra.mxu2 %v13835_v4  ;;  %v13842_v19 = vld [vmem:[#allocation176_spill] sm:$0xff]  ;;  %v13843_v4 = vld [vmem:[#allocation202_spill] sm:$0xff] }
 0x6d3   :  { %7268 = vmatpush.msra.mxu0 %v13830_v40  ;;  %7468 = vmatpush.msra.mxu3 %v13836_v42 }
 0x6d4   :  { %7375 = vmatpush.msra.mxu1 %v13837_v35  ;;  %7431 = vmatpush.msra.mxu2 %v13838_v34  ;;  %v13845_v35 = vld [vmem:[#allocation180_spill] sm:$0xff]  ;;  %v13846_v34 = vld [vmem:[#allocation194_spill] sm:$0xff] }
 0x6d5   :  { %7270 = vmatpush.msra.mxu0 %v13833_v3  ;;  %7470 = vmatpush.msra.mxu3 %v13839_v60 }
 0x6d6   :  { %7381 = vmatpush.msra.mxu1 %v13840_v21  ;;  %7434 = vmatpush.msra.mxu2 %v13841_v12  ;;  %v13847_v12 = vld [vmem:[#allocation184_spill] sm:$0xff]  ;;  %v13851_v21 = vld [vmem:[#allocation13_spill] sm:$0xff] }
 0x6d7   :  { %7272 = vmatpush.msra.mxu0 %v13836_v42  ;;  %7472 = vmatpush.msra.mxu3 %v13842_v19 }
 0x6d8   :  { %7387 = vmatpush.msra.mxu1 %v13843_v4  ;;  %7437 = vmatpush.msra.mxu2 %v13844_v49  ;;  %v13848_v49 = vld [vmem:[#allocation188_spill] sm:$0xff] }
 0x6d9   :  { %7274 = vmatpush.msra.mxu0 %v13839_v60  ;;  %7474 = vmatpush.msra.mxu3 %v13845_v35  ;;  %v13849_v4 = vld [vmem:[#allocation12_spill] sm:$0xff] }
 0x6da   :  { %7389 = vmatmul.f32.vlgmr.msra.gmra.mxu1 %v11625_v20  ;;  %7440 = vmatpush.msra.mxu2 %v13846_v34  ;;  %v13850_v34 = vld [vmem:[#allocation34_spill] sm:$0xff] }
 0x6db   :  { %7556 = vmatpush.msrb.mxu1 %v13804_v51  ;;  %7276 = vmatpush.msra.mxu0 %v13842_v19  ;;  %v13858_v51 = vld [vmem:[#allocation15_spill] sm:$0xff] }
 0x6dc   :  { %7476 = vmatpush.msra.mxu3 %v13847_v12  ;;  %7443 = vmatmul.f32.vlgmr.msra.gmra.mxu2 %v11630_v25  ;;  %v13852_v25 = vld [vmem:[#allocation35_spill] sm:$0xff] }
 0x6dd   :  { %7558 = vmatpush.msrb.mxu1 %v13808_v57  ;;  %7278 = vmatpush.msra.mxu0 %v13845_v35  ;;  %v13853_v57 = vld [vmem:[#allocation145_spill] sm:$0xff] }
 0x6de   :  { %7478 = vmatpush.msra.mxu3 %v13848_v49  ;;  %7644 = vmatpush.msrb.mxu2 %v13849_v4 }
 0x6df   :  { %7482 = vmatmul.f32.vlgmr.msra.gmra.mxu3 %v11635_v9  ;;  %7560 = vmatpush.msrb.mxu1 %v13812_v6  ;;  %v13854_v9 = vld [vmem:[#allocation38_spill] sm:$0xff] }
 0x6e0   :  { %7280 = vmatpush.msra.mxu0 %v13847_v12  ;;  %7689 = vmatpush.msrb.mxu3 %v13850_v34  ;;  %v13855_v6 = vld [vmem:[#allocation14_spill] sm:$0xff]  ;;  %v13856_v34 = vld [vmem:[#allocation148_spill] sm:$0xff] }
 0x6e1   :  { %7562 = vmatpush.msrb.mxu1 %v13815_v23  ;;  %7646 = vmatpush.msrb.mxu2 %v13851_v21  ;;  %v13857_v23 = vld [vmem:[#allocation43_spill] sm:$0xff] }
 0x6e2   :  { %7282 = vmatpush.msra.mxu0 %v13848_v49  ;;  %7695 = vmatpush.msrb.mxu3 %v13852_v25  ;;  %v13859_v25 = vld [vmem:[#allocation152_spill] sm:$0xff] }
 0x6e3   :  { %7288 = vmatmul.f32.vlgmr.msra.gmra.mxu0 %v11645_v36  ;;  %7564 = vmatpush.msrb.mxu1 %v13818_v18  ;;  %v13860_v36 = vld [vmem:[#allocation47_spill] sm:$0xff] }
 0x6e4   :  { %7489 = vmatpush.msrb.mxu0 %v13853_v57  ;;  %7701 = vmatpush.msrb.mxu3 %v13854_v9  ;;  %v13861_v57 = vld [vmem:[#allocation16_spill] sm:$0xff]  ;;  %v13862_v9 = vld [vmem:[#allocation155_spill] sm:$0xff] }
 0x6e5   :  { %7566 = vmatpush.msrb.mxu1 %v13821_v1  ;;  %7648 = vmatpush.msrb.mxu2 %v13855_v6  ;;  %v13863_v1 = vld [vmem:[#allocation51_spill] sm:$0xff] }
 0x6e6   :  { %7493 = vmatpush.msrb.mxu0 %v13856_v34  ;;  %7707 = vmatpush.msrb.mxu3 %v13857_v23  ;;  %v13864_v34 = vld [vmem:[#allocation17_spill] sm:$0xff]  ;;  %v13865_v23 = vld [vmem:[#allocation159_spill] sm:$0xff] }
 0x6e7   :  { %7568 = vmatpush.msrb.mxu1 %v13824_v33  ;;  %7650 = vmatpush.msrb.mxu2 %v13858_v51  ;;  %v13866_v33 = vld [vmem:[#allocation54_spill] sm:$0xff] }
 0x6e8   :  { %7497 = vmatpush.msrb.mxu0 %v13859_v25  ;;  %7713 = vmatpush.msrb.mxu3 %v13860_v36  ;;  %v13867_v25 = vld [vmem:[#allocation21_spill] sm:$0xff]  ;;  %v13868_v36 = vld [vmem:[#allocation163_spill] sm:$0xff] }
 0x6e9   :  { %7570 = vmatpush.msrb.mxu1 %v13827_v38  ;;  %7652 = vmatpush.msrb.mxu2 %v13861_v57  ;;  %v13869_v38 = vld [vmem:[#allocation58_spill] sm:$0xff] }
 0x6ea   :  { %7501 = vmatpush.msrb.mxu0 %v13862_v9  ;;  %7719 = vmatpush.msrb.mxu3 %v13863_v1  ;;  %v13870_v9 = vld [vmem:[#allocation24_spill] sm:$0xff]  ;;  %v13871_v1 = vld [vmem:[#allocation165_spill] sm:$0xff] }
 0x6eb   :  { %7572 = vmatpush.msrb.mxu1 %v13830_v40  ;;  %7654 = vmatpush.msrb.mxu2 %v13864_v34  ;;  %v13872_v40 = vld [vmem:[#allocation65_spill] sm:$0xff] }
 0x6ec   :  { %7505 = vmatpush.msrb.mxu0 %v13865_v23  ;;  %7725 = vmatpush.msrb.mxu3 %v13866_v33  ;;  %v13873_v23 = vld [vmem:[#allocation32_spill] sm:$0xff]  ;;  %v13874_v33 = vld [vmem:[#allocation169_spill] sm:$0xff] }
 0x6ed   :  { %7574 = vmatpush.msrb.mxu1 %v13833_v3  ;;  %7656 = vmatpush.msrb.mxu2 %v13867_v25  ;;  %v13875_v3 = vld [vmem:[#allocation70_spill] sm:$0xff] }
 0x6ee   :  { %7509 = vmatpush.msrb.mxu0 %v13868_v36  ;;  %7731 = vmatpush.msrb.mxu3 %v13869_v38  ;;  %v13876_v36 = vld [vmem:[#allocation39_spill] sm:$0xff]  ;;  %v13877_v38 = vld [vmem:[#allocation174_spill] sm:$0xff] }
 0x6ef   :  { %7576 = vmatpush.msrb.mxu1 %v13836_v42  ;;  %7658 = vmatpush.msrb.mxu2 %v13870_v9  ;;  %v13878_v42 = vld [vmem:[#allocation73_spill] sm:$0xff] }
 0x6f0   :  { %7513 = vmatpush.msrb.mxu0 %v13871_v1  ;;  %7737 = vmatpush.msrb.mxu3 %v13872_v40  ;;  %v13879_v1 = vld [vmem:[#allocation41_spill] sm:$0xff]  ;;  %v13880_v40 = vld [vmem:[#allocation178_spill] sm:$0xff] }
 0x6f1   :  { %7578 = vmatpush.msrb.mxu1 %v13839_v60  ;;  %7660 = vmatpush.msrb.mxu2 %v13873_v23  ;;  %v13881_v60 = vld [vmem:[#allocation78_spill] sm:$0xff] }
 0x6f2   :  { %7517 = vmatpush.msrb.mxu0 %v13874_v33  ;;  %7743 = vmatpush.msrb.mxu3 %v13875_v3  ;;  %v13882_v33 = vld [vmem:[#allocation45_spill] sm:$0xff]  ;;  %v13883_v3 = vld [vmem:[#allocation182_spill] sm:$0xff] }
 0x6f3   :  { %7580 = vmatpush.msrb.mxu1 %v13842_v19  ;;  %7662 = vmatpush.msrb.mxu2 %v13876_v36  ;;  %v13884_v19 = vld [vmem:[#allocation80_spill] sm:$0xff] }
 0x6f4   :  { %7521 = vmatpush.msrb.mxu0 %v13877_v38  ;;  %7749 = vmatpush.msrb.mxu3 %v13878_v42  ;;  %v13885_v38 = vld [vmem:[#allocation46_spill] sm:$0xff] }
 0x6f5   :  { %7582 = vmatpush.msrb.mxu1 %v13845_v35  ;;  %7664 = vmatpush.msrb.mxu2 %v13879_v1  ;;  %v13886_v42 = vld [vmem:[#allocation186_spill] sm:$0xff]  ;;  %v13894_v35 = vld [vmem:[#allocation196_spill] sm:$0xff] }
 0x6f6   :  { %7525 = vmatpush.msrb.mxu0 %v13880_v40  ;;  %7755 = vmatpush.msrb.mxu3 %v13881_v60  ;;  %v13887_v40 = vld [vmem:[#allocation84_spill] sm:$0xff]  ;;  %v13888_v60 = vld [vmem:[#allocation190_spill] sm:$0xff] }
 0x6f7   :  { %7584 = vmatpush.msrb.mxu1 %v13847_v12  ;;  %7666 = vmatpush.msrb.mxu2 %v13882_v33  ;;  %v13889_v12 = vld [vmem:[#allocation50_spill] sm:$0xff] }
 0x6f8   :  { %7529 = vmatpush.msrb.mxu0 %v13883_v3  ;;  %7761 = vmatpush.msrb.mxu3 %v13884_v19  ;;  %v13890_v3 = vld [vmem:[#allocation87_spill] sm:$0xff]  ;;  %v13891_v19 = vld [vmem:[#allocation193_spill] sm:$0xff] }
 0x6f9   :  { %7586 = vmatpush.msrb.mxu1 %v13848_v49  ;;  %7668 = vmatpush.msrb.mxu2 %v13885_v38  ;;  %v13892_v49 = vld [vmem:[#allocation57_spill] sm:$0xff] }
 0x6fa   :  { %7533 = vmatpush.msrb.mxu0 %v13886_v42  ;;  %7588 = vmatmul.f32.vlgmr.msrb.gmra.mxu1 %v11625_v20  ;;  %v13893_v42 = vld [vmem:[#allocation92_spill] sm:$0xff] }
 0x6fb   :  { %7840 = vmatpush.msra.mxu1 %v13849_v4  ;;  %7767 = vmatpush.msrb.mxu3 %v13887_v40  ;;  %v13895_v40 = vld [vmem:[#allocation61_spill] sm:$0xff] }
 0x6fc   :  { %7537 = vmatpush.msrb.mxu0 %v13888_v60  ;;  %7670 = vmatpush.msrb.mxu2 %v13889_v12  ;;  %v13896_v60 = vld [vmem:[#allocation198_spill] sm:$0xff] }
 0x6fd   :  { %7842 = vmatpush.msra.mxu1 %v13851_v21  ;;  %7773 = vmatpush.msrb.mxu3 %v13890_v3  ;;  %v13897_v3 = vld [vmem:[#allocation18_spill] sm:$0xff] }
 0x6fe   :  { %7541 = vmatpush.msrb.mxu0 %v13891_v19  ;;  %7672 = vmatpush.msrb.mxu2 %v13892_v49 }
 0x6ff   :  { %7844 = vmatpush.msra.mxu1 %v13855_v6  ;;  %7779 = vmatpush.msrb.mxu3 %v13893_v42  ;;  %v13898_v42 = vld [vmem:[#allocation25_spill] sm:$0xff] }
 0x700   :  { %7545 = vmatpush.msrb.mxu0 %v13894_v35  ;;  %7674 = vmatpush.msrb.mxu2 %v13895_v40 }
 0x701   :  { %7948 = vmatpush.msra.mxu3 %v13849_v4  ;;  %7846 = vmatpush.msra.mxu1 %v13858_v51  ;;  %v13899_v4 = vld [vmem:[#allocation19_spill] sm:$0xff] }
 0x702   :  { %7549 = vmatpush.msrb.mxu0 %v13896_v60  ;;  %7881 = vmatpush.msra.mxu2 %v13898_v42  ;;  %v13900_v60 = vld [vmem:[#allocation26_spill] sm:$0xff]  ;;  %v13908_v42 = vld [vmem:[#allocation36_spill] sm:$0xff] }
 0x703   :  { %7950 = vmatpush.msra.mxu3 %v13851_v21  ;;  %7551 = vmatmul.f32.vlgmr.msrb.gmra.mxu0 %v11625_v20  ;;  %v13901_v21 = vld [vmem:[#allocation20_spill] sm:$0xff]  ;;  %v13902_v20 = vld [vmem:[#allocation27_spill] sm:$0xff] }
 0x704   :  { %7848 = vmatpush.msra.mxu1 %v13861_v57  ;;  %7787 = vmatpush.msra.mxu0 %v13897_v3  ;;  %v13904_v3 = vld [vmem:[#allocation29_spill] sm:$0xff] }
 0x705   :  { %7952 = vmatpush.msra.mxu3 %v13855_v6  ;;  %7885 = vmatpush.msra.mxu2 %v13900_v60  ;;  %v13903_v6 = vld [vmem:[#allocation22_spill] sm:$0xff] }
 0x706   :  { %7850 = vmatpush.msra.mxu1 %v13864_v34  ;;  %7790 = vmatpush.msra.mxu0 %v13899_v4  ;;  %v13906_v60 = vld [vmem:[#allocation30_spill] sm:$0xff]  ;;  %v13910_v4 = vld [vmem:[#allocation37_spill] sm:$0xff] }
 0x707   :  { %7954 = vmatpush.msra.mxu3 %v13858_v51  ;;  %7889 = vmatpush.msra.mxu2 %v13902_v20  ;;  %v13905_v51 = vld [vmem:[#allocation23_spill] sm:$0xff]  ;;  %v13914_v20 = vld [vmem:[#allocation48_spill] sm:$0xff] }
 0x708   :  { %7852 = vmatpush.msra.mxu1 %v13867_v25  ;;  %7793 = vmatpush.msra.mxu0 %v13901_v21  ;;  %v13912_v21 = vld [vmem:[#allocation42_spill] sm:$0xff] }
 0x709   :  { %7956 = vmatpush.msra.mxu3 %v13861_v57  ;;  %7893 = vmatpush.msra.mxu2 %v13904_v3  ;;  %v13907_v57 = vld [vmem:[#allocation28_spill] sm:$0xff] }
 0x70a   :  { %7854 = vmatpush.msra.mxu1 %v13870_v9  ;;  %7796 = vmatpush.msra.mxu0 %v13903_v6  ;;  %v13916_v6 = vld [vmem:[#allocation52_spill] sm:$0xff] }
 0x70b   :  { %7958 = vmatpush.msra.mxu3 %v13864_v34  ;;  %7897 = vmatpush.msra.mxu2 %v13906_v60  ;;  %v13909_v34 = vld [vmem:[#allocation31_spill] sm:$0xff]  ;;  %v13918_v3 = vld [vmem:[#allocation56_spill] sm:$0xff] }
 0x70c   :  { %7856 = vmatpush.msra.mxu1 %v13873_v23  ;;  %7799 = vmatpush.msra.mxu0 %v13905_v51  ;;  %v13920_v51 = vld [vmem:[#allocation86_spill] sm:$0xff]  ;;  %v13921_v60 = vld [vmem:[#allocation60_spill] sm:$0xff] }
 0x70d   :  { %7960 = vmatpush.msra.mxu3 %v13867_v25  ;;  %7901 = vmatpush.msra.mxu2 %v13908_v42  ;;  %v13911_v25 = vld [vmem:[#allocation33_spill] sm:$0xff]  ;;  %v13924_v42 = vld [vmem:[#allocation63_spill] sm:$0xff] }
 0x70e   :  { %7858 = vmatpush.msra.mxu1 %v13876_v36  ;;  %7802 = vmatpush.msra.mxu0 %v13907_v57  ;;  %v13923_v57 = vld [vmem:[#allocation90_spill] sm:$0xff] }
 0x70f   :  { %7962 = vmatpush.msra.mxu3 %v13870_v9  ;;  %7905 = vmatpush.msra.mxu2 %v13910_v4  ;;  %v13913_v9 = vld [vmem:[#allocation40_spill] sm:$0xff] }
 0x710   :  { %7860 = vmatpush.msra.mxu1 %v13879_v1  ;;  %7805 = vmatpush.msra.mxu0 %v13909_v34  ;;  %v13926_v34 = vld [vmem:[#allocation96_spill] sm:$0xff] }
 0x711   :  { %7964 = vmatpush.msra.mxu3 %v13873_v23  ;;  %7909 = vmatpush.msra.mxu2 %v13912_v21  ;;  %v13915_v23 = vld [vmem:[#allocation44_spill] sm:$0xff]  ;;  %v13930_v21 = vld [vmem:[#allocation74_spill] sm:$0xff] }
 0x712   :  { %7862 = vmatpush.msra.mxu1 %v13882_v33  ;;  %7808 = vmatpush.msra.mxu0 %v13911_v25  ;;  %v13927_v4 = vld [vmem:[#allocation68_spill] sm:$0xff]  ;;  %v13928_v25 = vld [vmem:[#allocation66_spill] sm:$0xff] }
 0x713   :  { %7966 = vmatpush.msra.mxu3 %v13876_v36  ;;  %7913 = vmatpush.msra.mxu2 %v13914_v20  ;;  %v13917_v36 = vld [vmem:[#allocation49_spill] sm:$0xff] }
 0x714   :  { %7864 = vmatpush.msra.mxu1 %v13885_v38  ;;  %7811 = vmatpush.msra.mxu0 %v13913_v9  ;;  %v13931_v9 = vld [vmem:[#allocation71_spill] sm:$0xff]  ;;  %v13932_v20 = vld [vmem:[#allocation109_spill] sm:$0xff] }
 0x715   :  { %7968 = vmatpush.msra.mxu3 %v13879_v1  ;;  %7917 = vmatpush.msra.mxu2 %v13916_v6  ;;  %v13919_v1 = vld [vmem:[#allocation53_spill] sm:$0xff]  ;;  %v13936_v6 = vld [vmem:[#allocation119_spill] sm:$0xff] }
 0x716   :  { %7866 = vmatpush.msra.mxu1 %v13889_v12  ;;  %7814 = vmatpush.msra.mxu0 %v13915_v23  ;;  %v13934_v23 = vld [vmem:[#allocation112_spill] sm:$0xff] }
 0x717   :  { %7970 = vmatpush.msra.mxu3 %v13882_v33  ;;  %7921 = vmatpush.msra.mxu2 %v13918_v3  ;;  %v13922_v33 = vld [vmem:[#allocation55_spill] sm:$0xff]  ;;  %v13938_v3 = vld [vmem:[#allocation126_spill] sm:$0xff] }
 0x718   :  { %7868 = vmatpush.msra.mxu1 %v13892_v49  ;;  %7817 = vmatpush.msra.mxu0 %v13917_v36  ;;  %v13937_v36 = vld [vmem:[#allocation122_spill] sm:$0xff] }
 0x719   :  { %7972 = vmatpush.msra.mxu3 %v13885_v38  ;;  %7925 = vmatpush.msra.mxu2 %v13921_v60  ;;  %v13925_v38 = vld [vmem:[#allocation59_spill] sm:$0xff] }
 0x71a   :  { %7870 = vmatpush.msra.mxu1 %v13895_v40  ;;  %7820 = vmatpush.msra.mxu0 %v13919_v1  ;;  %v13939_v1 = vld [vmem:[#allocation129_spill] sm:$0xff]  ;;  %v13941_v60 = vld [vmem:[#allocation135_spill] sm:$0xff] }
 0x71b   :  { %7974 = vmatpush.msra.mxu3 %v13889_v12  ;;  %7929 = vmatpush.msra.mxu2 %v13924_v42  ;;  %v13929_v12 = vld [vmem:[#allocation105_spill] sm:$0xff] }
 0x71c   :  { %8030 = vmatpush.msrb.mxu1 %v13920_v51  ;;  %7823 = vmatpush.msra.mxu0 %v13922_v33  ;;  %v13940_v51 = vld [vmem:[#allocation133_spill] sm:$0xff]  ;;  %v13942_v33 = vld [vmem:[#allocation136_spill] sm:$0xff] }
 0x71d   :  { %7976 = vmatpush.msra.mxu3 %v13892_v49  ;;  %7933 = vmatpush.msra.mxu2 %v13927_v4  ;;  %v13933_v49 = vld [vmem:[#allocation79_spill] sm:$0xff]  ;;  %v13943_v42 = vld [vmem:[#allocation137_spill] sm:$0xff]  ;;  %v6708_v4 = vpop.f32.mrf.mxu1 }
 0x71e   :  { %8036 = vmatpush.msrb.mxu1 %v13923_v57  ;;  %7826 = vmatpush.msra.mxu0 %v13925_v38  ;;  %v6607_v57 = vpop.f32.mrf.mxu0  ;;  %v6762_v38 = vpop.f32.mrf.mxu2 }
 0x71f   :  { %7978 = vmatpush.msra.mxu3 %v13895_v40  ;;  %7937 = vmatpush.msra.mxu2 %v13930_v21  ;;  %v13935_v40 = vld [vmem:[#allocation115_spill] sm:$0xff]  ;;  %v6801_v21 = vpop.f32.mrf.mxu3 }
 0x720   :  { %8042 = vmatpush.msrb.mxu1 %v13926_v34  ;;  %7829 = vmatpush.msra.mxu0 %v13928_v25  ;;  %v13944_v34 = vld [vmem:[#allocation138_spill] sm:$0xff] }
 0x721   :  { %7941 = vmatpush.msra.mxu2 %v13933_v49  ;;  %v13945_v25 = vld [vmem:[#allocation62_spill] sm:$0xff] }
 0x722   :  { %8048 = vmatpush.msrb.mxu1 %v13929_v12  ;;  %7832 = vmatpush.msra.mxu0 %v13931_v9  ;;  %v6608_v12 = vadd.f32 %v6607_v57, %v13945_v25 }
 0x724   :  { %8054 = vmatpush.msrb.mxu1 %v13932_v20  ;;  %7985 = vmatpush.msrb.mxu0 %v9136_v29  ;;  %v6709_v9 = vadd.f32 %v6708_v4, %v6608_v12  ;;  %v6566_v4 = vld [vmem:[#allocation2 + $0x90] sm:$0xff] }
 0x726   :  { %8060 = vmatpush.msrb.mxu1 %v13934_v23  ;;  %7987 = vmatpush.msrb.mxu0 %v12960_v48  ;;  %v6870_v20 = vpop.f32.mrf.mxu0  ;;  %v6948_v49 = vpop.f32.mrf.mxu2  ;;  %v6763_v23 = vadd.f32 %v6762_v38, %v6709_v9  ;;  %v6567_v38 = vld [vmem:[#allocation2 + $0x98] sm:$0xff] }
 0x728   :  { %8066 = vmatpush.msrb.mxu1 %v13935_v40  ;;  %7989 = vmatpush.msrb.mxu0 %v12962_v30  ;;  %v13946_v40 = vld [vmem:[#allocation67_spill] sm:$0xff] }
 0x72a   :  { %8072 = vmatpush.msrb.mxu1 %v13936_v6  ;;  %7991 = vmatpush.msrb.mxu0 %v12964_v53  ;;  %v6949_v6 = vadd.f32 %v6948_v49, %v13946_v40 }
 0x72c   :  { %8078 = vmatpush.msrb.mxu1 %v13937_v36  ;;  %7993 = vmatpush.msrb.mxu0 %v12967_v26  ;;  %v6907_v36 = vpop.f32.mrf.mxu1 }
 0x72e   :  { %8084 = vmatpush.msrb.mxu1 %v13938_v3  ;;  %7995 = vmatpush.msrb.mxu0 %v12970_v2  ;;  %v7049_v3 = vpop.f32.mrf.mxu3 }
 0x730   :  { %8090 = vmatpush.msrb.mxu1 %v13939_v1  ;;  %7997 = vmatpush.msrb.mxu0 %v12973_v7  ;;  %v6802_v1 = vadd.f32 %v6801_v21, %v6763_v23 }
 0x732   :  { %8096 = vmatpush.msrb.mxu1 %v13940_v51  ;;  %7999 = vmatpush.msrb.mxu0 %v12976_v32  ;;  %v6871_v57 = vadd.f32 %v6870_v20, %v6802_v1 }
 0x734   :  { %8102 = vmatpush.msrb.mxu1 %v13941_v60  ;;  %8001 = vmatpush.msrb.mxu0 %v12979_v44  ;;  %v7050_v60 = vadd.f32 %v7049_v3, %v6949_v6  ;;  %v6908_v25 = vadd.f32 %v6907_v36, %v6871_v57 }
 0x736   :  { %8108 = vmatpush.msrb.mxu1 %v13942_v33  ;;  %8003 = vmatpush.msrb.mxu0 %v12982_v46  ;;  %v7592_v19 = vadd.f32 %v6908_v25, %v6566_v4 }
 0x738   :  { %8114 = vmatpush.msrb.mxu1 %v13943_v42  ;;  %8005 = vmatpush.msrb.mxu0 %v12985_v52  ;;  %v7142_v42 = vpop.f32.mrf.mxu1 }
 0x73a   :  { %8120 = vmatpush.msrb.mxu1 %v13944_v34  ;;  %8007 = vmatpush.msrb.mxu0 %v12988_v55 }
 0x73c   :  { %8009 = vmatpush.msrb.mxu0 %v12991_v15 }
 0x73d   :  { %v7211_v12 = vpop.f32.mrf.mxu2 }
 0x73e   :  { %8011 = vmatpush.msrb.mxu0 %v12995_v24 }
 0x73f   :  { %v7103_v51 = vpop.f32.mrf.mxu0 }
 0x740   :  { %8013 = vmatpush.msrb.mxu0 %v13791_v54  ;;  %v7104_v33 = vadd.f32 %v7103_v51, %v7050_v60  ;;  %v7248_v18 = vpop.f32.mrf.mxu3 }
 0x742   :  { %8015 = vmatpush.msrb.mxu0 %v13794_v0  ;;  %v7143_v34 = vadd.f32 %v7142_v42, %v7104_v33  ;;  %v8744_v0 = vmul.f32 -1.442695, %v7592_v19 }
 0x744   :  { %v7212_v35 = vadd.f32 %v7211_v12, %v7143_v34  ;;  %8815 = vpow2.f32 %v8744_v0 }
 0x746   :  { %v7249_v54 = vadd.f32 %v7248_v18, %v7212_v35 }
 0x748   :  { %v7612_v9 = vadd.f32 %v7249_v54, %v6567_v38 }
 0x74a   :  { %v8745_v49 = vmul.f32 -1.442695, %v7612_v9  ;;  %v8816_v40 = vpop.eup %8815 }
 0x74b   :  { %v7596_v21 = vadd.f32 1.0, %v8816_v40 }
 0x74c   :  { %8817 = vpow2.f32 %v8745_v49 }
 0x74d   :  { %8819 = vrcp.f32 %v7596_v21  ;;  %v7608_v42 = vand.u32 2147483648, %v7596_v21  ;;  %vm7602_vm1 = vweird.f32 %v7596_v21  ;;  %v7606_v4 = vand.u32 2147483647, %v7596_v21 }
 0x74f   :  { %vm7607_vm3 = vcmp.eq.f32.partialorder %v7606_v4, 8.507059e+37 }
 0x752   :  { %v8818_v23 = vpop.eup %8817 }
 0x753   :  { %v7616_v20 = vadd.f32 1.0, %v8818_v23  ;;  %v8820_v6 = vpop.eup %8819 }
 0x754   :  { %v7598_v3 = vmul.f32 %v8820_v6, %v7596_v21  ;;  %vm7603_vm0 = vweird.f32 %v8820_v6 }
 0x755   :  { %8821 = vrcp.f32 %v7616_v20  ;;  %vm7604_vm2 = vmor %vm7602_vm1, %vm7603_vm0  ;;  %vm7622_vm5 = vweird.f32 %v7616_v20 }
 0x756   :  { %v7599_v51 = vsub.f32 1.0, %v7598_v3 }
 0x757   :  { %v7390_v35 = vpop.f32.mrf.mxu1 }
 0x758   :  { %v7600_v54 = vmul.f32 %v8820_v6, %v7599_v51  ;;  %v6568_v51 = vld [vmem:[#allocation2 + $0xa0] sm:$0xff] }
 0x75a   :  { %v7601_v57 = vadd.f32 %v8820_v6, %v7600_v54  ;;  %v7626_v54 = vand.u32 2147483647, %v7616_v20 }
 0x75b   :  { %v8822_v25 = vpop.eup %8821 }
 0x75c   :  { %v7618_v19 = vmul.f32 %v8822_v25, %v7616_v20  ;;  %v7605_v49 = vsel %vm7604_vm2, %v8820_v6, %v7601_v57  ;;  %vm7623_vm4 = vweird.f32 %v8822_v25  ;;  %vm7627_vm7 = vcmp.eq.f32.partialorder %v7626_v54, 8.507059e+37  ;;  %v13995_v54 = vld [vmem:[#allocation183_spill] sm:$0xff] }
 0x75d   :  { %vm7624_vm6 = vmor %vm7622_vm5, %vm7623_vm4 }
 0x75e   :  { %v7619_v33 = vsub.f32 1.0, %v7618_v19 }
 0x75f   :  { %v7444_v0 = vpop.f32.mrf.mxu2 }
 0x760   :  { %v7289_v36 = vpop.f32.mrf.mxu0  ;;  %v7620_v12 = vmul.f32 %v8822_v25, %v7619_v33 }
 0x761   :  { %v7290_v1 = vadd.f32 %v7289_v36, %v9989_v14  ;;  %v7609_v36 = vor.u32 1.1754944e-38, %v7608_v42 }
 0x762   :  { %v7483_v40 = vpop.f32.mrf.mxu3 }
 0x763   :  { %v7391_v18 = vadd.f32 %v7390_v35, %v7290_v1  ;;  %v7621_v1 = vadd.f32 %v8822_v25, %v7620_v12  ;;  %v7610_v35 = vsel %vm7607_vm3, %v7609_v36, %v7605_v49  ;;  %v13986_v49 = vld [vmem:[#allocation171_spill] sm:$0xff]  ;;  %v13988_v36 = vld [vmem:[#allocation197_spill] sm:$0xff] }
 0x765   :  { %v7445_v60 = vadd.f32 %v7444_v0, %v7391_v18  ;;  %v7628_v18 = vand.u32 2147483648, %v7616_v20  ;;  %v7625_v21 = vsel %vm7624_vm6, %v8822_v25, %v7621_v1  ;;  %v13990_v1 = vld [vmem:[#allocation164_spill] sm:$0xff] }
 0x767   :  { %v7484_v34 = vadd.f32 %v7483_v40, %v7445_v60  ;;  %v7629_v60 = vor.u32 1.1754944e-38, %v7628_v18  ;;  %v13993_v18 = vld [vmem:[#allocation168_spill] sm:$0xff] }
 0x769   :  { %v7630_v33 = vsel %vm7627_vm7, %v7629_v60, %v7625_v21  ;;  %v13997_v21 = vld [vmem:[#allocation201_spill] sm:$0xff]  ;;  %v13998_v60 = vld [vmem:[#allocation187_spill] sm:$0xff] }
 0x76a   :  { %v7635_v6 = vsub.f32 1.0, %v7630_v33  ;;  %v7637_v42 = vmul.f32 %v7630_v33, %v11622_v45  ;;  %v13999_v33 = vld [vmem:[#allocation176_spill] sm:$0xff] }
 0x777   :  { %v7589_v23 = vpop.f32.mrf.mxu1 }
 0x780   :  { %v7552_v38 = vpop.f32.mrf.mxu0 }
 0x781   :  { %v7553_v9 = vadd.f32 %v7552_v38, %v7484_v34  ;;  %v13984_v38 = vld [vmem:[#allocation154_spill] sm:$0xff] }
 0x783   :  { %v7590_v3 = vadd.f32 %v7589_v23, %v7553_v9  ;;  %v13985_v9 = vld [vmem:[#allocation195_spill] sm:$0xff]  ;;  %v13987_v23 = vld [vmem:[#allocation160_spill] sm:$0xff] }
 0x785   :  { %v7632_v19 = vmul.f32 %v7610_v35, %v7590_v3  ;;  %v13989_v3 = vld [vmem:[#allocation175_spill] sm:$0xff] }
 0x786   :  { %v13992_v35 = vld [vmem:[#allocation179_spill] sm:$0xff] }
 0x787   :  { %v7633_v0 = vadd.f32 %v7632_v19, %v6568_v51  ;;  %v13991_v51 = vld [vmem:[#allocation199_spill] sm:$0xff]  ;;  %v13994_v19 = vld [vmem:[#allocation200_spill] sm:$0xff] }
 0x789   :  { %8823 = vtanh.f32 %v7633_v0  ;;  %v13996_v0 = vld [vmem:[#allocation172_spill] sm:$0xff] }
 0x78f   :  { %v8824_v57 = vpop.eup %8823 }
 0x790   :  { %v7636_v40 = vmul.f32 %v8824_v57, %v7635_v6  ;;  %v14000_v6 = vld [vmem:[#allocation202_spill] sm:$0xff]  ;;  %v14001_v57 = vld [vmem:[#allocation191_spill] sm:$0xff] }
 0x792   :  { %v11948_v34 = vadd.f32 %v7637_v42, %v7636_v40  ;;  %v14002_v40 = vld [vmem:[#allocation180_spill] sm:$0xff]  ;;  %v14003_v42 = vld [vmem:[#allocation194_spill] sm:$0xff] }
 0x794   :  { %v11951_v4 = vand.u32 4294901760, %v11948_v34 }
 0x796   :  { %7781 = vmatmul.f32.vlgmr.msrb.gmra.mxu3 %v11951_v4  ;;  %v11956_v20 = vsub.f32 %v11948_v34, %v11951_v4 }
 0x797   :  { %8181 = vmatpush.msrb.mxu3 %v9136_v29 }
 0x798   :  { %7835 = vmatmul.f32.vlgmr.msra.gmra.mxu0 %v11956_v20  ;;  %v11961_v25 = vand.u32 4294901760, %v11956_v20 }
 0x799   :  { %8183 = vmatpush.msrb.mxu3 %v12960_v48  ;;  %8222 = vmatpush.msra.mxu0 %v13007_v17  ;;  %v13961_v17 = vld [vmem:[#allocation139_spill] sm:$0xff] }
 0x79a   :  { %7874 = vmatmul.f32.vlgmr.msra.gmra.mxu1 %v11961_v25  ;;  %v7678_v45 = vsub.f32 %v11956_v20, %v11961_v25 }
 0x79b   :  { %8185 = vmatpush.msrb.mxu3 %v12962_v30  ;;  %8226 = vmatpush.msra.mxu0 %v13008_v43  ;;  %v13962_v43 = vld [vmem:[#allocation128_spill] sm:$0xff] }
 0x79c   :  { %8289 = vmatpush.msra.mxu1 %v9136_v29  ;;  %v11971_v12 = vand.u32 4294901760, %v7678_v45  ;;  %v13955_v29 = vld [vmem:[#allocation134_spill] sm:$0xff]  ;;  %v14004_v45 = vld [vmem:[#allocation184_spill] sm:$0xff] }
 0x79d   :  { %8187 = vmatpush.msrb.mxu3 %v12964_v53  ;;  %8230 = vmatpush.msra.mxu0 %v13009_v61  ;;  %v13963_v61 = vld [vmem:[#allocation170_spill] sm:$0xff] }
 0x79e   :  { %8291 = vmatpush.msra.mxu1 %v12960_v48  ;;  %7680 = vmatmul.f32.vlgmr.msrb.gmra.mxu2 %v11971_v12  ;;  %v13951_v48 = vld [vmem:[#allocation125_spill] sm:$0xff] }
 0x79f   :  { %7980 = vmatmul.f32.vlgmr.msra.gmra.mxu3 %v11951_v4  ;;  %8128 = vmatpush.msrb.mxu2 %v13010_v27  ;;  %v13964_v27 = vld [vmem:[#allocation146_spill] sm:$0xff] }
 0x7a0   :  { %8189 = vmatpush.msrb.mxu3 %v12967_v26  ;;  %8234 = vmatpush.msra.mxu0 %v13011_v28  ;;  %v13965_v28 = vld [vmem:[#allocation140_spill] sm:$0xff] }
 0x7a1   :  { %8293 = vmatpush.msra.mxu1 %v12962_v30  ;;  %8021 = vmatmul.f32.vlgmr.msrb.gmra.mxu0 %v11971_v12  ;;  %v13959_v30 = vld [vmem:[#allocation166_spill] sm:$0xff] }
 0x7a2   :  { %8131 = vmatpush.msrb.mxu2 %v13012_v8  ;;  %8191 = vmatpush.msrb.mxu3 %v12970_v2  ;;  %v13966_v8 = vld [vmem:[#allocation131_spill] sm:$0xff] }
 0x7a3   :  { %8238 = vmatpush.msra.mxu0 %v13013_v41  ;;  %8295 = vmatpush.msra.mxu1 %v12964_v53  ;;  %v13958_v53 = vld [vmem:[#allocation124_spill] sm:$0xff]  ;;  %v13967_v41 = vld [vmem:[#allocation173_spill] sm:$0xff] }
 0x7a4   :  { %8122 = vmatmul.f32.vlgmr.msrb.gmra.mxu1 %v11951_v4  ;;  %8134 = vmatpush.msrb.mxu2 %v13014_v50  ;;  %v13968_v50 = vld [vmem:[#allocation149_spill] sm:$0xff] }
 0x7a5   :  { %8193 = vmatpush.msrb.mxu3 %v12973_v7  ;;  %8242 = vmatpush.msra.mxu0 %v13015_v56  ;;  %v13969_v56 = vld [vmem:[#allocation142_spill] sm:$0xff] }
 0x7a6   :  { %8297 = vmatpush.msra.mxu1 %v12967_v26  ;;  %8137 = vmatpush.msrb.mxu2 %v13016_v59  ;;  %v13947_v26 = vld [vmem:[#allocation111_spill] sm:$0xff]  ;;  %v13970_v59 = vld [vmem:[#allocation177_spill] sm:$0xff] }
 0x7a7   :  { %8195 = vmatpush.msrb.mxu3 %v12976_v32  ;;  %8246 = vmatpush.msra.mxu0 %v13017_v31  ;;  %v13971_v31 = vld [vmem:[#allocation153_spill] sm:$0xff] }
 0x7a8   :  { %8299 = vmatpush.msra.mxu1 %v12970_v2  ;;  %7943 = vmatmul.f32.vlgmr.msra.gmra.mxu2 %v11951_v4  ;;  %v13953_v2 = vld [vmem:[#allocation120_spill] sm:$0xff] }
 0x7a9   :  { %8140 = vmatpush.msrb.mxu2 %v13018_v47  ;;  %8197 = vmatpush.msrb.mxu3 %v12979_v44  ;;  %v13972_v47 = vld [vmem:[#allocation144_spill] sm:$0xff] }
 0x7aa   :  { %8250 = vmatpush.msra.mxu0 %v13162_v63  ;;  %8301 = vmatpush.msra.mxu1 %v12973_v7  ;;  %v13957_v7 = vld [vmem:[#allocation141_spill] sm:$0xff] }
 0x7ab   :  { %8143 = vmatpush.msrb.mxu2 %v13163_v37  ;;  %8199 = vmatpush.msrb.mxu3 %v12982_v46  ;;  %v13973_v63 = vld [vmem:[#allocation181_spill] sm:$0xff]  ;;  %v13974_v37 = vld [vmem:[#allocation156_spill] sm:$0xff] }
 0x7ac   :  { %8254 = vmatpush.msra.mxu0 %v13164_v11  ;;  %8303 = vmatpush.msra.mxu1 %v12976_v32  ;;  %v13948_v32 = vld [vmem:[#allocation121_spill] sm:$0xff]  ;;  %v13975_v11 = vld [vmem:[#allocation147_spill] sm:$0xff] }
 0x7ad   :  { %8146 = vmatpush.msrb.mxu2 %v13165_v62  ;;  %8201 = vmatpush.msrb.mxu3 %v12985_v52  ;;  %v13976_v62 = vld [vmem:[#allocation185_spill] sm:$0xff] }
 0x7ae   :  { %8258 = vmatpush.msra.mxu0 %v13166_v5  ;;  %8305 = vmatpush.msra.mxu1 %v12979_v44  ;;  %v13949_v44 = vld [vmem:[#allocation130_spill] sm:$0xff]  ;;  %v13977_v5 = vld [vmem:[#allocation157_spill] sm:$0xff] }
 0x7af   :  { %8149 = vmatpush.msrb.mxu2 %v13167_v10  ;;  %8203 = vmatpush.msrb.mxu3 %v12988_v55  ;;  %v13978_v10 = vld [vmem:[#allocation150_spill] sm:$0xff] }
 0x7b0   :  { %8262 = vmatpush.msra.mxu0 %v13168_v22  ;;  %8307 = vmatpush.msra.mxu1 %v12982_v46  ;;  %v13950_v46 = vld [vmem:[#allocation117_spill] sm:$0xff] }
 0x7b1   :  { %8152 = vmatpush.msrb.mxu2 %v13169_v16  ;;  %8205 = vmatpush.msrb.mxu3 %v12991_v15  ;;  %v13979_v22 = vld [vmem:[#allocation189_spill] sm:$0xff] }
 0x7b2   :  { %8266 = vmatpush.msra.mxu0 %v13170_v58  ;;  %8309 = vmatpush.msra.mxu1 %v12985_v52  ;;  %v13952_v52 = vld [vmem:[#allocation132_spill] sm:$0xff]  ;;  %v13980_v16 = vld [vmem:[#allocation161_spill] sm:$0xff]  ;;  %v13981_v58 = vld [vmem:[#allocation151_spill] sm:$0xff] }
 0x7b3   :  { %8155 = vmatpush.msrb.mxu2 %v13171_v39  ;;  %8207 = vmatpush.msrb.mxu3 %v12995_v24  ;;  %v13982_v39 = vld [vmem:[#allocation192_spill] sm:$0xff] }
 0x7b4   :  { %8270 = vmatpush.msra.mxu0 %v13172_v13  ;;  %8311 = vmatpush.msra.mxu1 %v12988_v55  ;;  %v13954_v55 = vld [vmem:[#allocation158_spill] sm:$0xff]  ;;  %v13983_v13 = vld [vmem:[#allocation167_spill] sm:$0xff] }
 0x7b5   :  { %8158 = vmatpush.msrb.mxu2 %v13947_v26  ;;  %8209 = vmatpush.msrb.mxu3 %v13948_v32  ;;  %v14005_v26 = vld [vmem:[#allocation188_spill] sm:$0xff] }
 0x7b6   :  { %8274 = vmatpush.msra.mxu0 %v13949_v44  ;;  %8313 = vmatpush.msra.mxu1 %v12991_v15  ;;  %v13956_v15 = vld [vmem:[#allocation162_spill] sm:$0xff]  ;;  %v14009_v44 = vld [vmem:[#allocation155_spill] sm:$0xff] }
 0x7b7   :  { %8161 = vmatpush.msrb.mxu2 %v13950_v46  ;;  %8211 = vmatpush.msrb.mxu3 %v13951_v48  ;;  %v14010_v46 = vld [vmem:[#allocation159_spill] sm:$0xff] }
 0x7b8   :  { %8278 = vmatpush.msra.mxu0 %v13952_v52  ;;  %8315 = vmatpush.msra.mxu1 %v12995_v24  ;;  %v13960_v24 = vld [vmem:[#allocation143_spill] sm:$0xff]  ;;  %v14013_v52 = vld [vmem:[#allocation169_spill] sm:$0xff] }
 0x7b9   :  { %8215 = vmatmul.f32.vlgmr.msrb.gmra.mxu3 %v11961_v25  ;;  %8164 = vmatpush.msrb.mxu2 %v13953_v2  ;;  %v14014_v2 = vld [vmem:[#allocation174_spill] sm:$0xff] }
 0x7ba   :  { %8371 = vmatpush.msra.mxu3 %v13954_v55  ;;  %8282 = vmatpush.msra.mxu0 %v13955_v29  ;;  %v14015_v55 = vld [vmem:[#allocation178_spill] sm:$0xff] }
 0x7bb   :  { %8317 = vmatpush.msra.mxu1 %v13948_v32  ;;  %8284 = vmatmul.f32.vlgmr.msra.gmra.mxu0 %v11951_v4  ;;  %v14007_v32 = vld [vmem:[#allocation148_spill] sm:$0xff]  ;;  %v14016_v29 = vld [vmem:[#allocation182_spill] sm:$0xff] }
 0x7bc   :  { %8377 = vmatpush.msra.mxu3 %v13956_v15  ;;  %8469 = vmatpush.msrb.mxu0 %v13957_v7  ;;  %v14017_v15 = vld [vmem:[#allocation186_spill] sm:$0xff] }
 0x7bd   :  { %8167 = vmatpush.msrb.mxu2 %v13958_v53  ;;  %8319 = vmatpush.msra.mxu1 %v13951_v48  ;;  %v14012_v48 = vld [vmem:[#allocation165_spill] sm:$0xff]  ;;  %v14018_v7 = vld [vmem:[#allocation190_spill] sm:$0xff] }
 0x7be   :  { %8321 = vmatmul.f32.vlgmr.msra.gmra.mxu1 %v11951_v4  ;;  %8383 = vmatpush.msra.mxu3 %v13959_v30  ;;  %v14019_v53 = vld [vmem:[#allocation193_spill] sm:$0xff]  ;;  %v14020_v30 = vld [vmem:[#allocation196_spill] sm:$0xff] }
 0x7bf   :  { %8472 = vmatpush.msrb.mxu0 %v13960_v24  ;;  %8522 = vmatpush.msrb.mxu1 %v13961_v17  ;;  %v14021_v24 = vld [vmem:[#allocation198_spill] sm:$0xff] }
 0x7c0   :  { %8170 = vmatpush.msrb.mxu2 %v13962_v43  ;;  %8389 = vmatpush.msra.mxu3 %v13963_v61 }
 0x7c1   :  { %8475 = vmatpush.msrb.mxu0 %v13964_v27  ;;  %8524 = vmatpush.msrb.mxu1 %v13965_v28 }
 0x7c2   :  { %8173 = vmatpush.msrb.mxu2 %v13966_v8  ;;  %8395 = vmatpush.msra.mxu3 %v13967_v41 }
 0x7c3   :  { %8176 = vmatmul.f32.vlgmr.msrb.gmra.mxu2 %v11956_v20  ;;  %8478 = vmatpush.msrb.mxu0 %v13968_v50 }
 0x7c4   :  { %8326 = vmatpush.msra.mxu2 %v13961_v17  ;;  %8526 = vmatpush.msrb.mxu1 %v13969_v56 }
 0x7c5   :  { %8401 = vmatpush.msra.mxu3 %v13970_v59  ;;  %8481 = vmatpush.msrb.mxu0 %v13971_v31  ;;  %v14023_v31 = vld [vmem:[#allocation67_spill] sm:$0xff] }
 0x7c6   :  { %8328 = vmatpush.msra.mxu2 %v13965_v28  ;;  %8528 = vmatpush.msrb.mxu1 %v13972_v47 }
 0x7c7   :  { %8407 = vmatpush.msra.mxu3 %v13973_v63  ;;  %8484 = vmatpush.msrb.mxu0 %v13974_v37 }
 0x7c8   :  { %8330 = vmatpush.msra.mxu2 %v13969_v56  ;;  %8530 = vmatpush.msrb.mxu1 %v13975_v11 }
 0x7c9   :  { %8413 = vmatpush.msra.mxu3 %v13976_v62  ;;  %8487 = vmatpush.msrb.mxu0 %v13977_v5 }
 0x7ca   :  { %8332 = vmatpush.msra.mxu2 %v13972_v47  ;;  %8532 = vmatpush.msrb.mxu1 %v13978_v10 }
 0x7cb   :  { %8419 = vmatpush.msra.mxu3 %v13979_v22  ;;  %8490 = vmatpush.msrb.mxu0 %v13980_v16 }
 0x7cc   :  { %8334 = vmatpush.msra.mxu2 %v13975_v11  ;;  %8534 = vmatpush.msrb.mxu1 %v13981_v58 }
 0x7cd   :  { %8425 = vmatpush.msra.mxu3 %v13982_v39  ;;  %8493 = vmatpush.msrb.mxu0 %v13983_v13  ;;  %v7640_v39 = vld [vmem:[#allocation2 + $0xa8] sm:$0xff] }
 0x7ce   :  { %8336 = vmatpush.msra.mxu2 %v13978_v10  ;;  %8536 = vmatpush.msrb.mxu1 %v13984_v38 }
 0x7cf   :  { %8431 = vmatpush.msra.mxu3 %v13985_v9  ;;  %8496 = vmatpush.msrb.mxu0 %v13986_v49 }
 0x7d0   :  { %8338 = vmatpush.msra.mxu2 %v13981_v58  ;;  %8538 = vmatpush.msrb.mxu1 %v13987_v23 }
 0x7d1   :  { %8437 = vmatpush.msra.mxu3 %v13988_v36  ;;  %8499 = vmatpush.msrb.mxu0 %v13989_v3  ;;  %v7641_v3 = vld [vmem:[#allocation2 + $0xb0] sm:$0xff] }
 0x7d2   :  { %8340 = vmatpush.msra.mxu2 %v13984_v38  ;;  %8540 = vmatpush.msrb.mxu1 %v13990_v1 }
 0x7d3   :  { %8443 = vmatpush.msra.mxu3 %v13991_v51  ;;  %8502 = vmatpush.msrb.mxu0 %v13992_v35 }
 0x7d4   :  { %8342 = vmatpush.msra.mxu2 %v13987_v23  ;;  %8542 = vmatpush.msrb.mxu1 %v13993_v18 }
 0x7d5   :  { %8449 = vmatpush.msra.mxu3 %v13994_v19  ;;  %8505 = vmatpush.msrb.mxu0 %v13995_v54 }
 0x7d6   :  { %8344 = vmatpush.msra.mxu2 %v13990_v1  ;;  %8544 = vmatpush.msrb.mxu1 %v13996_v0 }
 0x7d7   :  { %8455 = vmatpush.msra.mxu3 %v13997_v21  ;;  %8508 = vmatpush.msrb.mxu0 %v13998_v60 }
 0x7d8   :  { %8346 = vmatpush.msra.mxu2 %v13993_v18  ;;  %8546 = vmatpush.msrb.mxu1 %v13999_v33 }
 0x7d9   :  { %8461 = vmatpush.msra.mxu3 %v14000_v6  ;;  %8511 = vmatpush.msrb.mxu0 %v14001_v57 }
 0x7da   :  { %8348 = vmatpush.msra.mxu2 %v13996_v0  ;;  %8548 = vmatpush.msrb.mxu1 %v14002_v40 }
 0x7db   :  { %8463 = vmatmul.f32.vlgmr.msra.gmra.mxu3 %v11951_v4  ;;  %8514 = vmatpush.msrb.mxu0 %v14003_v42 }
 0x7dc   :  { %8630 = vmatpush.msrb.mxu3 %v13961_v17  ;;  %8350 = vmatpush.msra.mxu2 %v13999_v33 }
 0x7dd   :  { %8550 = vmatpush.msrb.mxu1 %v14004_v45  ;;  %8517 = vmatmul.f32.vlgmr.msrb.gmra.mxu0 %v11956_v20  ;;  %v14006_v20 = vld [vmem:[#allocation145_spill] sm:$0xff] }
 0x7de   :  { %8632 = vmatpush.msrb.mxu3 %v13965_v28  ;;  %8352 = vmatpush.msra.mxu2 %v14002_v40  ;;  %v14022_v28 = vld [vmem:[#allocation62_spill] sm:$0xff] }
 0x7df   :  { %8552 = vmatpush.msrb.mxu1 %v14005_v26 }
 0x7e0   :  { %8556 = vmatmul.f32.vlgmr.msrb.gmra.mxu1 %v11961_v25  ;;  %8634 = vmatpush.msrb.mxu3 %v13969_v56  ;;  %v14008_v25 = vld [vmem:[#allocation152_spill] sm:$0xff] }
 0x7e1   :  { %8354 = vmatpush.msra.mxu2 %v14004_v45 }
 0x7e2   :  { %8636 = vmatpush.msrb.mxu3 %v13972_v47 }
 0x7e3   :  { %8356 = vmatpush.msra.mxu2 %v14005_v26 }
 0x7e4   :  { %8362 = vmatmul.f32.vlgmr.msra.gmra.mxu2 %v11971_v12  ;;  %8638 = vmatpush.msrb.mxu3 %v13975_v11  ;;  %v14011_v12 = vld [vmem:[#allocation163_spill] sm:$0xff] }
 0x7e5   :  { %8563 = vmatpush.msrb.mxu2 %v14006_v20 }
 0x7e6   :  { %8640 = vmatpush.msrb.mxu3 %v13978_v10 }
 0x7e7   :  { %8567 = vmatpush.msrb.mxu2 %v14007_v32 }
 0x7e8   :  { %8642 = vmatpush.msrb.mxu3 %v13981_v58 }
 0x7e9   :  { %8571 = vmatpush.msrb.mxu2 %v14008_v25 }
 0x7ea   :  { %8644 = vmatpush.msrb.mxu3 %v13984_v38 }
 0x7eb   :  { %8575 = vmatpush.msrb.mxu2 %v14009_v44 }
 0x7ec   :  { %8646 = vmatpush.msrb.mxu3 %v13987_v23 }
 0x7ed   :  { %8579 = vmatpush.msrb.mxu2 %v14010_v46 }
 0x7ee   :  { %8648 = vmatpush.msrb.mxu3 %v13990_v1 }
 0x7ef   :  { %8583 = vmatpush.msrb.mxu2 %v14011_v12 }
 0x7f0   :  { %8650 = vmatpush.msrb.mxu3 %v13993_v18 }
 0x7f1   :  { %8587 = vmatpush.msrb.mxu2 %v14012_v48 }
 0x7f2   :  { %8652 = vmatpush.msrb.mxu3 %v13996_v0 }
 0x7f3   :  { %8591 = vmatpush.msrb.mxu2 %v14013_v52 }
 0x7f4   :  { %8654 = vmatpush.msrb.mxu3 %v13999_v33 }
 0x7f5   :  { %8595 = vmatpush.msrb.mxu2 %v14014_v2 }
 0x7f6   :  { %8656 = vmatpush.msrb.mxu3 %v14002_v40 }
 0x7f7   :  { %8599 = vmatpush.msrb.mxu2 %v14015_v55 }
 0x7f8   :  { %8658 = vmatpush.msrb.mxu3 %v14004_v45 }
 0x7f9   :  { %8603 = vmatpush.msrb.mxu2 %v14016_v29 }
 0x7fa   :  { %8660 = vmatpush.msrb.mxu3 %v14005_v26 }
 0x7fb   :  { %8607 = vmatpush.msrb.mxu2 %v14017_v15  ;;  %8662 = vmatmul.f32.vlgmr.msrb.gmra.mxu3 %v11951_v4 }
 0x7fd   :  { %8611 = vmatpush.msrb.mxu2 %v14018_v7 }
 0x7ff   :  { %8615 = vmatpush.msrb.mxu2 %v14019_v53 }
 0x801   :  { %8619 = vmatpush.msrb.mxu2 %v14020_v30  ;;  %v7642_v30 = vld [vmem:[#allocation2 + $0xb8] sm:$0xff] }
 0x803   :  { %8623 = vmatpush.msrb.mxu2 %v14021_v24 }
 0x804   :  { %8625 = vmatmul.f32.vlgmr.msrb.gmra.mxu2 %v11951_v4 }
 0x815   :  { %v7836_v43 = vpop.f32.mrf.mxu0 }
 0x817   :  { %v7875_v61 = vpop.f32.mrf.mxu1 }
 0x819   :  { %v7782_v27 = vpop.f32.mrf.mxu3 }
 0x81e   :  { %v8022_v56 = vpop.f32.mrf.mxu0 }
 0x81f   :  { %v8023_v47 = vadd.f32 %v8022_v56, %v14023_v31 }
 0x821   :  { %v7681_v17 = vpop.f32.mrf.mxu2  ;;  %v8123_v63 = vpop.f32.mrf.mxu1 }
 0x822   :  { %v7682_v8 = vadd.f32 %v7681_v17, %v14022_v28  ;;  %v7981_v37 = vpop.f32.mrf.mxu3  ;;  %v8124_v5 = vadd.f32 %v8123_v63, %v8023_v47 }
 0x824   :  { %v7783_v41 = vadd.f32 %v7782_v27, %v7682_v8 }
 0x826   :  { %v7837_v59 = vadd.f32 %v7836_v43, %v7783_v41 }
 0x828   :  { %v7876_v11 = vadd.f32 %v7875_v61, %v7837_v59 }
 0x82b   :  { %v7944_v50 = vpop.f32.mrf.mxu2 }
 0x82c   :  { %v7945_v22 = vadd.f32 %v7944_v50, %v7876_v11 }
 0x82e   :  { %v7982_v58 = vadd.f32 %v7981_v37, %v7945_v22 }
 0x830   :  { %v8666_v9 = vadd.f32 %v7982_v58, %v7640_v39 }
 0x832   :  { %v8746_v36 = vmul.f32 -1.442695, %v8666_v9 }
 0x834   :  { %8825 = vpow2.f32 %v8746_v36 }
 0x838   :  { %v8285_v13 = vpop.f32.mrf.mxu0 }
 0x83a   :  { %v8826_v35 = vpop.eup %8825 }
 0x83b   :  { %v8322_v49 = vpop.f32.mrf.mxu1  ;;  %v8670_v18 = vadd.f32 1.0, %v8826_v35 }
 0x83c   :  { %v8216_v4 = vpop.f32.mrf.mxu3 }
 0x83d   :  { %v8682_v12 = vand.u32 2147483648, %v8670_v18  ;;  %vm8676_vm9 = vweird.f32 %v8670_v18  ;;  %v8680_v52 = vand.u32 2147483647, %v8670_v18 }
 0x83f   :  { %v8683_v7 = vor.u32 1.1754944e-38, %v8682_v12  ;;  %vm8681_vm11 = vcmp.eq.f32.partialorder %v8680_v52, 8.507059e+37 }
 0x846   :  { %v8177_v62 = vpop.f32.mrf.mxu2 }
 0x847   :  { %v8178_v10 = vadd.f32 %v8177_v62, %v8124_v5 }
 0x849   :  { %v8217_v16 = vadd.f32 %v8216_v4, %v8178_v10 }
 0x84b   :  { %v8286_v38 = vadd.f32 %v8285_v13, %v8217_v16 }
 0x84d   :  { %v8323_v23 = vadd.f32 %v8322_v49, %v8286_v38 }
 0x84f   :  { %v8686_v1 = vadd.f32 %v8323_v23, %v7641_v3 }
 0x851   :  { %v8747_v51 = vmul.f32 -1.442695, %v8686_v1 }
 0x853   :  { %8827 = vpow2.f32 %v8747_v51 }
 0x854   :  { %8829 = vrcp.f32 %v8670_v18 }
 0x859   :  { %v8828_v19 = vpop.eup %8827 }
 0x85a   :  { %v8690_v54 = vadd.f32 1.0, %v8828_v19  ;;  %v8830_v0 = vpop.eup %8829  ;;  %v8518_v20 = vpop.f32.mrf.mxu0 }
 0x85b   :  { %v8672_v60 = vmul.f32 %v8830_v0, %v8670_v18  ;;  %vm8677_vm8 = vweird.f32 %v8830_v0 }
 0x85c   :  { %8831 = vrcp.f32 %v8690_v54  ;;  %vm8678_vm10 = vmor %vm8676_vm9, %vm8677_vm8  ;;  %v8702_v61 = vand.u32 2147483648, %v8690_v54  ;;  %vm8696_vm13 = vweird.f32 %v8690_v54  ;;  %v8700_v27 = vand.u32 2147483647, %v8690_v54 }
 0x85d   :  { %v8673_v57 = vsub.f32 1.0, %v8672_v60  ;;  %v8557_v46 = vpop.f32.mrf.mxu1 }
 0x85e   :  { %v8464_v40 = vpop.f32.mrf.mxu3  ;;  %v8703_v41 = vor.u32 1.1754944e-38, %v8702_v61  ;;  %vm8701_vm15 = vcmp.eq.f32.partialorder %v8700_v27, 8.507059e+37 }
 0x85f   :  { %v8674_v26 = vmul.f32 %v8830_v0, %v8673_v57 }
 0x861   :  { %v8675_v44 = vadd.f32 %v8830_v0, %v8674_v26 }
 0x862   :  { %v8832_v6 = vpop.eup %8831 }
 0x863   :  { %v8692_v45 = vmul.f32 %v8832_v6, %v8690_v54  ;;  %v8679_v29 = vsel %vm8678_vm10, %v8830_v0, %v8675_v44  ;;  %vm8697_vm12 = vweird.f32 %v8832_v6 }
 0x864   :  { %v8684_v24 = vsel %vm8681_vm11, %v8683_v7, %v8679_v29  ;;  %vm8698_vm14 = vmor %vm8696_vm13, %vm8697_vm12 }
 0x865   :  { %v8693_v25 = vsub.f32 1.0, %v8692_v45 }
 0x867   :  { %v8363_v21 = vpop.f32.mrf.mxu2  ;;  %v8694_v55 = vmul.f32 %v8832_v6, %v8693_v25 }
 0x868   :  { %v8364_v33 = vadd.f32 %v8363_v21, %v9989_v14 }
 0x869   :  { %v8695_v17 = vadd.f32 %v8832_v6, %v8694_v55 }
 0x86a   :  { %v8465_v42 = vadd.f32 %v8464_v40, %v8364_v33 }
 0x86b   :  { %v8699_v8 = vsel %vm8698_vm14, %v8832_v6, %v8695_v17 }
 0x86c   :  { %v8519_v32 = vadd.f32 %v8518_v20, %v8465_v42  ;;  %v8704_v50 = vsel %vm8701_vm15, %v8703_v41, %v8699_v8 }
 0x86d   :  { %v8709_v56 = vsub.f32 1.0, %v8704_v50  ;;  %v8711_v47 = vmul.f32 %v8704_v50, %v11948_v34 }
 0x86e   :  { %v8558_v48 = vadd.f32 %v8557_v46, %v8519_v32 }
 0x87e   :  { %v8663_v15 = vpop.f32.mrf.mxu3 }
 0x887   :  { %v8626_v2 = vpop.f32.mrf.mxu2 }
 0x888   :  { %v8627_v14 = vadd.f32 %v8626_v2, %v8558_v48 }
 0x88a   :  { %v8664_v53 = vadd.f32 %v8663_v15, %v8627_v14 }
 0x88c   :  { %v8706_v43 = vmul.f32 %v8684_v24, %v8664_v53 }
 0x88e   :  { %v8707_v28 = vadd.f32 %v8706_v43, %v7642_v30 }
 0x890   :  { %8833 = vtanh.f32 %v8707_v28 }
 0x896   :  { %v8834_v59 = vpop.eup %8833 }
 0x897   :  { %v8710_v31 = vmul.f32 %v8834_v59, %v8709_v56 }
 0x899   :  { %v8712_v63 = vadd.f32 %v8711_v47, %v8710_v31 }
 0x89b   :  { %8713 = vst [vmem:[#allocation8] sm:$0xff] %v8712_v63 }
 0x89c   :  { %8724 = dma.vmem_to_hbm [thread:$0]  %s8720_s2, 128, %s8722_s30, [#allocation4]  }
 0x89d   :  { %8935 = dma.done.wait [#allocation4], 128  }
 0x89e   :  { %8936 = vsyncadd [#allocation4], 4294967168 }
 0x89f   :  { %8729 = vsyncpa [#allocation3], 1 }
 0x8a0   :  { %8730 = vsyncpa [#allocation6], 1 }
 0x8a1   :  { %8731 = vsyncpa [#allocation4], 1 }

</bundles_post_ra>
